<compile_context>
chip_gen: v7x
topology: tpu7x:2x2x1
jax: 0.10.0
libtpu: 0.0.40
codegen_flags: <defaults>
</compile_context>

<pallas_src>
import math

import jax
import jax.numpy as jnp
from jax.experimental import pallas as pl
from jax.experimental.pallas import tpu as pltpu

EPS = 1e-5  # nn.BatchNorm2d default eps


def basic_block_gumbel_forward(params, x_nchw, temp=1.0, is_hard=False, *, stride=1):
    """Fused BasicBlockGumbel forward. Returns (out_nchw, w_complexity)."""
    del temp, is_hard  # only steer Gumbel complexity bookkeeping, never tensor math
    w1 = params["conv1_w"]
    Cout, Cin, KH, KW = w1.shape
    x = jnp.transpose(x_nchw, (0, 2, 3, 1)).astype(jnp.float32)      # NCHW -> NHWC
    N, H, W, _ = x.shape
    has_ds = (stride != 1) or (Cin != Cout)
    Ho = (H + 2 - KH) // stride + 1
    Wo = (W + 2 - KW) // stride + 1
    M = N * Ho * Wo

    # ---- wrapper-side prep (cheap XLA: pad / transpose / dtype cast) ---------------
    xp = jnp.pad(x, ((0, 0), (1, 1), (1, 1), (0, 0)))
    if stride == 1:
        conv1_in = xp                                    # taps sliced inside the kernel
    else:
        # TODO(synk): stride-2 tap extraction stays in XLA so only contiguous slices
        # are needed in-kernel (~2.25x input-read inflation vs in-kernel strided loads).
        taps = [xp[:, i:i + stride * Ho:stride, j:j + stride * Wo:stride, :]
                .reshape(M, Cin) for i in range(KH) for j in range(KW)]
        conv1_in = jnp.stack(taps, axis=0).astype(jnp.bfloat16)       # (9, M, Cin)

    def _wmat(w):   # (Cout, Cin, kh, kw) -> (kh*kw, Cin, Cout), bf16 MXU operand
        co, ci, kh, kw = w.shape
        return jnp.transpose(w, (2, 3, 1, 0)).reshape(kh * kw, ci, co).astype(jnp.bfloat16)

    w1m = _wmat(params["conv1_w"])
    w2m = _wmat(params["conv2_w"])
    g1 = params["bn1_g"].reshape(1, Cout)
    b1 = params["bn1_b"].reshape(1, Cout)
    g2 = params["bn2_g"].reshape(1, Cout)
    b2 = params["bn2_b"].reshape(1, Cout)

    args = [conv1_in, w1m, g1, b1, w2m, g2, b2]
    if has_ds:
        wds = jnp.transpose(params["ds_w"][:, :, 0, 0]).astype(jnp.bfloat16)  # (Cin, Cout)
        # the 1x1 downsample uses exactly conv1's centre-tap activation slice:
        # pack its weight onto that tap's weight -> one matmul with 2*Cout columns.
        wcat = jnp.concatenate([w1m[4], wds], axis=1)                          # (Cin, 2*Cout)
        gds = params["bn_ds_g"].reshape(1, Cout)
        bds = params["bn_ds_b"].reshape(1, Cout)
        args += [wcat, gds, bds]

    # ---- the fused block kernel ----------------------------------------------------
    def kernel(*refs):
        if has_ds:
            (x1_ref, w1_ref, g1_ref, b1_ref, w2_ref, g2_ref, b2_ref,
             wcat_ref, gds_ref, bds_ref, out_ref, xp2_ref) = refs
        else:
            (x1_ref, w1_ref, g1_ref, b1_ref, w2_ref, g2_ref, b2_ref,
             out_ref, xp2_ref) = refs

        def batchnorm(y, g_ref, b_ref):
            mean = jnp.mean(y, axis=0, keepdims=True)                 # stats over (N,H,W)
            var = jnp.mean((y - mean) ** 2, axis=0, keepdims=True)    # biased (training)
            return (y - mean) * jax.lax.rsqrt(var + EPS) * g_ref[...] + b_ref[...]

        def conv1_tap(k):
            if stride == 1:
                i, j = divmod(k, KW)
                t = x1_ref[:, i:i + Ho, j:j + Wo, :]                  # (N,Ho,Wo,Cin) f32
                return t.reshape(M, Cin).astype(jnp.bfloat16)
            return x1_ref[k]                                          # (M, Cin) bf16

        # conv1 (+ packed 1x1 downsample on the centre tap), f32 accumulation
        acc1 = jnp.zeros((M, Cout), jnp.float32)
        y_ds = None
        for k in range(KH * KW):
            t = conv1_tap(k)
            if has_ds and k == 4:
                ycat = jnp.dot(t, wcat_ref[...], preferred_element_type=jnp.float32)
                acc1 = acc1 + ycat[:, :Cout]
                y_ds = ycat[:, Cout:]
            else:
                acc1 = acc1 + jnp.dot(t, w1_ref[k], preferred_element_type=jnp.float32)

        y1 = batchnorm(acc1, g1_ref, b1_ref)                          # (M, Cout) f32

        # stash bn1 output in a zero-padded VMEM scratch: conv2's input never hits HBM
        xp2_ref[...] = jnp.zeros(xp2_ref.shape, xp2_ref.dtype)
        xp2_ref[:, 1:1 + Ho, 1:1 + Wo, :] = y1.reshape(N, Ho, Wo, Cout)

        # conv2: 3x3, stride 1, pad 1, taps sliced in-kernel, bf16 MXU / f32 accum
        acc2 = jnp.zeros((M, Cout), jnp.float32)
        for k in range(KH * KW):
            i, j = divmod(k, KW)
            t = xp2_ref[:, i:i + Ho, j:j + Wo, :].reshape(M, Cout).astype(jnp.bfloat16)
            acc2 = acc2 + jnp.dot(t, w2_ref[k], preferred_element_type=jnp.float32)
        y2 = batchnorm(acc2, g2_ref, b2_ref)

        # residual: bn_ds(downsample(x)) or x itself -- never a materialized zero
        if has_ds:
            res = batchnorm(y_ds, gds_ref, bds_ref)
        else:
            res = x1_ref[:, 1:1 + H, 1:1 + W, :].reshape(M, Cin)      # f32 identity

        out_ref[...] = (y2 + res).reshape(N, Ho, Wo, Cout)

    flops = 2 * M * Cin * Cout * KH * KW + 2 * M * Cout * Cout * KH * KW
    if has_ds:
        flops += 2 * M * Cin * Cout
    bytes_accessed = sum(math.prod(a.shape) * a.dtype.itemsize for a in args)
    bytes_accessed += M * Cout * 4

    vmem = pl.BlockSpec(memory_space=pltpu.MemorySpace.VMEM)
    out = pl.pallas_call(
        kernel,
        out_shape=jax.ShapeDtypeStruct((N, Ho, Wo, Cout), jnp.float32),
        in_specs=[vmem] * len(args),
        out_specs=vmem,
        scratch_shapes=[pltpu.VMEM((N, Ho + 2, Wo + 2, Cout), jnp.float32)],
        cost_estimate=pl.CostEstimate(flops=flops, transcendentals=0,
                                      bytes_accessed=bytes_accessed),
    )(*args)

    out_nchw = jnp.transpose(out, (0, 3, 1, 2))                       # NHWC -> NCHW
    w_complexity = jnp.float32(0.0)                                   # plain conv_func
    return out_nchw, w_complexity


# -------------------------------------------------------------------------------------
# Pure-JAX f32 reference (lax conv + training-mode BN) for validation.
# -------------------------------------------------------------------------------------
def _reference_block(params, x_nchw, stride):
    def conv(x, w, s, p):
        return jax.lax.conv_general_dilated(
            x, w, window_strides=(s, s), padding=[(p, p), (p, p)],
            dimension_numbers=("NCHW", "OIHW", "NCHW"))

    def bn(y, g, b):
        mean = jnp.mean(y, axis=(0, 2, 3), keepdims=True)
        var = jnp.mean((y - mean) ** 2, axis=(0, 2, 3), keepdims=True)
        return ((y - mean) * jax.lax.rsqrt(var + EPS)
                * g.reshape(1, -1, 1, 1) + b.reshape(1, -1, 1, 1))

    out = bn(conv(x_nchw, params["conv1_w"], stride, 1), params["bn1_g"], params["bn1_b"])
    out = bn(conv(out, params["conv2_w"], 1, 1), params["bn2_g"], params["bn2_b"])
    if "ds_w" in params:
        res = bn(conv(x_nchw, params["ds_w"], stride, 0),
                 params["bn_ds_g"], params["bn_ds_b"])
    else:
        res = x_nchw
    return out + res


def init_block_params(key, inplanes, planes, stride):
    ks = jax.random.split(key, 7)

    def conv_init(k, cout, cin, kh, kw):
        std = math.sqrt(2.0 / (kh * kw * cout))      # matches m.weight.data.normal_
        return std * jax.random.normal(k, (cout, cin, kh, kw), jnp.float32)

    p = {
        "conv1_w": conv_init(ks[0], planes, inplanes, 3, 3),
        "bn1_g": 1.0 + 0.1 * jax.random.normal(ks[1], (planes,), jnp.float32),
        "bn1_b": 0.1 * jax.random.normal(ks[2], (planes,), jnp.float32),
        "conv2_w": conv_init(ks[3], planes, planes, 3, 3),
        "bn2_g": 1.0 + 0.1 * jax.random.normal(ks[4], (planes,), jnp.float32),
        "bn2_b": 0.1 * jax.random.normal(ks[5], (planes,), jnp.float32),
    }
    if stride != 1 or inplanes != planes:
        p["ds_w"] = conv_init(ks[6], planes, inplanes, 1, 1)
        p["bn_ds_g"] = jnp.ones((planes,), jnp.float32)
        p["bn_ds_b"] = jnp.zeros((planes,), jnp.float32)
    return p


if __name__ == "__main__":
    key = jax.random.PRNGKey(0)
    kx, kp1, kp2 = jax.random.split(key, 3)

    N, inplanes, H, W = 2, 16, 16, 16
    x = jax.random.normal(kx, (N, inplanes, H, W), jnp.float32)       # NCHW like PyTorch

    # (a) identity block: stride=1, inplanes == planes -> no downsample branch
    p_id = init_block_params(kp1, inplanes, inplanes, stride=1)
    fwd_id = jax.jit(lambda p, a: basic_block_gumbel_forward(p, a, 1.0, False, stride=1))
    out_id, wc_id = fwd_id(p_id, x)
    jax.block_until_ready(out_id)
    assert out_id.shape == (N, inplanes, H, W)

    # (b) downsampling block: stride=2, 16 -> 32 planes (fused 1x1 downsample + bn_ds)
    planes = 32
    p_ds = init_block_params(kp2, inplanes, planes, stride=2)
    fwd_ds = jax.jit(lambda p, a: basic_block_gumbel_forward(p, a, 1.0, False, stride=2))
    out_ds, wc_ds = fwd_ds(p_ds, x)
    jax.block_until_ready(out_ds)
    assert out_ds.shape == (N, planes, H // 2, W // 2)

    # validate against the pure-JAX f32 reference (bf16 MXU operands -> loose tolerance)
    err_id = float(jnp.max(jnp.abs(out_id - _reference_block(p_id, x, 1))))
    err_ds = float(jnp.max(jnp.abs(out_ds - _reference_block(p_ds, x, 2))))
    assert err_id < 0.15 and err_ds < 0.15, (err_id, err_ds)
    assert float(wc_id) == 0.0 and float(wc_ds) == 0.0

    print("KERNEL_OK")
</pallas_src>

<mosaic_0001>
module attributes {stable_mosaic.version = 11 : i64} {
  func.func @kernel(%arg0: memref<2x18x18x16xf32, #tpu.memory_space<vmem>>, %arg1: memref<9x16x16xbf16, #tpu.memory_space<vmem>>, %arg2: memref<1x16xf32, #tpu.memory_space<vmem>>, %arg3: memref<1x16xf32, #tpu.memory_space<vmem>>, %arg4: memref<9x16x16xbf16, #tpu.memory_space<vmem>>, %arg5: memref<1x16xf32, #tpu.memory_space<vmem>>, %arg6: memref<1x16xf32, #tpu.memory_space<vmem>>, %arg7: memref<2x16x16x16xf32, #tpu.memory_space<vmem>>, %arg8: memref<2x18x18x16xf32, #tpu.memory_space<vmem>>) attributes {dimension_semantics = [], scalar_prefetch = 0 : i64, scratch_operands = 1 : i64, tpu.core_type = #tpu.core_type<tc>} {
    %cst = arith.constant 0.000000e+00 : f32
    %0 = vector.broadcast %cst : f32 to vector<512x16xf32>
    %c0 = arith.constant 0 : index
    %c0_0 = arith.constant 0 : index
    %c0_1 = arith.constant 0 : index
    %c0_2 = arith.constant 0 : index
    %1 = vector.load %arg0[%c0, %c0_0, %c0_1, %c0_2] : memref<2x18x18x16xf32, #tpu.memory_space<vmem>>, vector<2x16x16x16xf32>
    %2 = vector.shape_cast %1 : vector<2x16x16x16xf32> to vector<512x16xf32>
    %3 = arith.truncf %2 : vector<512x16xf32> to vector<512x16xbf16>
    %c0_3 = arith.constant 0 : index
    %c0_4 = arith.constant 0 : index
    %c0_5 = arith.constant 0 : index
    %4 = vector.load %arg1[%c0_3, %c0_4, %c0_5] : memref<9x16x16xbf16, #tpu.memory_space<vmem>>, vector<1x16x16xbf16>
    %5 = vector.shape_cast %4 : vector<1x16x16xbf16> to vector<16x16xbf16>
    %cst_6 = arith.constant dense<0.000000e+00> : vector<512x16xf32>
    %6 = tpu.matmul %3, %5, %cst_6 {dimension_numbers = #tpu.dot_dimension_numbers<[1], [0], [0], [1], [0, 0, 1, 1], [], []>} : vector<512x16xbf16>, vector<16x16xbf16>, vector<512x16xf32> -> vector<512x16xf32>
    %7 = arith.addf %0, %6 : vector<512x16xf32>
    %c0_7 = arith.constant 0 : index
    %c0_8 = arith.constant 0 : index
    %c1 = arith.constant 1 : index
    %c0_9 = arith.constant 0 : index
    %8 = vector.load %arg0[%c0_7, %c0_8, %c1, %c0_9] : memref<2x18x18x16xf32, #tpu.memory_space<vmem>>, vector<2x16x16x16xf32>
    %9 = vector.shape_cast %8 : vector<2x16x16x16xf32> to vector<512x16xf32>
    %10 = arith.truncf %9 : vector<512x16xf32> to vector<512x16xbf16>
    %c1_10 = arith.constant 1 : index
    %c0_11 = arith.constant 0 : index
    %c0_12 = arith.constant 0 : index
    %11 = vector.load %arg1[%c1_10, %c0_11, %c0_12] : memref<9x16x16xbf16, #tpu.memory_space<vmem>>, vector<1x16x16xbf16>
    %12 = vector.shape_cast %11 : vector<1x16x16xbf16> to vector<16x16xbf16>
    %cst_13 = arith.constant dense<0.000000e+00> : vector<512x16xf32>
    %13 = tpu.matmul %10, %12, %cst_13 {dimension_numbers = #tpu.dot_dimension_numbers<[1], [0], [0], [1], [0, 0, 1, 1], [], []>} : vector<512x16xbf16>, vector<16x16xbf16>, vector<512x16xf32> -> vector<512x16xf32>
    %14 = arith.addf %7, %13 : vector<512x16xf32>
    %c0_14 = arith.constant 0 : index
    %c0_15 = arith.constant 0 : index
    %c2 = arith.constant 2 : index
    %c0_16 = arith.constant 0 : index
    %15 = vector.load %arg0[%c0_14, %c0_15, %c2, %c0_16] : memref<2x18x18x16xf32, #tpu.memory_space<vmem>>, vector<2x16x16x16xf32>
    %16 = vector.shape_cast %15 : vector<2x16x16x16xf32> to vector<512x16xf32>
    %17 = arith.truncf %16 : vector<512x16xf32> to vector<512x16xbf16>
    %c2_17 = arith.constant 2 : index
    %c0_18 = arith.constant 0 : index
    %c0_19 = arith.constant 0 : index
    %18 = vector.load %arg1[%c2_17, %c0_18, %c0_19] : memref<9x16x16xbf16, #tpu.memory_space<vmem>>, vector<1x16x16xbf16>
    %19 = vector.shape_cast %18 : vector<1x16x16xbf16> to vector<16x16xbf16>
    %cst_20 = arith.constant dense<0.000000e+00> : vector<512x16xf32>
    %20 = tpu.matmul %17, %19, %cst_20 {dimension_numbers = #tpu.dot_dimension_numbers<[1], [0], [0], [1], [0, 0, 1, 1], [], []>} : vector<512x16xbf16>, vector<16x16xbf16>, vector<512x16xf32> -> vector<512x16xf32>
    %21 = arith.addf %14, %20 : vector<512x16xf32>
    %c0_21 = arith.constant 0 : index
    %c1_22 = arith.constant 1 : index
    %c0_23 = arith.constant 0 : index
    %c0_24 = arith.constant 0 : index
    %22 = vector.load %arg0[%c0_21, %c1_22, %c0_23, %c0_24] : memref<2x18x18x16xf32, #tpu.memory_space<vmem>>, vector<2x16x16x16xf32>
    %23 = vector.shape_cast %22 : vector<2x16x16x16xf32> to vector<512x16xf32>
    %24 = arith.truncf %23 : vector<512x16xf32> to vector<512x16xbf16>
    %c3 = arith.constant 3 : index
    %c0_25 = arith.constant 0 : index
    %c0_26 = arith.constant 0 : index
    %25 = vector.load %arg1[%c3, %c0_25, %c0_26] : memref<9x16x16xbf16, #tpu.memory_space<vmem>>, vector<1x16x16xbf16>
    %26 = vector.shape_cast %25 : vector<1x16x16xbf16> to vector<16x16xbf16>
    %cst_27 = arith.constant dense<0.000000e+00> : vector<512x16xf32>
    %27 = tpu.matmul %24, %26, %cst_27 {dimension_numbers = #tpu.dot_dimension_numbers<[1], [0], [0], [1], [0, 0, 1, 1], [], []>} : vector<512x16xbf16>, vector<16x16xbf16>, vector<512x16xf32> -> vector<512x16xf32>
    %28 = arith.addf %21, %27 : vector<512x16xf32>
    %c0_28 = arith.constant 0 : index
    %c1_29 = arith.constant 1 : index
    %c1_30 = arith.constant 1 : index
    %c0_31 = arith.constant 0 : index
    %29 = vector.load %arg0[%c0_28, %c1_29, %c1_30, %c0_31] : memref<2x18x18x16xf32, #tpu.memory_space<vmem>>, vector<2x16x16x16xf32>
    %30 = vector.shape_cast %29 : vector<2x16x16x16xf32> to vector<512x16xf32>
    %31 = arith.truncf %30 : vector<512x16xf32> to vector<512x16xbf16>
    %c4 = arith.constant 4 : index
    %c0_32 = arith.constant 0 : index
    %c0_33 = arith.constant 0 : index
    %32 = vector.load %arg1[%c4, %c0_32, %c0_33] : memref<9x16x16xbf16, #tpu.memory_space<vmem>>, vector<1x16x16xbf16>
    %33 = vector.shape_cast %32 : vector<1x16x16xbf16> to vector<16x16xbf16>
    %cst_34 = arith.constant dense<0.000000e+00> : vector<512x16xf32>
    %34 = tpu.matmul %31, %33, %cst_34 {dimension_numbers = #tpu.dot_dimension_numbers<[1], [0], [0], [1], [0, 0, 1, 1], [], []>} : vector<512x16xbf16>, vector<16x16xbf16>, vector<512x16xf32> -> vector<512x16xf32>
    %35 = arith.addf %28, %34 : vector<512x16xf32>
    %c0_35 = arith.constant 0 : index
    %c1_36 = arith.constant 1 : index
    %c2_37 = arith.constant 2 : index
    %c0_38 = arith.constant 0 : index
    %36 = vector.load %arg0[%c0_35, %c1_36, %c2_37, %c0_38] : memref<2x18x18x16xf32, #tpu.memory_space<vmem>>, vector<2x16x16x16xf32>
    %37 = vector.shape_cast %36 : vector<2x16x16x16xf32> to vector<512x16xf32>
    %38 = arith.truncf %37 : vector<512x16xf32> to vector<512x16xbf16>
    %c5 = arith.constant 5 : index
    %c0_39 = arith.constant 0 : index
    %c0_40 = arith.constant 0 : index
    %39 = vector.load %arg1[%c5, %c0_39, %c0_40] : memref<9x16x16xbf16, #tpu.memory_space<vmem>>, vector<1x16x16xbf16>
    %40 = vector.shape_cast %39 : vector<1x16x16xbf16> to vector<16x16xbf16>
    %cst_41 = arith.constant dense<0.000000e+00> : vector<512x16xf32>
    %41 = tpu.matmul %38, %40, %cst_41 {dimension_numbers = #tpu.dot_dimension_numbers<[1], [0], [0], [1], [0, 0, 1, 1], [], []>} : vector<512x16xbf16>, vector<16x16xbf16>, vector<512x16xf32> -> vector<512x16xf32>
    %42 = arith.addf %35, %41 : vector<512x16xf32>
    %c0_42 = arith.constant 0 : index
    %c2_43 = arith.constant 2 : index
    %c0_44 = arith.constant 0 : index
    %c0_45 = arith.constant 0 : index
    %43 = vector.load %arg0[%c0_42, %c2_43, %c0_44, %c0_45] : memref<2x18x18x16xf32, #tpu.memory_space<vmem>>, vector<2x16x16x16xf32>
    %44 = vector.shape_cast %43 : vector<2x16x16x16xf32> to vector<512x16xf32>
    %45 = arith.truncf %44 : vector<512x16xf32> to vector<512x16xbf16>
    %c6 = arith.constant 6 : index
    %c0_46 = arith.constant 0 : index
    %c0_47 = arith.constant 0 : index
    %46 = vector.load %arg1[%c6, %c0_46, %c0_47] : memref<9x16x16xbf16, #tpu.memory_space<vmem>>, vector<1x16x16xbf16>
    %47 = vector.shape_cast %46 : vector<1x16x16xbf16> to vector<16x16xbf16>
    %cst_48 = arith.constant dense<0.000000e+00> : vector<512x16xf32>
    %48 = tpu.matmul %45, %47, %cst_48 {dimension_numbers = #tpu.dot_dimension_numbers<[1], [0], [0], [1], [0, 0, 1, 1], [], []>} : vector<512x16xbf16>, vector<16x16xbf16>, vector<512x16xf32> -> vector<512x16xf32>
    %49 = arith.addf %42, %48 : vector<512x16xf32>
    %c0_49 = arith.constant 0 : index
    %c2_50 = arith.constant 2 : index
    %c1_51 = arith.constant 1 : index
    %c0_52 = arith.constant 0 : index
    %50 = vector.load %arg0[%c0_49, %c2_50, %c1_51, %c0_52] : memref<2x18x18x16xf32, #tpu.memory_space<vmem>>, vector<2x16x16x16xf32>
    %51 = vector.shape_cast %50 : vector<2x16x16x16xf32> to vector<512x16xf32>
    %52 = arith.truncf %51 : vector<512x16xf32> to vector<512x16xbf16>
    %c7 = arith.constant 7 : index
    %c0_53 = arith.constant 0 : index
    %c0_54 = arith.constant 0 : index
    %53 = vector.load %arg1[%c7, %c0_53, %c0_54] : memref<9x16x16xbf16, #tpu.memory_space<vmem>>, vector<1x16x16xbf16>
    %54 = vector.shape_cast %53 : vector<1x16x16xbf16> to vector<16x16xbf16>
    %cst_55 = arith.constant dense<0.000000e+00> : vector<512x16xf32>
    %55 = tpu.matmul %52, %54, %cst_55 {dimension_numbers = #tpu.dot_dimension_numbers<[1], [0], [0], [1], [0, 0, 1, 1], [], []>} : vector<512x16xbf16>, vector<16x16xbf16>, vector<512x16xf32> -> vector<512x16xf32>
    %56 = arith.addf %49, %55 : vector<512x16xf32>
    %c0_56 = arith.constant 0 : index
    %c2_57 = arith.constant 2 : index
    %c2_58 = arith.constant 2 : index
    %c0_59 = arith.constant 0 : index
    %57 = vector.load %arg0[%c0_56, %c2_57, %c2_58, %c0_59] : memref<2x18x18x16xf32, #tpu.memory_space<vmem>>, vector<2x16x16x16xf32>
    %58 = vector.shape_cast %57 : vector<2x16x16x16xf32> to vector<512x16xf32>
    %59 = arith.truncf %58 : vector<512x16xf32> to vector<512x16xbf16>
    %c8 = arith.constant 8 : index
    %c0_60 = arith.constant 0 : index
    %c0_61 = arith.constant 0 : index
    %60 = vector.load %arg1[%c8, %c0_60, %c0_61] : memref<9x16x16xbf16, #tpu.memory_space<vmem>>, vector<1x16x16xbf16>
    %61 = vector.shape_cast %60 : vector<1x16x16xbf16> to vector<16x16xbf16>
    %cst_62 = arith.constant dense<0.000000e+00> : vector<512x16xf32>
    %62 = tpu.matmul %59, %61, %cst_62 {dimension_numbers = #tpu.dot_dimension_numbers<[1], [0], [0], [1], [0, 0, 1, 1], [], []>} : vector<512x16xbf16>, vector<16x16xbf16>, vector<512x16xf32> -> vector<512x16xf32>
    %63 = arith.addf %56, %62 : vector<512x16xf32>
    %cst_63 = arith.constant dense<0.000000e+00> : vector<16xf32>
    %64 = vector.multi_reduction <add>, %63, %cst_63 [0] : vector<512x16xf32> to vector<16xf32>
    %65 = vector.shape_cast %64 : vector<16xf32> to vector<1x16xf32>
    %cst_64 = arith.constant 5.120000e+02 : f32
    %66 = vector.broadcast %cst_64 : f32 to vector<1x16xf32>
    %67 = arith.divf %65, %66 : vector<1x16xf32>
    %68 = vector.broadcast %67 : vector<1x16xf32> to vector<512x16xf32>
    %69 = arith.subf %63, %68 : vector<512x16xf32>
    %70 = arith.mulf %69, %69 : vector<512x16xf32>
    %cst_65 = arith.constant dense<0.000000e+00> : vector<16xf32>
    %71 = vector.multi_reduction <add>, %70, %cst_65 [0] : vector<512x16xf32> to vector<16xf32>
    %72 = vector.shape_cast %71 : vector<16xf32> to vector<1x16xf32>
    %cst_66 = arith.constant 5.120000e+02 : f32
    %73 = vector.broadcast %cst_66 : f32 to vector<1x16xf32>
    %74 = arith.divf %72, %73 : vector<1x16xf32>
    %75 = vector.broadcast %67 : vector<1x16xf32> to vector<512x16xf32>
    %76 = arith.subf %63, %75 : vector<512x16xf32>
    %cst_67 = arith.constant 9.99999974E-6 : f32
    %77 = vector.broadcast %cst_67 : f32 to vector<1x16xf32>
    %78 = arith.addf %74, %77 : vector<1x16xf32>
    %79 = math.rsqrt %78 : vector<1x16xf32>
    %80 = vector.broadcast %79 : vector<1x16xf32> to vector<512x16xf32>
    %81 = arith.mulf %76, %80 : vector<512x16xf32>
    %c0_68 = arith.constant 0 : index
    %c0_69 = arith.constant 0 : index
    %82 = vector.load %arg2[%c0_68, %c0_69] : memref<1x16xf32, #tpu.memory_space<vmem>>, vector<1x16xf32>
    %83 = vector.broadcast %82 : vector<1x16xf32> to vector<512x16xf32>
    %84 = arith.mulf %81, %83 : vector<512x16xf32>
    %c0_70 = arith.constant 0 : index
    %c0_71 = arith.constant 0 : index
    %85 = vector.load %arg3[%c0_70, %c0_71] : memref<1x16xf32, #tpu.memory_space<vmem>>, vector<1x16xf32>
    %86 = vector.broadcast %85 : vector<1x16xf32> to vector<512x16xf32>
    %87 = arith.addf %84, %86 : vector<512x16xf32>
    %cst_72 = arith.constant 0.000000e+00 : f32
    %88 = vector.broadcast %cst_72 : f32 to vector<2x18x18x16xf32>
    %c0_73 = arith.constant 0 : index
    %c0_74 = arith.constant 0 : index
    %c0_75 = arith.constant 0 : index
    %c0_76 = arith.constant 0 : index
    %89 = vector.load %arg8[%c0_73, %c0_74, %c0_75, %c0_76] : memref<2x18x18x16xf32, #tpu.memory_space<vmem>>, vector<2x18x18x16xf32>
    tpu.vector_store %arg8[%c0_73, %c0_74, %c0_75, %c0_76], %88 {strides = array<i32>} : memref<2x18x18x16xf32, #tpu.memory_space<vmem>>, vector<2x18x18x16xf32>,
    %90 = vector.shape_cast %87 : vector<512x16xf32> to vector<2x16x16x16xf32>
    %c0_77 = arith.constant 0 : index
    %c1_78 = arith.constant 1 : index
    %c1_79 = arith.constant 1 : index
    %c0_80 = arith.constant 0 : index
    %91 = vector.load %arg8[%c0_77, %c1_78, %c1_79, %c0_80] : memref<2x18x18x16xf32, #tpu.memory_space<vmem>>, vector<2x16x16x16xf32>
    tpu.vector_store %arg8[%c0_77, %c1_78, %c1_79, %c0_80], %90 {strides = array<i32>} : memref<2x18x18x16xf32, #tpu.memory_space<vmem>>, vector<2x16x16x16xf32>,
    %cst_81 = arith.constant 0.000000e+00 : f32
    %92 = vector.broadcast %cst_81 : f32 to vector<512x16xf32>
    %c0_82 = arith.constant 0 : index
    %c0_83 = arith.constant 0 : index
    %c0_84 = arith.constant 0 : index
    %c0_85 = arith.constant 0 : index
    %93 = vector.load %arg8[%c0_82, %c0_83, %c0_84, %c0_85] : memref<2x18x18x16xf32, #tpu.memory_space<vmem>>, vector<2x16x16x16xf32>
    %94 = vector.shape_cast %93 : vector<2x16x16x16xf32> to vector<512x16xf32>
    %95 = arith.truncf %94 : vector<512x16xf32> to vector<512x16xbf16>
    %c0_86 = arith.constant 0 : index
    %c0_87 = arith.constant 0 : index
    %c0_88 = arith.constant 0 : index
    %96 = vector.load %arg4[%c0_86, %c0_87, %c0_88] : memref<9x16x16xbf16, #tpu.memory_space<vmem>>, vector<1x16x16xbf16>
    %97 = vector.shape_cast %96 : vector<1x16x16xbf16> to vector<16x16xbf16>
    %cst_89 = arith.constant dense<0.000000e+00> : vector<512x16xf32>
    %98 = tpu.matmul %95, %97, %cst_89 {dimension_numbers = #tpu.dot_dimension_numbers<[1], [0], [0], [1], [0, 0, 1, 1], [], []>} : vector<512x16xbf16>, vector<16x16xbf16>, vector<512x16xf32> -> vector<512x16xf32>
    %99 = arith.addf %92, %98 : vector<512x16xf32>
    %c0_90 = arith.constant 0 : index
    %c0_91 = arith.constant 0 : index
    %c1_92 = arith.constant 1 : index
    %c0_93 = arith.constant 0 : index
    %100 = vector.load %arg8[%c0_90, %c0_91, %c1_92, %c0_93] : memref<2x18x18x16xf32, #tpu.memory_space<vmem>>, vector<2x16x16x16xf32>
    %101 = vector.shape_cast %100 : vector<2x16x16x16xf32> to vector<512x16xf32>
    %102 = arith.truncf %101 : vector<512x16xf32> to vector<512x16xbf16>
    %c1_94 = arith.constant 1 : index
    %c0_95 = arith.constant 0 : index
    %c0_96 = arith.constant 0 : index
    %103 = vector.load %arg4[%c1_94, %c0_95, %c0_96] : memref<9x16x16xbf16, #tpu.memory_space<vmem>>, vector<1x16x16xbf16>
    %104 = vector.shape_cast %103 : vector<1x16x16xbf16> to vector<16x16xbf16>
    %cst_97 = arith.constant dense<0.000000e+00> : vector<512x16xf32>
    %105 = tpu.matmul %102, %104, %cst_97 {dimension_numbers = #tpu.dot_dimension_numbers<[1], [0], [0], [1], [0, 0, 1, 1], [], []>} : vector<512x16xbf16>, vector<16x16xbf16>, vector<512x16xf32> -> vector<512x16xf32>
    %106 = arith.addf %99, %105 : vector<512x16xf32>
    %c0_98 = arith.constant 0 : index
    %c0_99 = arith.constant 0 : index
    %c2_100 = arith.constant 2 : index
    %c0_101 = arith.constant 0 : index
    %107 = vector.load %arg8[%c0_98, %c0_99, %c2_100, %c0_101] : memref<2x18x18x16xf32, #tpu.memory_space<vmem>>, vector<2x16x16x16xf32>
    %108 = vector.shape_cast %107 : vector<2x16x16x16xf32> to vector<512x16xf32>
    %109 = arith.truncf %108 : vector<512x16xf32> to vector<512x16xbf16>
    %c2_102 = arith.constant 2 : index
    %c0_103 = arith.constant 0 : index
    %c0_104 = arith.constant 0 : index
    %110 = vector.load %arg4[%c2_102, %c0_103, %c0_104] : memref<9x16x16xbf16, #tpu.memory_space<vmem>>, vector<1x16x16xbf16>
    %111 = vector.shape_cast %110 : vector<1x16x16xbf16> to vector<16x16xbf16>
    %cst_105 = arith.constant dense<0.000000e+00> : vector<512x16xf32>
    %112 = tpu.matmul %109, %111, %cst_105 {dimension_numbers = #tpu.dot_dimension_numbers<[1], [0], [0], [1], [0, 0, 1, 1], [], []>} : vector<512x16xbf16>, vector<16x16xbf16>, vector<512x16xf32> -> vector<512x16xf32>
    %113 = arith.addf %106, %112 : vector<512x16xf32>
    %c0_106 = arith.constant 0 : index
    %c1_107 = arith.constant 1 : index
    %c0_108 = arith.constant 0 : index
    %c0_109 = arith.constant 0 : index
    %114 = vector.load %arg8[%c0_106, %c1_107, %c0_108, %c0_109] : memref<2x18x18x16xf32, #tpu.memory_space<vmem>>, vector<2x16x16x16xf32>
    %115 = vector.shape_cast %114 : vector<2x16x16x16xf32> to vector<512x16xf32>
    %116 = arith.truncf %115 : vector<512x16xf32> to vector<512x16xbf16>
    %c3_110 = arith.constant 3 : index
    %c0_111 = arith.constant 0 : index
    %c0_112 = arith.constant 0 : index
    %117 = vector.load %arg4[%c3_110, %c0_111, %c0_112] : memref<9x16x16xbf16, #tpu.memory_space<vmem>>, vector<1x16x16xbf16>
    %118 = vector.shape_cast %117 : vector<1x16x16xbf16> to vector<16x16xbf16>
    %cst_113 = arith.constant dense<0.000000e+00> : vector<512x16xf32>
    %119 = tpu.matmul %116, %118, %cst_113 {dimension_numbers = #tpu.dot_dimension_numbers<[1], [0], [0], [1], [0, 0, 1, 1], [], []>} : vector<512x16xbf16>, vector<16x16xbf16>, vector<512x16xf32> -> vector<512x16xf32>
    %120 = arith.addf %113, %119 : vector<512x16xf32>
    %c0_114 = arith.constant 0 : index
    %c1_115 = arith.constant 1 : index
    %c1_116 = arith.constant 1 : index
    %c0_117 = arith.constant 0 : index
    %121 = vector.load %arg8[%c0_114, %c1_115, %c1_116, %c0_117] : memref<2x18x18x16xf32, #tpu.memory_space<vmem>>, vector<2x16x16x16xf32>
    %122 = vector.shape_cast %121 : vector<2x16x16x16xf32> to vector<512x16xf32>
    %123 = arith.truncf %122 : vector<512x16xf32> to vector<512x16xbf16>
    %c4_118 = arith.constant 4 : index
    %c0_119 = arith.constant 0 : index
    %c0_120 = arith.constant 0 : index
    %124 = vector.load %arg4[%c4_118, %c0_119, %c0_120] : memref<9x16x16xbf16, #tpu.memory_space<vmem>>, vector<1x16x16xbf16>
    %125 = vector.shape_cast %124 : vector<1x16x16xbf16> to vector<16x16xbf16>
    %cst_121 = arith.constant dense<0.000000e+00> : vector<512x16xf32>
    %126 = tpu.matmul %123, %125, %cst_121 {dimension_numbers = #tpu.dot_dimension_numbers<[1], [0], [0], [1], [0, 0, 1, 1], [], []>} : vector<512x16xbf16>, vector<16x16xbf16>, vector<512x16xf32> -> vector<512x16xf32>
    %127 = arith.addf %120, %126 : vector<512x16xf32>
    %c0_122 = arith.constant 0 : index
    %c1_123 = arith.constant 1 : index
    %c2_124 = arith.constant 2 : index
    %c0_125 = arith.constant 0 : index
    %128 = vector.load %arg8[%c0_122, %c1_123, %c2_124, %c0_125] : memref<2x18x18x16xf32, #tpu.memory_space<vmem>>, vector<2x16x16x16xf32>
    %129 = vector.shape_cast %128 : vector<2x16x16x16xf32> to vector<512x16xf32>
    %130 = arith.truncf %129 : vector<512x16xf32> to vector<512x16xbf16>
    %c5_126 = arith.constant 5 : index
    %c0_127 = arith.constant 0 : index
    %c0_128 = arith.constant 0 : index
    %131 = vector.load %arg4[%c5_126, %c0_127, %c0_128] : memref<9x16x16xbf16, #tpu.memory_space<vmem>>, vector<1x16x16xbf16>
    %132 = vector.shape_cast %131 : vector<1x16x16xbf16> to vector<16x16xbf16>
    %cst_129 = arith.constant dense<0.000000e+00> : vector<512x16xf32>
    %133 = tpu.matmul %130, %132, %cst_129 {dimension_numbers = #tpu.dot_dimension_numbers<[1], [0], [0], [1], [0, 0, 1, 1], [], []>} : vector<512x16xbf16>, vector<16x16xbf16>, vector<512x16xf32> -> vector<512x16xf32>
    %134 = arith.addf %127, %133 : vector<512x16xf32>
    %c0_130 = arith.constant 0 : index
    %c2_131 = arith.constant 2 : index
    %c0_132 = arith.constant 0 : index
    %c0_133 = arith.constant 0 : index
    %135 = vector.load %arg8[%c0_130, %c2_131, %c0_132, %c0_133] : memref<2x18x18x16xf32, #tpu.memory_space<vmem>>, vector<2x16x16x16xf32>
    %136 = vector.shape_cast %135 : vector<2x16x16x16xf32> to vector<512x16xf32>
    %137 = arith.truncf %136 : vector<512x16xf32> to vector<512x16xbf16>
    %c6_134 = arith.constant 6 : index
    %c0_135 = arith.constant 0 : index
    %c0_136 = arith.constant 0 : index
    %138 = vector.load %arg4[%c6_134, %c0_135, %c0_136] : memref<9x16x16xbf16, #tpu.memory_space<vmem>>, vector<1x16x16xbf16>
    %139 = vector.shape_cast %138 : vector<1x16x16xbf16> to vector<16x16xbf16>
    %cst_137 = arith.constant dense<0.000000e+00> : vector<512x16xf32>
    %140 = tpu.matmul %137, %139, %cst_137 {dimension_numbers = #tpu.dot_dimension_numbers<[1], [0], [0], [1], [0, 0, 1, 1], [], []>} : vector<512x16xbf16>, vector<16x16xbf16>, vector<512x16xf32> -> vector<512x16xf32>
    %141 = arith.addf %134, %140 : vector<512x16xf32>
    %c0_138 = arith.constant 0 : index
    %c2_139 = arith.constant 2 : index
    %c1_140 = arith.constant 1 : index
    %c0_141 = arith.constant 0 : index
    %142 = vector.load %arg8[%c0_138, %c2_139, %c1_140, %c0_141] : memref<2x18x18x16xf32, #tpu.memory_space<vmem>>, vector<2x16x16x16xf32>
    %143 = vector.shape_cast %142 : vector<2x16x16x16xf32> to vector<512x16xf32>
    %144 = arith.truncf %143 : vector<512x16xf32> to vector<512x16xbf16>
    %c7_142 = arith.constant 7 : index
    %c0_143 = arith.constant 0 : index
    %c0_144 = arith.constant 0 : index
    %145 = vector.load %arg4[%c7_142, %c0_143, %c0_144] : memref<9x16x16xbf16, #tpu.memory_space<vmem>>, vector<1x16x16xbf16>
    %146 = vector.shape_cast %145 : vector<1x16x16xbf16> to vector<16x16xbf16>
    %cst_145 = arith.constant dense<0.000000e+00> : vector<512x16xf32>
    %147 = tpu.matmul %144, %146, %cst_145 {dimension_numbers = #tpu.dot_dimension_numbers<[1], [0], [0], [1], [0, 0, 1, 1], [], []>} : vector<512x16xbf16>, vector<16x16xbf16>, vector<512x16xf32> -> vector<512x16xf32>
    %148 = arith.addf %141, %147 : vector<512x16xf32>
    %c0_146 = arith.constant 0 : index
    %c2_147 = arith.constant 2 : index
    %c2_148 = arith.constant 2 : index
    %c0_149 = arith.constant 0 : index
    %149 = vector.load %arg8[%c0_146, %c2_147, %c2_148, %c0_149] : memref<2x18x18x16xf32, #tpu.memory_space<vmem>>, vector<2x16x16x16xf32>
    %150 = vector.shape_cast %149 : vector<2x16x16x16xf32> to vector<512x16xf32>
    %151 = arith.truncf %150 : vector<512x16xf32> to vector<512x16xbf16>
    %c8_150 = arith.constant 8 : index
    %c0_151 = arith.constant 0 : index
    %c0_152 = arith.constant 0 : index
    %152 = vector.load %arg4[%c8_150, %c0_151, %c0_152] : memref<9x16x16xbf16, #tpu.memory_space<vmem>>, vector<1x16x16xbf16>
    %153 = vector.shape_cast %152 : vector<1x16x16xbf16> to vector<16x16xbf16>
    %cst_153 = arith.constant dense<0.000000e+00> : vector<512x16xf32>
    %154 = tpu.matmul %151, %153, %cst_153 {dimension_numbers = #tpu.dot_dimension_numbers<[1], [0], [0], [1], [0, 0, 1, 1], [], []>} : vector<512x16xbf16>, vector<16x16xbf16>, vector<512x16xf32> -> vector<512x16xf32>
    %155 = arith.addf %148, %154 : vector<512x16xf32>
    %cst_154 = arith.constant dense<0.000000e+00> : vector<16xf32>
    %156 = vector.multi_reduction <add>, %155, %cst_154 [0] : vector<512x16xf32> to vector<16xf32>
    %157 = vector.shape_cast %156 : vector<16xf32> to vector<1x16xf32>
    %cst_155 = arith.constant 5.120000e+02 : f32
    %158 = vector.broadcast %cst_155 : f32 to vector<1x16xf32>
    %159 = arith.divf %157, %158 : vector<1x16xf32>
    %160 = vector.broadcast %159 : vector<1x16xf32> to vector<512x16xf32>
    %161 = arith.subf %155, %160 : vector<512x16xf32>
    %162 = arith.mulf %161, %161 : vector<512x16xf32>
    %cst_156 = arith.constant dense<0.000000e+00> : vector<16xf32>
    %163 = vector.multi_reduction <add>, %162, %cst_156 [0] : vector<512x16xf32> to vector<16xf32>
    %164 = vector.shape_cast %163 : vector<16xf32> to vector<1x16xf32>
    %cst_157 = arith.constant 5.120000e+02 : f32
    %165 = vector.broadcast %cst_157 : f32 to vector<1x16xf32>
    %166 = arith.divf %164, %165 : vector<1x16xf32>
    %167 = vector.broadcast %159 : vector<1x16xf32> to vector<512x16xf32>
    %168 = arith.subf %155, %167 : vector<512x16xf32>
    %cst_158 = arith.constant 9.99999974E-6 : f32
    %169 = vector.broadcast %cst_158 : f32 to vector<1x16xf32>
    %170 = arith.addf %166, %169 : vector<1x16xf32>
    %171 = math.rsqrt %170 : vector<1x16xf32>
    %172 = vector.broadcast %171 : vector<1x16xf32> to vector<512x16xf32>
    %173 = arith.mulf %168, %172 : vector<512x16xf32>
    %c0_159 = arith.constant 0 : index
    %c0_160 = arith.constant 0 : index
    %174 = vector.load %arg5[%c0_159, %c0_160] : memref<1x16xf32, #tpu.memory_space<vmem>>, vector<1x16xf32>
    %175 = vector.broadcast %174 : vector<1x16xf32> to vector<512x16xf32>
    %176 = arith.mulf %173, %175 : vector<512x16xf32>
    %c0_161 = arith.constant 0 : index
    %c0_162 = arith.constant 0 : index
    %177 = vector.load %arg6[%c0_161, %c0_162] : memref<1x16xf32, #tpu.memory_space<vmem>>, vector<1x16xf32>
    %178 = vector.broadcast %177 : vector<1x16xf32> to vector<512x16xf32>
    %179 = arith.addf %176, %178 : vector<512x16xf32>
    %c0_163 = arith.constant 0 : index
    %c1_164 = arith.constant 1 : index
    %c1_165 = arith.constant 1 : index
    %c0_166 = arith.constant 0 : index
    %180 = vector.load %arg0[%c0_163, %c1_164, %c1_165, %c0_166] : memref<2x18x18x16xf32, #tpu.memory_space<vmem>>, vector<2x16x16x16xf32>
    %181 = vector.shape_cast %180 : vector<2x16x16x16xf32> to vector<512x16xf32>
    %182 = arith.addf %179, %181 : vector<512x16xf32>
    %183 = vector.shape_cast %182 : vector<512x16xf32> to vector<2x16x16x16xf32>
    %c0_167 = arith.constant 0 : index
    %c0_168 = arith.constant 0 : index
    %c0_169 = arith.constant 0 : index
    %c0_170 = arith.constant 0 : index
    %184 = vector.load %arg7[%c0_167, %c0_168, %c0_169, %c0_170] : memref<2x16x16x16xf32, #tpu.memory_space<vmem>>, vector<2x16x16x16xf32>
    tpu.vector_store %arg7[%c0_167, %c0_168, %c0_169, %c0_170], %183 {strides = array<i32>} : memref<2x16x16x16xf32, #tpu.memory_space<vmem>>, vector<2x16x16x16xf32>,
    return
  }
}

</mosaic_0001>

<bundles_post_ra>
// kernel: _lambda_.1
= control target key start
LH: loop header
LB: loop body
LE: loop exit
PB: predicated region body
PF: predicated region fallthrough
CT: control target
= control target key end

     0   :  { %vm230_vm0 = vcmask 130048   ;;  %vm5494_vm1 = vcmask 123904   ;;  %s21510_s1 = inlined_call_operand.vmem [shape: bf16[9,16,16], index: 1, kind: input, shape index: {}]   ;;  %s21511_s0 = inlined_call_operand.vmem [shape: f32[2,18,18,16], index: 0, kind: input, shape index: {}]   ;;  %s21512_s4 = inlined_call_operand.vmem [shape: bf16[9,16,16], index: 4, kind: input, shape index: {}]   ;;  %s21513_s2 = inlined_call_operand.vmem [shape: f32[1,16], index: 2, kind: input, shape index: {}]   ;;  %s21514_s3 = inlined_call_operand.vmem [shape: f32[1,16], index: 3, kind: input, shape index: {}]   ;;  %s21515_s5 = inlined_call_operand.vmem [shape: f32[1,16], index: 5, kind: input, shape index: {}]   ;;  %s21516_s6 = inlined_call_operand.vmem [shape: f32[1,16], index: 6, kind: input, shape index: {}]   ;;  %s21517_s7 = inlined_call_operand.vmem [shape: f32[2,16,16,16], index: 7, kind: output, shape index: {}]  }
   0x1   :  { %v15209_v0 = vld [vmem:[%s21510_s1 + $0x8] sm:$0xff]   ;;  %v127_v3 = vld [vmem:[%s21511_s0 + $0x19] sm:$0xff]  ;;  %v129_v8 = vld [vmem:[%s21511_s0 + $0x31] sm:$0xff] }
   0x2   :  { %v125_v1 = vld [vmem:[%s21511_s0 + $0x1] sm:$0xff]  ;;  %v126_v2 = vld [vmem:[%s21511_s0 + $0x9] sm:$0xff]  ;;  %12996 = vmatprep.subr.bf16.mxu0 %v15209_v0  ;;  %v130_v9 = vld [vmem:[%s21511_s0 + $0x39] sm:$0xff] }
   0x3   :  { %v189_v4 = vpack.c.bf16 %v126_v2, %v125_v1  ;;  %v128_v5 = vld [vmem:[%s21511_s0 + $0x21] sm:$0xff]  ;;  %12997 = vmatpush3.bf16.msra.mxu0 %v15209_v0  ;;  %v191_v10 = vpack.c.bf16 %v130_v9, %v129_v8  ;;  %v131_v11 = vld [vmem:[%s21511_s0 + $0x49] sm:$0xff]  ;;  %v132_v12 = vld [vmem:[%s21511_s0 + $0x51] sm:$0xff] }
   0x4   :  { %v190_v6 = vpack.c.bf16 %v128_v5, %v127_v3  ;;  %v15210_v7 = vld [vmem:[%s21510_s1] sm:$0xff]   ;;  %v134_v14 = vld [vmem:[%s21511_s0 + $0x69] sm:$0xff]  ;;  %v192_v15 = vpack.c.bf16 %v132_v12, %v131_v11  ;;  %v137_v19 = vld [vmem:[%s21511_s0 + $0x91] sm:$0xff] }
   0x5   :  { %12998 = vmatprep.mubr.msk.bf16.mxu0 %vm230_vm0, %v189_v4  ;;  %13062 = vmatprep.subr.bf16.mxu0 %v15210_v7  ;;  %v133_v13 = vld [vmem:[%s21511_s0 + $0x61] sm:$0xff]  ;;  %v135_v17 = vld [vmem:[%s21511_s0 + $0x79] sm:$0xff]  ;;  %v139_v23 = vld [vmem:[%s21511_s0 + $0xa9] sm:$0xff] }
   0x6   :  { %12999 = vmatmul.mubr.msk.bf16.vlgmr.msra.gmra.mrb[0].mxu0 %vm230_vm0, %v190_v6  ;;  %v193_v16 = vpack.c.bf16 %v134_v14, %v133_v13  ;;  %v136_v18 = vld [vmem:[%s21511_s0 + $0x81] sm:$0xff]  ;;  %v138_v20 = vld [vmem:[%s21511_s0 + $0x99] sm:$0xff]  ;;  %v140_v24 = vld [vmem:[%s21511_s0 + $0xb1] sm:$0xff] }
   0x7   :  { %13063 = vmatpush3.bf16.msra.mxu0 %v15210_v7  ;;  %13002 = vmatprep.mubr.msk.bf16.mxu0 %vm230_vm0, %v191_v10  ;;  %v194_v21 = vpack.c.bf16 %v136_v18, %v135_v17  ;;  %v195_v22 = vpack.c.bf16 %v138_v20, %v137_v19  ;;  %v141_v25 = vld [vmem:[%s21511_s0 + $0xc1] sm:$0xff]  ;;  %v142_v26 = vld [vmem:[%s21511_s0 + $0xc9] sm:$0xff]  ;;  %v196_v28 = vpack.c.bf16 %v140_v24, %v139_v23  ;;  %v143_v30 = vld [vmem:[%s21511_s0 + $0xd9] sm:$0xff] }
   0x8   :  { %v15342_v27 = vld [vmem:[%s21510_s1 + $0x10] sm:$0xff]   ;;  %v197_v29 = vpack.c.bf16 %v142_v26, %v141_v25  ;;  %v144_v31 = vld [vmem:[%s21511_s0 + $0xe1] sm:$0xff]  ;;  %v146_v33 = vld [vmem:[%s21511_s0 + $0xf9] sm:$0xff] }
   0x9   :  { %13128 = vmatprep.subr.bf16.mxu0 %v15342_v27  ;;  %v145_v32 = vld [vmem:[%s21511_s0 + $0xf1] sm:$0xff]  ;;  %v198_v34 = vpack.c.bf16 %v144_v31, %v143_v30  ;;  %v147_v36 = vld [vmem:[%s21511_s0 + $0x109] sm:$0xff]  ;;  %v149_v38 = vld [vmem:[%s21511_s0 + $0x121] sm:$0xff] }
   0xa   :  { %v199_v35 = vpack.c.bf16 %v146_v33, %v145_v32  ;;  %v148_v37 = vld [vmem:[%s21511_s0 + $0x111] sm:$0xff]  ;;  %v150_v39 = vld [vmem:[%s21511_s0 + $0x129] sm:$0xff]  ;;  %v151_v42 = vld [vmem:[%s21511_s0 + $0x139] sm:$0xff] }
   0xb   :  { %v200_v40 = vpack.c.bf16 %v148_v37, %v147_v36  ;;  %v201_v41 = vpack.c.bf16 %v150_v39, %v149_v38  ;;  %v152_v43 = vld [vmem:[%s21511_s0 + $0x141] sm:$0xff]  ;;  %v153_v44 = vld [vmem:[%s21511_s0 + $0x151] sm:$0xff]  ;;  %v154_v45 = vld [vmem:[%s21511_s0 + $0x159] sm:$0xff] }
   0xc   :  { %v202_v46 = vpack.c.bf16 %v152_v43, %v151_v42  ;;  %v203_v47 = vpack.c.bf16 %v154_v45, %v153_v44  ;;  %v155_v48 = vld [vmem:[%s21511_s0 + $0x169] sm:$0xff]  ;;  %v156_v49 = vld [vmem:[%s21511_s0 + $0x171] sm:$0xff]  ;;  %v158_v51 = vld [vmem:[%s21511_s0 + $0x1b9] sm:$0xff] }
   0xd   :  { %v157_v50 = vld [vmem:[%s21511_s0 + $0x1b1] sm:$0xff]  ;;  %v204_v52 = vpack.c.bf16 %v156_v49, %v155_v48  ;;  %v159_v54 = vld [vmem:[%s21511_s0 + $0x1c9] sm:$0xff]  ;;  %v161_v56 = vld [vmem:[%s21511_s0 + $0x1e1] sm:$0xff] }
   0xe   :  { %13003 = vmatmul.mubr.msk.bf16.gmra.mrb[4].mxu0 %vm230_vm0, %v192_v15  ;;  %v205_v53 = vpack.c.bf16 %v158_v51, %v157_v50  ;;  %v160_v55 = vld [vmem:[%s21511_s0 + $0x1d1] sm:$0xff]  ;;  %v162_v57 = vld [vmem:[%s21511_s0 + $0x1e9] sm:$0xff]  ;;  %v163_v60 = vld [vmem:[%s21511_s0 + $0x1f9] sm:$0xff] }
   0xf   :  { %13006 = vmatprep.mubr.msk.bf16.mxu0 %vm230_vm0, %v193_v16  ;;  %v206_v58 = vpack.c.bf16 %v160_v55, %v159_v54  ;;  %v207_v59 = vpack.c.bf16 %v162_v57, %v161_v56  ;;  %v164_v61 = vld [vmem:[%s21511_s0 + $0x201] sm:$0xff]  ;;  %v165_v62 = vld [vmem:[%s21511_s0 + $0x211] sm:$0xff]  ;;  %v166_v63 = vld [vmem:[%s21511_s0 + $0x219] sm:$0xff] }
  0x10   :  { %v208_v0 = vpack.c.bf16 %v164_v61, %v163_v60  ;;  %v209_v1 = vpack.c.bf16 %v166_v63, %v165_v62  ;;  %v167_v2 = vld [vmem:[%s21511_s0 + $0x229] sm:$0xff]  ;;  %v168_v3 = vld [vmem:[%s21511_s0 + $0x231] sm:$0xff]  ;;  %v169_v4 = vld [vmem:[%s21511_s0 + $0x241] sm:$0xff] }
  0x11   :  { %v170_v5 = vld [vmem:[%s21511_s0 + $0x249] sm:$0xff]  ;;  %v210_v6 = vpack.c.bf16 %v168_v3, %v167_v2  ;;  %v171_v8 = vld [vmem:[%s21511_s0 + $0x259] sm:$0xff]  ;;  %v172_v9 = vld [vmem:[%s21511_s0 + $0x261] sm:$0xff] }
  0x12   :  { %v211_v7 = vpack.c.bf16 %v170_v5, %v169_v4  ;;  %v173_v10 = vld [vmem:[%s21511_s0 + $0x271] sm:$0xff]  ;;  %v174_v11 = vld [vmem:[%s21511_s0 + $0x279] sm:$0xff]  ;;  %v212_v12 = vpack.c.bf16 %v172_v9, %v171_v8  ;;  %v175_v14 = vld [vmem:[%s21511_s0 + $0x289] sm:$0xff] }
  0x13   :  { %v213_v13 = vpack.c.bf16 %v174_v11, %v173_v10  ;;  %v176_v15 = vld [vmem:[%s21511_s0 + $0x291] sm:$0xff]  ;;  %v177_v16 = vld [vmem:[%s21511_s0 + $0x2a1] sm:$0xff]  ;;  %v178_v17 = vld [vmem:[%s21511_s0 + $0x2a9] sm:$0xff] }
  0x14   :  { %v214_v18 = vpack.c.bf16 %v176_v15, %v175_v14  ;;  %v215_v19 = vpack.c.bf16 %v178_v17, %v177_v16  ;;  %v179_v20 = vld [vmem:[%s21511_s0 + $0x2b9] sm:$0xff]  ;;  %v183_v26 = vld [vmem:[%s21511_s0 + $0x2e9] sm:$0xff] }
  0x15   :  { %v182_v23 = vld [vmem:[%s21511_s0 + $0x2d9] sm:$0xff]  ;;  %v186_v30 = vld [vmem:[%s21511_s0 + $0x309] sm:$0xff] }
  0x16   :  { %13007 = vmatmul.mubr.msk.bf16.gmra.mrb[8].mxu0 %vm230_vm0, %v194_v21  ;;  %v180_v21 = vld [vmem:[%s21511_s0 + $0x2c1] sm:$0xff]  ;;  %v187_v33 = vld [vmem:[%s21511_s0 + $0x319] sm:$0xff] }
  0x17   :  { %13010 = vmatprep.mubr.msk.bf16.mxu0 %vm230_vm0, %v195_v22  ;;  %v181_v22 = vld [vmem:[%s21511_s0 + $0x2d1] sm:$0xff]  ;;  %v216_v24 = vpack.c.bf16 %v180_v21, %v179_v20  ;;  %v28_v36 = vld [vmem:[%s21511_s0 + $0x8] sm:$0xff]  ;;  %v35_v48 = vld [vmem:[%s21511_s0 + $0x60] sm:$0xff] }
  0x18   :  { %v217_v25 = vpack.c.bf16 %v182_v23, %v181_v22  ;;  %v29_v39 = vld [vmem:[%s21511_s0 + $0x18] sm:$0xff]  ;;  %v36_v49 = vld [vmem:[%s21511_s0 + $0x68] sm:$0xff] }
  0x19   :  { %v32_v42 = vld [vmem:[%s21511_s0 + $0x38] sm:$0xff]  ;;  %v15556_v50 = vpack.c.bf16 %v36_v49, %v35_v48  ;;  %v41_v57 = vld [vmem:[%s21511_s0 + $0xa8] sm:$0xff] }
  0x1a   :  { %v15536_v45 = vld [vmem:[%s21510_s1 + $0x18] sm:$0xff]   ;;  %v44_v60 = vld [vmem:[%s21511_s0 + $0xc8] sm:$0xff] }
  0x1b   :  { %v37_v51 = vld [vmem:[%s21511_s0 + $0x78] sm:$0xff]  ;;  %v49_v5 = vld [vmem:[%s21511_s0 + $0x108] sm:$0xff] }
  0x1c   :  { %v40_v54 = vld [vmem:[%s21511_s0 + $0x98] sm:$0xff]  ;;  %v52_v8 = vld [vmem:[%s21511_s0 + $0x128] sm:$0xff] }
  0x1d   :  { %v45_v63 = vld [vmem:[%s21511_s0 + $0xd8] sm:$0xff]  ;;  %v57_v17 = vld [vmem:[%s21511_s0 + $0x168] sm:$0xff] }
  0x1e   :  { %13011 = vmatmul.mubr.msk.bf16.gmra.mrb[12].mxu0 %vm230_vm0, %v196_v28  ;;  %v184_v28 = vld [vmem:[%s21511_s0 + $0x2f1] sm:$0xff]  ;;  %v61_v23 = vld [vmem:[%s21511_s0 + $0x1c8] sm:$0xff] }
  0x1f   :  { %13014 = vmatprep.mubr.msk.bf16.mxu0 %vm230_vm0, %v197_v29  ;;  %v185_v29 = vld [vmem:[%s21511_s0 + $0x301] sm:$0xff]  ;;  %v218_v31 = vpack.c.bf16 %v184_v28, %v183_v26  ;;  %v48_v2 = vld [vmem:[%s21511_s0 + $0xf8] sm:$0xff] }
  0x20   :  { %v219_v32 = vpack.c.bf16 %v186_v30, %v185_v29  ;;  %v53_v11 = vld [vmem:[%s21511_s0 + $0x138] sm:$0xff]  ;;  %v64_v26 = vld [vmem:[%s21511_s0 + $0x1e8] sm:$0xff] }
  0x21   :  { %v56_v14 = vld [vmem:[%s21511_s0 + $0x158] sm:$0xff] }
  0x22   :  { %v60_v20 = vld [vmem:[%s21511_s0 + $0x1b8] sm:$0xff] }
  0x23   :  { %v65_v30 = vld [vmem:[%s21511_s0 + $0x1f8] sm:$0xff] }
  0x24   :  { %v76_v48 = vld [vmem:[%s21511_s0 + $0x278] sm:$0xff] }
  0x26   :  { %13015 = vmatmul.mubr.msk.bf16.gmra.mrb[16].mxu0 %vm230_vm0, %v198_v34  ;;  %v188_v34 = vld [vmem:[%s21511_s0 + $0x321] sm:$0xff] }
  0x27   :  { %13018 = vmatprep.mubr.msk.bf16.mxu0 %vm230_vm0, %v199_v35  ;;  %v27_v35 = vld [vmem:[%s21511_s0] sm:$0xff]  ;;  %v220_v37 = vpack.c.bf16 %v188_v34, %v187_v33  ;;  %v68_v33 = vld [vmem:[%s21511_s0 + $0x218] sm:$0xff] }
  0x28   :  { %v91_v38 = vpack.c.bf16 %v28_v36, %v27_v35  ;;  %v69_v36 = vld [vmem:[%s21511_s0 + $0x228] sm:$0xff] }
  0x2e   :  { %13019 = vmatmul.mubr.msk.bf16.gmra.mrb[20].mxu0 %vm230_vm0, %v200_v40  ;;  %v30_v40 = vld [vmem:[%s21511_s0 + $0x20] sm:$0xff] }
  0x2f   :  { %13022 = vmatprep.mubr.msk.bf16.mxu0 %vm230_vm0, %v201_v41  ;;  %v31_v41 = vld [vmem:[%s21511_s0 + $0x30] sm:$0xff]  ;;  %v15527_v43 = vpack.c.bf16 %v30_v40, %v29_v39  ;;  %v72_v39 = vld [vmem:[%s21511_s0 + $0x248] sm:$0xff] }
  0x30   :  { %v15529_v44 = vpack.c.bf16 %v32_v42, %v31_v41  ;;  %v73_v42 = vld [vmem:[%s21511_s0 + $0x258] sm:$0xff] }
  0x36   :  { %13023 = vmatmul.mubr.msk.bf16.gmra.mrb[24].mxu0 %vm230_vm0, %v202_v46  ;;  %v33_v46 = vld [vmem:[%s21511_s0 + $0x48] sm:$0xff] }
  0x37   :  { %13026 = vmatprep.mubr.msk.bf16.mxu0 %vm230_vm0, %v203_v47  ;;  %v34_v47 = vld [vmem:[%s21511_s0 + $0x50] sm:$0xff] }
  0x3e   :  { %13027 = vmatmul.mubr.msk.bf16.gmra.mrb[28].mxu0 %vm230_vm0, %v204_v52  ;;  %v38_v52 = vld [vmem:[%s21511_s0 + $0x80] sm:$0xff] }
  0x3f   :  { %13030 = vmatprep.mubr.msk.bf16.mxu0 %vm230_vm0, %v205_v53  ;;  %v39_v53 = vld [vmem:[%s21511_s0 + $0x90] sm:$0xff]  ;;  %v15574_v55 = vpack.c.bf16 %v38_v52, %v37_v51  ;;  %v77_v52 = vld [vmem:[%s21511_s0 + $0x288] sm:$0xff] }
  0x40   :  { %v15576_v56 = vpack.c.bf16 %v40_v54, %v39_v53  ;;  %v78_v53 = vld [vmem:[%s21511_s0 + $0x290] sm:$0xff]  ;;  %v79_v54 = vld [vmem:[%s21511_s0 + $0x2a0] sm:$0xff] }
  0x46   :  { %13031 = vmatmul.mubr.msk.bf16.gmra.mrb[32].mxu0 %vm230_vm0, %v206_v58  ;;  %v42_v58 = vld [vmem:[%s21511_s0 + $0xb0] sm:$0xff] }
  0x47   :  { %13034 = vmatprep.mubr.msk.bf16.mxu0 %vm230_vm0, %v207_v59  ;;  %v43_v59 = vld [vmem:[%s21511_s0 + $0xc0] sm:$0xff]  ;;  %v15594_v61 = vpack.c.bf16 %v42_v58, %v41_v57  ;;  %v80_v57 = vld [vmem:[%s21511_s0 + $0x2a8] sm:$0xff]  ;;  %v15771_v58 = vpack.c.bf16 %v78_v53, %v77_v52 }
  0x48   :  { %v15596_v62 = vpack.c.bf16 %v44_v60, %v43_v59  ;;  %v15773_v59 = vpack.c.bf16 %v80_v57, %v79_v54  ;;  %v81_v60 = vld [vmem:[%s21511_s0 + $0x2b8] sm:$0xff]  ;;  %v1021_v54 = vld [vmem:[%s21511_s0 + $0xaa] sm:$0xff] }
  0x49   :  { %v1022_v57 = vld [vmem:[%s21511_s0 + $0xb2] sm:$0xff] }
  0x4e   :  { %13035 = vmatmul.mubr.msk.bf16.gmra.mrb[36].mxu0 %vm230_vm0, %v208_v0  ;;  %v46_v0 = vld [vmem:[%s21511_s0 + $0xe0] sm:$0xff] }
  0x4f   :  { %13038 = vmatprep.mubr.msk.bf16.mxu0 %vm230_vm0, %v209_v1  ;;  %v47_v1 = vld [vmem:[%s21511_s0 + $0xf0] sm:$0xff]  ;;  %v15614_v3 = vpack.c.bf16 %v46_v0, %v45_v63  ;;  %v82_v63 = vld [vmem:[%s21511_s0 + $0x2c0] sm:$0xff] }
  0x50   :  { %v15616_v4 = vpack.c.bf16 %v48_v2, %v47_v1  ;;  %v83_v0 = vld [vmem:[%s21511_s0 + $0x2d0] sm:$0xff]  ;;  %v84_v1 = vld [vmem:[%s21511_s0 + $0x2d8] sm:$0xff]  ;;  %v15791_v2 = vpack.c.bf16 %v82_v63, %v81_v60  ;;  %v1023_v60 = vld [vmem:[%s21511_s0 + $0xc2] sm:$0xff] }
  0x51   :  { %v1024_v63 = vld [vmem:[%s21511_s0 + $0xca] sm:$0xff] }
  0x56   :  { %13039 = vmatmul.mubr.msk.bf16.gmra.mrb[40].mxu0 %vm230_vm0, %v210_v6  ;;  %v50_v6 = vld [vmem:[%s21511_s0 + $0x110] sm:$0xff] }
  0x57   :  { %13042 = vmatprep.mubr.msk.bf16.mxu0 %vm230_vm0, %v211_v7  ;;  %v51_v7 = vld [vmem:[%s21511_s0 + $0x120] sm:$0xff]  ;;  %v15634_v9 = vpack.c.bf16 %v50_v6, %v49_v5  ;;  %v15793_v5 = vpack.c.bf16 %v84_v1, %v83_v0  ;;  %v85_v6 = vld [vmem:[%s21511_s0 + $0x2e8] sm:$0xff]  ;;  %v15915_v0 = vpack.c.bf16 %v1022_v57, %v1021_v54  ;;  %v15917_v1 = vpack.c.bf16 %v1024_v63, %v1023_v60 }
  0x58   :  { %v15636_v10 = vpack.c.bf16 %v52_v8, %v51_v7  ;;  %v86_v7 = vld [vmem:[%s21511_s0 + $0x2f0] sm:$0xff]  ;;  %v87_v8 = vld [vmem:[%s21511_s0 + $0x300] sm:$0xff] }
  0x59   :  { %v1040_v54 = vld [vmem:[%s21511_s0 + $0x1ba] sm:$0xff]  ;;  %v1041_v63 = vld [vmem:[%s21511_s0 + $0x1ca] sm:$0xff] }
  0x5e   :  { %13043 = vmatmul.mubr.msk.bf16.gmra.mrb[44].mxu0 %vm230_vm0, %v212_v12  ;;  %v54_v12 = vld [vmem:[%s21511_s0 + $0x140] sm:$0xff] }
  0x5f   :  { %13046 = vmatprep.mubr.msk.bf16.mxu0 %vm230_vm0, %v213_v13  ;;  %v55_v13 = vld [vmem:[%s21511_s0 + $0x150] sm:$0xff]  ;;  %v15654_v15 = vpack.c.bf16 %v54_v12, %v53_v11  ;;  %v88_v11 = vld [vmem:[%s21511_s0 + $0x308] sm:$0xff]  ;;  %v15811_v12 = vpack.c.bf16 %v86_v7, %v85_v6  ;;  %v1025_v6 = vld [vmem:[%s21511_s0 + $0xda] sm:$0xff] }
  0x60   :  { %v15656_v16 = vpack.c.bf16 %v56_v14, %v55_v13  ;;  %v15813_v13 = vpack.c.bf16 %v88_v11, %v87_v8  ;;  %v89_v14 = vld [vmem:[%s21511_s0 + $0x318] sm:$0xff]  ;;  %v1026_v7 = vld [vmem:[%s21511_s0 + $0xe2] sm:$0xff] }
  0x61   :  { %v1027_v8 = vld [vmem:[%s21511_s0 + $0xf2] sm:$0xff]  ;;  %v1028_v11 = vld [vmem:[%s21511_s0 + $0xfa] sm:$0xff] }
  0x66   :  { %13047 = vmatmul.mubr.msk.bf16.gmra.mrb[48].mxu0 %vm230_vm0, %v214_v18  ;;  %v58_v18 = vld [vmem:[%s21511_s0 + $0x170] sm:$0xff] }
  0x67   :  { %13050 = vmatprep.mubr.msk.bf16.mxu0 %vm230_vm0, %v215_v19  ;;  %v59_v19 = vld [vmem:[%s21511_s0 + $0x1b0] sm:$0xff]  ;;  %v15674_v21 = vpack.c.bf16 %v58_v18, %v57_v17  ;;  %v90_v17 = vld [vmem:[%s21511_s0 + $0x320] sm:$0xff] }
  0x68   :  { %v107_v22 = vpack.c.bf16 %v60_v20, %v59_v19  ;;  %v1007_v18 = vld [vmem:[%s21511_s0 + $0x2] sm:$0xff]  ;;  %v1008_v19 = vld [vmem:[%s21511_s0 + $0xa] sm:$0xff]  ;;  %v15831_v20 = vpack.c.bf16 %v90_v17, %v89_v14  ;;  %v15935_v14 = vpack.c.bf16 %v1026_v7, %v1025_v6  ;;  %v15937_v17 = vpack.c.bf16 %v1028_v11, %v1027_v8  ;;  %v1042_v6 = vld [vmem:[%s21511_s0 + $0x1d2] sm:$0xff] }
  0x69   :  { %v1043_v7 = vld [vmem:[%s21511_s0 + $0x1e2] sm:$0xff]  ;;  %v1044_v8 = vld [vmem:[%s21511_s0 + $0x1ea] sm:$0xff]  ;;  %v16012_v11 = vpack.c.bf16 %v1042_v6, %v1041_v63  ;;  %v1053_v63 = vld [vmem:[%s21511_s0 + $0x25a] sm:$0xff] }
  0x6a   :  { %v1054_v6 = vld [vmem:[%s21511_s0 + $0x262] sm:$0xff] }
  0x6e   :  { %13051 = vmatmul.mubr.msk.bf16.gmra.mrb[52].mxu0 %vm230_vm0, %v216_v24  ;;  %v62_v24 = vld [vmem:[%s21511_s0 + $0x1d0] sm:$0xff] }
  0x6f   :  { %13054 = vmatprep.mubr.msk.bf16.mxu0 %vm230_vm0, %v217_v25  ;;  %v63_v25 = vld [vmem:[%s21511_s0 + $0x1e0] sm:$0xff]  ;;  %v15691_v28 = vpack.c.bf16 %v62_v24, %v61_v23 }
  0x70   :  { %v15693_v29 = vpack.c.bf16 %v64_v26, %v63_v25  ;;  %v1009_v23 = vld [vmem:[%s21511_s0 + $0x1a] sm:$0xff]  ;;  %v1010_v24 = vld [vmem:[%s21511_s0 + $0x22] sm:$0xff]  ;;  %v1011_v25 = vld [vmem:[%s21511_s0 + $0x32] sm:$0xff] }
  0x71   :  { %v1012_v26 = vld [vmem:[%s21511_s0 + $0x3a] sm:$0xff] }
  0x76   :  { %13055 = vmatmul.mubr.msk.bf16.gmra.mrb[56].mxu0 %vm230_vm0, %v218_v31  ;;  %v66_v31 = vld [vmem:[%s21511_s0 + $0x200] sm:$0xff] }
  0x77   :  { %13058 = vmatprep.mubr.msk.bf16.mxu0 %vm230_vm0, %v219_v32  ;;  %v67_v32 = vld [vmem:[%s21511_s0 + $0x210] sm:$0xff]  ;;  %v15711_v34 = vpack.c.bf16 %v66_v31, %v65_v30  ;;  %v15848_v30 = vpack.c.bf16 %v1010_v24, %v1009_v23  ;;  %v15850_v31 = vpack.c.bf16 %v1012_v26, %v1011_v25  ;;  %v1033_v26 = vld [vmem:[%s21511_s0 + $0x13a] sm:$0xff] }
  0x78   :  { %v15713_v35 = vpack.c.bf16 %v68_v33, %v67_v32  ;;  %v15857_v32 = vld [vmem:[%s21510_s1 + $0x20] sm:$0xff]   ;;  %v1013_v33 = vld [vmem:[%s21511_s0 + $0x4a] sm:$0xff] }
  0x79   :  { %v1032_v23 = vld [vmem:[%s21511_s0 + $0x12a] sm:$0xff] }
  0x7e   :  { %13059 = vmatmul.mubr.msk.bf16.gmra.mrb[60].mxu0 %vm230_vm0, %v220_v37  ;;  %v70_v37 = vld [vmem:[%s21511_s0 + $0x230] sm:$0xff] }
  0x7f   :  { %13064 = vmatprep.mubr.msk.bf16.mxu0 %vm230_vm0, %v91_v38  ;;  %v71_v38 = vld [vmem:[%s21511_s0 + $0x240] sm:$0xff]  ;;  %v15731_v40 = vpack.c.bf16 %v70_v37, %v69_v36  ;;  %v1014_v36 = vld [vmem:[%s21511_s0 + $0x52] sm:$0xff] }
  0x80   :  { %v15733_v41 = vpack.c.bf16 %v72_v39, %v71_v38  ;;  %v1015_v37 = vld [vmem:[%s21511_s0 + $0x62] sm:$0xff]  ;;  %v1016_v38 = vld [vmem:[%s21511_s0 + $0x6a] sm:$0xff] }
  0x81   :  { %v15877_v39 = vpack.c.bf16 %v1016_v38, %v1015_v37  ;;  %v1036_v37 = vld [vmem:[%s21511_s0 + $0x15a] sm:$0xff] }
  0x86   :  { %13065 = vmatmul.mubr.msk.bf16.vlgmr.msra.gmra.mrb[0].mxu0 %vm230_vm0, %v15527_v43 }
  0x87   :  { %13129 = vmatpush3.bf16.msra.mxu0 %v15342_v27  ;;  %13068 = vmatprep.mubr.msk.bf16.mxu0 %vm230_vm0, %v15529_v44  ;;  %v15554_v27 = vpack.c.bf16 %v34_v47, %v33_v46  ;;  %v74_v46 = vld [vmem:[%s21511_s0 + $0x260] sm:$0xff]  ;;  %v75_v47 = vld [vmem:[%s21511_s0 + $0x270] sm:$0xff] }
  0x88   :  { %13194 = vmatprep.subr.bf16.mxu0 %v15536_v45  ;;  %v15751_v49 = vpack.c.bf16 %v74_v46, %v73_v42  ;;  %v15753_v51 = vpack.c.bf16 %v76_v48, %v75_v47  ;;  %v1017_v42 = vld [vmem:[%s21511_s0 + $0x7a] sm:$0xff]  ;;  %v1018_v46 = vld [vmem:[%s21511_s0 + $0x82] sm:$0xff]  ;;  %v1019_v47 = vld [vmem:[%s21511_s0 + $0x92] sm:$0xff] }
  0x89   :  { %v1020_v48 = vld [vmem:[%s21511_s0 + $0x9a] sm:$0xff]  ;;  %v15895_v52 = vpack.c.bf16 %v1018_v46, %v1017_v42  ;;  %v1037_v46 = vld [vmem:[%s21511_s0 + $0x16a] sm:$0xff] }
  0x8a   :  { %v15897_v53 = vpack.c.bf16 %v1020_v48, %v1019_v47  ;;  %v1038_v47 = vld [vmem:[%s21511_s0 + $0x172] sm:$0xff] }
  0x8b   :  { %v1039_v48 = vld [vmem:[%s21511_s0 + $0x1b2] sm:$0xff]  ;;  %v15995_v57 = vpack.c.bf16 %v1038_v47, %v1037_v46  ;;  %v1051_v47 = vld [vmem:[%s21511_s0 + $0x242] sm:$0xff] }
  0x8c   :  { %v1087_v60 = vpack.c.bf16 %v1040_v54, %v1039_v48  ;;  %v1050_v46 = vld [vmem:[%s21511_s0 + $0x232] sm:$0xff]  ;;  %v1052_v48 = vld [vmem:[%s21511_s0 + $0x24a] sm:$0xff] }
  0x8e   :  { %13069 = vmatmul.mubr.msk.bf16.gmra.mrb[4].mxu0 %vm230_vm0, %v15554_v27 }
  0x8f   :  { %13072 = vmatprep.mubr.msk.bf16.mxu0 %vm230_vm0, %v15556_v50 }
  0x96   :  { %13073 = vmatmul.mubr.msk.bf16.gmra.mrb[8].mxu0 %vm230_vm0, %v15574_v55 }
  0x97   :  { %13076 = vmatprep.mubr.msk.bf16.mxu0 %vm230_vm0, %v15576_v56 }
  0x9e   :  { %13077 = vmatmul.mubr.msk.bf16.gmra.mrb[12].mxu0 %vm230_vm0, %v15594_v61 }
  0x9f   :  { %13080 = vmatprep.mubr.msk.bf16.mxu0 %vm230_vm0, %v15596_v62 }
  0xa6   :  { %13081 = vmatmul.mubr.msk.bf16.gmra.mrb[16].mxu0 %vm230_vm0, %v15614_v3 }
  0xa7   :  { %13084 = vmatprep.mubr.msk.bf16.mxu0 %vm230_vm0, %v15616_v4 }
  0xae   :  { %13085 = vmatmul.mubr.msk.bf16.gmra.mrb[20].mxu0 %vm230_vm0, %v15634_v9 }
  0xaf   :  { %13088 = vmatprep.mubr.msk.bf16.mxu0 %vm230_vm0, %v15636_v10 }
  0xb6   :  { %13089 = vmatmul.mubr.msk.bf16.gmra.mrb[24].mxu0 %vm230_vm0, %v15654_v15 }
  0xb7   :  { %13092 = vmatprep.mubr.msk.bf16.mxu0 %vm230_vm0, %v15656_v16 }
  0xbe   :  { %13093 = vmatmul.mubr.msk.bf16.gmra.mrb[28].mxu0 %vm230_vm0, %v15674_v21 }
  0xbf   :  { %13096 = vmatprep.mubr.msk.bf16.mxu0 %vm230_vm0, %v107_v22  ;;  %v1071_v22 = vpack.c.bf16 %v1008_v19, %v1007_v18  ;;  %v1029_v18 = vld [vmem:[%s21511_s0 + $0x10a] sm:$0xff]  ;;  %v1030_v19 = vld [vmem:[%s21511_s0 + $0x112] sm:$0xff] }
  0xc0   :  { %v15955_v24 = vpack.c.bf16 %v1030_v19, %v1029_v18  ;;  %v16014_v18 = vpack.c.bf16 %v1044_v8, %v1043_v7  ;;  %v1045_v19 = vld [vmem:[%s21511_s0 + $0x1fa] sm:$0xff]  ;;  %v1055_v7 = vld [vmem:[%s21511_s0 + $0x272] sm:$0xff] }
  0xc1   :  { %v1056_v8 = vld [vmem:[%s21511_s0 + $0x27a] sm:$0xff] }
  0xc6   :  { %13097 = vmatmul.mubr.msk.bf16.gmra.mrb[32].mxu0 %vm230_vm0, %v15691_v28 }
  0xc7   :  { %13100 = vmatprep.mubr.msk.bf16.mxu0 %vm230_vm0, %v15693_v29 }
  0xce   :  { %13101 = vmatmul.mubr.msk.bf16.gmra.mrb[36].mxu0 %vm230_vm0, %v15711_v34 }
  0xcf   :  { %13104 = vmatprep.mubr.msk.bf16.mxu0 %vm230_vm0, %v15713_v35 }
  0xd6   :  { %13105 = vmatmul.mubr.msk.bf16.gmra.mrb[40].mxu0 %vm230_vm0, %v15731_v40 }
  0xd7   :  { %13108 = vmatprep.mubr.msk.bf16.mxu0 %vm230_vm0, %v15733_v41 }
  0xde   :  { %13109 = vmatmul.mubr.msk.bf16.gmra.mrb[44].mxu0 %vm230_vm0, %v15751_v49 }
  0xdf   :  { %13112 = vmatprep.mubr.msk.bf16.mxu0 %vm230_vm0, %v15753_v51 }
  0xe6   :  { %13113 = vmatmul.mubr.msk.bf16.gmra.mrb[48].mxu0 %vm230_vm0, %v15771_v58 }
  0xe7   :  { %13116 = vmatprep.mubr.msk.bf16.mxu0 %vm230_vm0, %v15773_v59 }
  0xee   :  { %13117 = vmatmul.mubr.msk.bf16.gmra.mrb[52].mxu0 %vm230_vm0, %v15791_v2 }
  0xef   :  { %13120 = vmatprep.mubr.msk.bf16.mxu0 %vm230_vm0, %v15793_v5 }
  0xf6   :  { %13121 = vmatmul.mubr.msk.bf16.gmra.mrb[56].mxu0 %vm230_vm0, %v15811_v12 }
  0xf7   :  { %13124 = vmatprep.mubr.msk.bf16.mxu0 %vm230_vm0, %v15813_v13 }
  0xfe   :  { %13125 = vmatmul.mubr.msk.bf16.gmra.mrb[60].mxu0 %vm230_vm0, %v15831_v20 }
  0xff   :  { %13130 = vmatprep.mubr.msk.bf16.mxu0 %vm230_vm0, %v1071_v22  ;;  %v1031_v22 = vld [vmem:[%s21511_s0 + $0x122] sm:$0xff] }
 0x100   :  { %v15957_v25 = vpack.c.bf16 %v1032_v23, %v1031_v22  ;;  %v1046_v22 = vld [vmem:[%s21511_s0 + $0x202] sm:$0xff]  ;;  %v1047_v23 = vld [vmem:[%s21511_s0 + $0x212] sm:$0xff] }
 0x106   :  { %13131 = vmatmul.mubr.msk.bf16.vlgmr.msra.gmra.mrb[0].mxu0 %vm230_vm0, %v15848_v30 }
 0x107   :  { %13195 = vmatpush3.bf16.msra.mxu0 %v15536_v45  ;;  %13134 = vmatprep.mubr.msk.bf16.mxu0 %vm230_vm0, %v15850_v31  ;;  %v15875_v45 = vpack.c.bf16 %v1014_v36, %v1013_v33  ;;  %v1034_v33 = vld [vmem:[%s21511_s0 + $0x142] sm:$0xff]  ;;  %v1035_v36 = vld [vmem:[%s21511_s0 + $0x152] sm:$0xff] }
 0x108   :  { %13260 = vmatprep.subr.bf16.mxu0 %v15857_v32  ;;  %v15975_v38 = vpack.c.bf16 %v1034_v33, %v1033_v26  ;;  %v15977_v42 = vpack.c.bf16 %v1036_v37, %v1035_v36  ;;  %v1048_v26 = vld [vmem:[%s21511_s0 + $0x21a] sm:$0xff]  ;;  %v16032_v33 = vpack.c.bf16 %v1046_v22, %v1045_v19  ;;  %v1049_v37 = vld [vmem:[%s21511_s0 + $0x22a] sm:$0xff]  ;;  %v16072_v19 = vpack.c.bf16 %v1054_v6, %v1053_v63  ;;  %v1062_v6 = vld [vmem:[%s21511_s0 + $0x2c2] sm:$0xff] }
 0x109   :  { %v16034_v36 = vpack.c.bf16 %v1048_v26, %v1047_v23  ;;  %v16052_v54 = vpack.c.bf16 %v1050_v46, %v1049_v37  ;;  %v16074_v22 = vpack.c.bf16 %v1056_v8, %v1055_v7  ;;  %v1057_v23 = vld [vmem:[%s21511_s0 + $0x28a] sm:$0xff]  ;;  %v1058_v26 = vld [vmem:[%s21511_s0 + $0x292] sm:$0xff]  ;;  %v1059_v37 = vld [vmem:[%s21511_s0 + $0x2a2] sm:$0xff] }
 0x10a   :  { %v1060_v46 = vld [vmem:[%s21511_s0 + $0x2aa] sm:$0xff]  ;;  %v1061_v63 = vld [vmem:[%s21511_s0 + $0x2ba] sm:$0xff]  ;;  %v1063_v7 = vld [vmem:[%s21511_s0 + $0x2d2] sm:$0xff] }
 0x10b   :  { %v1064_v8 = vld [vmem:[%s21511_s0 + $0x2da] sm:$0xff] }
 0x10e   :  { %13135 = vmatmul.mubr.msk.bf16.gmra.mrb[4].mxu0 %vm230_vm0, %v15875_v45 }
 0x10f   :  { %13138 = vmatprep.mubr.msk.bf16.mxu0 %vm230_vm0, %v15877_v39 }
 0x116   :  { %13139 = vmatmul.mubr.msk.bf16.gmra.mrb[8].mxu0 %vm230_vm0, %v15895_v52 }
 0x117   :  { %13142 = vmatprep.mubr.msk.bf16.mxu0 %vm230_vm0, %v15897_v53 }
 0x11e   :  { %13143 = vmatmul.mubr.msk.bf16.gmra.mrb[12].mxu0 %vm230_vm0, %v15915_v0 }
 0x11f   :  { %13146 = vmatprep.mubr.msk.bf16.mxu0 %vm230_vm0, %v15917_v1 }
 0x126   :  { %13147 = vmatmul.mubr.msk.bf16.gmra.mrb[16].mxu0 %vm230_vm0, %v15935_v14 }
 0x127   :  { %13150 = vmatprep.mubr.msk.bf16.mxu0 %vm230_vm0, %v15937_v17 }
 0x12e   :  { %13151 = vmatmul.mubr.msk.bf16.gmra.mrb[20].mxu0 %vm230_vm0, %v15955_v24 }
 0x12f   :  { %13154 = vmatprep.mubr.msk.bf16.mxu0 %vm230_vm0, %v15957_v25 }
 0x136   :  { %13155 = vmatmul.mubr.msk.bf16.gmra.mrb[24].mxu0 %vm230_vm0, %v15975_v38 }
 0x137   :  { %13158 = vmatprep.mubr.msk.bf16.mxu0 %vm230_vm0, %v15977_v42 }
 0x13e   :  { %13159 = vmatmul.mubr.msk.bf16.gmra.mrb[28].mxu0 %vm230_vm0, %v15995_v57 }
 0x13f   :  { %13162 = vmatprep.mubr.msk.bf16.mxu0 %vm230_vm0, %v1087_v60  ;;  %v16054_v60 = vpack.c.bf16 %v1052_v48, %v1051_v47  ;;  %v16092_v47 = vpack.c.bf16 %v1058_v26, %v1057_v23  ;;  %v16094_v48 = vpack.c.bf16 %v1060_v46, %v1059_v37  ;;  %v16112_v23 = vpack.c.bf16 %v1062_v6, %v1061_v63  ;;  %v1065_v37 = vld [vmem:[%s21511_s0 + $0x2ea] sm:$0xff]  ;;  %v1066_v46 = vld [vmem:[%s21511_s0 + $0x2f2] sm:$0xff]  ;;  %v1067_v63 = vld [vmem:[%s21511_s0 + $0x302] sm:$0xff] }
 0x140   :  { %v16114_v26 = vpack.c.bf16 %v1064_v8, %v1063_v7  ;;  %v1068_v6 = vld [vmem:[%s21511_s0 + $0x30a] sm:$0xff]  ;;  %v16132_v7 = vpack.c.bf16 %v1066_v46, %v1065_v37 }
 0x141   :  { %21605 = vst [vmem:[#allocation3_spill] sm:$0xff] %v16094_v48  ;;  %21606 = vst [vmem:[#allocation4_spill] sm:$0xff] %v16112_v23  ;;  %v16134_v8 = vpack.c.bf16 %v1068_v6, %v1067_v63  ;;  %v15214_v37 = vld [vmem:[%s21510_s1 + $0x28] sm:$0xff]   ;;  %v11544_v63 = vld [vmem:[%s21511_s0 + $0xf1] sm:$0xff] }
 0x142   :  { %21607 = vst [vmem:[#allocation5_spill] sm:$0xff] %v16114_v26  ;;  %v11545_v6 = vld [vmem:[%s21511_s0 + $0xf9] sm:$0xff] }
 0x146   :  { %13163 = vmatmul.mubr.msk.bf16.gmra.mrb[32].mxu0 %vm230_vm0, %v16012_v11 }
 0x147   :  { %13166 = vmatprep.mubr.msk.bf16.mxu0 %vm230_vm0, %v16014_v18 }
 0x14e   :  { %13167 = vmatmul.mubr.msk.bf16.gmra.mrb[36].mxu0 %vm230_vm0, %v16032_v33 }
 0x14f   :  { %13170 = vmatprep.mubr.msk.bf16.mxu0 %vm230_vm0, %v16034_v36 }
 0x156   :  { %13171 = vmatmul.mubr.msk.bf16.gmra.mrb[40].mxu0 %vm230_vm0, %v16052_v54 }
 0x157   :  { %13174 = vmatprep.mubr.msk.bf16.mxu0 %vm230_vm0, %v16054_v60 }
 0x15e   :  { %13175 = vmatmul.mubr.msk.bf16.gmra.mrb[44].mxu0 %vm230_vm0, %v16072_v19 }
 0x15f   :  { %13178 = vmatprep.mubr.msk.bf16.mxu0 %vm230_vm0, %v16074_v22 }
 0x166   :  { %13179 = vmatmul.mubr.msk.bf16.gmra.mrb[48].mxu0 %vm230_vm0, %v16092_v47 }
 0x167   :  { %13182 = vmatprep.mubr.msk.bf16.mxu0 %vm230_vm0, %v16094_v48 }
 0x16e   :  { %13183 = vmatmul.mubr.msk.bf16.gmra.mrb[52].mxu0 %vm230_vm0, %v16112_v23  ;;  %v1070_v23 = vld [vmem:[%s21511_s0 + $0x322] sm:$0xff] }
 0x16f   :  { %13186 = vmatprep.mubr.msk.bf16.mxu0 %vm230_vm0, %v16114_v26  ;;  %v1069_v26 = vld [vmem:[%s21511_s0 + $0x31a] sm:$0xff] }
 0x170   :  { %v16146_v48 = vpack.c.bf16 %v1070_v23, %v1069_v26  ;;  %v11543_v23 = vld [vmem:[%s21511_s0 + $0xe1] sm:$0xff] }
 0x176   :  { %13187 = vmatmul.mubr.msk.bf16.gmra.mrb[56].mxu0 %vm230_vm0, %v16132_v7 }
 0x177   :  { %13190 = vmatprep.mubr.msk.bf16.mxu0 %vm230_vm0, %v16134_v8 }
 0x17e   :  { %13191 = vmatmul.mubr.msk.bf16.gmra.mrb[60].mxu0 %vm230_vm0, %v16146_v48 }
 0x17f   :  { %13196 = vmatprep.mubr.msk.bf16.mxu0 %vm230_vm0, %v15527_v43  ;;  %v11457_v43 = vld [vmem:[%s21511_s0 + $0x180] sm:$0xff] }
 0x186   :  { %13197 = vmatmul.mubr.msk.bf16.vlgmr.msra.gmra.mrb[0].mxu0 %vm230_vm0, %v15529_v44  ;;  %v11458_v44 = vld [vmem:[%s21511_s0 + $0x188] sm:$0xff] }
 0x187   :  { %13261 = vmatpush3.bf16.msra.mxu0 %v15857_v32  ;;  %13200 = vmatprep.mubr.msk.bf16.mxu0 %vm230_vm0, %v15554_v27  ;;  %v16190_v27 = vpack.c.bf16 %v11458_v44, %v11457_v43  ;;  %v11542_v32 = vld [vmem:[%s21511_s0 + $0xd9] sm:$0xff]  ;;  %v11547_v43 = vld [vmem:[%s21511_s0 + $0x111] sm:$0xff]  ;;  %v16339_v44 = vpack.c.bf16 %v11545_v6, %v11544_v63  ;;  %v11563_v6 = vld [vmem:[%s21511_s0 + $0x201] sm:$0xff] }
 0x188   :  { %13326 = vmatprep.subr.bf16.mxu0 %v15214_v37  ;;  %v16321_v46 = vpack.c.bf16 %v11543_v23, %v11542_v32  ;;  %v11560_v32 = vld [vmem:[%s21511_s0 + $0x1e1] sm:$0xff]  ;;  %v11561_v23 = vld [vmem:[%s21511_s0 + $0x1e9] sm:$0xff]  ;;  %v11562_v63 = vld [vmem:[%s21511_s0 + $0x1f9] sm:$0xff] }
 0x18e   :  { %13201 = vmatmul.mubr.msk.bf16.gmra.mrb[4].mxu0 %vm230_vm0, %v15556_v50  ;;  %v11489_v50 = vld [vmem:[%s21511_s0 + $0x330] sm:$0xff] }
 0x18f   :  { %13204 = vmatprep.mubr.msk.bf16.mxu0 %vm230_vm0, %v15574_v55  ;;  %v11490_v55 = vld [vmem:[%s21511_s0 + $0x338] sm:$0xff] }
 0x196   :  { %13205 = vmatmul.mubr.msk.bf16.gmra.mrb[8].mxu0 %vm230_vm0, %v15576_v56  ;;  %v11526_v56 = vld [vmem:[%s21511_s0 + $0x19] sm:$0xff] }
 0x197   :  { %13208 = vmatprep.mubr.msk.bf16.mxu0 %vm230_vm0, %v15594_v61  ;;  %v11527_v61 = vld [vmem:[%s21511_s0 + $0x21] sm:$0xff] }
 0x19e   :  { %13209 = vmatmul.mubr.msk.bf16.gmra.mrb[12].mxu0 %vm230_vm0, %v15596_v62  ;;  %v16236_v62 = vpack.c.bf16 %v11490_v55, %v11489_v50  ;;  %v11548_v55 = vld [vmem:[%s21511_s0 + $0x121] sm:$0xff] }
 0x19f   :  { %13212 = vmatprep.mubr.msk.bf16.mxu0 %vm230_vm0, %v15614_v3  ;;  %v2180_v3 = vpack.c.bf16 %v11527_v61, %v11526_v56  ;;  %v11549_v56 = vld [vmem:[%s21511_s0 + $0x129] sm:$0xff]  ;;  %v11550_v61 = vld [vmem:[%s21511_s0 + $0x139] sm:$0xff] }
 0x1a6   :  { %13213 = vmatmul.mubr.msk.bf16.gmra.mrb[16].mxu0 %vm230_vm0, %v15616_v4  ;;  %v11528_v4 = vld [vmem:[%s21511_s0 + $0x31] sm:$0xff] }
 0x1a7   :  { %13216 = vmatprep.mubr.msk.bf16.mxu0 %vm230_vm0, %v15634_v9  ;;  %v11529_v9 = vld [vmem:[%s21511_s0 + $0x39] sm:$0xff] }
 0x1ae   :  { %13217 = vmatmul.mubr.msk.bf16.gmra.mrb[20].mxu0 %vm230_vm0, %v15636_v10  ;;  %v11530_v10 = vld [vmem:[%s21511_s0 + $0x49] sm:$0xff] }
 0x1af   :  { %13220 = vmatprep.mubr.msk.bf16.mxu0 %vm230_vm0, %v15654_v15  ;;  %v11531_v15 = vld [vmem:[%s21511_s0 + $0x51] sm:$0xff] }
 0x1b6   :  { %13221 = vmatmul.mubr.msk.bf16.gmra.mrb[24].mxu0 %vm230_vm0, %v15656_v16  ;;  %v16253_v16 = vpack.c.bf16 %v11529_v9, %v11528_v4  ;;  %v16359_v4 = vpack.c.bf16 %v11549_v56, %v11548_v55  ;;  %v11564_v55 = vld [vmem:[%s21511_s0 + $0x211] sm:$0xff]  ;;  %v11565_v56 = vld [vmem:[%s21511_s0 + $0x219] sm:$0xff] }
 0x1b7   :  { %13224 = vmatprep.mubr.msk.bf16.mxu0 %vm230_vm0, %v15674_v21  ;;  %v16255_v21 = vpack.c.bf16 %v11531_v15, %v11530_v10  ;;  %v11552_v10 = vld [vmem:[%s21511_s0 + $0x151] sm:$0xff]  ;;  %v11553_v15 = vld [vmem:[%s21511_s0 + $0x159] sm:$0xff] }
 0x1be   :  { %13225 = vmatmul.mubr.msk.bf16.gmra.mrb[28].mxu0 %vm230_vm0, %v16190_v27 }
 0x1bf   :  { %13228 = vmatprep.mubr.msk.bf16.mxu0 %vm230_vm0, %v15691_v28  ;;  %v16262_v28 = vld [vmem:[%s21510_s1 + $0x30] sm:$0xff]  }
 0x1c6   :  { %13229 = vmatmul.mubr.msk.bf16.gmra.mrb[32].mxu0 %vm230_vm0, %v15693_v29  ;;  %v11532_v29 = vld [vmem:[%s21511_s0 + $0x61] sm:$0xff] }
 0x1c7   :  { %13232 = vmatprep.mubr.msk.bf16.mxu0 %vm230_vm0, %v15711_v34  ;;  %v11533_v34 = vld [vmem:[%s21511_s0 + $0x69] sm:$0xff] }
 0x1ce   :  { %13233 = vmatmul.mubr.msk.bf16.gmra.mrb[36].mxu0 %vm230_vm0, %v15713_v35  ;;  %v11534_v35 = vld [vmem:[%s21511_s0 + $0x79] sm:$0xff] }
 0x1cf   :  { %13236 = vmatprep.mubr.msk.bf16.mxu0 %vm230_vm0, %v15731_v40  ;;  %v11535_v40 = vld [vmem:[%s21511_s0 + $0x81] sm:$0xff] }
 0x1d6   :  { %13237 = vmatmul.mubr.msk.bf16.gmra.mrb[40].mxu0 %vm230_vm0, %v15733_v41  ;;  %v16279_v41 = vpack.c.bf16 %v11533_v34, %v11532_v29  ;;  %v11554_v29 = vld [vmem:[%s21511_s0 + $0x169] sm:$0xff]  ;;  %v11555_v34 = vld [vmem:[%s21511_s0 + $0x171] sm:$0xff] }
 0x1d7   :  { %13240 = vmatprep.mubr.msk.bf16.mxu0 %vm230_vm0, %v15751_v49  ;;  %v16281_v49 = vpack.c.bf16 %v11535_v40, %v11534_v35  ;;  %v16379_v35 = vpack.c.bf16 %v11553_v15, %v11552_v10  ;;  %v16381_v40 = vpack.c.bf16 %v11555_v34, %v11554_v29  ;;  %v16436_v10 = vpack.c.bf16 %v11565_v56, %v11564_v55  ;;  %v11568_v29 = vld [vmem:[%s21511_s0 + $0x241] sm:$0xff]  ;;  %v11569_v34 = vld [vmem:[%s21511_s0 + $0x249] sm:$0xff] }
 0x1d8   :  { %v11576_v56 = vld [vmem:[%s21511_s0 + $0x2a1] sm:$0xff] }
 0x1de   :  { %13241 = vmatmul.mubr.msk.bf16.gmra.mrb[44].mxu0 %vm230_vm0, %v15753_v51  ;;  %v11536_v51 = vld [vmem:[%s21511_s0 + $0x91] sm:$0xff] }
 0x1df   :  { %13244 = vmatprep.mubr.msk.bf16.mxu0 %vm230_vm0, %v15771_v58  ;;  %v11537_v58 = vld [vmem:[%s21511_s0 + $0x99] sm:$0xff] }
 0x1e6   :  { %13245 = vmatmul.mubr.msk.bf16.gmra.mrb[48].mxu0 %vm230_vm0, %v15773_v59  ;;  %v11538_v59 = vld [vmem:[%s21511_s0 + $0xa9] sm:$0xff] }
 0x1e7   :  { %13248 = vmatprep.mubr.msk.bf16.mxu0 %vm230_vm0, %v15791_v2  ;;  %v11539_v2 = vld [vmem:[%s21511_s0 + $0xb1] sm:$0xff] }
 0x1ee   :  { %13249 = vmatmul.mubr.msk.bf16.gmra.mrb[52].mxu0 %vm230_vm0, %v15793_v5  ;;  %v16299_v5 = vpack.c.bf16 %v11537_v58, %v11536_v51  ;;  %v11556_v51 = vld [vmem:[%s21511_s0 + $0x181] sm:$0xff]  ;;  %v11557_v58 = vld [vmem:[%s21511_s0 + $0x189] sm:$0xff] }
 0x1ef   :  { %13252 = vmatprep.mubr.msk.bf16.mxu0 %vm230_vm0, %v15811_v12  ;;  %v16301_v12 = vpack.c.bf16 %v11539_v2, %v11538_v59  ;;  %v11558_v59 = vld [vmem:[%s21511_s0 + $0x1c9] sm:$0xff]  ;;  %v11559_v2 = vld [vmem:[%s21511_s0 + $0x1d1] sm:$0xff] }
 0x1f6   :  { %13253 = vmatmul.mubr.msk.bf16.gmra.mrb[56].mxu0 %vm230_vm0, %v15813_v13  ;;  %v11540_v13 = vld [vmem:[%s21511_s0 + $0xc1] sm:$0xff] }
 0x1f7   :  { %13256 = vmatprep.mubr.msk.bf16.mxu0 %vm230_vm0, %v15831_v20  ;;  %v11541_v20 = vld [vmem:[%s21511_s0 + $0xc9] sm:$0xff] }
 0x1f8   :  { %v16319_v26 = vpack.c.bf16 %v11541_v20, %v11540_v13  ;;  %v16399_v13 = vpack.c.bf16 %v11557_v58, %v11556_v51  ;;  %v2196_v20 = vpack.c.bf16 %v11559_v2, %v11558_v59  ;;  %v11570_v51 = vld [vmem:[%s21511_s0 + $0x259] sm:$0xff]  ;;  %v11571_v58 = vld [vmem:[%s21511_s0 + $0x261] sm:$0xff]  ;;  %v16456_v59 = vpack.c.bf16 %v11569_v34, %v11568_v29 }
 0x1f9   :  { %v16458_v2 = vpack.c.bf16 %v11571_v58, %v11570_v51  ;;  %v11579_v29 = vld [vmem:[%s21511_s0 + $0x2c1] sm:$0xff]  ;;  %v11580_v58 = vld [vmem:[%s21511_s0 + $0x2d1] sm:$0xff] }
 0x1fe   :  { %13257 = vmatmul.mubr.msk.bf16.gmra.mrb[60].mxu0 %vm230_vm0, %v16236_v62 }
 0x1ff   :  { %13262 = vmatprep.mubr.msk.bf16.mxu0 %vm230_vm0, %v2180_v3  ;;  %v11551_v3 = vld [vmem:[%s21511_s0 + $0x141] sm:$0xff] }
 0x200   :  { %v16361_v9 = vpack.c.bf16 %v11551_v3, %v11550_v61  ;;  %v11566_v61 = vld [vmem:[%s21511_s0 + $0x229] sm:$0xff]  ;;  %v11567_v3 = vld [vmem:[%s21511_s0 + $0x231] sm:$0xff] }
 0x201   :  { %v16438_v15 = vpack.c.bf16 %v11567_v3, %v11566_v61  ;;  %v11577_v61 = vld [vmem:[%s21511_s0 + $0x2a9] sm:$0xff]  ;;  %v11578_v3 = vld [vmem:[%s21511_s0 + $0x2b9] sm:$0xff] }
 0x202   :  { %v16496_v34 = vpack.c.bf16 %v11577_v61, %v11576_v56  ;;  %v16498_v51 = vpack.c.bf16 %v11579_v29, %v11578_v3  ;;  %v11584_v61 = vld [vmem:[%s21511_s0 + $0x301] sm:$0xff]  ;;  %v11585_v3 = vld [vmem:[%s21511_s0 + $0x309] sm:$0xff]  ;;  %v11586_v29 = vld [vmem:[%s21511_s0 + $0x319] sm:$0xff] }
 0x206   :  { %13263 = vmatmul.mubr.msk.bf16.vlgmr.msra.gmra.mrb[0].mxu0 %vm230_vm0, %v16253_v16 }
 0x207   :  { %13327 = vmatpush3.bf16.msra.mxu0 %v15214_v37  ;;  %13266 = vmatprep.mubr.msk.bf16.mxu0 %vm230_vm0, %v16255_v21  ;;  %v11546_v37 = vld [vmem:[%s21511_s0 + $0x109] sm:$0xff] }
 0x208   :  { %13392 = vmatprep.subr.bf16.mxu0 %v16262_v28  ;;  %v16341_v50 = vpack.c.bf16 %v11547_v43, %v11546_v37  ;;  %v16416_v37 = vpack.c.bf16 %v11561_v23, %v11560_v32  ;;  %v16418_v43 = vpack.c.bf16 %v11563_v6, %v11562_v63  ;;  %v11573_v32 = vld [vmem:[%s21511_s0 + $0x279] sm:$0xff]  ;;  %v11574_v23 = vld [vmem:[%s21511_s0 + $0x289] sm:$0xff]  ;;  %v11575_v63 = vld [vmem:[%s21511_s0 + $0x291] sm:$0xff] }
 0x209   :  { %v16478_v55 = vpack.c.bf16 %v11575_v63, %v11574_v23  ;;  %v11583_v23 = vld [vmem:[%s21511_s0 + $0x2f1] sm:$0xff] }
 0x20e   :  { %13267 = vmatmul.mubr.msk.bf16.gmra.mrb[4].mxu0 %vm230_vm0, %v16279_v41 }
 0x20f   :  { %13270 = vmatprep.mubr.msk.bf16.mxu0 %vm230_vm0, %v16281_v49 }
 0x216   :  { %13271 = vmatmul.mubr.msk.bf16.gmra.mrb[8].mxu0 %vm230_vm0, %v16299_v5 }
 0x217   :  { %13274 = vmatprep.mubr.msk.bf16.mxu0 %vm230_vm0, %v16301_v12 }
 0x21e   :  { %13275 = vmatmul.mubr.msk.bf16.gmra.mrb[12].mxu0 %vm230_vm0, %v16319_v26 }
 0x21f   :  { %13278 = vmatprep.mubr.msk.bf16.mxu0 %vm230_vm0, %v16321_v46 }
 0x226   :  { %13279 = vmatmul.mubr.msk.bf16.gmra.mrb[16].mxu0 %vm230_vm0, %v16339_v44 }
 0x227   :  { %13282 = vmatprep.mubr.msk.bf16.mxu0 %vm230_vm0, %v16341_v50 }
 0x22e   :  { %13283 = vmatmul.mubr.msk.bf16.gmra.mrb[20].mxu0 %vm230_vm0, %v16359_v4 }
 0x22f   :  { %13286 = vmatprep.mubr.msk.bf16.mxu0 %vm230_vm0, %v16361_v9 }
 0x236   :  { %13287 = vmatmul.mubr.msk.bf16.gmra.mrb[24].mxu0 %vm230_vm0, %v16379_v35 }
 0x237   :  { %13290 = vmatprep.mubr.msk.bf16.mxu0 %vm230_vm0, %v16381_v40 }
 0x23e   :  { %13291 = vmatmul.mubr.msk.bf16.gmra.mrb[28].mxu0 %vm230_vm0, %v16399_v13 }
 0x23f   :  { %13294 = vmatprep.mubr.msk.bf16.mxu0 %vm230_vm0, %v2196_v20  ;;  %v11572_v20 = vld [vmem:[%s21511_s0 + $0x271] sm:$0xff] }
 0x240   :  { %v16476_v6 = vpack.c.bf16 %v11573_v32, %v11572_v20  ;;  %v11581_v20 = vld [vmem:[%s21511_s0 + $0x2d9] sm:$0xff]  ;;  %v11582_v32 = vld [vmem:[%s21511_s0 + $0x2e9] sm:$0xff] }
 0x241   :  { %v16516_v63 = vpack.c.bf16 %v11581_v20, %v11580_v58  ;;  %v16518_v56 = vpack.c.bf16 %v11583_v23, %v11582_v32  ;;  %v11587_v58 = vld [vmem:[%s21511_s0 + $0x321] sm:$0xff]  ;;  %v16536_v20 = vpack.c.bf16 %v11585_v3, %v11584_v61  ;;  %v11588_v23 = vld [vmem:[%s21511_s0 + $0x331] sm:$0xff] }
 0x242   :  { %v16538_v32 = vpack.c.bf16 %v11587_v58, %v11586_v29  ;;  %v15216_v61 = vld [vmem:[%s21510_s1 + $0x38] sm:$0xff]  }
 0x243   :  { %21608 = vst [vmem:[#allocation6_spill] sm:$0xff] %v16516_v63  ;;  %21609 = vst [vmem:[#allocation7_spill] sm:$0xff] %v16518_v56  ;;  %v11738_v58 = vld [vmem:[%s21511_s0 + $0xd8] sm:$0xff] }
 0x246   :  { %13295 = vmatmul.mubr.msk.bf16.gmra.mrb[32].mxu0 %vm230_vm0, %v16416_v37 }
 0x247   :  { %13298 = vmatprep.mubr.msk.bf16.mxu0 %vm230_vm0, %v16418_v43 }
 0x24e   :  { %13299 = vmatmul.mubr.msk.bf16.gmra.mrb[36].mxu0 %vm230_vm0, %v16436_v10 }
 0x24f   :  { %13302 = vmatprep.mubr.msk.bf16.mxu0 %vm230_vm0, %v16438_v15 }
 0x256   :  { %13303 = vmatmul.mubr.msk.bf16.gmra.mrb[40].mxu0 %vm230_vm0, %v16456_v59 }
 0x257   :  { %13306 = vmatprep.mubr.msk.bf16.mxu0 %vm230_vm0, %v16458_v2 }
 0x25e   :  { %13307 = vmatmul.mubr.msk.bf16.gmra.mrb[44].mxu0 %vm230_vm0, %v16476_v6 }
 0x25f   :  { %13310 = vmatprep.mubr.msk.bf16.mxu0 %vm230_vm0, %v16478_v55 }
 0x266   :  { %13311 = vmatmul.mubr.msk.bf16.gmra.mrb[48].mxu0 %vm230_vm0, %v16496_v34 }
 0x267   :  { %13314 = vmatprep.mubr.msk.bf16.mxu0 %vm230_vm0, %v16498_v51 }
 0x26e   :  { %13315 = vmatmul.mubr.msk.bf16.gmra.mrb[52].mxu0 %vm230_vm0, %v16516_v63 }
 0x26f   :  { %13318 = vmatprep.mubr.msk.bf16.mxu0 %vm230_vm0, %v16518_v56  ;;  %v11589_v56 = vld [vmem:[%s21511_s0 + $0x339] sm:$0xff] }
 0x270   :  { %v16550_v63 = vpack.c.bf16 %v11589_v56, %v11588_v23  ;;  %v11737_v56 = vld [vmem:[%s21511_s0 + $0xc8] sm:$0xff]  ;;  %v11739_v23 = vld [vmem:[%s21511_s0 + $0xe0] sm:$0xff] }
 0x276   :  { %13319 = vmatmul.mubr.msk.bf16.gmra.mrb[56].mxu0 %vm230_vm0, %v16536_v20 }
 0x277   :  { %13322 = vmatprep.mubr.msk.bf16.mxu0 %vm230_vm0, %v16538_v32 }
 0x27e   :  { %13323 = vmatmul.mubr.msk.bf16.gmra.mrb[60].mxu0 %vm230_vm0, %v16550_v63 }
 0x27f   :  { %13328 = vmatprep.mubr.msk.bf16.mxu0 %vm230_vm0, %v15848_v30  ;;  %v11655_v30 = vld [vmem:[%s21511_s0 + $0x182] sm:$0xff] }
 0x286   :  { %13329 = vmatmul.mubr.msk.bf16.vlgmr.msra.gmra.mrb[0].mxu0 %vm230_vm0, %v15850_v31  ;;  %v11656_v31 = vld [vmem:[%s21511_s0 + $0x18a] sm:$0xff] }
 0x287   :  { %13393 = vmatpush3.bf16.msra.mxu0 %v16262_v28  ;;  %13332 = vmatprep.mubr.msk.bf16.mxu0 %vm230_vm0, %v15875_v45  ;;  %v16594_v45 = vpack.c.bf16 %v11656_v31, %v11655_v30  ;;  %v11736_v28 = vld [vmem:[%s21511_s0 + $0xc0] sm:$0xff]  ;;  %v11741_v30 = vld [vmem:[%s21511_s0 + $0xf8] sm:$0xff]  ;;  %v3296_v31 = vpack.c.bf16 %v11739_v23, %v11738_v58  ;;  %v11762_v23 = vld [vmem:[%s21511_s0 + $0x228] sm:$0xff] }
 0x288   :  { %13458 = vmatprep.subr.bf16.mxu0 %v15216_v61  ;;  %v3295_v29 = vpack.c.bf16 %v11737_v56, %v11736_v28  ;;  %v11759_v28 = vld [vmem:[%s21511_s0 + $0x200] sm:$0xff]  ;;  %v11760_v56 = vld [vmem:[%s21511_s0 + $0x210] sm:$0xff] }
 0x28e   :  { %13333 = vmatmul.mubr.msk.bf16.gmra.mrb[4].mxu0 %vm230_vm0, %v15877_v39  ;;  %v21610_v39 = vld [vmem:[#allocation3_spill] sm:$0xff] }
 0x28f   :  { %13336 = vmatprep.mubr.msk.bf16.mxu0 %vm230_vm0, %v15895_v52  ;;  %v21611_v52 = vld [vmem:[#allocation4_spill] sm:$0xff] }
 0x296   :  { %13337 = vmatmul.mubr.msk.bf16.gmra.mrb[8].mxu0 %vm230_vm0, %v15897_v53  ;;  %v21612_v53 = vld [vmem:[#allocation5_spill] sm:$0xff] }
 0x297   :  { %13340 = vmatprep.mubr.msk.bf16.mxu0 %vm230_vm0, %v15915_v0  ;;  %v11687_v0 = vld [vmem:[%s21511_s0 + $0x332] sm:$0xff] }
 0x29e   :  { %13341 = vmatmul.mubr.msk.bf16.gmra.mrb[12].mxu0 %vm230_vm0, %v15917_v1  ;;  %v11688_v1 = vld [vmem:[%s21511_s0 + $0x33a] sm:$0xff] }
 0x29f   :  { %13344 = vmatprep.mubr.msk.bf16.mxu0 %vm230_vm0, %v15935_v14  ;;  %v11724_v14 = vld [vmem:[%s21511_s0 + $0x30] sm:$0xff] }
 0x2a6   :  { %13345 = vmatmul.mubr.msk.bf16.gmra.mrb[16].mxu0 %vm230_vm0, %v15937_v17  ;;  %v11725_v17 = vld [vmem:[%s21511_s0 + $0x38] sm:$0xff] }
 0x2a7   :  { %13348 = vmatprep.mubr.msk.bf16.mxu0 %vm230_vm0, %v15955_v24  ;;  %v16640_v24 = vpack.c.bf16 %v11688_v1, %v11687_v0  ;;  %v11744_v0 = vld [vmem:[%s21511_s0 + $0x120] sm:$0xff]  ;;  %v11745_v1 = vld [vmem:[%s21511_s0 + $0x128] sm:$0xff] }
 0x2ae   :  { %13349 = vmatmul.mubr.msk.bf16.gmra.mrb[20].mxu0 %vm230_vm0, %v15957_v25  ;;  %v3289_v25 = vpack.c.bf16 %v11725_v17, %v11724_v14  ;;  %v3299_v17 = vpack.c.bf16 %v11745_v1, %v11744_v0  ;;  %v11767_v0 = vld [vmem:[%s21511_s0 + $0x260] sm:$0xff]  ;;  %v11768_v1 = vld [vmem:[%s21511_s0 + $0x270] sm:$0xff] }
 0x2af   :  { %13352 = vmatprep.mubr.msk.bf16.mxu0 %vm230_vm0, %v15975_v38  ;;  %v11726_v38 = vld [vmem:[%s21511_s0 + $0x48] sm:$0xff] }
 0x2b6   :  { %13353 = vmatmul.mubr.msk.bf16.gmra.mrb[24].mxu0 %vm230_vm0, %v15977_v42  ;;  %v11727_v42 = vld [vmem:[%s21511_s0 + $0x50] sm:$0xff] }
 0x2b7   :  { %13356 = vmatprep.mubr.msk.bf16.mxu0 %vm230_vm0, %v15995_v57  ;;  %v11728_v57 = vld [vmem:[%s21511_s0 + $0x60] sm:$0xff] }
 0x2be   :  { %13357 = vmatmul.mubr.msk.bf16.gmra.mrb[28].mxu0 %vm230_vm0, %v16594_v45 }
 0x2bf   :  { %13360 = vmatprep.mubr.msk.bf16.mxu0 %vm230_vm0, %v16012_v11  ;;  %v11729_v11 = vld [vmem:[%s21511_s0 + $0x68] sm:$0xff] }
 0x2c6   :  { %13361 = vmatmul.mubr.msk.bf16.gmra.mrb[32].mxu0 %vm230_vm0, %v16014_v18  ;;  %v3290_v18 = vpack.c.bf16 %v11727_v42, %v11726_v38  ;;  %v11747_v38 = vld [vmem:[%s21511_s0 + $0x140] sm:$0xff]  ;;  %v11748_v42 = vld [vmem:[%s21511_s0 + $0x150] sm:$0xff] }
 0x2c7   :  { %13364 = vmatprep.mubr.msk.bf16.mxu0 %vm230_vm0, %v16032_v33  ;;  %v3291_v33 = vpack.c.bf16 %v11729_v11, %v11728_v57  ;;  %v11749_v57 = vld [vmem:[%s21511_s0 + $0x158] sm:$0xff] }
 0x2ce   :  { %13365 = vmatmul.mubr.msk.bf16.gmra.mrb[36].mxu0 %vm230_vm0, %v16034_v36  ;;  %v16661_v36 = vld [vmem:[%s21510_s1 + $0x40] sm:$0xff]  }
 0x2cf   :  { %13368 = vmatprep.mubr.msk.bf16.mxu0 %vm230_vm0, %v16052_v54  ;;  %v11730_v54 = vld [vmem:[%s21511_s0 + $0x78] sm:$0xff] }
 0x2d6   :  { %13369 = vmatmul.mubr.msk.bf16.gmra.mrb[40].mxu0 %vm230_vm0, %v16054_v60  ;;  %v11731_v60 = vld [vmem:[%s21511_s0 + $0x80] sm:$0xff] }
 0x2d7   :  { %13372 = vmatprep.mubr.msk.bf16.mxu0 %vm230_vm0, %v16072_v19  ;;  %v11732_v19 = vld [vmem:[%s21511_s0 + $0x90] sm:$0xff] }
 0x2de   :  { %13373 = vmatmul.mubr.msk.bf16.gmra.mrb[44].mxu0 %vm230_vm0, %v16074_v22  ;;  %v11733_v22 = vld [vmem:[%s21511_s0 + $0x98] sm:$0xff] }
 0x2df   :  { %13376 = vmatprep.mubr.msk.bf16.mxu0 %vm230_vm0, %v16092_v47  ;;  %v3292_v47 = vpack.c.bf16 %v11731_v60, %v11730_v54  ;;  %v11751_v54 = vld [vmem:[%s21511_s0 + $0x170] sm:$0xff] }
 0x2e6   :  { %13377 = vmatmul.mubr.msk.bf16.gmra.mrb[48].mxu0 %vm230_vm0, %v21610_v39 }
 0x2e7   :  { %13380 = vmatprep.mubr.msk.bf16.mxu0 %vm230_vm0, %v21611_v52  ;;  %v11742_v52 = vld [vmem:[%s21511_s0 + $0x108] sm:$0xff] }
 0x2ee   :  { %13381 = vmatmul.mubr.msk.bf16.gmra.mrb[52].mxu0 %vm230_vm0, %v21612_v53  ;;  %v11743_v53 = vld [vmem:[%s21511_s0 + $0x110] sm:$0xff] }
 0x2ef   :  { %13384 = vmatprep.mubr.msk.bf16.mxu0 %vm230_vm0, %v16132_v7  ;;  %v11734_v7 = vld [vmem:[%s21511_s0 + $0xa8] sm:$0xff]  ;;  %v3298_v14 = vpack.c.bf16 %v11743_v53, %v11742_v52  ;;  %v11766_v53 = vld [vmem:[%s21511_s0 + $0x258] sm:$0xff] }
 0x2f6   :  { %13385 = vmatmul.mubr.msk.bf16.gmra.mrb[56].mxu0 %vm230_vm0, %v16134_v8  ;;  %v11735_v8 = vld [vmem:[%s21511_s0 + $0xb0] sm:$0xff] }
 0x2f7   :  { %13388 = vmatprep.mubr.msk.bf16.mxu0 %vm230_vm0, %v16146_v48  ;;  %v3293_v48 = vpack.c.bf16 %v11733_v22, %v11732_v19  ;;  %v3294_v3 = vpack.c.bf16 %v11735_v8, %v11734_v7  ;;  %v11754_v19 = vld [vmem:[%s21511_s0 + $0x198] sm:$0xff]  ;;  %v11755_v22 = vld [vmem:[%s21511_s0 + $0x1a0] sm:$0xff] }
 0x2f8   :  { %v3304_v7 = vpack.c.bf16 %v11755_v22, %v11754_v19  ;;  %v11776_v19 = vld [vmem:[%s21511_s0 + $0x2d0] sm:$0xff]  ;;  %v11777_v22 = vld [vmem:[%s21511_s0 + $0x2d8] sm:$0xff] }
 0x2fe   :  { %13389 = vmatmul.mubr.msk.bf16.gmra.mrb[60].mxu0 %vm230_vm0, %v16640_v24 }
 0x2ff   :  { %13394 = vmatprep.mubr.msk.bf16.mxu0 %vm230_vm0, %v3289_v25  ;;  %v11746_v25 = vld [vmem:[%s21511_s0 + $0x138] sm:$0xff] }
 0x300   :  { %v3300_v11 = vpack.c.bf16 %v11747_v38, %v11746_v25  ;;  %v11770_v38 = vld [vmem:[%s21511_s0 + $0x288] sm:$0xff] }
 0x306   :  { %13395 = vmatmul.mubr.msk.bf16.vlgmr.msra.gmra.mrb[0].mxu0 %vm230_vm0, %v3290_v18  ;;  %v3301_v18 = vpack.c.bf16 %v11749_v57, %v11748_v42  ;;  %v11771_v42 = vld [vmem:[%s21511_s0 + $0x290] sm:$0xff]  ;;  %v11772_v57 = vld [vmem:[%s21511_s0 + $0x2a0] sm:$0xff] }
 0x307   :  { %13459 = vmatpush3.bf16.msra.mxu0 %v15216_v61  ;;  %13398 = vmatprep.mubr.msk.bf16.mxu0 %vm230_vm0, %v3291_v33  ;;  %v11740_v61 = vld [vmem:[%s21511_s0 + $0xf0] sm:$0xff]  ;;  %v11750_v33 = vld [vmem:[%s21511_s0 + $0x168] sm:$0xff] }
 0x308   :  { %13524 = vmatprep.subr.bf16.mxu0 %v16661_v36  ;;  %v3297_v39 = vpack.c.bf16 %v11741_v30, %v11740_v61  ;;  %v3302_v60 = vpack.c.bf16 %v11751_v54, %v11750_v33  ;;  %v11763_v61 = vld [vmem:[%s21511_s0 + $0x230] sm:$0xff]  ;;  %v11764_v30 = vld [vmem:[%s21511_s0 + $0x240] sm:$0xff]  ;;  %v11774_v54 = vld [vmem:[%s21511_s0 + $0x2b8] sm:$0xff] }
 0x30e   :  { %13399 = vmatmul.mubr.msk.bf16.gmra.mrb[4].mxu0 %vm230_vm0, %v3292_v47  ;;  %v11756_v47 = vld [vmem:[%s21511_s0 + $0x1e0] sm:$0xff] }
 0x30f   :  { %13402 = vmatprep.mubr.msk.bf16.mxu0 %vm230_vm0, %v3293_v48  ;;  %v11757_v48 = vld [vmem:[%s21511_s0 + $0x1e8] sm:$0xff] }
 0x310   :  { %v3305_v8 = vpack.c.bf16 %v11757_v48, %v11756_v47  ;;  %v3315_v48 = vpack.c.bf16 %v11777_v22, %v11776_v19  ;;  %v11948_v22 = vld [vmem:[%s21511_s0 + $0x16a] sm:$0xff] }
 0x316   :  { %13403 = vmatmul.mubr.msk.bf16.gmra.mrb[8].mxu0 %vm230_vm0, %v3294_v3  ;;  %v11761_v3 = vld [vmem:[%s21511_s0 + $0x218] sm:$0xff] }
 0x317   :  { %13406 = vmatprep.mubr.msk.bf16.mxu0 %vm230_vm0, %v3295_v29  ;;  %v3307_v58 = vpack.c.bf16 %v11761_v3, %v11760_v56 }
 0x31e   :  { %13407 = vmatmul.mubr.msk.bf16.gmra.mrb[12].mxu0 %vm230_vm0, %v3296_v31  ;;  %v11765_v31 = vld [vmem:[%s21511_s0 + $0x248] sm:$0xff] }
 0x31f   :  { %13410 = vmatprep.mubr.msk.bf16.mxu0 %vm230_vm0, %v3297_v39  ;;  %v3308_v39 = vpack.c.bf16 %v11763_v61, %v11762_v23  ;;  %v3309_v52 = vpack.c.bf16 %v11765_v31, %v11764_v30  ;;  %v11786_v61 = vld [vmem:[%s21511_s0 + $0x348] sm:$0xff]  ;;  %v11787_v30 = vld [vmem:[%s21511_s0 + $0x350] sm:$0xff] }
 0x320   :  { %v3320_v31 = vpack.c.bf16 %v11787_v30, %v11786_v61 }
 0x326   :  { %13411 = vmatmul.mubr.msk.bf16.gmra.mrb[16].mxu0 %vm230_vm0, %v3298_v14  ;;  %v11769_v14 = vld [vmem:[%s21511_s0 + $0x278] sm:$0xff] }
 0x327   :  { %13414 = vmatprep.mubr.msk.bf16.mxu0 %vm230_vm0, %v3299_v17  ;;  %v3310_v17 = vpack.c.bf16 %v11767_v0, %v11766_v53  ;;  %v3311_v25 = vpack.c.bf16 %v11769_v14, %v11768_v1  ;;  %v11939_v53 = vld [vmem:[%s21511_s0 + $0xfa] sm:$0xff]  ;;  %v11940_v14 = vld [vmem:[%s21511_s0 + $0x10a] sm:$0xff] }
 0x32e   :  { %13415 = vmatmul.mubr.msk.bf16.gmra.mrb[20].mxu0 %vm230_vm0, %v3300_v11  ;;  %v11773_v11 = vld [vmem:[%s21511_s0 + $0x2a8] sm:$0xff] }
 0x32f   :  { %13418 = vmatprep.mubr.msk.bf16.mxu0 %vm230_vm0, %v3301_v18  ;;  %v3312_v18 = vpack.c.bf16 %v11771_v42, %v11770_v38  ;;  %v3313_v33 = vpack.c.bf16 %v11773_v11, %v11772_v57  ;;  %v11943_v38 = vld [vmem:[%s21511_s0 + $0x12a] sm:$0xff]  ;;  %v11944_v11 = vld [vmem:[%s21511_s0 + $0x13a] sm:$0xff] }
 0x336   :  { %13419 = vmatmul.mubr.msk.bf16.gmra.mrb[24].mxu0 %vm230_vm0, %v3302_v60  ;;  %v11775_v60 = vld [vmem:[%s21511_s0 + $0x2c0] sm:$0xff] }
 0x337   :  { %13422 = vmatprep.mubr.msk.bf16.mxu0 %vm230_vm0, %v16190_v27  ;;  %v11758_v27 = vld [vmem:[%s21511_s0 + $0x1f8] sm:$0xff]  ;;  %v3314_v47 = vpack.c.bf16 %v11775_v60, %v11774_v54 }
 0x338   :  { %v3306_v29 = vpack.c.bf16 %v11759_v28, %v11758_v27  ;;  %v11780_v27 = vld [vmem:[%s21511_s0 + $0x300] sm:$0xff]  ;;  %v11781_v28 = vld [vmem:[%s21511_s0 + $0x308] sm:$0xff] }
 0x339   :  { %v3317_v3 = vpack.c.bf16 %v11781_v28, %v11780_v27  ;;  %v11947_v54 = vld [vmem:[%s21511_s0 + $0x15a] sm:$0xff]  ;;  %v11954_v27 = vld [vmem:[%s21511_s0 + $0x1e2] sm:$0xff]  ;;  %v11955_v28 = vld [vmem:[%s21511_s0 + $0x1ea] sm:$0xff] }
 0x33e   :  { %13423 = vmatmul.mubr.msk.bf16.gmra.mrb[28].mxu0 %vm230_vm0, %v3304_v7  ;;  %v11778_v7 = vld [vmem:[%s21511_s0 + $0x2e8] sm:$0xff] }
 0x33f   :  { %13426 = vmatprep.mubr.msk.bf16.mxu0 %vm230_vm0, %v3305_v8  ;;  %v11779_v8 = vld [vmem:[%s21511_s0 + $0x2f0] sm:$0xff] }
 0x340   :  { %v3316_v56 = vpack.c.bf16 %v11779_v8, %v11778_v7  ;;  %v11952_v7 = vld [vmem:[%s21511_s0 + $0x19a] sm:$0xff]  ;;  %v11953_v8 = vld [vmem:[%s21511_s0 + $0x1a2] sm:$0xff] }
 0x346   :  { %13427 = vmatmul.mubr.msk.bf16.gmra.mrb[32].mxu0 %vm230_vm0, %v3306_v29  ;;  %v11782_v29 = vld [vmem:[%s21511_s0 + $0x318] sm:$0xff] }
 0x347   :  { %13430 = vmatprep.mubr.msk.bf16.mxu0 %vm230_vm0, %v3307_v58  ;;  %v11783_v58 = vld [vmem:[%s21511_s0 + $0x320] sm:$0xff] }
 0x348   :  { %v3318_v23 = vpack.c.bf16 %v11783_v58, %v11782_v29  ;;  %v11957_v29 = vld [vmem:[%s21511_s0 + $0x202] sm:$0xff]  ;;  %v11958_v58 = vld [vmem:[%s21511_s0 + $0x212] sm:$0xff] }
 0x34e   :  { %13431 = vmatmul.mubr.msk.bf16.gmra.mrb[36].mxu0 %vm230_vm0, %v3308_v39  ;;  %v11937_v39 = vld [vmem:[%s21511_s0 + $0xe2] sm:$0xff] }
 0x34f   :  { %13434 = vmatprep.mubr.msk.bf16.mxu0 %vm230_vm0, %v3309_v52  ;;  %v11938_v52 = vld [vmem:[%s21511_s0 + $0xf2] sm:$0xff] }
 0x350   :  { %v4405_v1 = vpack.c.bf16 %v11939_v53, %v11938_v52  ;;  %v11981_v52 = vld [vmem:[%s21511_s0 + $0x322] sm:$0xff] }
 0x356   :  { %13435 = vmatmul.mubr.msk.bf16.gmra.mrb[40].mxu0 %vm230_vm0, %v3310_v17  ;;  %v11941_v17 = vld [vmem:[%s21511_s0 + $0x112] sm:$0xff] }
 0x357   :  { %13438 = vmatprep.mubr.msk.bf16.mxu0 %vm230_vm0, %v3311_v25  ;;  %v11942_v25 = vld [vmem:[%s21511_s0 + $0x122] sm:$0xff]  ;;  %v4406_v42 = vpack.c.bf16 %v11941_v17, %v11940_v14 }
 0x358   :  { %v4407_v57 = vpack.c.bf16 %v11943_v38, %v11942_v25 }
 0x35e   :  { %13439 = vmatmul.mubr.msk.bf16.gmra.mrb[44].mxu0 %vm230_vm0, %v3312_v18  ;;  %v11945_v18 = vld [vmem:[%s21511_s0 + $0x142] sm:$0xff] }
 0x35f   :  { %13442 = vmatprep.mubr.msk.bf16.mxu0 %vm230_vm0, %v3313_v33  ;;  %v11946_v33 = vld [vmem:[%s21511_s0 + $0x152] sm:$0xff]  ;;  %v4408_v60 = vpack.c.bf16 %v11945_v18, %v11944_v11 }
 0x360   :  { %v4409_v19 = vpack.c.bf16 %v11947_v54, %v11946_v33 }
 0x366   :  { %13443 = vmatmul.mubr.msk.bf16.gmra.mrb[48].mxu0 %vm230_vm0, %v3314_v47  ;;  %v11949_v47 = vld [vmem:[%s21511_s0 + $0x172] sm:$0xff] }
 0x367   :  { %13446 = vmatprep.mubr.msk.bf16.mxu0 %vm230_vm0, %v3315_v48  ;;  %v4410_v48 = vpack.c.bf16 %v11949_v47, %v11948_v22 }
 0x36e   :  { %13447 = vmatmul.mubr.msk.bf16.gmra.mrb[52].mxu0 %vm230_vm0, %v3316_v56  ;;  %v4412_v56 = vpack.c.bf16 %v11953_v8, %v11952_v7 }
 0x36f   :  { %13450 = vmatprep.mubr.msk.bf16.mxu0 %vm230_vm0, %v3317_v3  ;;  %v4413_v3 = vpack.c.bf16 %v11955_v28, %v11954_v27 }
 0x376   :  { %13451 = vmatmul.mubr.msk.bf16.gmra.mrb[56].mxu0 %vm230_vm0, %v3318_v23  ;;  %v11959_v23 = vld [vmem:[%s21511_s0 + $0x21a] sm:$0xff] }
 0x377   :  { %13454 = vmatprep.mubr.msk.bf16.mxu0 %vm230_vm0, %v16236_v62  ;;  %v11853_v62 = vld [vmem:[%s21511_s0 + $0x199] sm:$0xff]  ;;  %v4415_v30 = vpack.c.bf16 %v11959_v23, %v11958_v58 }
 0x37e   :  { %13455 = vmatmul.mubr.msk.bf16.gmra.mrb[60].mxu0 %vm230_vm0, %v3320_v31  ;;  %v11960_v31 = vld [vmem:[%s21511_s0 + $0x22a] sm:$0xff] }
 0x37f   :  { %13460 = vmatprep.mubr.msk.bf16.mxu0 %vm230_vm0, %v16253_v16  ;;  %v11854_v16 = vld [vmem:[%s21511_s0 + $0x1a1] sm:$0xff] }
 0x386   :  { %13461 = vmatmul.mubr.msk.bf16.vlgmr.msra.gmra.mrb[0].mxu0 %vm230_vm0, %v16255_v21  ;;  %v3858_v21 = vpack.c.bf16 %v11854_v16, %v11853_v62  ;;  %v11961_v62 = vld [vmem:[%s21511_s0 + $0x232] sm:$0xff]  ;;  %v11962_v16 = vld [vmem:[%s21511_s0 + $0x242] sm:$0xff] }
 0x387   :  { %13525 = vmatpush3.bf16.msra.mxu0 %v16661_v36  ;;  %13464 = vmatprep.mubr.msk.bf16.mxu0 %vm230_vm0, %v16279_v41  ;;  %v21613_v41 = vld [vmem:[#allocation6_spill] sm:$0xff] }
 0x388   :  { %v11936_v36 = vld [vmem:[%s21511_s0 + $0xda] sm:$0xff] }
 0x389   :  { %v4404_v0 = vpack.c.bf16 %v11937_v39, %v11936_v36  ;;  %v11980_v39 = vld [vmem:[%s21511_s0 + $0x31a] sm:$0xff] }
 0x38a   :  { %v4426_v53 = vpack.c.bf16 %v11981_v52, %v11980_v39 }
 0x38e   :  { %13465 = vmatmul.mubr.msk.bf16.gmra.mrb[4].mxu0 %vm230_vm0, %v16281_v49  ;;  %v21614_v49 = vld [vmem:[#allocation7_spill] sm:$0xff] }
 0x38f   :  { %13468 = vmatprep.mubr.msk.bf16.mxu0 %vm230_vm0, %v16299_v5  ;;  %v11885_v5 = vld [vmem:[%s21511_s0 + $0x349] sm:$0xff] }
 0x396   :  { %13469 = vmatmul.mubr.msk.bf16.gmra.mrb[8].mxu0 %vm230_vm0, %v16301_v12  ;;  %v11886_v12 = vld [vmem:[%s21511_s0 + $0x351] sm:$0xff] }
 0x397   :  { %13472 = vmatprep.mubr.msk.bf16.mxu0 %vm230_vm0, %v16319_v26  ;;  %v11922_v26 = vld [vmem:[%s21511_s0 + $0x32] sm:$0xff] }
 0x39e   :  { %13473 = vmatmul.mubr.msk.bf16.gmra.mrb[12].mxu0 %vm230_vm0, %v16321_v46  ;;  %v11923_v46 = vld [vmem:[%s21511_s0 + $0x3a] sm:$0xff] }
 0x39f   :  { %13476 = vmatprep.mubr.msk.bf16.mxu0 %vm230_vm0, %v16339_v44  ;;  %v3874_v44 = vpack.c.bf16 %v11886_v12, %v11885_v5  ;;  %v11964_v5 = vld [vmem:[%s21511_s0 + $0x25a] sm:$0xff]  ;;  %v11965_v12 = vld [vmem:[%s21511_s0 + $0x262] sm:$0xff] }
 0x3a6   :  { %13477 = vmatmul.mubr.msk.bf16.gmra.mrb[16].mxu0 %vm230_vm0, %v16341_v50  ;;  %v4397_v50 = vpack.c.bf16 %v11923_v46, %v11922_v26  ;;  %v11966_v26 = vld [vmem:[%s21511_s0 + $0x272] sm:$0xff]  ;;  %v11967_v46 = vld [vmem:[%s21511_s0 + $0x27a] sm:$0xff] }
 0x3a7   :  { %13480 = vmatprep.mubr.msk.bf16.mxu0 %vm230_vm0, %v16359_v4  ;;  %v11924_v4 = vld [vmem:[%s21511_s0 + $0x4a] sm:$0xff] }
 0x3ae   :  { %13481 = vmatmul.mubr.msk.bf16.gmra.mrb[20].mxu0 %vm230_vm0, %v16361_v9  ;;  %v11925_v9 = vld [vmem:[%s21511_s0 + $0x52] sm:$0xff] }
 0x3af   :  { %13484 = vmatprep.mubr.msk.bf16.mxu0 %vm230_vm0, %v16379_v35  ;;  %v11926_v35 = vld [vmem:[%s21511_s0 + $0x62] sm:$0xff] }
 0x3b6   :  { %13485 = vmatmul.mubr.msk.bf16.gmra.mrb[24].mxu0 %vm230_vm0, %v16381_v40  ;;  %v11927_v40 = vld [vmem:[%s21511_s0 + $0x6a] sm:$0xff] }
 0x3b7   :  { %13488 = vmatprep.mubr.msk.bf16.mxu0 %vm230_vm0, %v16399_v13  ;;  %v4398_v13 = vpack.c.bf16 %v11925_v9, %v11924_v4  ;;  %v17092_v4 = vld [vmem:[%s21511_s0 + $0x28a] sm:$0xff]  ;;  %v17097_v9 = vld [vmem:[%s21511_s0 + $0x292] sm:$0xff] }
 0x3be   :  { %13489 = vmatmul.mubr.msk.bf16.gmra.mrb[28].mxu0 %vm230_vm0, %v3858_v21  ;;  %v11963_v21 = vld [vmem:[%s21511_s0 + $0x24a] sm:$0xff] }
 0x3bf   :  { %13492 = vmatprep.mubr.msk.bf16.mxu0 %vm230_vm0, %v16416_v37  ;;  %v4399_v37 = vpack.c.bf16 %v11927_v40, %v11926_v35  ;;  %v17102_v35 = vld [vmem:[%s21511_s0 + $0x2a2] sm:$0xff]  ;;  %v17107_v40 = vld [vmem:[%s21511_s0 + $0x2aa] sm:$0xff] }
 0x3c6   :  { %13493 = vmatmul.mubr.msk.bf16.gmra.mrb[32].mxu0 %vm230_vm0, %v16418_v43  ;;  %v11928_v43 = vld [vmem:[%s21511_s0 + $0x7a] sm:$0xff] }
 0x3c7   :  { %13496 = vmatprep.mubr.msk.bf16.mxu0 %vm230_vm0, %v16436_v10  ;;  %v11929_v10 = vld [vmem:[%s21511_s0 + $0x82] sm:$0xff] }
 0x3ce   :  { %13497 = vmatmul.mubr.msk.bf16.gmra.mrb[36].mxu0 %vm230_vm0, %v16438_v15  ;;  %v11930_v15 = vld [vmem:[%s21511_s0 + $0x92] sm:$0xff] }
 0x3cf   :  { %13500 = vmatprep.mubr.msk.bf16.mxu0 %vm230_vm0, %v16456_v59  ;;  %v11931_v59 = vld [vmem:[%s21511_s0 + $0x9a] sm:$0xff] }
 0x3d6   :  { %13501 = vmatmul.mubr.msk.bf16.gmra.mrb[40].mxu0 %vm230_vm0, %v16458_v2  ;;  %v4400_v2 = vpack.c.bf16 %v11929_v10, %v11928_v43  ;;  %v15231_v43 = vmov 0.0   ;;  %v11972_v10 = vld [vmem:[%s21511_s0 + $0x2ba] sm:$0xff] }
 0x3d7   :  { %13504 = vmatprep.mubr.msk.bf16.mxu0 %vm230_vm0, %v16476_v6  ;;  %v4401_v6 = vpack.c.bf16 %v11931_v59, %v11930_v15  ;;  %5499 = vst.msk [vmem:[#allocation2 + $0x30] sm:$0xff] %vm230_vm0, %v15231_v43  ;;  %5500 = vst.msk [vmem:[#allocation2 + $0x38] sm:$0xff] %vm230_vm0, %v15231_v43  ;;  %v11973_v15 = vld [vmem:[%s21511_s0 + $0x2c2] sm:$0xff]  ;;  %v11974_v59 = vld [vmem:[%s21511_s0 + $0x2d2] sm:$0xff] }
 0x3d8   :  { %5492 = vst.msk [vmem:[#allocation2] sm:$0xff] %vm230_vm0, %v15231_v43  ;;  %5493 = vst.msk [vmem:[#allocation2 + $0x8] sm:$0xff] %vm230_vm0, %v15231_v43 }
 0x3d9   :  { %5496 = vst.msk [vmem:[#allocation2 + $0x18] sm:$0xff] %vm230_vm0, %v15231_v43  ;;  %5497 = vst.msk [vmem:[#allocation2 + $0x20] sm:$0xff] %vm230_vm0, %v15231_v43 }
 0x3da   :  { %5502 = vst.msk [vmem:[#allocation2 + $0x48] sm:$0xff] %vm230_vm0, %v15231_v43  ;;  %5503 = vst.msk [vmem:[#allocation2 + $0x50] sm:$0xff] %vm230_vm0, %v15231_v43 }
 0x3db   :  { %5505 = vst.msk [vmem:[#allocation2 + $0x60] sm:$0xff] %vm230_vm0, %v15231_v43  ;;  %5506 = vst.msk [vmem:[#allocation2 + $0x68] sm:$0xff] %vm230_vm0, %v15231_v43 }
 0x3dc   :  { %5508 = vst.msk [vmem:[#allocation2 + $0x78] sm:$0xff] %vm230_vm0, %v15231_v43  ;;  %5509 = vst.msk [vmem:[#allocation2 + $0x80] sm:$0xff] %vm230_vm0, %v15231_v43 }
 0x3dd   :  { %5511 = vst.msk [vmem:[#allocation2 + $0x90] sm:$0xff] %vm230_vm0, %v15231_v43  ;;  %5512 = vst.msk [vmem:[#allocation2 + $0x98] sm:$0xff] %vm230_vm0, %v15231_v43 }
 0x3de   :  { %13505 = vmatmul.mubr.msk.bf16.gmra.mrb[44].mxu0 %vm230_vm0, %v16478_v55  ;;  %v11932_v55 = vld [vmem:[%s21511_s0 + $0xaa] sm:$0xff]  ;;  %5514 = vst.msk [vmem:[#allocation2 + $0xa8] sm:$0xff] %vm230_vm0, %v15231_v43  ;;  %5515 = vst.msk [vmem:[#allocation2 + $0xb0] sm:$0xff] %vm230_vm0, %v15231_v43 }
 0x3df   :  { %13508 = vmatprep.mubr.msk.bf16.mxu0 %vm230_vm0, %v16496_v34  ;;  %v11933_v34 = vld [vmem:[%s21511_s0 + $0xb2] sm:$0xff]  ;;  %5517 = vst.msk [vmem:[#allocation2 + $0xc0] sm:$0xff] %vm230_vm0, %v15231_v43  ;;  %5518 = vst.msk [vmem:[#allocation2 + $0xc8] sm:$0xff] %vm230_vm0, %v15231_v43 }
 0x3e0   :  { %5520 = vst.msk [vmem:[#allocation2 + $0xd8] sm:$0xff] %vm230_vm0, %v15231_v43  ;;  %5521 = vst.msk [vmem:[#allocation2 + $0xe0] sm:$0xff] %vm230_vm0, %v15231_v43 }
 0x3e1   :  { %5523 = vst.msk [vmem:[#allocation2 + $0xf0] sm:$0xff] %vm230_vm0, %v15231_v43  ;;  %5524 = vst.msk [vmem:[#allocation2 + $0xf8] sm:$0xff] %vm230_vm0, %v15231_v43 }
 0x3e2   :  { %5526 = vst.msk [vmem:[#allocation2 + $0x108] sm:$0xff] %vm230_vm0, %v15231_v43  ;;  %5527 = vst.msk [vmem:[#allocation2 + $0x110] sm:$0xff] %vm230_vm0, %v15231_v43 }
 0x3e3   :  { %5529 = vst.msk [vmem:[#allocation2 + $0x120] sm:$0xff] %vm230_vm0, %v15231_v43  ;;  %5530 = vst.msk [vmem:[#allocation2 + $0x128] sm:$0xff] %vm230_vm0, %v15231_v43 }
 0x3e4   :  { %5532 = vst.msk [vmem:[#allocation2 + $0x138] sm:$0xff] %vm230_vm0, %v15231_v43  ;;  %5533 = vst.msk [vmem:[#allocation2 + $0x140] sm:$0xff] %vm230_vm0, %v15231_v43 }
 0x3e5   :  { %5535 = vst.msk [vmem:[#allocation2 + $0x150] sm:$0xff] %vm230_vm0, %v15231_v43  ;;  %5536 = vst.msk [vmem:[#allocation2 + $0x158] sm:$0xff] %vm230_vm0, %v15231_v43 }
 0x3e6   :  { %13509 = vmatmul.mubr.msk.bf16.gmra.mrb[48].mxu0 %vm230_vm0, %v16498_v51  ;;  %v11934_v51 = vld [vmem:[%s21511_s0 + $0xc2] sm:$0xff]  ;;  %5538 = vst.msk [vmem:[#allocation2 + $0x168] sm:$0xff] %vm230_vm0, %v15231_v43  ;;  %5539 = vst.msk [vmem:[#allocation2 + $0x170] sm:$0xff] %vm230_vm0, %v15231_v43 }
 0x3e7   :  { %13512 = vmatprep.mubr.msk.bf16.mxu0 %vm230_vm0, %v21613_v41  ;;  %v4416_v41 = vpack.c.bf16 %v11961_v62, %v11960_v31  ;;  %5541 = vst.msk [vmem:[#allocation2 + $0x180] sm:$0xff] %vm230_vm0, %v15231_v43  ;;  %5542 = vst.msk [vmem:[#allocation2 + $0x188] sm:$0xff] %vm230_vm0, %v15231_v43 }
 0x3e8   :  { %5544 = vst.msk [vmem:[#allocation2 + $0x198] sm:$0xff] %vm230_vm0, %v15231_v43  ;;  %5545 = vst.msk [vmem:[#allocation2 + $0x1a0] sm:$0xff] %vm230_vm0, %v15231_v43 }
 0x3e9   :  { %5547 = vst.msk [vmem:[#allocation2 + $0x1b0] sm:$0xff] %vm230_vm0, %v15231_v43  ;;  %5548 = vst.msk [vmem:[#allocation2 + $0x1b8] sm:$0xff] %vm230_vm0, %v15231_v43 }
 0x3ea   :  { %5550 = vst.msk [vmem:[#allocation2 + $0x1c8] sm:$0xff] %vm230_vm0, %v15231_v43  ;;  %5551 = vst.msk [vmem:[#allocation2 + $0x1d0] sm:$0xff] %vm230_vm0, %v15231_v43 }
 0x3eb   :  { %5553 = vst.msk [vmem:[#allocation2 + $0x1e0] sm:$0xff] %vm230_vm0, %v15231_v43  ;;  %5554 = vst.msk [vmem:[#allocation2 + $0x1e8] sm:$0xff] %vm230_vm0, %v15231_v43 }
 0x3ec   :  { %5556 = vst.msk [vmem:[#allocation2 + $0x1f8] sm:$0xff] %vm230_vm0, %v15231_v43  ;;  %5557 = vst.msk [vmem:[#allocation2 + $0x200] sm:$0xff] %vm230_vm0, %v15231_v43 }
 0x3ed   :  { %5559 = vst.msk [vmem:[#allocation2 + $0x210] sm:$0xff] %vm230_vm0, %v15231_v43  ;;  %5560 = vst.msk [vmem:[#allocation2 + $0x218] sm:$0xff] %vm230_vm0, %v15231_v43 }
 0x3ee   :  { %13513 = vmatmul.mubr.msk.bf16.gmra.mrb[52].mxu0 %vm230_vm0, %v21614_v49  ;;  %v4417_v49 = vpack.c.bf16 %v11963_v21, %v11962_v16  ;;  %5562 = vst.msk [vmem:[#allocation2 + $0x228] sm:$0xff] %vm230_vm0, %v15231_v43  ;;  %5563 = vst.msk [vmem:[#allocation2 + $0x230] sm:$0xff] %vm230_vm0, %v15231_v43 }
 0x3ef   :  { %13516 = vmatprep.mubr.msk.bf16.mxu0 %vm230_vm0, %v16536_v20  ;;  %v4402_v20 = vpack.c.bf16 %v11933_v34, %v11932_v55  ;;  %5565 = vst.msk [vmem:[#allocation2 + $0x240] sm:$0xff] %vm230_vm0, %v15231_v43  ;;  %5566 = vst.msk [vmem:[#allocation2 + $0x248] sm:$0xff] %vm230_vm0, %v15231_v43  ;;  %v11976_v34 = vld [vmem:[%s21511_s0 + $0x2ea] sm:$0xff] }
 0x3f0   :  { %5568 = vst.msk [vmem:[#allocation2 + $0x258] sm:$0xff] %vm230_vm0, %v15231_v43  ;;  %5569 = vst.msk [vmem:[#allocation2 + $0x260] sm:$0xff] %vm230_vm0, %v15231_v43 }
 0x3f1   :  { %5571 = vst.msk [vmem:[#allocation2 + $0x270] sm:$0xff] %vm230_vm0, %v15231_v43  ;;  %5572 = vst.msk [vmem:[#allocation2 + $0x278] sm:$0xff] %vm230_vm0, %v15231_v43 }
 0x3f2   :  { %5574 = vst.msk [vmem:[#allocation2 + $0x288] sm:$0xff] %vm230_vm0, %v15231_v43  ;;  %5575 = vst.msk [vmem:[#allocation2 + $0x290] sm:$0xff] %vm230_vm0, %v15231_v43 }
 0x3f3   :  { %5577 = vst.msk [vmem:[#allocation2 + $0x2a0] sm:$0xff] %vm230_vm0, %v15231_v43  ;;  %5578 = vst.msk [vmem:[#allocation2 + $0x2a8] sm:$0xff] %vm230_vm0, %v15231_v43 }
 0x3f4   :  { %5580 = vst.msk [vmem:[#allocation2 + $0x2b8] sm:$0xff] %vm230_vm0, %v15231_v43  ;;  %5581 = vst.msk [vmem:[#allocation2 + $0x2c0] sm:$0xff] %vm230_vm0, %v15231_v43 }
 0x3f5   :  { %5583 = vst.msk [vmem:[#allocation2 + $0x2d0] sm:$0xff] %vm230_vm0, %v15231_v43  ;;  %5584 = vst.msk [vmem:[#allocation2 + $0x2d8] sm:$0xff] %vm230_vm0, %v15231_v43 }
 0x3f6   :  { %13517 = vmatmul.mubr.msk.bf16.gmra.mrb[56].mxu0 %vm230_vm0, %v16538_v32  ;;  %5586 = vst.msk [vmem:[#allocation2 + $0x2e8] sm:$0xff] %vm230_vm0, %v15231_v43  ;;  %5587 = vst.msk [vmem:[#allocation2 + $0x2f0] sm:$0xff] %vm230_vm0, %v15231_v43 }
 0x3f7   :  { %13520 = vmatprep.mubr.msk.bf16.mxu0 %vm230_vm0, %v16550_v63  ;;  %v11935_v63 = vld [vmem:[%s21511_s0 + $0xca] sm:$0xff]  ;;  %5589 = vst.msk [vmem:[#allocation2 + $0x300] sm:$0xff] %vm230_vm0, %v15231_v43  ;;  %5590 = vst.msk [vmem:[#allocation2 + $0x308] sm:$0xff] %vm230_vm0, %v15231_v43 }
 0x3f8   :  { %v4403_v32 = vpack.c.bf16 %v11935_v63, %v11934_v51  ;;  %5592 = vst.msk [vmem:[#allocation2 + $0x318] sm:$0xff] %vm230_vm0, %v15231_v43  ;;  %5593 = vst.msk [vmem:[#allocation2 + $0x320] sm:$0xff] %vm230_vm0, %v15231_v43  ;;  %v11977_v51 = vld [vmem:[%s21511_s0 + $0x2f2] sm:$0xff]  ;;  %v11978_v63 = vld [vmem:[%s21511_s0 + $0x302] sm:$0xff] }
 0x3f9   :  { %5595 = vst.msk [vmem:[#allocation2 + $0x330] sm:$0xff] %vm230_vm0, %v15231_v43  ;;  %5596 = vst.msk [vmem:[#allocation2 + $0x338] sm:$0xff] %vm230_vm0, %v15231_v43 }
 0x3fa   :  { %5598 = vst.msk [vmem:[#allocation2 + $0x348] sm:$0xff] %vm230_vm0, %v15231_v43  ;;  %5599 = vst.msk [vmem:[#allocation2 + $0x350] sm:$0xff] %vm230_vm0, %v15231_v43 }
 0x3fb   :  { %5501 = vst.msk [vmem:[#allocation2 + $0x40] sm:$0x3] %vm5494_vm1, %v15231_v43  ;;  %5495 = vst.msk [vmem:[#allocation2 + $0x10] sm:$0x3] %vm5494_vm1, %v15231_v43 }
 0x3fc   :  { %5498 = vst.msk [vmem:[#allocation2 + $0x28] sm:$0x3] %vm5494_vm1, %v15231_v43  ;;  %5504 = vst.msk [vmem:[#allocation2 + $0x58] sm:$0x3] %vm5494_vm1, %v15231_v43 }
 0x3fd   :  { %5507 = vst.msk [vmem:[#allocation2 + $0x70] sm:$0x3] %vm5494_vm1, %v15231_v43  ;;  %5510 = vst.msk [vmem:[#allocation2 + $0x88] sm:$0x3] %vm5494_vm1, %v15231_v43 }
 0x3fe   :  { %13521 = vmatmul.mubr.msk.bf16.gmra.mrb[60].mxu0 %vm230_vm0, %v3874_v44  ;;  %v4418_v44 = vpack.c.bf16 %v11965_v12, %v11964_v5  ;;  %5513 = vst.msk [vmem:[#allocation2 + $0xa0] sm:$0x3] %vm5494_vm1, %v15231_v43  ;;  %5516 = vst.msk [vmem:[#allocation2 + $0xb8] sm:$0x3] %vm5494_vm1, %v15231_v43 }
 0x3ff   :  { %13526 = vmatprep.mubr.msk.bf16.mxu0 %vm230_vm0, %v4397_v50  ;;  %v4419_v50 = vpack.c.bf16 %v11967_v46, %v11966_v26  ;;  %5519 = vst.msk [vmem:[#allocation2 + $0xd0] sm:$0x3] %vm5494_vm1, %v15231_v43  ;;  %5522 = vst.msk [vmem:[#allocation2 + $0xe8] sm:$0x3] %vm5494_vm1, %v15231_v43 }
 0x400   :  { %5525 = vst.msk [vmem:[#allocation2 + $0x100] sm:$0x3] %vm5494_vm1, %v15231_v43  ;;  %5528 = vst.msk [vmem:[#allocation2 + $0x118] sm:$0x3] %vm5494_vm1, %v15231_v43 }
 0x401   :  { %5531 = vst.msk [vmem:[#allocation2 + $0x130] sm:$0x3] %vm5494_vm1, %v15231_v43  ;;  %5534 = vst.msk [vmem:[#allocation2 + $0x148] sm:$0x3] %vm5494_vm1, %v15231_v43 }
 0x402   :  { %5537 = vst.msk [vmem:[#allocation2 + $0x160] sm:$0x3] %vm5494_vm1, %v15231_v43  ;;  %5540 = vst.msk [vmem:[#allocation2 + $0x178] sm:$0x3] %vm5494_vm1, %v15231_v43 }
 0x403   :  { %5543 = vst.msk [vmem:[#allocation2 + $0x190] sm:$0x3] %vm5494_vm1, %v15231_v43  ;;  %5546 = vst.msk [vmem:[#allocation2 + $0x1a8] sm:$0x3] %vm5494_vm1, %v15231_v43 }
 0x404   :  { %5549 = vst.msk [vmem:[#allocation2 + $0x1c0] sm:$0x3] %vm5494_vm1, %v15231_v43  ;;  %5552 = vst.msk [vmem:[#allocation2 + $0x1d8] sm:$0x3] %vm5494_vm1, %v15231_v43 }
 0x405   :  { %5555 = vst.msk [vmem:[#allocation2 + $0x1f0] sm:$0x3] %vm5494_vm1, %v15231_v43  ;;  %5558 = vst.msk [vmem:[#allocation2 + $0x208] sm:$0x3] %vm5494_vm1, %v15231_v43 }
 0x406   :  { %13527 = vmatmul.mubr.msk.bf16.vlgmr.msra.gmra.mrb[0].mxu0 %vm230_vm0, %v4398_v13  ;;  %v4420_v13 = vpack.c.bf16 %v17097_v9, %v17092_v4  ;;  %5561 = vst.msk [vmem:[#allocation2 + $0x220] sm:$0x3] %vm5494_vm1, %v15231_v43  ;;  %5564 = vst.msk [vmem:[#allocation2 + $0x238] sm:$0x3] %vm5494_vm1, %v15231_v43 }
 0x407   :  { %13530 = vmatprep.mubr.msk.bf16.mxu0 %vm230_vm0, %v4399_v37  ;;  %v4421_v37 = vpack.c.bf16 %v17107_v40, %v17102_v35  ;;  %5567 = vst.msk [vmem:[#allocation2 + $0x250] sm:$0x3] %vm5494_vm1, %v15231_v43  ;;  %5570 = vst.msk [vmem:[#allocation2 + $0x268] sm:$0x3] %vm5494_vm1, %v15231_v43 }
 0x408   :  { %5573 = vst.msk [vmem:[#allocation2 + $0x280] sm:$0x3] %vm5494_vm1, %v15231_v43  ;;  %5576 = vst.msk [vmem:[#allocation2 + $0x298] sm:$0x3] %vm5494_vm1, %v15231_v43 }
 0x409   :  { %5579 = vst.msk [vmem:[#allocation2 + $0x2b0] sm:$0x3] %vm5494_vm1, %v15231_v43  ;;  %5582 = vst.msk [vmem:[#allocation2 + $0x2c8] sm:$0x3] %vm5494_vm1, %v15231_v43 }
 0x40a   :  { %5585 = vst.msk [vmem:[#allocation2 + $0x2e0] sm:$0x3] %vm5494_vm1, %v15231_v43  ;;  %5588 = vst.msk [vmem:[#allocation2 + $0x2f8] sm:$0x3] %vm5494_vm1, %v15231_v43 }
 0x40b   :  { %5591 = vst.msk [vmem:[#allocation2 + $0x310] sm:$0x3] %vm5494_vm1, %v15231_v43  ;;  %5594 = vst.msk [vmem:[#allocation2 + $0x328] sm:$0x3] %vm5494_vm1, %v15231_v43 }
 0x40c   :  { %5597 = vst.msk [vmem:[#allocation2 + $0x340] sm:$0x3] %vm5494_vm1, %v15231_v43  ;;  %5600 = vst.msk [vmem:[#allocation2 + $0x358] sm:$0x3] %vm5494_vm1, %v15231_v43 }
 0x40e   :  { %13531 = vmatmul.mubr.msk.bf16.gmra.mrb[4].mxu0 %vm230_vm0, %v4400_v2  ;;  %v11975_v2 = vld [vmem:[%s21511_s0 + $0x2da] sm:$0xff] }
 0x40f   :  { %13534 = vmatprep.mubr.msk.bf16.mxu0 %vm230_vm0, %v4401_v6  ;;  %v4422_v6 = vpack.c.bf16 %v11973_v15, %v11972_v10  ;;  %v4423_v55 = vpack.c.bf16 %v11975_v2, %v11974_v59 }
 0x416   :  { %13535 = vmatmul.mubr.msk.bf16.gmra.mrb[8].mxu0 %vm230_vm0, %v4402_v20  ;;  %v11979_v20 = vld [vmem:[%s21511_s0 + $0x30a] sm:$0xff] }
 0x417   :  { %13538 = vmatprep.mubr.msk.bf16.mxu0 %vm230_vm0, %v4403_v32  ;;  %v4424_v32 = vpack.c.bf16 %v11977_v51, %v11976_v34  ;;  %v4425_v36 = vpack.c.bf16 %v11979_v20, %v11978_v63 }
 0x41e   :  { %13539 = vmatmul.mubr.msk.bf16.gmra.mrb[12].mxu0 %vm230_vm0, %v4404_v0  ;;  %v11984_v0 = vld [vmem:[%s21511_s0 + $0x34a] sm:$0xff] }
 0x41f   :  { %13542 = vmatprep.mubr.msk.bf16.mxu0 %vm230_vm0, %v4405_v1  ;;  %v11985_v1 = vld [vmem:[%s21511_s0 + $0x352] sm:$0xff] }
 0x420   :  { %v4428_v14 = vpack.c.bf16 %v11985_v1, %v11984_v0 }
 0x426   :  { %13543 = vmatmul.mubr.msk.bf16.gmra.mrb[16].mxu0 %vm230_vm0, %v4406_v42 }
 0x427   :  { %13546 = vmatprep.mubr.msk.bf16.mxu0 %vm230_vm0, %v4407_v57 }
 0x42e   :  { %13547 = vmatmul.mubr.msk.bf16.gmra.mrb[20].mxu0 %vm230_vm0, %v4408_v60 }
 0x42f   :  { %13550 = vmatprep.mubr.msk.bf16.mxu0 %vm230_vm0, %v4409_v19 }
 0x436   :  { %13551 = vmatmul.mubr.msk.bf16.gmra.mrb[24].mxu0 %vm230_vm0, %v4410_v48 }
 0x437   :  { %13554 = vmatprep.mubr.msk.bf16.mxu0 %vm230_vm0, %v16594_v45  ;;  %v11956_v45 = vld [vmem:[%s21511_s0 + $0x1fa] sm:$0xff] }
 0x438   :  { %v4414_v61 = vpack.c.bf16 %v11957_v29, %v11956_v45 }
 0x43e   :  { %13555 = vmatmul.mubr.msk.bf16.gmra.mrb[28].mxu0 %vm230_vm0, %v4412_v56 }
 0x43f   :  { %13558 = vmatprep.mubr.msk.bf16.mxu0 %vm230_vm0, %v4413_v3 }
 0x446   :  { %13559 = vmatmul.mubr.msk.bf16.gmra.mrb[32].mxu0 %vm230_vm0, %v4414_v61 }
 0x447   :  { %13562 = vmatprep.mubr.msk.bf16.mxu0 %vm230_vm0, %v4415_v30 }
 0x44e   :  { %13563 = vmatmul.mubr.msk.bf16.gmra.mrb[36].mxu0 %vm230_vm0, %v4416_v41 }
 0x44f   :  { %13566 = vmatprep.mubr.msk.bf16.mxu0 %vm230_vm0, %v4417_v49 }
 0x456   :  { %13567 = vmatmul.mubr.msk.bf16.gmra.mrb[40].mxu0 %vm230_vm0, %v4418_v44 }
 0x457   :  { %13570 = vmatprep.mubr.msk.bf16.mxu0 %vm230_vm0, %v4419_v50 }
 0x45e   :  { %13571 = vmatmul.mubr.msk.bf16.gmra.mrb[44].mxu0 %vm230_vm0, %v4420_v13 }
 0x45f   :  { %13574 = vmatprep.mubr.msk.bf16.mxu0 %vm230_vm0, %v4421_v37 }
 0x466   :  { %13575 = vmatmul.mubr.msk.bf16.gmra.mrb[48].mxu0 %vm230_vm0, %v4422_v6 }
 0x467   :  { %13578 = vmatprep.mubr.msk.bf16.mxu0 %vm230_vm0, %v4423_v55 }
 0x46e   :  { %13579 = vmatmul.mubr.msk.bf16.gmra.mrb[52].mxu0 %vm230_vm0, %v4424_v32 }
 0x46f   :  { %13582 = vmatprep.mubr.msk.bf16.mxu0 %vm230_vm0, %v4425_v36 }
 0x476   :  { %13583 = vmatmul.mubr.msk.bf16.gmra.mrb[56].mxu0 %vm230_vm0, %v4426_v53 }
 0x477   :  { %13586 = vmatprep.mubr.msk.bf16.mxu0 %vm230_vm0, %v16640_v24 }
 0x47e   :  { %13587 = vmatmul.mubr.msk.bf16.gmra.mrb[60].mxu0 %vm230_vm0, %v4428_v14 }
 0x4d9   :  { %v17381_v17 = vpop.f32.mrb[0].mxu0 }
 0x4da   :  { %v17383_v25 = vpop.f32.mrb[1].mxu0  ;;  %v4890_v18 = vsel %vm230_vm0, %v17381_v17, 0.0 }
 0x4db   :  { %v17385_v38 = vpop.f32.mrb[2].mxu0  ;;  %v4887_v24 = vsel %vm230_vm0, %v17383_v25, 0.0 }
 0x4dc   :  { %v17387_v42 = vpop.f32.mrb[3].mxu0  ;;  %v4892_v54 = vsel %vm230_vm0, %v17385_v38, 0.0 }
 0x4dd   :  { %v4888_v57 = vsel %vm230_vm0, %v17387_v42, 0.0 }
 0x4de   :  { %v4889_v11 = vadd.f32 %v4888_v57, %v4887_v24 }
 0x4e0   :  { %v4891_v33 = vadd.f32 %v4890_v18, %v4889_v11 }
 0x4e1   :  { %v17397_v60 = vpop.f32.mrb[4].mxu0 }
 0x4e2   :  { %v17399_v19 = vpop.f32.mrb[5].mxu0  ;;  %v4893_v22 = vadd.f32 %v4892_v54, %v4891_v33  ;;  %v4898_v56 = vsel %vm230_vm0, %v17397_v60, 0.0 }
 0x4e3   :  { %v4894_v47 = vsel %vm230_vm0, %v17399_v19, 0.0  ;;  %v17403_v48 = vpop.f32.mrb[6].mxu0 }
 0x4e4   :  { %v4895_v7 = vadd.f32 %v4894_v47, %v4893_v22  ;;  %v17405_v8 = vpop.f32.mrb[7].mxu0  ;;  %v4900_v45 = vsel %vm230_vm0, %v17403_v48, 0.0 }
 0x4e5   :  { %v4896_v27 = vsel %vm230_vm0, %v17405_v8, 0.0 }
 0x4e6   :  { %v4897_v28 = vadd.f32 %v4896_v27, %v4895_v7 }
 0x4e8   :  { %v4899_v3 = vadd.f32 %v4898_v56, %v4897_v28 }
 0x4e9   :  { %v17413_v29 = vpop.f32.mrb[8].mxu0 }
 0x4ea   :  { %v17415_v58 = vpop.f32.mrb[9].mxu0  ;;  %v4901_v23 = vadd.f32 %v4900_v45, %v4899_v3  ;;  %v4906_v41 = vsel %vm230_vm0, %v17413_v29, 0.0 }
 0x4eb   :  { %v4902_v61 = vsel %vm230_vm0, %v17415_v58, 0.0  ;;  %v17419_v30 = vpop.f32.mrb[10].mxu0 }
 0x4ec   :  { %v4903_v31 = vadd.f32 %v4902_v61, %v4901_v23  ;;  %v17421_v62 = vpop.f32.mrb[11].mxu0  ;;  %v4908_v5 = vsel %vm230_vm0, %v17419_v30, 0.0 }
 0x4ed   :  { %v4904_v16 = vsel %vm230_vm0, %v17421_v62, 0.0 }
 0x4ee   :  { %v4905_v21 = vadd.f32 %v4904_v16, %v4903_v31 }
 0x4f0   :  { %v4907_v49 = vadd.f32 %v4906_v41, %v4905_v21 }
 0x4f1   :  { %v17429_v12 = vpop.f32.mrb[12].mxu0 }
 0x4f2   :  { %v17431_v26 = vpop.f32.mrb[13].mxu0  ;;  %v4909_v46 = vadd.f32 %v4908_v5, %v4907_v49  ;;  %v4914_v13 = vsel %vm230_vm0, %v17429_v12, 0.0 }
 0x4f3   :  { %v4910_v44 = vsel %vm230_vm0, %v17431_v26, 0.0  ;;  %v17435_v50 = vpop.f32.mrb[14].mxu0 }
 0x4f4   :  { %v4911_v4 = vadd.f32 %v4910_v44, %v4909_v46  ;;  %v17437_v9 = vpop.f32.mrb[15].mxu0  ;;  %v4916_v43 = vsel %vm230_vm0, %v17435_v50, 0.0 }
 0x4f5   :  { %v4912_v35 = vsel %vm230_vm0, %v17437_v9, 0.0 }
 0x4f6   :  { %v4913_v40 = vadd.f32 %v4912_v35, %v4911_v4 }
 0x4f8   :  { %v4915_v37 = vadd.f32 %v4914_v13, %v4913_v40 }
 0x4f9   :  { %v17445_v10 = vpop.f32.mrb[16].mxu0 }
 0x4fa   :  { %v17447_v15 = vpop.f32.mrb[17].mxu0  ;;  %v4917_v59 = vadd.f32 %v4916_v43, %v4915_v37  ;;  %v4922_v20 = vsel %vm230_vm0, %v17445_v10, 0.0 }
 0x4fb   :  { %v4918_v2 = vsel %vm230_vm0, %v17447_v15, 0.0  ;;  %v17451_v6 = vpop.f32.mrb[18].mxu0 }
 0x4fc   :  { %v4919_v55 = vadd.f32 %v4918_v2, %v4917_v59  ;;  %v17453_v34 = vpop.f32.mrb[19].mxu0  ;;  %v4924_v36 = vsel %vm230_vm0, %v17451_v6, 0.0 }
 0x4fd   :  { %v4920_v51 = vsel %vm230_vm0, %v17453_v34, 0.0 }
 0x4fe   :  { %v4921_v63 = vadd.f32 %v4920_v51, %v4919_v55 }
 0x500   :  { %v4923_v32 = vadd.f32 %v4922_v20, %v4921_v63 }
 0x501   :  { %v17461_v39 = vpop.f32.mrb[20].mxu0 }
 0x502   :  { %v17463_v52 = vpop.f32.mrb[21].mxu0  ;;  %v4925_v53 = vadd.f32 %v4924_v36, %v4923_v32  ;;  %v4930_v18 = vsel %vm230_vm0, %v17461_v39, 0.0 }
 0x503   :  { %v4926_v0 = vsel %vm230_vm0, %v17463_v52, 0.0  ;;  %v17467_v1 = vpop.f32.mrb[22].mxu0 }
 0x504   :  { %v4927_v14 = vadd.f32 %v4926_v0, %v4925_v53  ;;  %v17469_v24 = vpop.f32.mrb[23].mxu0  ;;  %v4932_v54 = vsel %vm230_vm0, %v17467_v1, 0.0 }
 0x505   :  { %v4928_v57 = vsel %vm230_vm0, %v17469_v24, 0.0 }
 0x506   :  { %v4929_v11 = vadd.f32 %v4928_v57, %v4927_v14 }
 0x508   :  { %v4931_v33 = vadd.f32 %v4930_v18, %v4929_v11 }
 0x509   :  { %v17477_v22 = vpop.f32.mrb[24].mxu0 }
 0x50a   :  { %v17479_v47 = vpop.f32.mrb[25].mxu0  ;;  %v4933_v7 = vadd.f32 %v4932_v54, %v4931_v33  ;;  %v4938_v61 = vsel %vm230_vm0, %v17477_v22, 0.0 }
 0x50b   :  { %v4934_v27 = vsel %vm230_vm0, %v17479_v47, 0.0  ;;  %v17483_v28 = vpop.f32.mrb[26].mxu0 }
 0x50c   :  { %v4935_v56 = vadd.f32 %v4934_v27, %v4933_v7  ;;  %v17485_v3 = vpop.f32.mrb[27].mxu0  ;;  %v4940_v16 = vsel %vm230_vm0, %v17483_v28, 0.0 }
 0x50d   :  { %v4936_v45 = vsel %vm230_vm0, %v17485_v3, 0.0 }
 0x50e   :  { %v4937_v23 = vadd.f32 %v4936_v45, %v4935_v56 }
 0x510   :  { %v4939_v31 = vadd.f32 %v4938_v61, %v4937_v23 }
 0x511   :  { %v17493_v21 = vpop.f32.mrb[28].mxu0 }
 0x512   :  { %v17495_v41 = vpop.f32.mrb[29].mxu0  ;;  %v4941_v49 = vadd.f32 %v4940_v16, %v4939_v31  ;;  %v4946_v13 = vsel %vm230_vm0, %v17493_v21, 0.0 }
 0x513   :  { %v4942_v5 = vsel %vm230_vm0, %v17495_v41, 0.0  ;;  %v17499_v46 = vpop.f32.mrb[30].mxu0 }
 0x514   :  { %v4943_v44 = vadd.f32 %v4942_v5, %v4941_v49  ;;  %v17501_v4 = vpop.f32.mrb[31].mxu0  ;;  %v4948_v43 = vsel %vm230_vm0, %v17499_v46, 0.0 }
 0x515   :  { %v4944_v35 = vsel %vm230_vm0, %v17501_v4, 0.0 }
 0x516   :  { %v4945_v40 = vadd.f32 %v4944_v35, %v4943_v44 }
 0x518   :  { %v4947_v37 = vadd.f32 %v4946_v13, %v4945_v40 }
 0x519   :  { %v17509_v59 = vpop.f32.mrb[32].mxu0 }
 0x51a   :  { %v17511_v2 = vpop.f32.mrb[33].mxu0  ;;  %v4949_v55 = vadd.f32 %v4948_v43, %v4947_v37  ;;  %v4954_v0 = vsel %vm230_vm0, %v17509_v59, 0.0 }
 0x51b   :  { %v4950_v51 = vsel %vm230_vm0, %v17511_v2, 0.0  ;;  %v17515_v63 = vpop.f32.mrb[34].mxu0 }
 0x51c   :  { %v4951_v20 = vadd.f32 %v4950_v51, %v4949_v55  ;;  %v17517_v32 = vpop.f32.mrb[35].mxu0  ;;  %v4956_v57 = vsel %vm230_vm0, %v17515_v63, 0.0 }
 0x51d   :  { %v4952_v36 = vsel %vm230_vm0, %v17517_v32, 0.0 }
 0x51e   :  { %v4953_v53 = vadd.f32 %v4952_v36, %v4951_v20 }
 0x520   :  { %v4955_v14 = vadd.f32 %v4954_v0, %v4953_v53 }
 0x521   :  { %v17525_v11 = vpop.f32.mrb[36].mxu0 }
 0x522   :  { %v17527_v18 = vpop.f32.mrb[37].mxu0  ;;  %v4957_v33 = vadd.f32 %v4956_v57, %v4955_v14  ;;  %v4962_v61 = vsel %vm230_vm0, %v17525_v11, 0.0 }
 0x523   :  { %v4958_v54 = vsel %vm230_vm0, %v17527_v18, 0.0  ;;  %v17531_v7 = vpop.f32.mrb[38].mxu0 }
 0x524   :  { %v4959_v27 = vadd.f32 %v4958_v54, %v4957_v33  ;;  %v17533_v56 = vpop.f32.mrb[39].mxu0  ;;  %v4964_v16 = vsel %vm230_vm0, %v17531_v7, 0.0 }
 0x525   :  { %v4960_v45 = vsel %vm230_vm0, %v17533_v56, 0.0 }
 0x526   :  { %v4961_v23 = vadd.f32 %v4960_v45, %v4959_v27 }
 0x528   :  { %v4963_v31 = vadd.f32 %v4962_v61, %v4961_v23 }
 0x529   :  { %v17541_v49 = vpop.f32.mrb[40].mxu0 }
 0x52a   :  { %v17543_v5 = vpop.f32.mrb[41].mxu0  ;;  %v4965_v44 = vadd.f32 %v4964_v16, %v4963_v31  ;;  %v4970_v51 = vsel %vm230_vm0, %v17541_v49, 0.0 }
 0x52b   :  { %v4966_v35 = vsel %vm230_vm0, %v17543_v5, 0.0  ;;  %v17547_v40 = vpop.f32.mrb[42].mxu0 }
 0x52c   :  { %v4967_v13 = vadd.f32 %v4966_v35, %v4965_v44  ;;  %v17549_v37 = vpop.f32.mrb[43].mxu0  ;;  %v4972_v36 = vsel %vm230_vm0, %v17547_v40, 0.0 }
 0x52d   :  { %v4968_v43 = vsel %vm230_vm0, %v17549_v37, 0.0 }
 0x52e   :  { %v4969_v55 = vadd.f32 %v4968_v43, %v4967_v13 }
 0x530   :  { %v4971_v20 = vadd.f32 %v4970_v51, %v4969_v55 }
 0x531   :  { %v17557_v53 = vpop.f32.mrb[44].mxu0 }
 0x532   :  { %v17559_v0 = vpop.f32.mrb[45].mxu0  ;;  %v4973_v14 = vadd.f32 %v4972_v36, %v4971_v20  ;;  %v4978_v61 = vsel %vm230_vm0, %v17557_v53, 0.0 }
 0x533   :  { %v4974_v57 = vsel %vm230_vm0, %v17559_v0, 0.0  ;;  %v17563_v33 = vpop.f32.mrb[46].mxu0 }
 0x534   :  { %21615 = vst [vmem:[#allocation3_spill] sm:$0xff] %v17563_v33  ;;  %v4975_v54 = vadd.f32 %v4974_v57, %v4973_v14  ;;  %v17565_v27 = vpop.f32.mrb[47].mxu0  ;;  %v4980_v16 = vsel %vm230_vm0, %v17563_v33, 0.0 }
 0x535   :  { %v4976_v45 = vsel %vm230_vm0, %v17565_v27, 0.0 }
 0x536   :  { %v4977_v23 = vadd.f32 %v4976_v45, %v4975_v54 }
 0x538   :  { %v4979_v31 = vadd.f32 %v4978_v61, %v4977_v23 }
 0x539   :  { %v17573_v44 = vpop.f32.mrb[48].mxu0 }
 0x53a   :  { %21616 = vst [vmem:[#allocation4_spill] sm:$0xff] %v17573_v44  ;;  %v17575_v35 = vpop.f32.mrb[49].mxu0  ;;  %v4981_v13 = vadd.f32 %v4980_v16, %v4979_v31  ;;  %v4986_v57 = vsel %vm230_vm0, %v17573_v44, 0.0 }
 0x53b   :  { %21617 = vst [vmem:[#allocation5_spill] sm:$0xff] %v17575_v35  ;;  %v4982_v43 = vsel %vm230_vm0, %v17575_v35, 0.0  ;;  %v17579_v55 = vpop.f32.mrb[50].mxu0 }
 0x53c   :  { %21618 = vst [vmem:[#allocation6_spill] sm:$0xff] %v17579_v55  ;;  %v4983_v51 = vadd.f32 %v4982_v43, %v4981_v13  ;;  %v17581_v20 = vpop.f32.mrb[51].mxu0  ;;  %v4988_v45 = vsel %vm230_vm0, %v17579_v55, 0.0 }
 0x53d   :  { %21619 = vst [vmem:[#allocation7_spill] sm:$0xff] %v17581_v20  ;;  %v4984_v36 = vsel %vm230_vm0, %v17581_v20, 0.0 }
 0x53e   :  { %v4985_v14 = vadd.f32 %v4984_v36, %v4983_v51 }
 0x540   :  { %v4987_v54 = vadd.f32 %v4986_v57, %v4985_v14 }
 0x541   :  { %v17589_v23 = vpop.f32.mrb[52].mxu0 }
 0x542   :  { %21620 = vst [vmem:[#allocation8_spill] sm:$0xff] %v17589_v23  ;;  %v17591_v61 = vpop.f32.mrb[53].mxu0  ;;  %v4989_v31 = vadd.f32 %v4988_v45, %v4987_v54  ;;  %v4994_v14 = vsel %vm230_vm0, %v17589_v23, 0.0 }
 0x543   :  { %21621 = vst [vmem:[#allocation9_spill] sm:$0xff] %v17591_v61  ;;  %v4990_v16 = vsel %vm230_vm0, %v17591_v61, 0.0  ;;  %v17595_v13 = vpop.f32.mrb[54].mxu0 }
 0x544   :  { %21622 = vst [vmem:[#allocation10_spill] sm:$0xff] %v17595_v13  ;;  %v4991_v43 = vadd.f32 %v4990_v16, %v4989_v31  ;;  %v17597_v20 = vpop.f32.mrb[55].mxu0  ;;  %v4996_v55 = vsel %vm230_vm0, %v17595_v13, 0.0 }
 0x545   :  { %21623 = vst [vmem:[#allocation11_spill] sm:$0xff] %v17597_v20  ;;  %v4992_v51 = vsel %vm230_vm0, %v17597_v20, 0.0 }
 0x546   :  { %v4993_v36 = vadd.f32 %v4992_v51, %v4991_v43 }
 0x548   :  { %v4995_v57 = vadd.f32 %v4994_v14, %v4993_v36 }
 0x549   :  { %v17605_v54 = vpop.f32.mrb[56].mxu0 }
 0x54a   :  { %21624 = vst [vmem:[#allocation12_spill] sm:$0xff] %v17605_v54  ;;  %v17607_v45 = vpop.f32.mrb[57].mxu0  ;;  %v4997_v61 = vadd.f32 %v4996_v55, %v4995_v57  ;;  %v5002_v36 = vsel %vm230_vm0, %v17605_v54, 0.0 }
 0x54b   :  { %21625 = vst [vmem:[#allocation13_spill] sm:$0xff] %v17607_v45  ;;  %v4998_v31 = vsel %vm230_vm0, %v17607_v45, 0.0  ;;  %v17611_v16 = vpop.f32.mrb[58].mxu0 }
 0x54c   :  { %21626 = vst [vmem:[#allocation14_spill] sm:$0xff] %v17611_v16  ;;  %v4999_v44 = vadd.f32 %v4998_v31, %v4997_v61  ;;  %v17613_v20 = vpop.f32.mrb[59].mxu0  ;;  %v5004_v13 = vsel %vm230_vm0, %v17611_v16, 0.0 }
 0x54d   :  { %21627 = vst [vmem:[#allocation15_spill] sm:$0xff] %v17613_v20  ;;  %v5000_v43 = vsel %vm230_vm0, %v17613_v20, 0.0 }
 0x54e   :  { %v5001_v51 = vadd.f32 %v5000_v43, %v4999_v44 }
 0x550   :  { %v5003_v14 = vadd.f32 %v5002_v36, %v5001_v51 }
 0x551   :  { %v17621_v55 = vpop.f32.mrb[60].mxu0 }
 0x552   :  { %v17623_v57 = vpop.f32.mrb[61].mxu0  ;;  %v5005_v45 = vadd.f32 %v5004_v13, %v5003_v14  ;;  %v5010_v51 = vsel %vm230_vm0, %v17621_v55, 0.0 }
 0x553   :  { %21628 = vst [vmem:[#allocation16_spill] sm:$0xff] %v17623_v57  ;;  %v5006_v61 = vsel %vm230_vm0, %v17623_v57, 0.0  ;;  %v17627_v31 = vpop.f32.mrb[62].mxu0 }
 0x554   :  { %v5007_v23 = vadd.f32 %v5006_v61, %v5005_v45  ;;  %v17629_v20 = vpop.f32.mrb[63].mxu0  ;;  %v5012_v16 = vsel %vm230_vm0, %v17627_v31, 0.0 }
 0x555   :  { %21629 = vst [vmem:[#allocation17_spill] sm:$0xff] %v17629_v20  ;;  %v5008_v44 = vsel %vm230_vm0, %v17629_v20, 0.0 }
 0x556   :  { %v5009_v43 = vadd.f32 %v5008_v44, %v5007_v23 }
 0x558   :  { %v5011_v36 = vadd.f32 %v5010_v51, %v5009_v43  ;;  %v21641_v43 = vld [vmem:[#allocation4_spill] sm:$0xff]  ;;  %v21643_v51 = vld [vmem:[#allocation6_spill] sm:$0xff] }
 0x55a   :  { %v5013_v13 = vadd.f32 %v5012_v16, %v5011_v36  ;;  %v21645_v36 = vld [vmem:[#allocation9_spill] sm:$0xff] }
 0x55c   :  { %v5014_v14 = vrot.slane %v5013_v13, 4 }
 0x55e   :  { %v5015_v54 = vadd.f32 %v5014_v14, %v5013_v13  ;;  %v21647_v14 = vld [vmem:[#allocation11_spill] sm:$0xff] }
 0x560   :  { %v5016_v57 = vrot.slane %v5015_v54, 2 }
 0x562   :  { %v5017_v35 = vadd.f32 %v5016_v57, %v5015_v54  ;;  %v21639_v54 = vld [vmem:[#allocation5_spill] sm:$0xff]  ;;  %v21640_v57 = vld [vmem:[#allocation7_spill] sm:$0xff] }
 0x564   :  { %v5018_v33 = vrot.slane %v5017_v35, 1 }
 0x566   :  { %v5019_v45 = vadd.f32 %v5018_v33, %v5017_v35  ;;  %v21638_v35 = vld [vmem:[#allocation3_spill] sm:$0xff] }
 0x568   :  { %v17637_v61 = vmul.f32 0.001953125, %v5019_v45 }
 0x56a   :  { %v17641_v20 = vsub.f32 %v17383_v25, %v17637_v61  ;;  %v17645_v23 = vsub.f32 %v17387_v42, %v17637_v61  ;;  %v17649_v44 = vsub.f32 %v17381_v17, %v17637_v61  ;;  %v17653_v16 = vsub.f32 %v17385_v38, %v17637_v61 }
 0x56b   :  { %v17657_v33 = vsub.f32 %v17399_v19, %v17637_v61  ;;  %v17661_v25 = vsub.f32 %v17405_v8, %v17637_v61  ;;  %v17665_v42 = vsub.f32 %v17397_v60, %v17637_v61  ;;  %v17669_v17 = vsub.f32 %v17403_v48, %v17637_v61 }
 0x56c   :  { %21630 = vst [vmem:[#allocation18_spill] sm:$0xff] %v17641_v20  ;;  %21631 = vst [vmem:[#allocation19_spill] sm:$0xff] %v17645_v23  ;;  %v17673_v38 = vsub.f32 %v17415_v58, %v17637_v61  ;;  %v17677_v19 = vsub.f32 %v17421_v62, %v17637_v61  ;;  %v17681_v8 = vsub.f32 %v17413_v29, %v17637_v61 }
 0x56d   :  { %21632 = vst [vmem:[#allocation20_spill] sm:$0xff] %v17649_v44  ;;  %21633 = vst [vmem:[#allocation21_spill] sm:$0xff] %v17653_v16  ;;  %v17685_v60 = vsub.f32 %v17419_v30, %v17637_v61  ;;  %v17689_v48 = vsub.f32 %v17431_v26, %v17637_v61  ;;  %v17693_v58 = vsub.f32 %v17437_v9, %v17637_v61 }
 0x56e   :  { %v17697_v62 = vsub.f32 %v17429_v12, %v17637_v61  ;;  %v17701_v29 = vsub.f32 %v17435_v50, %v17637_v61  ;;  %v17705_v30 = vsub.f32 %v17447_v15, %v17637_v61  ;;  %v17709_v26 = vsub.f32 %v17453_v34, %v17637_v61 }
 0x56f   :  { %v17713_v9 = vsub.f32 %v17445_v10, %v17637_v61  ;;  %v17717_v12 = vsub.f32 %v17451_v6, %v17637_v61  ;;  %v17721_v50 = vsub.f32 %v17463_v52, %v17637_v61  ;;  %v17725_v15 = vsub.f32 %v17469_v24, %v17637_v61 }
 0x570   :  { %v17729_v34 = vsub.f32 %v17461_v39, %v17637_v61  ;;  %v17733_v10 = vsub.f32 %v17467_v1, %v17637_v61  ;;  %v17737_v6 = vsub.f32 %v17479_v47, %v17637_v61  ;;  %v17741_v52 = vsub.f32 %v17485_v3, %v17637_v61 }
 0x571   :  { %v17745_v24 = vsub.f32 %v17477_v22, %v17637_v61  ;;  %v17749_v39 = vsub.f32 %v17483_v28, %v17637_v61  ;;  %v17753_v1 = vsub.f32 %v17495_v41, %v17637_v61  ;;  %v17757_v47 = vsub.f32 %v17501_v4, %v17637_v61 }
 0x572   :  { %21634 = vst [vmem:[#allocation22_spill] sm:$0xff] %v17729_v34  ;;  %21635 = vst [vmem:[#allocation23_spill] sm:$0xff] %v17733_v10  ;;  %v17761_v3 = vsub.f32 %v17493_v21, %v17637_v61  ;;  %v17765_v22 = vsub.f32 %v17499_v46, %v17637_v61  ;;  %v17769_v28 = vsub.f32 %v17511_v2, %v17637_v61 }
 0x573   :  { %21636 = vst [vmem:[#allocation24_spill] sm:$0xff] %v17737_v6  ;;  %21637 = vst [vmem:[#allocation25_spill] sm:$0xff] %v17741_v52  ;;  %v17773_v41 = vsub.f32 %v17517_v32, %v17637_v61  ;;  %v17777_v4 = vsub.f32 %v17509_v59, %v17637_v61  ;;  %v17781_v21 = vsub.f32 %v17515_v63, %v17637_v61 }
 0x574   :  { %v17785_v46 = vsub.f32 %v17527_v18, %v17637_v61  ;;  %v17789_v2 = vsub.f32 %v17533_v56, %v17637_v61  ;;  %v17793_v32 = vsub.f32 %v17525_v11, %v17637_v61  ;;  %v17797_v59 = vsub.f32 %v17531_v7, %v17637_v61 }
 0x575   :  { %v17801_v63 = vsub.f32 %v17543_v5, %v17637_v61  ;;  %v17805_v18 = vsub.f32 %v17549_v37, %v17637_v61  ;;  %v17809_v56 = vsub.f32 %v17541_v49, %v17637_v61  ;;  %v17813_v11 = vsub.f32 %v17547_v40, %v17637_v61 }
 0x576   :  { %v17817_v7 = vsub.f32 %v17559_v0, %v17637_v61  ;;  %v17821_v5 = vsub.f32 %v17565_v27, %v17637_v61  ;;  %v17825_v37 = vsub.f32 %v17557_v53, %v17637_v61  ;;  %v17829_v49 = vsub.f32 %v21638_v35, %v17637_v61  ;;  %v21649_v35 = vld [vmem:[#allocation8_spill] sm:$0xff] }
 0x577   :  { %v17833_v40 = vsub.f32 %v21639_v54, %v17637_v61  ;;  %v17837_v0 = vsub.f32 %v21640_v57, %v17637_v61  ;;  %v17841_v27 = vsub.f32 %v21641_v43, %v17637_v61  ;;  %v17845_v53 = vsub.f32 %v21643_v51, %v17637_v61  ;;  %v21651_v57 = vld [vmem:[#allocation10_spill] sm:$0xff] }
 0x578   :  { %v17849_v13 = vsub.f32 %v21645_v36, %v17637_v61  ;;  %v17853_v45 = vsub.f32 %v21647_v14, %v17637_v61  ;;  %v17857_v54 = vsub.f32 %v21649_v35, %v17637_v61  ;;  %v17861_v43 = vsub.f32 %v21651_v57, %v17637_v61 }
 0x579   :  { %21642 = vst [vmem:[#allocation3_spill] sm:$0xff] %v17841_v27  ;;  %21644 = vst [vmem:[#allocation5_spill] sm:$0xff] %v17845_v53  ;;  %v21653_v27 = vld [vmem:[#allocation13_spill] sm:$0xff]  ;;  %v21655_v53 = vld [vmem:[#allocation15_spill] sm:$0xff] }
 0x57a   :  { %21646 = vst [vmem:[#allocation7_spill] sm:$0xff] %v17849_v13  ;;  %21648 = vst [vmem:[#allocation4_spill] sm:$0xff] %v17853_v45  ;;  %v17865_v51 = vsub.f32 %v21653_v27, %v17637_v61  ;;  %v17869_v36 = vsub.f32 %v21655_v53, %v17637_v61  ;;  %v21657_v13 = vld [vmem:[#allocation12_spill] sm:$0xff]  ;;  %v21659_v45 = vld [vmem:[#allocation14_spill] sm:$0xff]  ;;  %v17889_v53 = vsub.f32 %v17621_v55, %v17637_v61 }
 0x57b   :  { %21650 = vst [vmem:[#allocation6_spill] sm:$0xff] %v17857_v54  ;;  %21652 = vst [vmem:[#allocation9_spill] sm:$0xff] %v17861_v43  ;;  %v17873_v14 = vsub.f32 %v21657_v13, %v17637_v61  ;;  %v17877_v35 = vsub.f32 %v21659_v45, %v17637_v61  ;;  %v21661_v54 = vld [vmem:[#allocation16_spill] sm:$0xff]  ;;  %v21663_v43 = vld [vmem:[#allocation17_spill] sm:$0xff]  ;;  %v17893_v13 = vsub.f32 %v17627_v31, %v17637_v61 }
 0x57c   :  { %21654 = vst [vmem:[#allocation11_spill] sm:$0xff] %v17865_v51  ;;  %21656 = vst [vmem:[#allocation8_spill] sm:$0xff] %v17869_v36  ;;  %v17881_v57 = vsub.f32 %v21661_v54, %v17637_v61  ;;  %v17885_v27 = vsub.f32 %v21663_v43, %v17637_v61  ;;  %v5086_v45 = vmul.f32 %v17641_v20, %v17641_v20 }
 0x57d   :  { %21658 = vst [vmem:[#allocation10_spill] sm:$0xff] %v17873_v14  ;;  %21660 = vst [vmem:[#allocation13_spill] sm:$0xff] %v17877_v35  ;;  %v5087_v35 = vmul.f32 %v17645_v23, %v17645_v23  ;;  %v5088_v54 = vmul.f32 %v17649_v44, %v17649_v44  ;;  %v5089_v43 = vmul.f32 %v17653_v16, %v17653_v16 }
 0x57e   :  { %21662 = vst [vmem:[#allocation15_spill] sm:$0xff] %v17881_v57  ;;  %21664 = vst [vmem:[#allocation12_spill] sm:$0xff] %v17885_v27  ;;  %v5150_v27 = vsel %vm230_vm0, %v5086_v45, 0.0  ;;  %v5090_v31 = vmul.f32 %v17657_v33, %v17657_v33  ;;  %v5091_v23 = vmul.f32 %v17661_v25, %v17661_v25  ;;  %v5092_v16 = vmul.f32 %v17665_v42, %v17665_v42 }
 0x57f   :  { %21665 = vst [vmem:[#allocation14_spill] sm:$0xff] %v17889_v53  ;;  %21666 = vst [vmem:[#allocation16_spill] sm:$0xff] %v17893_v13  ;;  %v5151_v55 = vsel %vm230_vm0, %v5087_v35, 0.0  ;;  %v5153_v61 = vsel %vm230_vm0, %v5088_v54, 0.0  ;;  %v5155_v13 = vsel %vm230_vm0, %v5089_v43, 0.0  ;;  %v5093_v35 = vmul.f32 %v17669_v17, %v17669_v17 }
 0x580   :  { %v5152_v53 = vadd.f32 %v5151_v55, %v5150_v27  ;;  %v5157_v45 = vsel %vm230_vm0, %v5090_v31, 0.0  ;;  %v5159_v27 = vsel %vm230_vm0, %v5091_v23, 0.0  ;;  %v5161_v54 = vsel %vm230_vm0, %v5092_v16, 0.0 }
 0x581   :  { %v5097_v23 = vmul.f32 %v17685_v60, %v17685_v60  ;;  %v5098_v16 = vmul.f32 %v17689_v48, %v17689_v48 }
 0x582   :  { %v5154_v20 = vadd.f32 %v5153_v61, %v5152_v53  ;;  %v5094_v53 = vmul.f32 %v17673_v38, %v17673_v38 }
 0x584   :  { %v5156_v44 = vadd.f32 %v5155_v13, %v5154_v20  ;;  %v5095_v20 = vmul.f32 %v17677_v19, %v17677_v19  ;;  %v5163_v13 = vsel %vm230_vm0, %v5093_v35, 0.0  ;;  %v5165_v31 = vsel %vm230_vm0, %v5094_v53, 0.0 }
 0x585   :  { %v5099_v35 = vmul.f32 %v17693_v58, %v17693_v58  ;;  %v5100_v53 = vmul.f32 %v17697_v62, %v17697_v62 }
 0x586   :  { %v5158_v57 = vadd.f32 %v5157_v45, %v5156_v44  ;;  %v5096_v44 = vmul.f32 %v17681_v8, %v17681_v8 }
 0x588   :  { %v5160_v55 = vadd.f32 %v5159_v27, %v5158_v57  ;;  %v5167_v57 = vsel %vm230_vm0, %v5095_v20, 0.0  ;;  %v5101_v20 = vmul.f32 %v17701_v29, %v17701_v29 }
 0x58a   :  { %v5162_v61 = vadd.f32 %v5161_v54, %v5160_v55  ;;  %v5169_v55 = vsel %vm230_vm0, %v5096_v44, 0.0  ;;  %v5102_v44 = vmul.f32 %v17705_v30, %v17705_v30 }
 0x58c   :  { %v5164_v43 = vadd.f32 %v5163_v13, %v5162_v61  ;;  %v5171_v61 = vsel %vm230_vm0, %v5097_v23, 0.0  ;;  %v5103_v23 = vmul.f32 %v17709_v26, %v17709_v26 }
 0x58e   :  { %v5166_v45 = vadd.f32 %v5165_v31, %v5164_v43  ;;  %v5173_v43 = vsel %vm230_vm0, %v5098_v16, 0.0  ;;  %v5104_v16 = vmul.f32 %v17713_v9, %v17713_v9 }
 0x590   :  { %v5168_v27 = vadd.f32 %v5167_v57, %v5166_v45  ;;  %v5175_v45 = vsel %vm230_vm0, %v5099_v35, 0.0  ;;  %v5105_v35 = vmul.f32 %v17717_v12, %v17717_v12 }
 0x592   :  { %v5170_v54 = vadd.f32 %v5169_v55, %v5168_v27  ;;  %v5177_v27 = vsel %vm230_vm0, %v5100_v53, 0.0  ;;  %v5106_v53 = vmul.f32 %v17721_v50, %v17721_v50 }
 0x594   :  { %v5172_v13 = vadd.f32 %v5171_v61, %v5170_v54  ;;  %v5179_v54 = vsel %vm230_vm0, %v5101_v20, 0.0  ;;  %v5107_v20 = vmul.f32 %v17725_v15, %v17725_v15 }
 0x596   :  { %v5174_v31 = vadd.f32 %v5173_v43, %v5172_v13  ;;  %v5181_v13 = vsel %vm230_vm0, %v5102_v44, 0.0  ;;  %v5108_v44 = vmul.f32 %v17729_v34, %v17729_v34 }
 0x598   :  { %v5176_v57 = vadd.f32 %v5175_v45, %v5174_v31  ;;  %v5183_v31 = vsel %vm230_vm0, %v5103_v23, 0.0  ;;  %v5110_v23 = vmul.f32 %v17737_v6, %v17737_v6  ;;  %v5112_v6 = vmul.f32 %v17745_v24, %v17745_v24 }
 0x59a   :  { %v5178_v55 = vadd.f32 %v5177_v27, %v5176_v57  ;;  %v5185_v57 = vsel %vm230_vm0, %v5104_v16, 0.0  ;;  %v5189_v16 = vsel %vm230_vm0, %v5106_v53, 0.0  ;;  %v5113_v53 = vmul.f32 %v17749_v39, %v17749_v39 }
 0x59c   :  { %v5180_v61 = vadd.f32 %v5179_v54, %v5178_v55  ;;  %v5187_v55 = vsel %vm230_vm0, %v5105_v35, 0.0  ;;  %v5193_v35 = vsel %vm230_vm0, %v5108_v44, 0.0  ;;  %v5201_v44 = vsel %vm230_vm0, %v5112_v6, 0.0 }
 0x59d   :  { %v5118_v6 = vmul.f32 %v17769_v28, %v17769_v28 }
 0x59e   :  { %v5182_v43 = vadd.f32 %v5181_v13, %v5180_v61  ;;  %v5109_v61 = vmul.f32 %v17733_v10, %v17733_v10  ;;  %v5111_v13 = vmul.f32 %v17741_v52, %v17741_v52 }
 0x5a0   :  { %v5184_v45 = vadd.f32 %v5183_v31, %v5182_v43  ;;  %v5191_v31 = vsel %vm230_vm0, %v5107_v20, 0.0  ;;  %v5114_v20 = vmul.f32 %v17753_v1, %v17753_v1 }
 0x5a2   :  { %v5186_v27 = vadd.f32 %v5185_v57, %v5184_v45  ;;  %v5195_v57 = vsel %vm230_vm0, %v5109_v61, 0.0 }
 0x5a4   :  { %v5188_v54 = vadd.f32 %v5187_v55, %v5186_v27  ;;  %v5197_v27 = vsel %vm230_vm0, %v5110_v23, 0.0  ;;  %v5199_v55 = vsel %vm230_vm0, %v5111_v13, 0.0  ;;  %v5115_v23 = vmul.f32 %v17757_v47, %v17757_v47 }
 0x5a5   :  { %v5203_v13 = vsel %vm230_vm0, %v5113_v53, 0.0 }
 0x5a6   :  { %v5190_v43 = vadd.f32 %v5189_v16, %v5188_v54  ;;  %v5116_v16 = vmul.f32 %v17761_v3, %v17761_v3 }
 0x5a8   :  { %v5192_v45 = vadd.f32 %v5191_v31, %v5190_v43  ;;  %v5207_v31 = vsel %vm230_vm0, %v5115_v23, 0.0 }
 0x5aa   :  { %v5194_v10 = vadd.f32 %v5193_v35, %v5192_v45  ;;  %v5209_v35 = vsel %vm230_vm0, %v5116_v16, 0.0 }
 0x5ac   :  { %v5196_v34 = vadd.f32 %v5195_v57, %v5194_v10 }
 0x5ae   :  { %v5198_v52 = vadd.f32 %v5197_v27, %v5196_v34  ;;  %v5205_v34 = vsel %vm230_vm0, %v5114_v20, 0.0  ;;  %v5119_v27 = vmul.f32 %v17773_v41, %v17773_v41  ;;  %v5213_v20 = vsel %vm230_vm0, %v5118_v6, 0.0 }
 0x5b0   :  { %v5200_v54 = vadd.f32 %v5199_v55, %v5198_v52  ;;  %v5117_v52 = vmul.f32 %v17765_v22, %v17765_v22  ;;  %v5215_v23 = vsel %vm230_vm0, %v5119_v27, 0.0 }
 0x5b2   :  { %v5202_v61 = vadd.f32 %v5201_v44, %v5200_v54  ;;  %v5211_v55 = vsel %vm230_vm0, %v5117_v52, 0.0  ;;  %v5120_v54 = vmul.f32 %v17777_v4, %v17777_v4 }
 0x5b4   :  { %v5204_v10 = vadd.f32 %v5203_v13, %v5202_v61  ;;  %v5121_v61 = vmul.f32 %v17781_v21, %v17781_v21  ;;  %v5217_v16 = vsel %vm230_vm0, %v5120_v54, 0.0 }
 0x5b6   :  { %v5206_v43 = vadd.f32 %v5205_v34, %v5204_v10  ;;  %v5122_v10 = vmul.f32 %v17785_v46, %v17785_v46  ;;  %v5219_v52 = vsel %vm230_vm0, %v5121_v61, 0.0  ;;  %v5764_v61 = vld [vmem:[#allocation2 + $0x1] sm:$0xff] }
 0x5b8   :  { %v5208_v45 = vadd.f32 %v5207_v31, %v5206_v43  ;;  %v5123_v43 = vmul.f32 %v17789_v2, %v17789_v2  ;;  %v5221_v6 = vsel %vm230_vm0, %v5122_v10, 0.0 }
 0x5ba   :  { %v5210_v57 = vadd.f32 %v5209_v35, %v5208_v45  ;;  %v5124_v45 = vmul.f32 %v17793_v32, %v17793_v32  ;;  %v5223_v27 = vsel %vm230_vm0, %v5123_v43, 0.0 }
 0x5bc   :  { %v5212_v53 = vadd.f32 %v5211_v55, %v5210_v57  ;;  %v5125_v57 = vmul.f32 %v17797_v59, %v17797_v59  ;;  %v5225_v54 = vsel %vm230_vm0, %v5124_v45, 0.0 }
 0x5be   :  { %v5214_v44 = vadd.f32 %v5213_v20, %v5212_v53  ;;  %v5126_v53 = vmul.f32 %v17801_v63, %v17801_v63  ;;  %v5227_v10 = vsel %vm230_vm0, %v5125_v57, 0.0 }
 0x5c0   :  { %v5216_v13 = vadd.f32 %v5215_v23, %v5214_v44  ;;  %v15218_v44 = vld [vmem:[%s21512_s4 + $0x8] sm:$0xff]  }
 0x5c1   :  { %v5765_v23 = vld [vmem:[#allocation2 + $0x9] sm:$0xff]  ;;  %13590 = vmatprep.subr.bf16.mxu1 %v15218_v44 }
 0x5c2   :  { %v5218_v34 = vadd.f32 %v5217_v16, %v5216_v13  ;;  %v5127_v13 = vmul.f32 %v17805_v18, %v17805_v18  ;;  %v5828_v16 = vpack.c.bf16 %v5765_v23, %v5764_v61  ;;  %13591 = vmatpush3.bf16.msra.mxu1 %v15218_v44  ;;  %v5132_v61 = vmul.f32 %v17825_v37, %v17825_v37 }
 0x5c4   :  { %v5220_v31 = vadd.f32 %v5219_v52, %v5218_v34  ;;  %v18025_v34 = vld [vmem:[%s21512_s4] sm:$0xff]   ;;  %v5128_v52 = vmul.f32 %v17809_v56, %v17809_v56  ;;  %13592 = vmatprep.mubr.msk.bf16.mxu1 %vm230_vm0, %v5828_v16 }
 0x5c5   :  { %21667 = vst [vmem:[#allocation17_spill] sm:$0xff] %v18025_v34  ;;  %13656 = vmatprep.subr.bf16.mxu1 %v18025_v34 }
 0x5c6   :  { %v5222_v35 = vadd.f32 %v5221_v6, %v5220_v31  ;;  %v5229_v31 = vsel %vm230_vm0, %v5126_v53, 0.0  ;;  %v5129_v6 = vmul.f32 %v17813_v11, %v17813_v11  ;;  %v5131_v53 = vmul.f32 %v17821_v5, %v17821_v5 }
 0x5c8   :  { %v5224_v55 = vadd.f32 %v5223_v27, %v5222_v35  ;;  %v5231_v35 = vsel %vm230_vm0, %v5127_v13, 0.0  ;;  %v5130_v27 = vmul.f32 %v17817_v7, %v17817_v7  ;;  %v5133_v13 = vmul.f32 %v17829_v49, %v17829_v49 }
 0x5c9   :  { %v5239_v16 = vsel %vm230_vm0, %v5131_v53, 0.0  ;;  %v21669_v53 = vld [vmem:[#allocation5_spill] sm:$0xff] }
 0x5ca   :  { %v5226_v20 = vadd.f32 %v5225_v54, %v5224_v55  ;;  %v5233_v55 = vsel %vm230_vm0, %v5128_v52, 0.0  ;;  %v5237_v23 = vsel %vm230_vm0, %v5130_v27, 0.0  ;;  %v5134_v52 = vmul.f32 %v17833_v40, %v17833_v40  ;;  %v21668_v27 = vld [vmem:[#allocation3_spill] sm:$0xff] }
 0x5cc   :  { %v5228_v43 = vadd.f32 %v5227_v10, %v5226_v20  ;;  %v5235_v20 = vsel %vm230_vm0, %v5129_v6, 0.0  ;;  %v5135_v6 = vmul.f32 %v17837_v0, %v17837_v0 }
 0x5ce   :  { %v5230_v45 = vadd.f32 %v5229_v31, %v5228_v43  ;;  %v5241_v31 = vsel %vm230_vm0, %v5132_v61, 0.0  ;;  %v21670_v61 = vld [vmem:[#allocation7_spill] sm:$0xff] }
 0x5d0   :  { %v5232_v57 = vadd.f32 %v5231_v35, %v5230_v45  ;;  %v5243_v35 = vsel %vm230_vm0, %v5133_v13, 0.0  ;;  %v21671_v13 = vld [vmem:[#allocation4_spill] sm:$0xff] }
 0x5d2   :  { %v5234_v54 = vadd.f32 %v5233_v55, %v5232_v57  ;;  %v5136_v55 = vmul.f32 %v21668_v27, %v21668_v27 }
 0x5d4   :  { %v5236_v44 = vadd.f32 %v5235_v20, %v5234_v54  ;;  %v5245_v54 = vsel %vm230_vm0, %v5134_v52, 0.0  ;;  %v21672_v52 = vld [vmem:[#allocation6_spill] sm:$0xff] }
 0x5d6   :  { %v5238_v10 = vadd.f32 %v5237_v23, %v5236_v44  ;;  %v5137_v44 = vmul.f32 %v21669_v53, %v21669_v53  ;;  %v5247_v23 = vsel %vm230_vm0, %v5135_v6, 0.0  ;;  %v21673_v6 = vld [vmem:[#allocation9_spill] sm:$0xff] }
 0x5d8   :  { %v5240_v43 = vadd.f32 %v5239_v16, %v5238_v10  ;;  %v5138_v16 = vmul.f32 %v21670_v61, %v21670_v61 }
 0x5da   :  { %v5242_v45 = vadd.f32 %v5241_v31, %v5240_v43  ;;  %v5249_v43 = vsel %vm230_vm0, %v5136_v55, 0.0  ;;  %v5142_v55 = vmul.f32 %v17865_v51, %v17865_v51 }
 0x5dc   :  { %v5244_v57 = vadd.f32 %v5243_v35, %v5242_v45  ;;  %v5139_v45 = vmul.f32 %v21671_v13, %v21671_v13  ;;  %v5251_v35 = vsel %vm230_vm0, %v5137_v44, 0.0  ;;  %v5143_v44 = vmul.f32 %v17869_v36, %v17869_v36 }
 0x5de   :  { %v5246_v20 = vadd.f32 %v5245_v54, %v5244_v57  ;;  %v5140_v57 = vmul.f32 %v21672_v52, %v21672_v52  ;;  %v5253_v54 = vsel %vm230_vm0, %v5138_v16, 0.0  ;;  %v5261_v16 = vsel %vm230_vm0, %v5142_v55, 0.0  ;;  %v21677_v55 = vld [vmem:[#allocation14_spill] sm:$0xff] }
 0x5e0   :  { %v5248_v10 = vadd.f32 %v5247_v23, %v5246_v20  ;;  %v5141_v20 = vmul.f32 %v21673_v6, %v21673_v6  ;;  %v5255_v23 = vsel %vm230_vm0, %v5139_v45, 0.0  ;;  %v21674_v45 = vld [vmem:[#allocation13_spill] sm:$0xff] }
 0x5e2   :  { %v5250_v31 = vadd.f32 %v5249_v43, %v5248_v10  ;;  %v5257_v10 = vsel %vm230_vm0, %v5140_v57, 0.0  ;;  %v21675_v57 = vld [vmem:[#allocation15_spill] sm:$0xff] }
 0x5e4   :  { %v5252_v34 = vadd.f32 %v5251_v35, %v5250_v31  ;;  %v5259_v31 = vsel %vm230_vm0, %v5141_v20, 0.0  ;;  %v21676_v20 = vld [vmem:[#allocation12_spill] sm:$0xff] }
 0x5e6   :  { %v5254_v53 = vadd.f32 %v5253_v54, %v5252_v34  ;;  %v5144_v34 = vmul.f32 %v17873_v14, %v17873_v14 }
 0x5e8   :  { %v5256_v61 = vadd.f32 %v5255_v23, %v5254_v53  ;;  %v5145_v53 = vmul.f32 %v21674_v45, %v21674_v45  ;;  %v5263_v23 = vsel %vm230_vm0, %v5143_v44, 0.0  ;;  %v21678_v44 = vld [vmem:[#allocation16_spill] sm:$0xff] }
 0x5ea   :  { %v5258_v43 = vadd.f32 %v5257_v10, %v5256_v61  ;;  %v5146_v61 = vmul.f32 %v21675_v57, %v21675_v57  ;;  %v5265_v10 = vsel %vm230_vm0, %v5144_v34, 0.0 }
 0x5ec   :  { %v5260_v35 = vadd.f32 %v5259_v31, %v5258_v43  ;;  %v5147_v43 = vmul.f32 %v21676_v20, %v21676_v20  ;;  %v5267_v31 = vsel %vm230_vm0, %v5145_v53, 0.0 }
 0x5ee   :  { %v5262_v54 = vadd.f32 %v5261_v16, %v5260_v35  ;;  %v5148_v35 = vmul.f32 %v21677_v55, %v21677_v55  ;;  %v5269_v16 = vsel %vm230_vm0, %v5146_v61, 0.0 }
 0x5f0   :  { %v5264_v51 = vadd.f32 %v5263_v23, %v5262_v54  ;;  %v5149_v54 = vmul.f32 %v21678_v44, %v21678_v44  ;;  %v5271_v23 = vsel %vm230_vm0, %v5147_v43, 0.0  ;;  %v21679_v43 = vld [vmem:[#allocation18_spill] sm:$0xff] }
 0x5f2   :  { %v5266_v36 = vadd.f32 %v5265_v10, %v5264_v51  ;;  %v5273_v51 = vsel %vm230_vm0, %v5148_v35, 0.0  ;;  %v5275_v10 = vsel %vm230_vm0, %v5149_v54, 0.0  ;;  %v21680_v35 = vld [vmem:[#allocation19_spill] sm:$0xff] }
 0x5f3   :  { %v18121_v54 = vld [vmem:[%s21514_s3] ss:$0 sm:$0xff] }
 0x5f4   :  { %v5268_v14 = vadd.f32 %v5267_v31, %v5266_v36  ;;  %21682 = vst [vmem:[#allocation3_spill] sm:$0xff] %v18121_v54 }
 0x5f6   :  { %v5270_v45 = vadd.f32 %v5269_v16, %v5268_v14 }
 0x5f8   :  { %v5272_v57 = vadd.f32 %v5271_v23, %v5270_v45  ;;  %v18102_v45 = vld [vmem:[%s21513_s2] ss:$0 sm:$0xff]  ;;  %v21683_v23 = vld [vmem:[#allocation21_spill] sm:$0xff] }
 0x5fa   :  { %v5274_v34 = vadd.f32 %v5273_v51, %v5272_v57 }
 0x5fc   :  { %v5276_v6 = vadd.f32 %v5275_v10, %v5274_v34 }
 0x5fe   :  { %v5277_v53 = vrot.slane %v5276_v6, 4 }
 0x600   :  { %v5278_v36 = vadd.f32 %v5277_v53, %v5276_v6 }
 0x602   :  { %v5279_v31 = vrot.slane %v5278_v36, 2 }
 0x604   :  { %v5280_v52 = vadd.f32 %v5279_v31, %v5278_v36 }
 0x606   :  { %v5281_v55 = vrot.slane %v5280_v52, 1 }
 0x608   :  { %v5282_v13 = vadd.f32 %v5281_v55, %v5280_v52 }
 0x60a   :  { %v5283_v61 = vmul.f32 0.001953125, %v5282_v13  ;;  %v21681_v13 = vld [vmem:[#allocation20_spill] sm:$0xff] }
 0x60c   :  { %v5284_v14 = vadd.f32 1e-05, %v5283_v61 }
 0x60e   :  { %15227 = vrsqrt.f32 %v5284_v14 }
 0x618   :  { %v18097_v16 = vpop.eup %15227 }
 0x619   :  { %v5347_v57 = vmul.f32 %v18097_v16, %v21676_v20  ;;  %v18108_v6 = vmul.f32 %v18097_v16, %v21679_v43  ;;  %v18112_v52 = vmul.f32 %v18097_v16, %v21680_v35  ;;  %v18116_v55 = vmul.f32 %v18097_v16, %v21681_v13 }
 0x61a   :  { %v18125_v20 = vmul.f32 %v18097_v16, %v21683_v23  ;;  %v18129_v51 = vmul.f32 %v18097_v16, %v17657_v33  ;;  %v18133_v34 = vmul.f32 %v18097_v16, %v17661_v25  ;;  %v18137_v10 = vmul.f32 %v18097_v16, %v17665_v42 }
 0x61b   :  { %v5418_v53 = vmul.f32 %v18102_v45, %v5347_v57  ;;  %v18142_v36 = vmul.f32 %v18097_v16, %v17669_v17  ;;  %v18146_v31 = vmul.f32 %v18097_v16, %v17673_v38  ;;  %v18150_v33 = vmul.f32 %v18097_v16, %v17677_v19 }
 0x61c   :  { %v18154_v25 = vmul.f32 %v18097_v16, %v17681_v8  ;;  %v18158_v42 = vmul.f32 %v18097_v16, %v17685_v60  ;;  %v18162_v17 = vmul.f32 %v18097_v16, %v17689_v48  ;;  %v18166_v38 = vmul.f32 %v18097_v16, %v17693_v58 }
 0x61d   :  { %v5489_v61 = vadd.f32 %v18121_v54, %v5418_v53  ;;  %v18171_v19 = vmul.f32 %v18097_v16, %v17697_v62  ;;  %v18175_v8 = vmul.f32 %v18097_v16, %v17701_v29  ;;  %v18179_v60 = vmul.f32 %v18097_v16, %v17705_v30  ;;  %v21697_v54 = vld [vmem:[#allocation9_spill] sm:$0xff] }
 0x61e   :  { %v18183_v48 = vmul.f32 %v18097_v16, %v17709_v26  ;;  %v18187_v58 = vmul.f32 %v18097_v16, %v17713_v9  ;;  %v18191_v62 = vmul.f32 %v18097_v16, %v17717_v12  ;;  %v18195_v29 = vmul.f32 %v18097_v16, %v17721_v50  ;;  %v21684_v26 = vld [vmem:[#allocation22_spill] sm:$0xff]  ;;  %v21685_v9 = vld [vmem:[#allocation23_spill] sm:$0xff]  ;;  %v21686_v12 = vld [vmem:[#allocation24_spill] sm:$0xff] }
 0x61f   :  { %5663 = vst.msk [vmem:[#allocation2 + $0x321] sm:$0xff] %vm230_vm0, %v5489_v61  ;;  %v18200_v30 = vmul.f32 %v18097_v16, %v17725_v15  ;;  %v18204_v14 = vmul.f32 %v18097_v16, %v21684_v26  ;;  %v18208_v57 = vmul.f32 %v18097_v16, %v21685_v9  ;;  %v18212_v43 = vmul.f32 %v18097_v16, %v21686_v12  ;;  %v21687_v50 = vld [vmem:[#allocation25_spill] sm:$0xff]  ;;  %v21691_v9 = vld [vmem:[#allocation7_spill] sm:$0xff]  ;;  %v21693_v12 = vld [vmem:[#allocation4_spill] sm:$0xff] }
 0x620   :  { %v18216_v35 = vmul.f32 %v18097_v16, %v21687_v50  ;;  %v18220_v15 = vmul.f32 %v18097_v16, %v17745_v24  ;;  %v18224_v13 = vmul.f32 %v18097_v16, %v17749_v39  ;;  %v18228_v23 = vmul.f32 %v18097_v16, %v17753_v1  ;;  %v21689_v26 = vld [vmem:[#allocation5_spill] sm:$0xff]  ;;  %v21695_v50 = vld [vmem:[#allocation6_spill] sm:$0xff] }
 0x621   :  { %v18232_v53 = vmul.f32 %v18097_v16, %v17757_v47  ;;  %v18236_v61 = vmul.f32 %v18097_v16, %v17761_v3  ;;  %v18240_v24 = vmul.f32 %v18097_v16, %v17765_v22  ;;  %v18244_v39 = vmul.f32 %v18097_v16, %v17769_v28 }
 0x622   :  { %v18248_v1 = vmul.f32 %v18097_v16, %v17773_v41  ;;  %v18252_v47 = vmul.f32 %v18097_v16, %v17777_v4  ;;  %v18256_v3 = vmul.f32 %v18097_v16, %v17781_v21  ;;  %v18260_v22 = vmul.f32 %v18097_v16, %v17785_v46 }
 0x623   :  { %v18264_v28 = vmul.f32 %v18097_v16, %v17789_v2  ;;  %v18268_v41 = vmul.f32 %v18097_v16, %v17793_v32  ;;  %v18272_v4 = vmul.f32 %v18097_v16, %v17797_v59  ;;  %v18276_v21 = vmul.f32 %v18097_v16, %v17801_v63 }
 0x624   :  { %v18280_v46 = vmul.f32 %v18097_v16, %v17805_v18  ;;  %v18284_v2 = vmul.f32 %v18097_v16, %v17809_v56  ;;  %v18288_v32 = vmul.f32 %v18097_v16, %v17813_v11  ;;  %v18292_v59 = vmul.f32 %v18097_v16, %v17817_v7 }
 0x625   :  { %v18296_v63 = vmul.f32 %v18097_v16, %v17821_v5  ;;  %v18300_v18 = vmul.f32 %v18097_v16, %v17825_v37  ;;  %v18304_v56 = vmul.f32 %v18097_v16, %v17829_v49  ;;  %v18308_v11 = vmul.f32 %v18097_v16, %v17833_v40 }
 0x626   :  { %v18312_v7 = vmul.f32 %v18097_v16, %v17837_v0  ;;  %v18316_v5 = vmul.f32 %v18097_v16, %v21668_v27  ;;  %v18320_v37 = vmul.f32 %v18097_v16, %v21689_v26  ;;  %v18324_v49 = vmul.f32 %v18097_v16, %v21691_v9 }
 0x627   :  { %v18328_v40 = vmul.f32 %v18097_v16, %v21693_v12  ;;  %v18332_v0 = vmul.f32 %v18097_v16, %v21695_v50  ;;  %v18336_v27 = vmul.f32 %v18097_v16, %v21697_v54 }
 0x628   :  { %21688 = vst [vmem:[#allocation12_spill] sm:$0xff] %v18316_v5  ;;  %21690 = vst [vmem:[#allocation16_spill] sm:$0xff] %v18320_v37  ;;  %v21699_v5 = vld [vmem:[#allocation11_spill] sm:$0xff]  ;;  %v21700_v37 = vld [vmem:[#allocation8_spill] sm:$0xff] }
 0x629   :  { %21692 = vst [vmem:[#allocation18_spill] sm:$0xff] %v18324_v49  ;;  %21694 = vst [vmem:[#allocation19_spill] sm:$0xff] %v18328_v40  ;;  %v18340_v26 = vmul.f32 %v18097_v16, %v21699_v5  ;;  %v18344_v9 = vmul.f32 %v18097_v16, %v21700_v37  ;;  %v21701_v49 = vld [vmem:[#allocation10_spill] sm:$0xff]  ;;  %v21702_v40 = vld [vmem:[#allocation13_spill] sm:$0xff]  ;;  %v18364_v37 = vmul.f32 %v18097_v16, %v21678_v44 }
 0x62a   :  { %21696 = vst [vmem:[#allocation20_spill] sm:$0xff] %v18332_v0  ;;  %21698 = vst [vmem:[#allocation21_spill] sm:$0xff] %v18336_v27  ;;  %v18348_v12 = vmul.f32 %v18097_v16, %v21701_v49  ;;  %v18352_v50 = vmul.f32 %v18097_v16, %v21702_v40  ;;  %v21703_v0 = vld [vmem:[#allocation15_spill] sm:$0xff]  ;;  %v21704_v27 = vld [vmem:[#allocation14_spill] sm:$0xff]  ;;  %v18368_v49 = vmul.f32 %v18102_v45, %v18108_v6 }
 0x62b   :  { %v18356_v54 = vmul.f32 %v18097_v16, %v21703_v0  ;;  %v18360_v5 = vmul.f32 %v18097_v16, %v21704_v27  ;;  %v18372_v40 = vmul.f32 %v18102_v45, %v18112_v52  ;;  %v18376_v0 = vmul.f32 %v18102_v45, %v18116_v55 }
 0x62c   :  { %v18380_v27 = vmul.f32 %v18102_v45, %v18125_v20  ;;  %v18384_v44 = vmul.f32 %v18102_v45, %v18129_v51  ;;  %v18388_v16 = vmul.f32 %v18102_v45, %v18133_v34  ;;  %v18392_v6 = vmul.f32 %v18102_v45, %v18137_v10 }
 0x62d   :  { %v18396_v52 = vmul.f32 %v18102_v45, %v18142_v36  ;;  %v18400_v55 = vmul.f32 %v18102_v45, %v18146_v31  ;;  %v18404_v20 = vmul.f32 %v18102_v45, %v18150_v33  ;;  %v18408_v51 = vmul.f32 %v18102_v45, %v18154_v25 }
 0x62e   :  { %v18412_v34 = vmul.f32 %v18102_v45, %v18158_v42  ;;  %v18416_v10 = vmul.f32 %v18102_v45, %v18162_v17  ;;  %v18420_v36 = vmul.f32 %v18102_v45, %v18166_v38  ;;  %v18424_v31 = vmul.f32 %v18102_v45, %v18171_v19 }
 0x62f   :  { %v18428_v33 = vmul.f32 %v18102_v45, %v18175_v8  ;;  %v18432_v25 = vmul.f32 %v18102_v45, %v18179_v60  ;;  %v18436_v42 = vmul.f32 %v18102_v45, %v18183_v48  ;;  %v18440_v17 = vmul.f32 %v18102_v45, %v18187_v58 }
 0x630   :  { %v18444_v38 = vmul.f32 %v18102_v45, %v18191_v62  ;;  %v18448_v19 = vmul.f32 %v18102_v45, %v18195_v29  ;;  %v18452_v8 = vmul.f32 %v18102_v45, %v18200_v30  ;;  %v18456_v60 = vmul.f32 %v18102_v45, %v18204_v14 }
 0x631   :  { %v18460_v48 = vmul.f32 %v18102_v45, %v18208_v57  ;;  %v18464_v58 = vmul.f32 %v18102_v45, %v18212_v43  ;;  %v18468_v62 = vmul.f32 %v18102_v45, %v18216_v35  ;;  %v18472_v29 = vmul.f32 %v18102_v45, %v18220_v15 }
 0x632   :  { %v18476_v30 = vmul.f32 %v18102_v45, %v18224_v13  ;;  %v18480_v14 = vmul.f32 %v18102_v45, %v18228_v23  ;;  %v18484_v57 = vmul.f32 %v18102_v45, %v18232_v53  ;;  %v18488_v43 = vmul.f32 %v18102_v45, %v18236_v61 }
 0x633   :  { %v18492_v35 = vmul.f32 %v18102_v45, %v18240_v24  ;;  %v18496_v15 = vmul.f32 %v18102_v45, %v18244_v39  ;;  %v18500_v13 = vmul.f32 %v18102_v45, %v18248_v1  ;;  %v18504_v23 = vmul.f32 %v18102_v45, %v18252_v47 }
 0x634   :  { %v18508_v53 = vmul.f32 %v18102_v45, %v18256_v3  ;;  %v18512_v61 = vmul.f32 %v18102_v45, %v18260_v22  ;;  %v18516_v24 = vmul.f32 %v18102_v45, %v18264_v28  ;;  %v18520_v39 = vmul.f32 %v18102_v45, %v18268_v41 }
 0x635   :  { %v18524_v1 = vmul.f32 %v18102_v45, %v18272_v4  ;;  %v18528_v47 = vmul.f32 %v18102_v45, %v18276_v21  ;;  %v18532_v3 = vmul.f32 %v18102_v45, %v18280_v46  ;;  %v18536_v22 = vmul.f32 %v18102_v45, %v18284_v2 }
 0x636   :  { %v18540_v28 = vmul.f32 %v18102_v45, %v18288_v32  ;;  %v18544_v41 = vmul.f32 %v18102_v45, %v18292_v59  ;;  %v18548_v4 = vmul.f32 %v18102_v45, %v18296_v63  ;;  %v18552_v21 = vmul.f32 %v18102_v45, %v18300_v18  ;;  %v21710_v59 = vld [vmem:[#allocation12_spill] sm:$0xff] }
 0x637   :  { %v18556_v46 = vmul.f32 %v18102_v45, %v18304_v56  ;;  %v18560_v2 = vmul.f32 %v18102_v45, %v18308_v11  ;;  %v18564_v32 = vmul.f32 %v18102_v45, %v18312_v7  ;;  %v18568_v63 = vmul.f32 %v18102_v45, %v21710_v59 }
 0x638   :  { %21705 = vst [vmem:[#allocation22_spill] sm:$0xff] %v18548_v4  ;;  %21706 = vst [vmem:[#allocation23_spill] sm:$0xff] %v18552_v21  ;;  %v21711_v4 = vld [vmem:[#allocation16_spill] sm:$0xff]  ;;  %v21712_v21 = vld [vmem:[#allocation18_spill] sm:$0xff] }
 0x639   :  { %21707 = vst [vmem:[#allocation24_spill] sm:$0xff] %v18556_v46  ;;  %21708 = vst [vmem:[#allocation25_spill] sm:$0xff] %v18560_v2  ;;  %v18572_v18 = vmul.f32 %v18102_v45, %v21711_v4  ;;  %v18576_v56 = vmul.f32 %v18102_v45, %v21712_v21  ;;  %v21713_v46 = vld [vmem:[#allocation19_spill] sm:$0xff]  ;;  %v21714_v2 = vld [vmem:[#allocation20_spill] sm:$0xff]  ;;  %v18592_v4 = vmul.f32 %v18102_v45, %v18340_v26 }
 0x63a   :  { %21709 = vst [vmem:[#allocation5_spill] sm:$0xff] %v18564_v32  ;;  %v18580_v11 = vmul.f32 %v18102_v45, %v21713_v46  ;;  %v18584_v7 = vmul.f32 %v18102_v45, %v21714_v2  ;;  %v21715_v32 = vld [vmem:[#allocation21_spill] sm:$0xff]  ;;  %v18596_v21 = vmul.f32 %v18102_v45, %v18344_v9  ;;  %v18600_v46 = vmul.f32 %v18102_v45, %v18348_v12 }
 0x63b   :  { %v18588_v59 = vmul.f32 %v18102_v45, %v21715_v32  ;;  %v18604_v2 = vmul.f32 %v18102_v45, %v18352_v50  ;;  %v18608_v32 = vmul.f32 %v18102_v45, %v18356_v54  ;;  %v18612_v26 = vmul.f32 %v18102_v45, %v18360_v5 }
 0x63c   :  { %21716 = vst [vmem:[#allocation7_spill] sm:$0xff] %v18596_v21  ;;  %21717 = vst [vmem:[#allocation4_spill] sm:$0xff] %v18600_v46  ;;  %v18616_v9 = vmul.f32 %v18102_v45, %v18364_v37  ;;  %v21719_v21 = vld [vmem:[#allocation3_spill] sm:$0xff] }
 0x63d   :  { %21718 = vst [vmem:[#allocation6_spill] sm:$0xff] %v18612_v26  ;;  %v5428_v12 = vadd.f32 %v21719_v21, %v18368_v49  ;;  %v5429_v46 = vadd.f32 %v21719_v21, %v18372_v40  ;;  %v5430_v50 = vadd.f32 %v21719_v21, %v18376_v0  ;;  %v5431_v54 = vadd.f32 %v21719_v21, %v18380_v27 }
 0x63e   :  { %v5432_v5 = vadd.f32 %v21719_v21, %v18384_v44  ;;  %v5433_v26 = vadd.f32 %v21719_v21, %v18388_v16  ;;  %v5434_v45 = vadd.f32 %v21719_v21, %v18392_v6  ;;  %v5435_v37 = vadd.f32 %v21719_v21, %v18396_v52 }
 0x63f   :  { %v5436_v49 = vadd.f32 %v21719_v21, %v18400_v55  ;;  %v5437_v40 = vadd.f32 %v21719_v21, %v18404_v20  ;;  %v5438_v0 = vadd.f32 %v21719_v21, %v18408_v51  ;;  %5602 = vst.msk [vmem:[#allocation2 + $0x19] sm:$0xff] %vm230_vm0, %v5428_v12  ;;  %5603 = vst.msk [vmem:[#allocation2 + $0x21] sm:$0xff] %vm230_vm0, %v5429_v46 }
 0x640   :  { %5604 = vst.msk [vmem:[#allocation2 + $0x31] sm:$0xff] %vm230_vm0, %v5430_v50  ;;  %v5439_v27 = vadd.f32 %v21719_v21, %v18412_v34  ;;  %v5440_v44 = vadd.f32 %v21719_v21, %v18416_v10  ;;  %v5441_v16 = vadd.f32 %v21719_v21, %v18420_v36  ;;  %v5442_v6 = vadd.f32 %v21719_v21, %v18424_v31 }
 0x641   :  { %5605 = vst.msk [vmem:[#allocation2 + $0x39] sm:$0xff] %vm230_vm0, %v5431_v54  ;;  %5606 = vst.msk [vmem:[#allocation2 + $0x49] sm:$0xff] %vm230_vm0, %v5432_v5  ;;  %v5443_v52 = vadd.f32 %v21719_v21, %v18428_v33  ;;  %v5444_v55 = vadd.f32 %v21719_v21, %v18432_v25  ;;  %v5445_v20 = vadd.f32 %v21719_v21, %v18436_v42  ;;  %v21724_v46 = vld [vmem:[#allocation5_spill] sm:$0xff] }
 0x642   :  { %5607 = vst.msk [vmem:[#allocation2 + $0x51] sm:$0xff] %vm230_vm0, %v5433_v26  ;;  %5608 = vst.msk [vmem:[#allocation2 + $0x61] sm:$0xff] %vm230_vm0, %v5434_v45  ;;  %v5446_v51 = vadd.f32 %v21719_v21, %v18440_v17  ;;  %v5447_v34 = vadd.f32 %v21719_v21, %v18444_v38  ;;  %v5448_v10 = vadd.f32 %v21719_v21, %v18448_v19 }
 0x643   :  { %5609 = vst.msk [vmem:[#allocation2 + $0x69] sm:$0xff] %vm230_vm0, %v5435_v37  ;;  %5610 = vst.msk [vmem:[#allocation2 + $0x79] sm:$0xff] %vm230_vm0, %v5436_v49  ;;  %v5449_v36 = vadd.f32 %v21719_v21, %v18452_v8  ;;  %v5450_v31 = vadd.f32 %v21719_v21, %v18456_v60  ;;  %v5451_v33 = vadd.f32 %v21719_v21, %v18460_v48 }
 0x644   :  { %5611 = vst.msk [vmem:[#allocation2 + $0x81] sm:$0xff] %vm230_vm0, %v5437_v40  ;;  %5612 = vst.msk [vmem:[#allocation2 + $0x91] sm:$0xff] %vm230_vm0, %v5438_v0  ;;  %v5452_v25 = vadd.f32 %v21719_v21, %v18464_v58  ;;  %v5453_v42 = vadd.f32 %v21719_v21, %v18468_v62  ;;  %v5454_v17 = vadd.f32 %v21719_v21, %v18472_v29  ;;  %v21725_v40 = vld [vmem:[#allocation7_spill] sm:$0xff]  ;;  %v21726_v0 = vld [vmem:[#allocation4_spill] sm:$0xff] }
 0x645   :  { %5613 = vst.msk [vmem:[#allocation2 + $0x99] sm:$0xff] %vm230_vm0, %v5439_v27  ;;  %5614 = vst.msk [vmem:[#allocation2 + $0xa9] sm:$0xff] %vm230_vm0, %v5440_v44  ;;  %v5455_v38 = vadd.f32 %v21719_v21, %v18476_v30  ;;  %v5456_v19 = vadd.f32 %v21719_v21, %v18480_v14  ;;  %v5457_v8 = vadd.f32 %v21719_v21, %v18484_v57  ;;  %v21727_v44 = vld [vmem:[#allocation6_spill] sm:$0xff] }
 0x646   :  { %5615 = vst.msk [vmem:[#allocation2 + $0xb1] sm:$0xff] %vm230_vm0, %v5441_v16  ;;  %5616 = vst.msk [vmem:[#allocation2 + $0xc1] sm:$0xff] %vm230_vm0, %v5442_v6  ;;  %v5458_v60 = vadd.f32 %v21719_v21, %v18488_v43  ;;  %v5459_v48 = vadd.f32 %v21719_v21, %v18492_v35  ;;  %v5460_v58 = vadd.f32 %v21719_v21, %v18496_v15  ;;  %v5766_v50 = vld [vmem:[#allocation2 + $0x19] sm:$0xff]  ;;  %v5767_v37 = vld [vmem:[#allocation2 + $0x21] sm:$0xff] }
 0x647   :  { %5617 = vst.msk [vmem:[#allocation2 + $0xc9] sm:$0xff] %vm230_vm0, %v5443_v52  ;;  %5618 = vst.msk [vmem:[#allocation2 + $0xd9] sm:$0xff] %vm230_vm0, %v5444_v55  ;;  %v5461_v62 = vadd.f32 %v21719_v21, %v18500_v13  ;;  %v5462_v29 = vadd.f32 %v21719_v21, %v18504_v23  ;;  %v5463_v30 = vadd.f32 %v21719_v21, %v18508_v53  ;;  %v5768_v49 = vld [vmem:[#allocation2 + $0x31] sm:$0xff] }
 0x648   :  { %5619 = vst.msk [vmem:[#allocation2 + $0xe1] sm:$0xff] %vm230_vm0, %v5445_v20  ;;  %5620 = vst.msk [vmem:[#allocation2 + $0xf1] sm:$0xff] %vm230_vm0, %v5446_v51  ;;  %v5464_v14 = vadd.f32 %v21719_v21, %v18512_v61  ;;  %v5465_v57 = vadd.f32 %v21719_v21, %v18516_v24  ;;  %v5466_v43 = vadd.f32 %v21719_v21, %v18520_v39  ;;  %v21720_v24 = vld [vmem:[#allocation22_spill] sm:$0xff] }
 0x649   :  { %5621 = vst.msk [vmem:[#allocation2 + $0xf9] sm:$0xff] %vm230_vm0, %v5447_v34  ;;  %5622 = vst.msk [vmem:[#allocation2 + $0x109] sm:$0xff] %vm230_vm0, %v5448_v10  ;;  %v5467_v35 = vadd.f32 %v21719_v21, %v18524_v1  ;;  %v5468_v15 = vadd.f32 %v21719_v21, %v18528_v47  ;;  %v5469_v13 = vadd.f32 %v21719_v21, %v18532_v3  ;;  %v21721_v1 = vld [vmem:[#allocation23_spill] sm:$0xff]  ;;  %v21722_v3 = vld [vmem:[#allocation24_spill] sm:$0xff] }
 0x64a   :  { %5623 = vst.msk [vmem:[#allocation2 + $0x111] sm:$0xff] %vm230_vm0, %v5449_v36  ;;  %5624 = vst.msk [vmem:[#allocation2 + $0x121] sm:$0xff] %vm230_vm0, %v5450_v31  ;;  %v5470_v23 = vadd.f32 %v21719_v21, %v18536_v22  ;;  %v5471_v53 = vadd.f32 %v21719_v21, %v18540_v28  ;;  %v5472_v61 = vadd.f32 %v21719_v21, %v18544_v41  ;;  %v21723_v28 = vld [vmem:[#allocation25_spill] sm:$0xff]  ;;  %v5772_v55 = vld [vmem:[#allocation2 + $0x61] sm:$0xff] }
 0x64b   :  { %5625 = vst.msk [vmem:[#allocation2 + $0x129] sm:$0xff] %vm230_vm0, %v5451_v33  ;;  %5626 = vst.msk [vmem:[#allocation2 + $0x139] sm:$0xff] %vm230_vm0, %v5452_v25  ;;  %v5473_v39 = vadd.f32 %v21719_v21, %v21720_v24  ;;  %v5474_v47 = vadd.f32 %v21719_v21, %v21721_v1  ;;  %v5475_v22 = vadd.f32 %v21719_v21, %v21722_v3  ;;  %v5771_v52 = vld [vmem:[#allocation2 + $0x51] sm:$0xff]  ;;  %v5773_v20 = vld [vmem:[#allocation2 + $0x69] sm:$0xff] }
 0x64c   :  { %5627 = vst.msk [vmem:[#allocation2 + $0x141] sm:$0xff] %vm230_vm0, %v5453_v42  ;;  %5628 = vst.msk [vmem:[#allocation2 + $0x151] sm:$0xff] %vm230_vm0, %v5454_v17  ;;  %v5476_v41 = vadd.f32 %v21719_v21, %v21723_v28  ;;  %v5477_v26 = vadd.f32 %v21719_v21, %v21724_v46  ;;  %v5478_v12 = vadd.f32 %v21719_v21, %v18568_v63  ;;  %v5774_v10 = vld [vmem:[#allocation2 + $0x79] sm:$0xff]  ;;  %v5775_v36 = vld [vmem:[#allocation2 + $0x81] sm:$0xff] }
 0x64d   :  { %5629 = vst.msk [vmem:[#allocation2 + $0x159] sm:$0xff] %vm230_vm0, %v5455_v38  ;;  %5630 = vst.msk [vmem:[#allocation2 + $0x169] sm:$0xff] %vm230_vm0, %v5456_v19  ;;  %v5479_v54 = vadd.f32 %v21719_v21, %v18572_v18  ;;  %v5480_v5 = vadd.f32 %v21719_v21, %v18576_v56  ;;  %v5481_v45 = vadd.f32 %v21719_v21, %v18580_v11  ;;  %v5769_v18 = vld [vmem:[#allocation2 + $0x39] sm:$0xff]  ;;  %v5776_v31 = vld [vmem:[#allocation2 + $0x91] sm:$0xff] }
 0x64e   :  { %5631 = vst.msk [vmem:[#allocation2 + $0x171] sm:$0xff] %vm230_vm0, %v5457_v8  ;;  %5632 = vst.msk [vmem:[#allocation2 + $0x181] sm:$0xff] %vm230_vm0, %v5458_v60  ;;  %v5482_v63 = vadd.f32 %v21719_v21, %v18584_v7  ;;  %v5483_v56 = vadd.f32 %v21719_v21, %v18588_v59  ;;  %v5484_v11 = vadd.f32 %v21719_v21, %v18592_v4  ;;  %v5777_v33 = vld [vmem:[#allocation2 + $0x99] sm:$0xff]  ;;  %v18815_v25 = vld [vmem:[%s21512_s4 + $0x10] sm:$0xff]  }
 0x64f   :  { %5633 = vst.msk [vmem:[#allocation2 + $0x189] sm:$0xff] %vm230_vm0, %v5459_v48  ;;  %5634 = vst.msk [vmem:[#allocation2 + $0x1c9] sm:$0xff] %vm230_vm0, %v5460_v58  ;;  %v5485_v7 = vadd.f32 %v21719_v21, %v21725_v40  ;;  %v5486_v27 = vadd.f32 %v21719_v21, %v21726_v0  ;;  %v5487_v59 = vadd.f32 %v21719_v21, %v18604_v2  ;;  %v5778_v38 = vld [vmem:[#allocation2 + $0xa9] sm:$0xff]  ;;  %v5779_v19 = vld [vmem:[#allocation2 + $0xb1] sm:$0xff] }
 0x650   :  { %5635 = vst.msk [vmem:[#allocation2 + $0x1d1] sm:$0xff] %vm230_vm0, %v5461_v62  ;;  %5636 = vst.msk [vmem:[#allocation2 + $0x1e1] sm:$0xff] %vm230_vm0, %v5462_v29  ;;  %v5488_v4 = vadd.f32 %v21719_v21, %v18608_v32  ;;  %v5490_v16 = vadd.f32 %v21719_v21, %v21727_v44  ;;  %v5491_v6 = vadd.f32 %v21719_v21, %v18616_v9  ;;  %v21728_v21 = vld [vmem:[#allocation17_spill] sm:$0xff]  ;;  %v5780_v8 = vld [vmem:[#allocation2 + $0xc1] sm:$0xff] }
 0x651   :  { %5637 = vst.msk [vmem:[#allocation2 + $0x1e9] sm:$0xff] %vm230_vm0, %v5463_v30  ;;  %5638 = vst.msk [vmem:[#allocation2 + $0x1f9] sm:$0xff] %vm230_vm0, %v5464_v14  ;;  %v5829_v2 = vpack.c.bf16 %v5767_v37, %v5766_v50  ;;  %v5830_v32 = vpack.c.bf16 %v5769_v18, %v5768_v49  ;;  %v5770_v9 = vld [vmem:[#allocation2 + $0x49] sm:$0xff]  ;;  %v5832_v34 = vpack.c.bf16 %v5773_v20, %v5772_v55  ;;  %v5782_v62 = vld [vmem:[#allocation2 + $0xd9] sm:$0xff] }
 0x652   :  { %5639 = vst.msk [vmem:[#allocation2 + $0x201] sm:$0xff] %vm230_vm0, %v5465_v57  ;;  %5640 = vst.msk [vmem:[#allocation2 + $0x211] sm:$0xff] %vm230_vm0, %v5466_v43  ;;  %v5831_v51 = vpack.c.bf16 %v5771_v52, %v5770_v9  ;;  %v5833_v42 = vpack.c.bf16 %v5775_v36, %v5774_v10  ;;  %v5834_v17 = vpack.c.bf16 %v5777_v33, %v5776_v31  ;;  %v5781_v60 = vld [vmem:[#allocation2 + $0xc9] sm:$0xff]  ;;  %v5783_v29 = vld [vmem:[#allocation2 + $0xe1] sm:$0xff] }
 0x653   :  { %5641 = vst.msk [vmem:[#allocation2 + $0x219] sm:$0xff] %vm230_vm0, %v5467_v35  ;;  %5642 = vst.msk [vmem:[#allocation2 + $0x229] sm:$0xff] %vm230_vm0, %v5468_v15  ;;  %13593 = vmatmul.mubr.msk.bf16.vlgmr.msra.gmra.mrb[0].mxu1 %vm230_vm0, %v5829_v2  ;;  %v5835_v48 = vpack.c.bf16 %v5779_v19, %v5778_v38  ;;  %v5836_v58 = vpack.c.bf16 %v5781_v60, %v5780_v8  ;;  %v5784_v30 = vld [vmem:[#allocation2 + $0xf1] sm:$0xff]  ;;  %v5785_v14 = vld [vmem:[#allocation2 + $0xf9] sm:$0xff]  ;;  %v5837_v57 = vpack.c.bf16 %v5783_v29, %v5782_v62 }
 0x654   :  { %5643 = vst.msk [vmem:[#allocation2 + $0x231] sm:$0xff] %vm230_vm0, %v5469_v13  ;;  %5644 = vst.msk [vmem:[#allocation2 + $0x241] sm:$0xff] %vm230_vm0, %v5470_v23  ;;  %13596 = vmatprep.mubr.msk.bf16.mxu1 %vm230_vm0, %v5830_v32  ;;  %13657 = vmatpush3.bf16.msra.mxu1 %v21728_v21  ;;  %v5838_v43 = vpack.c.bf16 %v5785_v14, %v5784_v30  ;;  %v5786_v35 = vld [vmem:[#allocation2 + $0x109] sm:$0xff]  ;;  %v5787_v15 = vld [vmem:[#allocation2 + $0x111] sm:$0xff] }
 0x655   :  { %5645 = vst.msk [vmem:[#allocation2 + $0x249] sm:$0xff] %vm230_vm0, %v5471_v53  ;;  %5646 = vst.msk [vmem:[#allocation2 + $0x259] sm:$0xff] %vm230_vm0, %v5472_v61  ;;  %13722 = vmatprep.subr.bf16.mxu1 %v18815_v25  ;;  %v5788_v13 = vld [vmem:[#allocation2 + $0x121] sm:$0xff]  ;;  %v5789_v23 = vld [vmem:[#allocation2 + $0x129] sm:$0xff]  ;;  %v5839_v53 = vpack.c.bf16 %v5787_v15, %v5786_v35 }
 0x656   :  { %5647 = vst.msk [vmem:[#allocation2 + $0x261] sm:$0xff] %vm230_vm0, %v5473_v39  ;;  %5648 = vst.msk [vmem:[#allocation2 + $0x271] sm:$0xff] %vm230_vm0, %v5474_v47  ;;  %v5840_v61 = vpack.c.bf16 %v5789_v23, %v5788_v13  ;;  %v5790_v24 = vld [vmem:[#allocation2 + $0x139] sm:$0xff]  ;;  %v5791_v39 = vld [vmem:[#allocation2 + $0x141] sm:$0xff] }
 0x657   :  { %5649 = vst.msk [vmem:[#allocation2 + $0x279] sm:$0xff] %vm230_vm0, %v5475_v22  ;;  %5650 = vst.msk [vmem:[#allocation2 + $0x289] sm:$0xff] %vm230_vm0, %v5476_v41  ;;  %v5792_v1 = vld [vmem:[#allocation2 + $0x151] sm:$0xff]  ;;  %v5793_v47 = vld [vmem:[#allocation2 + $0x159] sm:$0xff]  ;;  %v5841_v3 = vpack.c.bf16 %v5791_v39, %v5790_v24 }
 0x658   :  { %5651 = vst.msk [vmem:[#allocation2 + $0x291] sm:$0xff] %vm230_vm0, %v5477_v26  ;;  %5652 = vst.msk [vmem:[#allocation2 + $0x2a1] sm:$0xff] %vm230_vm0, %v5478_v12  ;;  %v5842_v22 = vpack.c.bf16 %v5793_v47, %v5792_v1  ;;  %v5796_v28 = vld [vmem:[#allocation2 + $0x1b1] sm:$0xff]  ;;  %v5797_v41 = vld [vmem:[#allocation2 + $0x1b9] sm:$0xff] }
 0x659   :  { %5653 = vst.msk [vmem:[#allocation2 + $0x2a9] sm:$0xff] %vm230_vm0, %v5479_v54  ;;  %5654 = vst.msk [vmem:[#allocation2 + $0x2b9] sm:$0xff] %vm230_vm0, %v5480_v5  ;;  %v5794_v46 = vld [vmem:[#allocation2 + $0x169] sm:$0xff]  ;;  %v5795_v26 = vld [vmem:[#allocation2 + $0x171] sm:$0xff]  ;;  %v5844_v12 = vpack.c.bf16 %v5797_v41, %v5796_v28 }
 0x65a   :  { %5655 = vst.msk [vmem:[#allocation2 + $0x2c1] sm:$0xff] %vm230_vm0, %v5481_v45  ;;  %5656 = vst.msk [vmem:[#allocation2 + $0x2d1] sm:$0xff] %vm230_vm0, %v5482_v63  ;;  %v5843_v50 = vpack.c.bf16 %v5795_v26, %v5794_v46  ;;  %v5798_v54 = vld [vmem:[#allocation2 + $0x1c9] sm:$0xff]  ;;  %v5799_v5 = vld [vmem:[#allocation2 + $0x1d1] sm:$0xff] }
 0x65b   :  { %5657 = vst.msk [vmem:[#allocation2 + $0x2d9] sm:$0xff] %vm230_vm0, %v5483_v56  ;;  %5658 = vst.msk [vmem:[#allocation2 + $0x2e9] sm:$0xff] %vm230_vm0, %v5484_v11  ;;  %13597 = vmatmul.mubr.msk.bf16.gmra.mrb[4].mxu1 %vm230_vm0, %v5831_v51  ;;  %v5800_v45 = vld [vmem:[#allocation2 + $0x1e1] sm:$0xff]  ;;  %v5801_v63 = vld [vmem:[#allocation2 + $0x1e9] sm:$0xff]  ;;  %v5845_v37 = vpack.c.bf16 %v5799_v5, %v5798_v54 }
 0x65c   :  { %5659 = vst.msk [vmem:[#allocation2 + $0x2f1] sm:$0xff] %vm230_vm0, %v5485_v7  ;;  %5660 = vst.msk [vmem:[#allocation2 + $0x301] sm:$0xff] %vm230_vm0, %v5486_v27  ;;  %13600 = vmatprep.mubr.msk.bf16.mxu1 %vm230_vm0, %v5832_v34  ;;  %v5846_v49 = vpack.c.bf16 %v5801_v63, %v5800_v45  ;;  %v5802_v18 = vld [vmem:[#allocation2 + $0x1f9] sm:$0xff]  ;;  %v5803_v56 = vld [vmem:[#allocation2 + $0x201] sm:$0xff] }
 0x65d   :  { %5661 = vst.msk [vmem:[#allocation2 + $0x309] sm:$0xff] %vm230_vm0, %v5487_v59  ;;  %5662 = vst.msk [vmem:[#allocation2 + $0x319] sm:$0xff] %vm230_vm0, %v5488_v4  ;;  %v5804_v11 = vld [vmem:[#allocation2 + $0x211] sm:$0xff]  ;;  %v5805_v40 = vld [vmem:[#allocation2 + $0x219] sm:$0xff]  ;;  %v5847_v7 = vpack.c.bf16 %v5803_v56, %v5802_v18 }
 0x65e   :  { %5664 = vst.msk [vmem:[#allocation2 + $0x331] sm:$0xff] %vm230_vm0, %v5490_v16  ;;  %5665 = vst.msk [vmem:[#allocation2 + $0x339] sm:$0xff] %vm230_vm0, %v5491_v6  ;;  %v5848_v0 = vpack.c.bf16 %v5805_v40, %v5804_v11  ;;  %v5806_v27 = vld [vmem:[#allocation2 + $0x229] sm:$0xff]  ;;  %v5807_v59 = vld [vmem:[#allocation2 + $0x231] sm:$0xff] }
 0x65f   :  { %v5808_v4 = vld [vmem:[#allocation2 + $0x241] sm:$0xff]  ;;  %v5809_v44 = vld [vmem:[#allocation2 + $0x249] sm:$0xff]  ;;  %v5849_v16 = vpack.c.bf16 %v5807_v59, %v5806_v27  ;;  %v5810_v2 = vld [vmem:[#allocation2 + $0x259] sm:$0xff] }
 0x660   :  { %v5850_v6 = vpack.c.bf16 %v5809_v44, %v5808_v4  ;;  %v5811_v32 = vld [vmem:[#allocation2 + $0x261] sm:$0xff]  ;;  %v5812_v21 = vld [vmem:[#allocation2 + $0x271] sm:$0xff]  ;;  %v5813_v9 = vld [vmem:[#allocation2 + $0x279] sm:$0xff] }
 0x661   :  { %v5851_v52 = vpack.c.bf16 %v5811_v32, %v5810_v2  ;;  %v5852_v55 = vpack.c.bf16 %v5813_v9, %v5812_v21  ;;  %v5814_v20 = vld [vmem:[#allocation2 + $0x289] sm:$0xff]  ;;  %v5815_v51 = vld [vmem:[#allocation2 + $0x291] sm:$0xff]  ;;  %v5816_v34 = vld [vmem:[#allocation2 + $0x2a1] sm:$0xff] }
 0x662   :  { %v5817_v10 = vld [vmem:[#allocation2 + $0x2a9] sm:$0xff]  ;;  %v5853_v36 = vpack.c.bf16 %v5815_v51, %v5814_v20  ;;  %v5818_v33 = vld [vmem:[#allocation2 + $0x2b9] sm:$0xff]  ;;  %v5827_v35 = vld [vmem:[#allocation2 + $0x321] sm:$0xff] }
 0x663   :  { %13601 = vmatmul.mubr.msk.bf16.gmra.mrb[8].mxu1 %vm230_vm0, %v5833_v42  ;;  %v5854_v31 = vpack.c.bf16 %v5817_v10, %v5816_v34  ;;  %v5819_v42 = vld [vmem:[#allocation2 + $0x2c1] sm:$0xff]  ;;  %v5821_v38 = vld [vmem:[#allocation2 + $0x2d9] sm:$0xff]  ;;  %v5822_v60 = vld [vmem:[#allocation2 + $0x2e9] sm:$0xff] }
 0x664   :  { %13604 = vmatprep.mubr.msk.bf16.mxu1 %vm230_vm0, %v5834_v17  ;;  %v5820_v17 = vld [vmem:[#allocation2 + $0x2d1] sm:$0xff]  ;;  %v5855_v19 = vpack.c.bf16 %v5819_v42, %v5818_v33  ;;  %v5825_v62 = vld [vmem:[#allocation2 + $0x309] sm:$0xff]  ;;  %v5666_v14 = vld [vmem:[#allocation2] sm:$0xff] }
 0x665   :  { %v5856_v8 = vpack.c.bf16 %v5821_v38, %v5820_v17  ;;  %v5668_v23 = vld [vmem:[#allocation2 + $0x18] sm:$0xff]  ;;  %v5674_v28 = vld [vmem:[#allocation2 + $0x60] sm:$0xff]  ;;  %v5675_v41 = vld [vmem:[#allocation2 + $0x68] sm:$0xff] }
 0x666   :  { %v5671_v24 = vld [vmem:[#allocation2 + $0x38] sm:$0xff]  ;;  %v18863_v26 = vpack.c.bf16 %v5675_v41, %v5674_v28  ;;  %v5678_v54 = vld [vmem:[#allocation2 + $0x90] sm:$0xff]  ;;  %v5680_v63 = vld [vmem:[#allocation2 + $0xa8] sm:$0xff] }
 0x667   :  { %v18855_v47 = vld [vmem:[%s21512_s4 + $0x18] sm:$0xff]   ;;  %v5683_v18 = vld [vmem:[#allocation2 + $0xc8] sm:$0xff]  ;;  %v5698_v10 = vld [vmem:[#allocation2 + $0x1b0] sm:$0xff] }
 0x668   :  { %v5684_v40 = vld [vmem:[#allocation2 + $0xd8] sm:$0xff]  ;;  %v5688_v44 = vld [vmem:[#allocation2 + $0x108] sm:$0xff]  ;;  %v5697_v33 = vld [vmem:[#allocation2 + $0x170] sm:$0xff] }
 0x669   :  { %v5687_v27 = vld [vmem:[#allocation2 + $0xf8] sm:$0xff]  ;;  %v5691_v2 = vld [vmem:[#allocation2 + $0x128] sm:$0xff] }
 0x66a   :  { %v5692_v9 = vld [vmem:[#allocation2 + $0x138] sm:$0xff]  ;;  %v5700_v38 = vld [vmem:[#allocation2 + $0x1c8] sm:$0xff] }
 0x66b   :  { %13605 = vmatmul.mubr.msk.bf16.gmra.mrb[12].mxu1 %vm230_vm0, %v5835_v48  ;;  %v5823_v48 = vld [vmem:[#allocation2 + $0x2f1] sm:$0xff] }
 0x66c   :  { %13608 = vmatprep.mubr.msk.bf16.mxu1 %vm230_vm0, %v5836_v58  ;;  %v5824_v58 = vld [vmem:[#allocation2 + $0x301] sm:$0xff]  ;;  %v5857_v29 = vpack.c.bf16 %v5823_v48, %v5822_v60  ;;  %v5695_v20 = vld [vmem:[#allocation2 + $0x158] sm:$0xff] }
 0x66d   :  { %v5858_v30 = vpack.c.bf16 %v5825_v62, %v5824_v58  ;;  %v5703_v60 = vld [vmem:[#allocation2 + $0x1e8] sm:$0xff]  ;;  %v5704_v62 = vld [vmem:[#allocation2 + $0x1f8] sm:$0xff] }
 0x66e   :  { %v5715_v28 = vld [vmem:[#allocation2 + $0x278] sm:$0xff] }
 0x673   :  { %13609 = vmatmul.mubr.msk.bf16.gmra.mrb[16].mxu1 %vm230_vm0, %v5837_v57  ;;  %v5667_v57 = vld [vmem:[#allocation2 + $0x8] sm:$0xff] }
 0x674   :  { %13612 = vmatprep.mubr.msk.bf16.mxu1 %vm230_vm0, %v5838_v43  ;;  %v5826_v43 = vld [vmem:[#allocation2 + $0x319] sm:$0xff]  ;;  %v5730_v15 = vpack.c.bf16 %v5667_v57, %v5666_v14 }
 0x675   :  { %v5859_v13 = vpack.c.bf16 %v5827_v35, %v5826_v43  ;;  %v5707_v14 = vld [vmem:[#allocation2 + $0x218] sm:$0xff]  ;;  %v5708_v35 = vld [vmem:[#allocation2 + $0x228] sm:$0xff] }
 0x67b   :  { %13613 = vmatmul.mubr.msk.bf16.gmra.mrb[20].mxu1 %vm230_vm0, %v5839_v53  ;;  %v5669_v53 = vld [vmem:[#allocation2 + $0x20] sm:$0xff] }
 0x67c   :  { %13616 = vmatprep.mubr.msk.bf16.mxu1 %vm230_vm0, %v5840_v61  ;;  %v5670_v61 = vld [vmem:[#allocation2 + $0x30] sm:$0xff]  ;;  %v18846_v39 = vpack.c.bf16 %v5669_v53, %v5668_v23  ;;  %v5711_v23 = vld [vmem:[#allocation2 + $0x248] sm:$0xff] }
 0x67d   :  { %v18848_v1 = vpack.c.bf16 %v5671_v24, %v5670_v61  ;;  %v5712_v24 = vld [vmem:[#allocation2 + $0x258] sm:$0xff] }
 0x683   :  { %13617 = vmatmul.mubr.msk.bf16.gmra.mrb[24].mxu1 %vm230_vm0, %v5841_v3  ;;  %v5672_v3 = vld [vmem:[#allocation2 + $0x48] sm:$0xff] }
 0x684   :  { %13620 = vmatprep.mubr.msk.bf16.mxu1 %vm230_vm0, %v5842_v22  ;;  %v5673_v22 = vld [vmem:[#allocation2 + $0x50] sm:$0xff] }
 0x685   :  { %v18861_v46 = vpack.c.bf16 %v5673_v22, %v5672_v3  ;;  %v5713_v3 = vld [vmem:[#allocation2 + $0x260] sm:$0xff]  ;;  %v5714_v22 = vld [vmem:[#allocation2 + $0x270] sm:$0xff] }
 0x686   :  { %v18938_v41 = vpack.c.bf16 %v5713_v3, %v5712_v24  ;;  %v6655_v3 = vld [vmem:[#allocation2 + $0x7a] sm:$0xff] }
 0x68b   :  { %13621 = vmatmul.mubr.msk.bf16.gmra.mrb[28].mxu1 %vm230_vm0, %v5843_v50  ;;  %v5677_v50 = vld [vmem:[#allocation2 + $0x80] sm:$0xff] }
 0x68c   :  { %13624 = vmatprep.mubr.msk.bf16.mxu1 %vm230_vm0, %v5844_v12  ;;  %v5676_v12 = vld [vmem:[#allocation2 + $0x78] sm:$0xff] }
 0x68d   :  { %v18869_v5 = vpack.c.bf16 %v5677_v50, %v5676_v12  ;;  %v18940_v12 = vpack.c.bf16 %v5715_v28, %v5714_v22  ;;  %v5716_v50 = vld [vmem:[#allocation2 + $0x288] sm:$0xff]  ;;  %v6657_v28 = vld [vmem:[#allocation2 + $0x92] sm:$0xff] }
 0x68e   :  { %v6656_v22 = vld [vmem:[#allocation2 + $0x82] sm:$0xff] }
 0x693   :  { %13625 = vmatmul.mubr.msk.bf16.gmra.mrb[32].mxu1 %vm230_vm0, %v5845_v37  ;;  %v5681_v37 = vld [vmem:[#allocation2 + $0xb0] sm:$0xff] }
 0x694   :  { %13628 = vmatprep.mubr.msk.bf16.mxu1 %vm230_vm0, %v5846_v49  ;;  %v5682_v49 = vld [vmem:[#allocation2 + $0xc0] sm:$0xff]  ;;  %v18877_v56 = vpack.c.bf16 %v5681_v37, %v5680_v63  ;;  %v5719_v63 = vld [vmem:[#allocation2 + $0x2a8] sm:$0xff] }
 0x695   :  { %v18879_v11 = vpack.c.bf16 %v5683_v18, %v5682_v49  ;;  %v5720_v18 = vld [vmem:[#allocation2 + $0x2b8] sm:$0xff] }
 0x69b   :  { %13629 = vmatmul.mubr.msk.bf16.gmra.mrb[36].mxu1 %vm230_vm0, %v5847_v7  ;;  %v5685_v7 = vld [vmem:[#allocation2 + $0xe0] sm:$0xff] }
 0x69c   :  { %13632 = vmatprep.mubr.msk.bf16.mxu1 %vm230_vm0, %v5848_v0  ;;  %v5686_v0 = vld [vmem:[#allocation2 + $0xf0] sm:$0xff]  ;;  %v18885_v59 = vpack.c.bf16 %v5685_v7, %v5684_v40  ;;  %v5721_v40 = vld [vmem:[#allocation2 + $0x2c0] sm:$0xff] }
 0x69d   :  { %v18887_v4 = vpack.c.bf16 %v5687_v27, %v5686_v0  ;;  %v5722_v7 = vld [vmem:[#allocation2 + $0x2d0] sm:$0xff]  ;;  %v5723_v0 = vld [vmem:[#allocation2 + $0x2d8] sm:$0xff]  ;;  %v18954_v27 = vpack.c.bf16 %v5721_v40, %v5720_v18  ;;  %v6661_v18 = vld [vmem:[#allocation2 + $0xc2] sm:$0xff] }
 0x69e   :  { %v6662_v40 = vld [vmem:[#allocation2 + $0xca] sm:$0xff] }
 0x6a3   :  { %13633 = vmatmul.mubr.msk.bf16.gmra.mrb[40].mxu1 %vm230_vm0, %v5849_v16  ;;  %v5689_v16 = vld [vmem:[#allocation2 + $0x110] sm:$0xff] }
 0x6a4   :  { %13636 = vmatprep.mubr.msk.bf16.mxu1 %vm230_vm0, %v5850_v6  ;;  %v5690_v6 = vld [vmem:[#allocation2 + $0x120] sm:$0xff]  ;;  %v18893_v32 = vpack.c.bf16 %v5689_v16, %v5688_v44  ;;  %v18956_v44 = vpack.c.bf16 %v5723_v0, %v5722_v7  ;;  %v5724_v16 = vld [vmem:[#allocation2 + $0x2e8] sm:$0xff]  ;;  %v19008_v0 = vpack.c.bf16 %v6662_v40, %v6661_v18 }
 0x6a5   :  { %v18895_v21 = vpack.c.bf16 %v5691_v2, %v5690_v6  ;;  %v5725_v6 = vld [vmem:[#allocation2 + $0x2f0] sm:$0xff]  ;;  %v5726_v2 = vld [vmem:[#allocation2 + $0x300] sm:$0xff] }
 0x6a6   :  { %v6679_v40 = vld [vmem:[#allocation2 + $0x1ca] sm:$0xff] }
 0x6ab   :  { %13637 = vmatmul.mubr.msk.bf16.gmra.mrb[44].mxu1 %vm230_vm0, %v5851_v52  ;;  %v5693_v52 = vld [vmem:[#allocation2 + $0x140] sm:$0xff] }
 0x6ac   :  { %13640 = vmatprep.mubr.msk.bf16.mxu1 %vm230_vm0, %v5852_v55  ;;  %v5694_v55 = vld [vmem:[#allocation2 + $0x150] sm:$0xff]  ;;  %v18901_v51 = vpack.c.bf16 %v5693_v52, %v5692_v9  ;;  %v5727_v9 = vld [vmem:[#allocation2 + $0x308] sm:$0xff]  ;;  %v18962_v52 = vpack.c.bf16 %v5725_v6, %v5724_v16  ;;  %v6663_v16 = vld [vmem:[#allocation2 + $0xda] sm:$0xff] }
 0x6ad   :  { %v18903_v34 = vpack.c.bf16 %v5695_v20, %v5694_v55  ;;  %v18964_v55 = vpack.c.bf16 %v5727_v9, %v5726_v2  ;;  %v6645_v20 = vld [vmem:[#allocation2 + $0x2] sm:$0xff]  ;;  %v6665_v2 = vld [vmem:[#allocation2 + $0xf2] sm:$0xff]  ;;  %v6666_v9 = vld [vmem:[#allocation2 + $0xfa] sm:$0xff] }
 0x6ae   :  { %v6664_v6 = vld [vmem:[#allocation2 + $0xe2] sm:$0xff] }
 0x6b3   :  { %13641 = vmatmul.mubr.msk.bf16.gmra.mrb[48].mxu1 %vm230_vm0, %v5853_v36  ;;  %v5699_v36 = vld [vmem:[#allocation2 + $0x1b8] sm:$0xff] }
 0x6b4   :  { %13644 = vmatprep.mubr.msk.bf16.mxu1 %vm230_vm0, %v5854_v31  ;;  %v5696_v31 = vld [vmem:[#allocation2 + $0x168] sm:$0xff]  ;;  %v5746_v42 = vpack.c.bf16 %v5699_v36, %v5698_v10  ;;  %v5728_v36 = vld [vmem:[#allocation2 + $0x318] sm:$0xff] }
 0x6b5   :  { %v18909_v17 = vpack.c.bf16 %v5697_v33, %v5696_v31  ;;  %v6646_v10 = vld [vmem:[#allocation2 + $0xa] sm:$0xff]  ;;  %v5729_v31 = vld [vmem:[#allocation2 + $0x320] sm:$0xff] }
 0x6b6   :  { %v6709_v33 = vpack.c.bf16 %v6646_v10, %v6645_v20  ;;  %v19014_v20 = vpack.c.bf16 %v6664_v6, %v6663_v16  ;;  %v19016_v10 = vpack.c.bf16 %v6666_v9, %v6665_v2  ;;  %v6680_v16 = vld [vmem:[#allocation2 + $0x1d2] sm:$0xff]  ;;  %v6681_v6 = vld [vmem:[#allocation2 + $0x1e2] sm:$0xff]  ;;  %v6682_v2 = vld [vmem:[#allocation2 + $0x1ea] sm:$0xff] }
 0x6b7   :  { %v19043_v9 = vpack.c.bf16 %v6680_v16, %v6679_v40  ;;  %v6691_v40 = vld [vmem:[#allocation2 + $0x25a] sm:$0xff]  ;;  %v6692_v16 = vld [vmem:[#allocation2 + $0x262] sm:$0xff] }
 0x6bb   :  { %13645 = vmatmul.mubr.msk.bf16.gmra.mrb[52].mxu1 %vm230_vm0, %v5855_v19  ;;  %v5701_v19 = vld [vmem:[#allocation2 + $0x1d0] sm:$0xff] }
 0x6bc   :  { %13648 = vmatprep.mubr.msk.bf16.mxu1 %vm230_vm0, %v5856_v8  ;;  %v5702_v8 = vld [vmem:[#allocation2 + $0x1e0] sm:$0xff]  ;;  %v18914_v48 = vpack.c.bf16 %v5701_v19, %v5700_v38 }
 0x6bd   :  { %v18916_v58 = vpack.c.bf16 %v5703_v60, %v5702_v8  ;;  %v6647_v38 = vld [vmem:[#allocation2 + $0x1a] sm:$0xff]  ;;  %v6648_v19 = vld [vmem:[#allocation2 + $0x22] sm:$0xff]  ;;  %v6649_v8 = vld [vmem:[#allocation2 + $0x32] sm:$0xff] }
 0x6be   :  { %v6650_v60 = vld [vmem:[#allocation2 + $0x3a] sm:$0xff] }
 0x6c3   :  { %13649 = vmatmul.mubr.msk.bf16.gmra.mrb[56].mxu1 %vm230_vm0, %v5857_v29  ;;  %v5705_v29 = vld [vmem:[#allocation2 + $0x200] sm:$0xff] }
 0x6c4   :  { %13652 = vmatprep.mubr.msk.bf16.mxu1 %vm230_vm0, %v5858_v30  ;;  %v5706_v30 = vld [vmem:[#allocation2 + $0x210] sm:$0xff]  ;;  %v18922_v57 = vpack.c.bf16 %v5705_v29, %v5704_v62  ;;  %v18975_v62 = vpack.c.bf16 %v6648_v19, %v6647_v38  ;;  %v18977_v29 = vpack.c.bf16 %v6650_v60, %v6649_v8  ;;  %v6671_v60 = vld [vmem:[#allocation2 + $0x13a] sm:$0xff] }
 0x6c5   :  { %v18924_v43 = vpack.c.bf16 %v5707_v14, %v5706_v30  ;;  %v18984_v30 = vld [vmem:[%s21512_s4 + $0x20] sm:$0xff]   ;;  %v6651_v14 = vld [vmem:[#allocation2 + $0x4a] sm:$0xff] }
 0x6c6   :  { %v6670_v38 = vld [vmem:[#allocation2 + $0x12a] sm:$0xff] }
 0x6cb   :  { %13653 = vmatmul.mubr.msk.bf16.gmra.mrb[60].mxu1 %vm230_vm0, %v5859_v13  ;;  %v5710_v13 = vld [vmem:[#allocation2 + $0x240] sm:$0xff] }
 0x6cc   :  { %13658 = vmatprep.mubr.msk.bf16.mxu1 %vm230_vm0, %v5730_v15  ;;  %v5709_v15 = vld [vmem:[#allocation2 + $0x230] sm:$0xff]  ;;  %v18932_v61 = vpack.c.bf16 %v5711_v23, %v5710_v13 }
 0x6cd   :  { %v18930_v53 = vpack.c.bf16 %v5709_v15, %v5708_v35  ;;  %v6652_v35 = vld [vmem:[#allocation2 + $0x52] sm:$0xff]  ;;  %v6653_v15 = vld [vmem:[#allocation2 + $0x62] sm:$0xff]  ;;  %v6654_v13 = vld [vmem:[#allocation2 + $0x6a] sm:$0xff] }
 0x6ce   :  { %v18990_v23 = vpack.c.bf16 %v6652_v35, %v6651_v14  ;;  %v18992_v24 = vpack.c.bf16 %v6654_v13, %v6653_v15  ;;  %v6672_v14 = vld [vmem:[#allocation2 + $0x142] sm:$0xff]  ;;  %v6673_v35 = vld [vmem:[#allocation2 + $0x152] sm:$0xff]  ;;  %v6674_v15 = vld [vmem:[#allocation2 + $0x15a] sm:$0xff] }
 0x6cf   :  { %v19030_v13 = vpack.c.bf16 %v6672_v14, %v6671_v60  ;;  %v6686_v60 = vld [vmem:[#allocation2 + $0x21a] sm:$0xff] }
 0x6d3   :  { %13659 = vmatmul.mubr.msk.bf16.vlgmr.msra.gmra.mrb[0].mxu1 %vm230_vm0, %v18846_v39 }
 0x6d4   :  { %13662 = vmatprep.mubr.msk.bf16.mxu1 %vm230_vm0, %v18848_v1  ;;  %13723 = vmatpush3.bf16.msra.mxu1 %v18815_v25  ;;  %v5679_v25 = vld [vmem:[#allocation2 + $0x98] sm:$0xff] }
 0x6d5   :  { %13788 = vmatprep.subr.bf16.mxu1 %v18855_v47  ;;  %v18871_v45 = vpack.c.bf16 %v5679_v25, %v5678_v54  ;;  %v5717_v54 = vld [vmem:[#allocation2 + $0x290] sm:$0xff]  ;;  %v5718_v25 = vld [vmem:[#allocation2 + $0x2a0] sm:$0xff] }
 0x6d6   :  { %v18946_v37 = vpack.c.bf16 %v5717_v54, %v5716_v50  ;;  %v18948_v49 = vpack.c.bf16 %v5719_v63, %v5718_v25  ;;  %v18998_v50 = vpack.c.bf16 %v6656_v22, %v6655_v3  ;;  %v6659_v25 = vld [vmem:[#allocation2 + $0xaa] sm:$0xff]  ;;  %v6660_v63 = vld [vmem:[#allocation2 + $0xb2] sm:$0xff]  ;;  %v19032_v3 = vpack.c.bf16 %v6674_v15, %v6673_v35 }
 0x6d7   :  { %v19006_v7 = vpack.c.bf16 %v6660_v63, %v6659_v25  ;;  %v6677_v22 = vld [vmem:[#allocation2 + $0x1b2] sm:$0xff]  ;;  %v6687_v15 = vld [vmem:[#allocation2 + $0x22a] sm:$0xff] }
 0x6d8   :  { %v6676_v25 = vld [vmem:[#allocation2 + $0x172] sm:$0xff] }
 0x6db   :  { %13663 = vmatmul.mubr.msk.bf16.gmra.mrb[4].mxu1 %vm230_vm0, %v18861_v46 }
 0x6dc   :  { %13666 = vmatprep.mubr.msk.bf16.mxu1 %vm230_vm0, %v18863_v26 }
 0x6e3   :  { %13667 = vmatmul.mubr.msk.bf16.gmra.mrb[8].mxu1 %vm230_vm0, %v18869_v5 }
 0x6e4   :  { %13670 = vmatprep.mubr.msk.bf16.mxu1 %vm230_vm0, %v18871_v45 }
 0x6eb   :  { %13671 = vmatmul.mubr.msk.bf16.gmra.mrb[12].mxu1 %vm230_vm0, %v18877_v56 }
 0x6ec   :  { %13674 = vmatprep.mubr.msk.bf16.mxu1 %vm230_vm0, %v18879_v11 }
 0x6f3   :  { %13675 = vmatmul.mubr.msk.bf16.gmra.mrb[16].mxu1 %vm230_vm0, %v18885_v59 }
 0x6f4   :  { %13678 = vmatprep.mubr.msk.bf16.mxu1 %vm230_vm0, %v18887_v4 }
 0x6fb   :  { %13679 = vmatmul.mubr.msk.bf16.gmra.mrb[20].mxu1 %vm230_vm0, %v18893_v32 }
 0x6fc   :  { %13682 = vmatprep.mubr.msk.bf16.mxu1 %vm230_vm0, %v18895_v21 }
 0x703   :  { %13683 = vmatmul.mubr.msk.bf16.gmra.mrb[24].mxu1 %vm230_vm0, %v18901_v51 }
 0x704   :  { %13686 = vmatprep.mubr.msk.bf16.mxu1 %vm230_vm0, %v18903_v34 }
 0x70b   :  { %13687 = vmatmul.mubr.msk.bf16.gmra.mrb[28].mxu1 %vm230_vm0, %v18909_v17 }
 0x70c   :  { %13690 = vmatprep.mubr.msk.bf16.mxu1 %vm230_vm0, %v5746_v42  ;;  %v18970_v42 = vpack.c.bf16 %v5729_v31, %v5728_v36  ;;  %v6667_v36 = vld [vmem:[#allocation2 + $0x10a] sm:$0xff]  ;;  %v6668_v31 = vld [vmem:[#allocation2 + $0x112] sm:$0xff] }
 0x70d   :  { %v19022_v19 = vpack.c.bf16 %v6668_v31, %v6667_v36  ;;  %v19045_v36 = vpack.c.bf16 %v6682_v2, %v6681_v6  ;;  %v6683_v31 = vld [vmem:[#allocation2 + $0x1fa] sm:$0xff]  ;;  %v6693_v6 = vld [vmem:[#allocation2 + $0x272] sm:$0xff] }
 0x70e   :  { %v6694_v2 = vld [vmem:[#allocation2 + $0x27a] sm:$0xff] }
 0x713   :  { %13691 = vmatmul.mubr.msk.bf16.gmra.mrb[32].mxu1 %vm230_vm0, %v18914_v48 }
 0x714   :  { %13694 = vmatprep.mubr.msk.bf16.mxu1 %vm230_vm0, %v18916_v58 }
 0x71b   :  { %13695 = vmatmul.mubr.msk.bf16.gmra.mrb[36].mxu1 %vm230_vm0, %v18922_v57 }
 0x71c   :  { %13698 = vmatprep.mubr.msk.bf16.mxu1 %vm230_vm0, %v18924_v43 }
 0x723   :  { %13699 = vmatmul.mubr.msk.bf16.gmra.mrb[40].mxu1 %vm230_vm0, %v18930_v53 }
 0x724   :  { %13702 = vmatprep.mubr.msk.bf16.mxu1 %vm230_vm0, %v18932_v61 }
 0x72b   :  { %13703 = vmatmul.mubr.msk.bf16.gmra.mrb[44].mxu1 %vm230_vm0, %v18938_v41 }
 0x72c   :  { %13706 = vmatprep.mubr.msk.bf16.mxu1 %vm230_vm0, %v18940_v12 }
 0x733   :  { %13707 = vmatmul.mubr.msk.bf16.gmra.mrb[48].mxu1 %vm230_vm0, %v18946_v37 }
 0x734   :  { %13710 = vmatprep.mubr.msk.bf16.mxu1 %vm230_vm0, %v18948_v49 }
 0x73b   :  { %13711 = vmatmul.mubr.msk.bf16.gmra.mrb[52].mxu1 %vm230_vm0, %v18954_v27 }
 0x73c   :  { %13714 = vmatprep.mubr.msk.bf16.mxu1 %vm230_vm0, %v18956_v44 }
 0x743   :  { %13715 = vmatmul.mubr.msk.bf16.gmra.mrb[56].mxu1 %vm230_vm0, %v18962_v52 }
 0x744   :  { %13718 = vmatprep.mubr.msk.bf16.mxu1 %vm230_vm0, %v18964_v55 }
 0x74b   :  { %13719 = vmatmul.mubr.msk.bf16.gmra.mrb[60].mxu1 %vm230_vm0, %v18970_v42 }
 0x74c   :  { %13724 = vmatprep.mubr.msk.bf16.mxu1 %vm230_vm0, %v6709_v33  ;;  %v6669_v33 = vld [vmem:[#allocation2 + $0x122] sm:$0xff] }
 0x74d   :  { %v19024_v8 = vpack.c.bf16 %v6670_v38, %v6669_v33  ;;  %v6684_v33 = vld [vmem:[#allocation2 + $0x202] sm:$0xff]  ;;  %v6685_v38 = vld [vmem:[#allocation2 + $0x212] sm:$0xff] }
 0x74e   :  { %v19051_v14 = vpack.c.bf16 %v6684_v33, %v6683_v31  ;;  %v19053_v35 = vpack.c.bf16 %v6686_v60, %v6685_v38  ;;  %v19067_v31 = vpack.c.bf16 %v6692_v16, %v6691_v40  ;;  %v19069_v33 = vpack.c.bf16 %v6694_v2, %v6693_v6  ;;  %v6695_v38 = vld [vmem:[#allocation2 + $0x28a] sm:$0xff]  ;;  %v6696_v60 = vld [vmem:[#allocation2 + $0x292] sm:$0xff]  ;;  %v6699_v40 = vld [vmem:[#allocation2 + $0x2ba] sm:$0xff] }
 0x74f   :  { %v6700_v16 = vld [vmem:[#allocation2 + $0x2c2] sm:$0xff]  ;;  %v6701_v6 = vld [vmem:[#allocation2 + $0x2d2] sm:$0xff]  ;;  %v6702_v2 = vld [vmem:[#allocation2 + $0x2da] sm:$0xff] }
 0x750   :  { %21729 = vst [vmem:[#allocation9_spill] sm:$0xff] %v19067_v31  ;;  %21730 = vst [vmem:[#allocation11_spill] sm:$0xff] %v19069_v33 }
 0x753   :  { %13725 = vmatmul.mubr.msk.bf16.vlgmr.msra.gmra.mrb[0].mxu1 %vm230_vm0, %v18975_v62 }
 0x754   :  { %13728 = vmatprep.mubr.msk.bf16.mxu1 %vm230_vm0, %v18977_v29  ;;  %13789 = vmatpush3.bf16.msra.mxu1 %v18855_v47  ;;  %v6658_v47 = vld [vmem:[#allocation2 + $0x9a] sm:$0xff] }
 0x755   :  { %13854 = vmatprep.subr.bf16.mxu1 %v18984_v30  ;;  %v19000_v54 = vpack.c.bf16 %v6658_v47, %v6657_v28  ;;  %v6678_v28 = vld [vmem:[#allocation2 + $0x1ba] sm:$0xff]  ;;  %v6675_v47 = vld [vmem:[#allocation2 + $0x16a] sm:$0xff] }
 0x756   :  { %v6725_v63 = vpack.c.bf16 %v6678_v28, %v6677_v22  ;;  %v19038_v18 = vpack.c.bf16 %v6676_v25, %v6675_v47  ;;  %v6688_v22 = vld [vmem:[#allocation2 + $0x232] sm:$0xff]  ;;  %v6689_v28 = vld [vmem:[#allocation2 + $0x242] sm:$0xff]  ;;  %v6690_v47 = vld [vmem:[#allocation2 + $0x24a] sm:$0xff] }
 0x757   :  { %v19059_v25 = vpack.c.bf16 %v6688_v22, %v6687_v15  ;;  %v6697_v15 = vld [vmem:[#allocation2 + $0x2a2] sm:$0xff]  ;;  %v6698_v22 = vld [vmem:[#allocation2 + $0x2aa] sm:$0xff] }
 0x75b   :  { %13729 = vmatmul.mubr.msk.bf16.gmra.mrb[4].mxu1 %vm230_vm0, %v18990_v23 }
 0x75c   :  { %13732 = vmatprep.mubr.msk.bf16.mxu1 %vm230_vm0, %v18992_v24 }
 0x763   :  { %13733 = vmatmul.mubr.msk.bf16.gmra.mrb[8].mxu1 %vm230_vm0, %v18998_v50 }
 0x764   :  { %13736 = vmatprep.mubr.msk.bf16.mxu1 %vm230_vm0, %v19000_v54 }
 0x76b   :  { %13737 = vmatmul.mubr.msk.bf16.gmra.mrb[12].mxu1 %vm230_vm0, %v19006_v7 }
 0x76c   :  { %13740 = vmatprep.mubr.msk.bf16.mxu1 %vm230_vm0, %v19008_v0 }
 0x773   :  { %13741 = vmatmul.mubr.msk.bf16.gmra.mrb[16].mxu1 %vm230_vm0, %v19014_v20 }
 0x774   :  { %13744 = vmatprep.mubr.msk.bf16.mxu1 %vm230_vm0, %v19016_v10 }
 0x77b   :  { %13745 = vmatmul.mubr.msk.bf16.gmra.mrb[20].mxu1 %vm230_vm0, %v19022_v19 }
 0x77c   :  { %13748 = vmatprep.mubr.msk.bf16.mxu1 %vm230_vm0, %v19024_v8 }
 0x783   :  { %13749 = vmatmul.mubr.msk.bf16.gmra.mrb[24].mxu1 %vm230_vm0, %v19030_v13 }
 0x784   :  { %13752 = vmatprep.mubr.msk.bf16.mxu1 %vm230_vm0, %v19032_v3 }
 0x78b   :  { %13753 = vmatmul.mubr.msk.bf16.gmra.mrb[28].mxu1 %vm230_vm0, %v19038_v18 }
 0x78c   :  { %13756 = vmatprep.mubr.msk.bf16.mxu1 %vm230_vm0, %v6725_v63  ;;  %v19061_v63 = vpack.c.bf16 %v6690_v47, %v6689_v28  ;;  %v19075_v28 = vpack.c.bf16 %v6696_v60, %v6695_v38  ;;  %v19077_v47 = vpack.c.bf16 %v6698_v22, %v6697_v15  ;;  %v6703_v38 = vld [vmem:[#allocation2 + $0x2ea] sm:$0xff]  ;;  %v6704_v60 = vld [vmem:[#allocation2 + $0x2f2] sm:$0xff]  ;;  %v6705_v15 = vld [vmem:[#allocation2 + $0x302] sm:$0xff] }
 0x78d   :  { %v6706_v22 = vld [vmem:[#allocation2 + $0x30a] sm:$0xff] }
 0x78e   :  { %21731 = vst [vmem:[#allocation8_spill] sm:$0xff] %v19075_v28  ;;  %21732 = vst [vmem:[#allocation10_spill] sm:$0xff] %v19077_v47 }
 0x793   :  { %13757 = vmatmul.mubr.msk.bf16.gmra.mrb[32].mxu1 %vm230_vm0, %v19043_v9 }
 0x794   :  { %13760 = vmatprep.mubr.msk.bf16.mxu1 %vm230_vm0, %v19045_v36 }
 0x79b   :  { %13761 = vmatmul.mubr.msk.bf16.gmra.mrb[36].mxu1 %vm230_vm0, %v19051_v14 }
 0x79c   :  { %13764 = vmatprep.mubr.msk.bf16.mxu1 %vm230_vm0, %v19053_v35 }
 0x7a3   :  { %13765 = vmatmul.mubr.msk.bf16.gmra.mrb[40].mxu1 %vm230_vm0, %v19059_v25 }
 0x7a4   :  { %13768 = vmatprep.mubr.msk.bf16.mxu1 %vm230_vm0, %v19061_v63 }
 0x7ab   :  { %13769 = vmatmul.mubr.msk.bf16.gmra.mrb[44].mxu1 %vm230_vm0, %v19067_v31  ;;  %v19083_v31 = vpack.c.bf16 %v6700_v16, %v6699_v40  ;;  %v6707_v40 = vld [vmem:[#allocation2 + $0x31a] sm:$0xff]  ;;  %v6708_v16 = vld [vmem:[#allocation2 + $0x322] sm:$0xff] }
 0x7ac   :  { %13772 = vmatprep.mubr.msk.bf16.mxu1 %vm230_vm0, %v19069_v33  ;;  %v19085_v33 = vpack.c.bf16 %v6702_v2, %v6701_v6  ;;  %v19099_v6 = vpack.c.bf16 %v6708_v16, %v6707_v40  ;;  %v15223_v2 = vld [vmem:[%s21512_s4 + $0x28] sm:$0xff]   ;;  %v7772_v40 = vld [vmem:[#allocation2 + $0xf9] sm:$0xff] }
 0x7ad   :  { %v7773_v16 = vld [vmem:[#allocation2 + $0x109] sm:$0xff] }
 0x7b3   :  { %13773 = vmatmul.mubr.msk.bf16.gmra.mrb[48].mxu1 %vm230_vm0, %v19075_v28  ;;  %v19091_v28 = vpack.c.bf16 %v6704_v60, %v6703_v38  ;;  %v7770_v38 = vld [vmem:[#allocation2 + $0xe1] sm:$0xff] }
 0x7b4   :  { %13776 = vmatprep.mubr.msk.bf16.mxu1 %vm230_vm0, %v19077_v47  ;;  %v19093_v47 = vpack.c.bf16 %v6706_v22, %v6705_v15  ;;  %v7771_v22 = vld [vmem:[#allocation2 + $0xf1] sm:$0xff] }
 0x7bb   :  { %13777 = vmatmul.mubr.msk.bf16.gmra.mrb[52].mxu1 %vm230_vm0, %v19083_v31 }
 0x7bc   :  { %13780 = vmatprep.mubr.msk.bf16.mxu1 %vm230_vm0, %v19085_v33 }
 0x7c3   :  { %13781 = vmatmul.mubr.msk.bf16.gmra.mrb[56].mxu1 %vm230_vm0, %v19091_v28 }
 0x7c4   :  { %13784 = vmatprep.mubr.msk.bf16.mxu1 %vm230_vm0, %v19093_v47 }
 0x7cb   :  { %13785 = vmatmul.mubr.msk.bf16.gmra.mrb[60].mxu1 %vm230_vm0, %v19099_v6 }
 0x7cc   :  { %13790 = vmatprep.mubr.msk.bf16.mxu1 %vm230_vm0, %v18846_v39  ;;  %v7229_v39 = vld [vmem:[#allocation2 + $0x180] sm:$0xff] }
 0x7d3   :  { %13791 = vmatmul.mubr.msk.bf16.vlgmr.msra.gmra.mrb[0].mxu1 %vm230_vm0, %v18848_v1  ;;  %v7230_v1 = vld [vmem:[#allocation2 + $0x188] sm:$0xff] }
 0x7d4   :  { %13794 = vmatprep.mubr.msk.bf16.mxu1 %vm230_vm0, %v18861_v46  ;;  %13855 = vmatpush3.bf16.msra.mxu1 %v18984_v30  ;;  %v19137_v46 = vpack.c.bf16 %v7230_v1, %v7229_v39  ;;  %v7769_v30 = vld [vmem:[#allocation2 + $0xd9] sm:$0xff]  ;;  %v19214_v39 = vpack.c.bf16 %v7772_v40, %v7771_v22  ;;  %v7790_v22 = vld [vmem:[#allocation2 + $0x201] sm:$0xff] }
 0x7d5   :  { %13920 = vmatprep.subr.bf16.mxu1 %v15223_v2  ;;  %v19208_v15 = vpack.c.bf16 %v7770_v38, %v7769_v30  ;;  %v7788_v30 = vld [vmem:[#allocation2 + $0x1e9] sm:$0xff]  ;;  %v7789_v38 = vld [vmem:[#allocation2 + $0x1f9] sm:$0xff] }
 0x7db   :  { %13795 = vmatmul.mubr.msk.bf16.gmra.mrb[4].mxu1 %vm230_vm0, %v18863_v26  ;;  %v7261_v26 = vld [vmem:[#allocation2 + $0x330] sm:$0xff] }
 0x7dc   :  { %13798 = vmatprep.mubr.msk.bf16.mxu1 %vm230_vm0, %v18869_v5  ;;  %v7262_v5 = vld [vmem:[#allocation2 + $0x338] sm:$0xff] }
 0x7e3   :  { %13799 = vmatmul.mubr.msk.bf16.gmra.mrb[8].mxu1 %vm230_vm0, %v18871_v45  ;;  %v7753_v45 = vld [vmem:[#allocation2 + $0x19] sm:$0xff] }
 0x7e4   :  { %13802 = vmatprep.mubr.msk.bf16.mxu1 %vm230_vm0, %v18877_v56  ;;  %v7754_v56 = vld [vmem:[#allocation2 + $0x21] sm:$0xff] }
 0x7eb   :  { %13803 = vmatmul.mubr.msk.bf16.gmra.mrb[12].mxu1 %vm230_vm0, %v18879_v11  ;;  %v19171_v11 = vpack.c.bf16 %v7262_v5, %v7261_v26  ;;  %v7775_v26 = vld [vmem:[#allocation2 + $0x121] sm:$0xff]  ;;  %v7776_v5 = vld [vmem:[#allocation2 + $0x129] sm:$0xff] }
 0x7ec   :  { %13806 = vmatprep.mubr.msk.bf16.mxu1 %vm230_vm0, %v18885_v59  ;;  %v7817_v59 = vpack.c.bf16 %v7754_v56, %v7753_v45  ;;  %v7777_v45 = vld [vmem:[#allocation2 + $0x139] sm:$0xff]  ;;  %v7778_v56 = vld [vmem:[#allocation2 + $0x141] sm:$0xff] }
 0x7f3   :  { %13807 = vmatmul.mubr.msk.bf16.gmra.mrb[16].mxu1 %vm230_vm0, %v18887_v4  ;;  %v7755_v4 = vld [vmem:[#allocation2 + $0x31] sm:$0xff] }
 0x7f4   :  { %13810 = vmatprep.mubr.msk.bf16.mxu1 %vm230_vm0, %v18893_v32  ;;  %v7756_v32 = vld [vmem:[#allocation2 + $0x39] sm:$0xff] }
 0x7fb   :  { %13811 = vmatmul.mubr.msk.bf16.gmra.mrb[20].mxu1 %vm230_vm0, %v18895_v21  ;;  %v7757_v21 = vld [vmem:[#allocation2 + $0x49] sm:$0xff] }
 0x7fc   :  { %13814 = vmatprep.mubr.msk.bf16.mxu1 %vm230_vm0, %v18901_v51  ;;  %v7758_v51 = vld [vmem:[#allocation2 + $0x51] sm:$0xff] }
 0x803   :  { %13815 = vmatmul.mubr.msk.bf16.gmra.mrb[24].mxu1 %vm230_vm0, %v18903_v34  ;;  %v19176_v34 = vpack.c.bf16 %v7756_v32, %v7755_v4  ;;  %v19224_v4 = vpack.c.bf16 %v7778_v56, %v7777_v45  ;;  %v7779_v32 = vld [vmem:[#allocation2 + $0x151] sm:$0xff] }
 0x804   :  { %13818 = vmatprep.mubr.msk.bf16.mxu1 %vm230_vm0, %v18909_v17  ;;  %v19178_v17 = vpack.c.bf16 %v7758_v51, %v7757_v21  ;;  %v7780_v21 = vld [vmem:[#allocation2 + $0x159] sm:$0xff]  ;;  %v7781_v51 = vld [vmem:[#allocation2 + $0x169] sm:$0xff]  ;;  %v7794_v45 = vld [vmem:[#allocation2 + $0x231] sm:$0xff] }
 0x80b   :  { %13819 = vmatmul.mubr.msk.bf16.gmra.mrb[28].mxu1 %vm230_vm0, %v19137_v46 }
 0x80c   :  { %13822 = vmatprep.mubr.msk.bf16.mxu1 %vm230_vm0, %v18914_v48  ;;  %v19185_v48 = vld [vmem:[%s21512_s4 + $0x30] sm:$0xff]  }
 0x813   :  { %13823 = vmatmul.mubr.msk.bf16.gmra.mrb[32].mxu1 %vm230_vm0, %v18916_v58  ;;  %v7759_v58 = vld [vmem:[#allocation2 + $0x61] sm:$0xff] }
 0x814   :  { %13826 = vmatprep.mubr.msk.bf16.mxu1 %vm230_vm0, %v18922_v57  ;;  %v7760_v57 = vld [vmem:[#allocation2 + $0x69] sm:$0xff] }
 0x81b   :  { %13827 = vmatmul.mubr.msk.bf16.gmra.mrb[36].mxu1 %vm230_vm0, %v18924_v43  ;;  %v7761_v43 = vld [vmem:[#allocation2 + $0x79] sm:$0xff] }
 0x81c   :  { %13830 = vmatprep.mubr.msk.bf16.mxu1 %vm230_vm0, %v18930_v53  ;;  %v7762_v53 = vld [vmem:[#allocation2 + $0x81] sm:$0xff] }
 0x823   :  { %13831 = vmatmul.mubr.msk.bf16.gmra.mrb[40].mxu1 %vm230_vm0, %v18932_v61  ;;  %v19190_v61 = vpack.c.bf16 %v7760_v57, %v7759_v58  ;;  %v7782_v58 = vld [vmem:[#allocation2 + $0x171] sm:$0xff]  ;;  %v19230_v57 = vpack.c.bf16 %v7780_v21, %v7779_v32  ;;  %v7795_v21 = vld [vmem:[#allocation2 + $0x241] sm:$0xff] }
 0x824   :  { %13834 = vmatprep.mubr.msk.bf16.mxu1 %vm230_vm0, %v18938_v41  ;;  %v19192_v41 = vpack.c.bf16 %v7762_v53, %v7761_v43  ;;  %v19232_v43 = vpack.c.bf16 %v7782_v58, %v7781_v51  ;;  %v7783_v53 = vld [vmem:[#allocation2 + $0x181] sm:$0xff]  ;;  %v7796_v51 = vld [vmem:[#allocation2 + $0x249] sm:$0xff]  ;;  %v7797_v58 = vld [vmem:[#allocation2 + $0x259] sm:$0xff] }
 0x82b   :  { %13835 = vmatmul.mubr.msk.bf16.gmra.mrb[44].mxu1 %vm230_vm0, %v18940_v12  ;;  %v7763_v12 = vld [vmem:[#allocation2 + $0x91] sm:$0xff] }
 0x82c   :  { %13838 = vmatprep.mubr.msk.bf16.mxu1 %vm230_vm0, %v18946_v37  ;;  %v7764_v37 = vld [vmem:[#allocation2 + $0x99] sm:$0xff] }
 0x833   :  { %13839 = vmatmul.mubr.msk.bf16.gmra.mrb[48].mxu1 %vm230_vm0, %v18948_v49  ;;  %v7765_v49 = vld [vmem:[#allocation2 + $0xa9] sm:$0xff] }
 0x834   :  { %13842 = vmatprep.mubr.msk.bf16.mxu1 %vm230_vm0, %v18954_v27  ;;  %v7766_v27 = vld [vmem:[#allocation2 + $0xb1] sm:$0xff] }
 0x83b   :  { %13843 = vmatmul.mubr.msk.bf16.gmra.mrb[52].mxu1 %vm230_vm0, %v18956_v44  ;;  %v19198_v44 = vpack.c.bf16 %v7764_v37, %v7763_v12  ;;  %v7784_v12 = vld [vmem:[#allocation2 + $0x189] sm:$0xff] }
 0x83c   :  { %13846 = vmatprep.mubr.msk.bf16.mxu1 %vm230_vm0, %v18962_v52  ;;  %v19200_v52 = vpack.c.bf16 %v7766_v27, %v7765_v49  ;;  %v7785_v37 = vld [vmem:[#allocation2 + $0x1c9] sm:$0xff]  ;;  %v7786_v49 = vld [vmem:[#allocation2 + $0x1d1] sm:$0xff]  ;;  %v19238_v27 = vpack.c.bf16 %v7784_v12, %v7783_v53  ;;  %v7798_v53 = vld [vmem:[#allocation2 + $0x261] sm:$0xff]  ;;  %v19259_v12 = vpack.c.bf16 %v7796_v51, %v7795_v21 }
 0x843   :  { %13847 = vmatmul.mubr.msk.bf16.gmra.mrb[56].mxu1 %vm230_vm0, %v18964_v55  ;;  %v7767_v55 = vld [vmem:[#allocation2 + $0xc1] sm:$0xff] }
 0x844   :  { %13850 = vmatprep.mubr.msk.bf16.mxu1 %vm230_vm0, %v18970_v42  ;;  %v7768_v42 = vld [vmem:[#allocation2 + $0xc9] sm:$0xff] }
 0x845   :  { %v19206_v60 = vpack.c.bf16 %v7768_v42, %v7767_v55  ;;  %v7833_v55 = vpack.c.bf16 %v7786_v49, %v7785_v37  ;;  %v7787_v42 = vld [vmem:[#allocation2 + $0x1e1] sm:$0xff]  ;;  %v19261_v37 = vpack.c.bf16 %v7798_v53, %v7797_v58  ;;  %v7799_v49 = vld [vmem:[#allocation2 + $0x271] sm:$0xff]  ;;  %v7808_v53 = vld [vmem:[#allocation2 + $0x2d9] sm:$0xff] }
 0x846   :  { %v19243_v40 = vpack.c.bf16 %v7788_v30, %v7787_v42  ;;  %v7801_v42 = vld [vmem:[#allocation2 + $0x289] sm:$0xff]  ;;  %v7802_v30 = vld [vmem:[#allocation2 + $0x291] sm:$0xff] }
 0x847   :  { %v7807_v58 = vld [vmem:[#allocation2 + $0x2d1] sm:$0xff] }
 0x84b   :  { %13851 = vmatmul.mubr.msk.bf16.gmra.mrb[60].mxu1 %vm230_vm0, %v19171_v11 }
 0x84c   :  { %13856 = vmatprep.mubr.msk.bf16.mxu1 %vm230_vm0, %v7817_v59  ;;  %v19222_v59 = vpack.c.bf16 %v7776_v5, %v7775_v26  ;;  %v7792_v26 = vld [vmem:[#allocation2 + $0x219] sm:$0xff]  ;;  %v7793_v5 = vld [vmem:[#allocation2 + $0x229] sm:$0xff] }
 0x84d   :  { %v19253_v32 = vpack.c.bf16 %v7794_v45, %v7793_v5  ;;  %v7805_v5 = vld [vmem:[#allocation2 + $0x2b9] sm:$0xff]  ;;  %v7806_v45 = vld [vmem:[#allocation2 + $0x2c1] sm:$0xff] }
 0x84e   :  { %v19277_v51 = vpack.c.bf16 %v7806_v45, %v7805_v5  ;;  %v7813_v5 = vld [vmem:[#allocation2 + $0x319] sm:$0xff]  ;;  %v7814_v45 = vld [vmem:[#allocation2 + $0x321] sm:$0xff] }
 0x850   :  { %21734 = vst [vmem:[#allocation15_spill] sm:$0xff] %v19277_v51 }
 0x853   :  { %13857 = vmatmul.mubr.msk.bf16.vlgmr.msra.gmra.mrb[0].mxu1 %vm230_vm0, %v19176_v34 }
 0x854   :  { %13860 = vmatprep.mubr.msk.bf16.mxu1 %vm230_vm0, %v19178_v17  ;;  %13921 = vmatpush3.bf16.msra.mxu1 %v15223_v2  ;;  %v7774_v2 = vld [vmem:[#allocation2 + $0x111] sm:$0xff] }
 0x855   :  { %13986 = vmatprep.subr.bf16.mxu1 %v19185_v48  ;;  %v19216_v1 = vpack.c.bf16 %v7774_v2, %v7773_v16  ;;  %v19245_v16 = vpack.c.bf16 %v7790_v22, %v7789_v38  ;;  %v7791_v2 = vld [vmem:[#allocation2 + $0x211] sm:$0xff]  ;;  %v19269_v22 = vpack.c.bf16 %v7802_v30, %v7801_v42  ;;  %v19283_v42 = vpack.c.bf16 %v7808_v53, %v7807_v58  ;;  %v7816_v53 = vld [vmem:[#allocation2 + $0x339] sm:$0xff] }
 0x856   :  { %v19251_v56 = vpack.c.bf16 %v7792_v26, %v7791_v2  ;;  %v7803_v2 = vld [vmem:[#allocation2 + $0x2a1] sm:$0xff]  ;;  %v7804_v26 = vld [vmem:[#allocation2 + $0x2a9] sm:$0xff]  ;;  %v7815_v58 = vld [vmem:[#allocation2 + $0x331] sm:$0xff] }
 0x857   :  { %v19275_v21 = vpack.c.bf16 %v7804_v26, %v7803_v2  ;;  %v7811_v2 = vld [vmem:[#allocation2 + $0x301] sm:$0xff]  ;;  %v7812_v26 = vld [vmem:[#allocation2 + $0x309] sm:$0xff] }
 0x859   :  { %21733 = vst [vmem:[#allocation13_spill] sm:$0xff] %v19275_v21 }
 0x85b   :  { %13861 = vmatmul.mubr.msk.bf16.gmra.mrb[4].mxu1 %vm230_vm0, %v19190_v61 }
 0x85c   :  { %13864 = vmatprep.mubr.msk.bf16.mxu1 %vm230_vm0, %v19192_v41 }
 0x863   :  { %13865 = vmatmul.mubr.msk.bf16.gmra.mrb[8].mxu1 %vm230_vm0, %v19198_v44 }
 0x864   :  { %13868 = vmatprep.mubr.msk.bf16.mxu1 %vm230_vm0, %v19200_v52 }
 0x86b   :  { %13869 = vmatmul.mubr.msk.bf16.gmra.mrb[12].mxu1 %vm230_vm0, %v19206_v60 }
 0x86c   :  { %13872 = vmatprep.mubr.msk.bf16.mxu1 %vm230_vm0, %v19208_v15 }
 0x873   :  { %13873 = vmatmul.mubr.msk.bf16.gmra.mrb[16].mxu1 %vm230_vm0, %v19214_v39 }
 0x874   :  { %13876 = vmatprep.mubr.msk.bf16.mxu1 %vm230_vm0, %v19216_v1 }
 0x87b   :  { %13877 = vmatmul.mubr.msk.bf16.gmra.mrb[20].mxu1 %vm230_vm0, %v19222_v59 }
 0x87c   :  { %13880 = vmatprep.mubr.msk.bf16.mxu1 %vm230_vm0, %v19224_v4 }
 0x883   :  { %13881 = vmatmul.mubr.msk.bf16.gmra.mrb[24].mxu1 %vm230_vm0, %v19230_v57 }
 0x884   :  { %13884 = vmatprep.mubr.msk.bf16.mxu1 %vm230_vm0, %v19232_v43 }
 0x88b   :  { %13885 = vmatmul.mubr.msk.bf16.gmra.mrb[28].mxu1 %vm230_vm0, %v19238_v27 }
 0x88c   :  { %13888 = vmatprep.mubr.msk.bf16.mxu1 %vm230_vm0, %v7833_v55  ;;  %v7800_v55 = vld [vmem:[#allocation2 + $0x279] sm:$0xff] }
 0x88d   :  { %v19267_v38 = vpack.c.bf16 %v7800_v55, %v7799_v49  ;;  %v7809_v49 = vld [vmem:[#allocation2 + $0x2e9] sm:$0xff]  ;;  %v7810_v55 = vld [vmem:[#allocation2 + $0x2f1] sm:$0xff] }
 0x88e   :  { %v19285_v30 = vpack.c.bf16 %v7810_v55, %v7809_v49  ;;  %v19299_v49 = vpack.c.bf16 %v7816_v53, %v7815_v58  ;;  %v15225_v55 = vld [vmem:[%s21512_s4 + $0x38] sm:$0xff]  }
 0x88f   :  { %v8876_v53 = vld [vmem:[#allocation2 + $0xd8] sm:$0xff] }
 0x893   :  { %13889 = vmatmul.mubr.msk.bf16.gmra.mrb[32].mxu1 %vm230_vm0, %v19243_v40 }
 0x894   :  { %13892 = vmatprep.mubr.msk.bf16.mxu1 %vm230_vm0, %v19245_v16 }
 0x89b   :  { %13893 = vmatmul.mubr.msk.bf16.gmra.mrb[36].mxu1 %vm230_vm0, %v19251_v56 }
 0x89c   :  { %13896 = vmatprep.mubr.msk.bf16.mxu1 %vm230_vm0, %v19253_v32 }
 0x8a3   :  { %13897 = vmatmul.mubr.msk.bf16.gmra.mrb[40].mxu1 %vm230_vm0, %v19259_v12 }
 0x8a4   :  { %13900 = vmatprep.mubr.msk.bf16.mxu1 %vm230_vm0, %v19261_v37 }
 0x8ab   :  { %13901 = vmatmul.mubr.msk.bf16.gmra.mrb[44].mxu1 %vm230_vm0, %v19267_v38 }
 0x8ac   :  { %13904 = vmatprep.mubr.msk.bf16.mxu1 %vm230_vm0, %v19269_v22 }
 0x8b3   :  { %13905 = vmatmul.mubr.msk.bf16.gmra.mrb[48].mxu1 %vm230_vm0, %v19275_v21  ;;  %v19291_v21 = vpack.c.bf16 %v7812_v26, %v7811_v2  ;;  %v8873_v2 = vld [vmem:[#allocation2 + $0xb0] sm:$0xff]  ;;  %v8874_v26 = vld [vmem:[#allocation2 + $0xc0] sm:$0xff] }
 0x8b4   :  { %13908 = vmatprep.mubr.msk.bf16.mxu1 %vm230_vm0, %v19277_v51  ;;  %v19293_v51 = vpack.c.bf16 %v7814_v45, %v7813_v5  ;;  %v8875_v5 = vld [vmem:[#allocation2 + $0xc8] sm:$0xff] }
 0x8b5   :  { %v8932_v58 = vpack.c.bf16 %v8875_v5, %v8874_v26  ;;  %v8896_v26 = vld [vmem:[#allocation2 + $0x1f8] sm:$0xff]  ;;  %v8897_v5 = vld [vmem:[#allocation2 + $0x200] sm:$0xff] }
 0x8bb   :  { %13909 = vmatmul.mubr.msk.bf16.gmra.mrb[52].mxu1 %vm230_vm0, %v19283_v42 }
 0x8bc   :  { %13912 = vmatprep.mubr.msk.bf16.mxu1 %vm230_vm0, %v19285_v30 }
 0x8c3   :  { %13913 = vmatmul.mubr.msk.bf16.gmra.mrb[56].mxu1 %vm230_vm0, %v19291_v21 }
 0x8c4   :  { %13916 = vmatprep.mubr.msk.bf16.mxu1 %vm230_vm0, %v19293_v51 }
 0x8cb   :  { %13917 = vmatmul.mubr.msk.bf16.gmra.mrb[60].mxu1 %vm230_vm0, %v19299_v49 }
 0x8cc   :  { %13922 = vmatprep.mubr.msk.bf16.mxu1 %vm230_vm0, %v18975_v62  ;;  %v8337_v62 = vld [vmem:[#allocation2 + $0x182] sm:$0xff] }
 0x8d3   :  { %13923 = vmatmul.mubr.msk.bf16.vlgmr.msra.gmra.mrb[0].mxu1 %vm230_vm0, %v18977_v29  ;;  %v8338_v29 = vld [vmem:[#allocation2 + $0x18a] sm:$0xff] }
 0x8d4   :  { %13926 = vmatprep.mubr.msk.bf16.mxu1 %vm230_vm0, %v18990_v23  ;;  %13987 = vmatpush3.bf16.msra.mxu1 %v19185_v48  ;;  %v19337_v23 = vpack.c.bf16 %v8338_v29, %v8337_v62  ;;  %v8872_v48 = vld [vmem:[#allocation2 + $0xa8] sm:$0xff]  ;;  %v8878_v62 = vld [vmem:[#allocation2 + $0xf0] sm:$0xff]  ;;  %v8879_v29 = vld [vmem:[#allocation2 + $0xf8] sm:$0xff] }
 0x8d5   :  { %14052 = vmatprep.subr.bf16.mxu1 %v15225_v55  ;;  %v8931_v45 = vpack.c.bf16 %v8873_v2, %v8872_v48  ;;  %v8895_v48 = vld [vmem:[#allocation2 + $0x1e8] sm:$0xff] }
 0x8db   :  { %13927 = vmatmul.mubr.msk.bf16.gmra.mrb[4].mxu1 %vm230_vm0, %v18992_v24  ;;  %v21735_v24 = vld [vmem:[#allocation9_spill] sm:$0xff] }
 0x8dc   :  { %13930 = vmatprep.mubr.msk.bf16.mxu1 %vm230_vm0, %v18998_v50  ;;  %v21736_v50 = vld [vmem:[#allocation11_spill] sm:$0xff] }
 0x8e3   :  { %13931 = vmatmul.mubr.msk.bf16.gmra.mrb[8].mxu1 %vm230_vm0, %v19000_v54  ;;  %v21737_v54 = vld [vmem:[#allocation8_spill] sm:$0xff] }
 0x8e4   :  { %13934 = vmatprep.mubr.msk.bf16.mxu1 %vm230_vm0, %v19006_v7  ;;  %v21738_v7 = vld [vmem:[#allocation10_spill] sm:$0xff] }
 0x8eb   :  { %13935 = vmatmul.mubr.msk.bf16.gmra.mrb[12].mxu1 %vm230_vm0, %v19008_v0  ;;  %v8369_v0 = vld [vmem:[#allocation2 + $0x332] sm:$0xff] }
 0x8ec   :  { %13938 = vmatprep.mubr.msk.bf16.mxu1 %vm230_vm0, %v19014_v20  ;;  %v8370_v20 = vld [vmem:[#allocation2 + $0x33a] sm:$0xff] }
 0x8f3   :  { %13939 = vmatmul.mubr.msk.bf16.gmra.mrb[16].mxu1 %vm230_vm0, %v19016_v10  ;;  %v8862_v10 = vld [vmem:[#allocation2 + $0x30] sm:$0xff] }
 0x8f4   :  { %13942 = vmatprep.mubr.msk.bf16.mxu1 %vm230_vm0, %v19022_v19  ;;  %v8863_v19 = vld [vmem:[#allocation2 + $0x38] sm:$0xff] }
 0x8fb   :  { %13943 = vmatmul.mubr.msk.bf16.gmra.mrb[20].mxu1 %vm230_vm0, %v19024_v8  ;;  %v19371_v8 = vpack.c.bf16 %v8370_v20, %v8369_v0  ;;  %v8882_v0 = vld [vmem:[#allocation2 + $0x120] sm:$0xff]  ;;  %v8883_v20 = vld [vmem:[#allocation2 + $0x128] sm:$0xff] }
 0x8fc   :  { %13946 = vmatprep.mubr.msk.bf16.mxu1 %vm230_vm0, %v19030_v13  ;;  %v8926_v13 = vpack.c.bf16 %v8863_v19, %v8862_v10  ;;  %v8936_v19 = vpack.c.bf16 %v8883_v20, %v8882_v0  ;;  %v8905_v0 = vld [vmem:[#allocation2 + $0x260] sm:$0xff]  ;;  %v8906_v20 = vld [vmem:[#allocation2 + $0x270] sm:$0xff] }
 0x903   :  { %13947 = vmatmul.mubr.msk.bf16.gmra.mrb[24].mxu1 %vm230_vm0, %v19032_v3  ;;  %v8864_v3 = vld [vmem:[#allocation2 + $0x48] sm:$0xff] }
 0x904   :  { %13950 = vmatprep.mubr.msk.bf16.mxu1 %vm230_vm0, %v19038_v18  ;;  %v8865_v18 = vld [vmem:[#allocation2 + $0x50] sm:$0xff] }
 0x90b   :  { %13951 = vmatmul.mubr.msk.bf16.gmra.mrb[28].mxu1 %vm230_vm0, %v19337_v23 }
 0x90c   :  { %13954 = vmatprep.mubr.msk.bf16.mxu1 %vm230_vm0, %v19043_v9  ;;  %v8866_v9 = vld [vmem:[#allocation2 + $0x60] sm:$0xff] }
 0x913   :  { %13955 = vmatmul.mubr.msk.bf16.gmra.mrb[32].mxu1 %vm230_vm0, %v19045_v36  ;;  %v8867_v36 = vld [vmem:[#allocation2 + $0x68] sm:$0xff] }
 0x914   :  { %13958 = vmatprep.mubr.msk.bf16.mxu1 %vm230_vm0, %v19051_v14  ;;  %v8927_v14 = vpack.c.bf16 %v8865_v18, %v8864_v3  ;;  %v8885_v3 = vld [vmem:[#allocation2 + $0x140] sm:$0xff]  ;;  %v8886_v18 = vld [vmem:[#allocation2 + $0x150] sm:$0xff] }
 0x91b   :  { %13959 = vmatmul.mubr.msk.bf16.gmra.mrb[36].mxu1 %vm230_vm0, %v19053_v35  ;;  %v8928_v35 = vpack.c.bf16 %v8867_v36, %v8866_v9  ;;  %v8887_v9 = vld [vmem:[#allocation2 + $0x158] sm:$0xff] }
 0x91c   :  { %13962 = vmatprep.mubr.msk.bf16.mxu1 %vm230_vm0, %v19059_v25  ;;  %v19380_v25 = vld [vmem:[%s21512_s4 + $0x40] sm:$0xff]  }
 0x923   :  { %13963 = vmatmul.mubr.msk.bf16.gmra.mrb[40].mxu1 %vm230_vm0, %v19061_v63  ;;  %v8868_v63 = vld [vmem:[#allocation2 + $0x78] sm:$0xff] }
 0x924   :  { %13966 = vmatprep.mubr.msk.bf16.mxu1 %vm230_vm0, %v21735_v24 }
 0x92b   :  { %13967 = vmatmul.mubr.msk.bf16.gmra.mrb[44].mxu1 %vm230_vm0, %v21736_v50  ;;  %v8934_v50 = vpack.c.bf16 %v8879_v29, %v8878_v62  ;;  %v8901_v62 = vld [vmem:[#allocation2 + $0x230] sm:$0xff]  ;;  %v8902_v29 = vld [vmem:[#allocation2 + $0x240] sm:$0xff] }
 0x92c   :  { %13970 = vmatprep.mubr.msk.bf16.mxu1 %vm230_vm0, %v21737_v54  ;;  %v8880_v54 = vld [vmem:[#allocation2 + $0x108] sm:$0xff] }
 0x933   :  { %13971 = vmatmul.mubr.msk.bf16.gmra.mrb[48].mxu1 %vm230_vm0, %v21738_v7  ;;  %v8881_v7 = vld [vmem:[#allocation2 + $0x110] sm:$0xff] }
 0x934   :  { %13974 = vmatprep.mubr.msk.bf16.mxu1 %vm230_vm0, %v19083_v31  ;;  %v8869_v31 = vld [vmem:[#allocation2 + $0x80] sm:$0xff]  ;;  %v8935_v10 = vpack.c.bf16 %v8881_v7, %v8880_v54  ;;  %v8904_v7 = vld [vmem:[#allocation2 + $0x258] sm:$0xff] }
 0x93b   :  { %13975 = vmatmul.mubr.msk.bf16.gmra.mrb[52].mxu1 %vm230_vm0, %v19085_v33  ;;  %v8870_v33 = vld [vmem:[#allocation2 + $0x90] sm:$0xff] }
 0x93c   :  { %13978 = vmatprep.mubr.msk.bf16.mxu1 %vm230_vm0, %v19091_v28  ;;  %v8871_v28 = vld [vmem:[#allocation2 + $0x98] sm:$0xff] }
 0x943   :  { %13979 = vmatmul.mubr.msk.bf16.gmra.mrb[56].mxu1 %vm230_vm0, %v19093_v47  ;;  %v8929_v47 = vpack.c.bf16 %v8869_v31, %v8868_v63  ;;  %v8889_v63 = vld [vmem:[#allocation2 + $0x170] sm:$0xff] }
 0x944   :  { %13982 = vmatprep.mubr.msk.bf16.mxu1 %vm230_vm0, %v19099_v6  ;;  %v8930_v6 = vpack.c.bf16 %v8871_v28, %v8870_v33  ;;  %v8892_v33 = vld [vmem:[#allocation2 + $0x198] sm:$0xff]  ;;  %v8893_v28 = vld [vmem:[#allocation2 + $0x1a0] sm:$0xff] }
 0x94b   :  { %13983 = vmatmul.mubr.msk.bf16.gmra.mrb[60].mxu1 %vm230_vm0, %v19371_v8 }
 0x94c   :  { %13988 = vmatprep.mubr.msk.bf16.mxu1 %vm230_vm0, %v8926_v13  ;;  %v8884_v13 = vld [vmem:[#allocation2 + $0x138] sm:$0xff] }
 0x94d   :  { %v8937_v36 = vpack.c.bf16 %v8885_v3, %v8884_v13  ;;  %v8908_v3 = vld [vmem:[#allocation2 + $0x288] sm:$0xff] }
 0x953   :  { %13989 = vmatmul.mubr.msk.bf16.vlgmr.msra.gmra.mrb[0].mxu1 %vm230_vm0, %v8927_v14  ;;  %v8938_v14 = vpack.c.bf16 %v8887_v9, %v8886_v18  ;;  %v8909_v18 = vld [vmem:[#allocation2 + $0x290] sm:$0xff]  ;;  %v8910_v9 = vld [vmem:[#allocation2 + $0x2a0] sm:$0xff] }
 0x954   :  { %13992 = vmatprep.mubr.msk.bf16.mxu1 %vm230_vm0, %v8928_v35  ;;  %14053 = vmatpush3.bf16.msra.mxu1 %v15225_v55  ;;  %v8877_v55 = vld [vmem:[#allocation2 + $0xe0] sm:$0xff]  ;;  %v8888_v35 = vld [vmem:[#allocation2 + $0x168] sm:$0xff] }
 0x955   :  { %14118 = vmatprep.subr.bf16.mxu1 %v19380_v25  ;;  %v8933_v24 = vpack.c.bf16 %v8877_v55, %v8876_v53  ;;  %v8939_v31 = vpack.c.bf16 %v8889_v63, %v8888_v35  ;;  %v8943_v53 = vpack.c.bf16 %v8897_v5, %v8896_v26  ;;  %v8912_v63 = vld [vmem:[#allocation2 + $0x2b8] sm:$0xff]  ;;  %v8918_v26 = vld [vmem:[#allocation2 + $0x300] sm:$0xff]  ;;  %v8919_v5 = vld [vmem:[#allocation2 + $0x308] sm:$0xff] }
 0x95b   :  { %13993 = vmatmul.mubr.msk.bf16.gmra.mrb[4].mxu1 %vm230_vm0, %v8929_v47  ;;  %v8941_v47 = vpack.c.bf16 %v8893_v28, %v8892_v33  ;;  %v8914_v33 = vld [vmem:[#allocation2 + $0x2d0] sm:$0xff]  ;;  %v8915_v28 = vld [vmem:[#allocation2 + $0x2d8] sm:$0xff] }
 0x95c   :  { %13996 = vmatprep.mubr.msk.bf16.mxu1 %vm230_vm0, %v8930_v6  ;;  %v8894_v6 = vld [vmem:[#allocation2 + $0x1e0] sm:$0xff] }
 0x95d   :  { %v8942_v2 = vpack.c.bf16 %v8895_v48, %v8894_v6  ;;  %v8952_v6 = vpack.c.bf16 %v8915_v28, %v8914_v33  ;;  %v8916_v48 = vld [vmem:[#allocation2 + $0x2e8] sm:$0xff] }
 0x95e   :  { %v9996_v28 = vld [vmem:[#allocation2 + $0x16a] sm:$0xff] }
 0x963   :  { %13997 = vmatmul.mubr.msk.bf16.gmra.mrb[8].mxu1 %vm230_vm0, %v8931_v45  ;;  %v8898_v45 = vld [vmem:[#allocation2 + $0x210] sm:$0xff] }
 0x964   :  { %14000 = vmatprep.mubr.msk.bf16.mxu1 %vm230_vm0, %v8932_v58  ;;  %v8899_v58 = vld [vmem:[#allocation2 + $0x218] sm:$0xff] }
 0x965   :  { %v8944_v55 = vpack.c.bf16 %v8899_v58, %v8898_v45  ;;  %v8954_v58 = vpack.c.bf16 %v8919_v5, %v8918_v26  ;;  %v10002_v5 = vld [vmem:[#allocation2 + $0x1e2] sm:$0xff] }
 0x96b   :  { %14001 = vmatmul.mubr.msk.bf16.gmra.mrb[12].mxu1 %vm230_vm0, %v8933_v24  ;;  %v8903_v24 = vld [vmem:[#allocation2 + $0x248] sm:$0xff] }
 0x96c   :  { %14004 = vmatprep.mubr.msk.bf16.mxu1 %vm230_vm0, %v8934_v50  ;;  %v8946_v54 = vpack.c.bf16 %v8903_v24, %v8902_v29  ;;  %v8925_v29 = vld [vmem:[#allocation2 + $0x350] sm:$0xff] }
 0x973   :  { %14005 = vmatmul.mubr.msk.bf16.gmra.mrb[16].mxu1 %vm230_vm0, %v8935_v10  ;;  %v8907_v10 = vld [vmem:[#allocation2 + $0x278] sm:$0xff] }
 0x974   :  { %14008 = vmatprep.mubr.msk.bf16.mxu1 %vm230_vm0, %v8936_v19  ;;  %v8947_v19 = vpack.c.bf16 %v8905_v0, %v8904_v7  ;;  %v8948_v13 = vpack.c.bf16 %v8907_v10, %v8906_v20  ;;  %v9987_v7 = vld [vmem:[#allocation2 + $0xfa] sm:$0xff]  ;;  %v9988_v10 = vld [vmem:[#allocation2 + $0x10a] sm:$0xff] }
 0x97b   :  { %14009 = vmatmul.mubr.msk.bf16.gmra.mrb[20].mxu1 %vm230_vm0, %v8937_v36  ;;  %v8911_v36 = vld [vmem:[#allocation2 + $0x2a8] sm:$0xff] }
 0x97c   :  { %14012 = vmatprep.mubr.msk.bf16.mxu1 %vm230_vm0, %v8938_v14  ;;  %v8949_v14 = vpack.c.bf16 %v8909_v18, %v8908_v3  ;;  %v8950_v35 = vpack.c.bf16 %v8911_v36, %v8910_v9  ;;  %v9991_v3 = vld [vmem:[#allocation2 + $0x12a] sm:$0xff]  ;;  %v9992_v36 = vld [vmem:[#allocation2 + $0x13a] sm:$0xff] }
 0x983   :  { %14013 = vmatmul.mubr.msk.bf16.gmra.mrb[24].mxu1 %vm230_vm0, %v8939_v31  ;;  %v8913_v31 = vld [vmem:[#allocation2 + $0x2c0] sm:$0xff] }
 0x984   :  { %14016 = vmatprep.mubr.msk.bf16.mxu1 %vm230_vm0, %v19137_v46  ;;  %v8900_v46 = vld [vmem:[#allocation2 + $0x228] sm:$0xff] }
 0x985   :  { %v8945_v50 = vpack.c.bf16 %v8901_v62, %v8900_v46  ;;  %v8924_v62 = vld [vmem:[#allocation2 + $0x348] sm:$0xff] }
 0x986   :  { %v8957_v24 = vpack.c.bf16 %v8925_v29, %v8924_v62  ;;  %v10007_v62 = vld [vmem:[#allocation2 + $0x21a] sm:$0xff] }
 0x98b   :  { %14017 = vmatmul.mubr.msk.bf16.gmra.mrb[28].mxu1 %vm230_vm0, %v8941_v47  ;;  %v8951_v47 = vpack.c.bf16 %v8913_v31, %v8912_v63  ;;  %v9995_v63 = vld [vmem:[#allocation2 + $0x15a] sm:$0xff] }
 0x98c   :  { %14020 = vmatprep.mubr.msk.bf16.mxu1 %vm230_vm0, %v8942_v2  ;;  %v8917_v2 = vld [vmem:[#allocation2 + $0x2f0] sm:$0xff] }
 0x98d   :  { %v8953_v45 = vpack.c.bf16 %v8917_v2, %v8916_v48  ;;  %v10000_v48 = vld [vmem:[#allocation2 + $0x19a] sm:$0xff]  ;;  %v10001_v2 = vld [vmem:[#allocation2 + $0x1a2] sm:$0xff] }
 0x98e   :  { %v10049_v26 = vpack.c.bf16 %v10001_v2, %v10000_v48 }
 0x993   :  { %14021 = vmatmul.mubr.msk.bf16.gmra.mrb[32].mxu1 %vm230_vm0, %v8943_v53  ;;  %v8920_v53 = vld [vmem:[#allocation2 + $0x318] sm:$0xff] }
 0x994   :  { %14024 = vmatprep.mubr.msk.bf16.mxu1 %vm230_vm0, %v8944_v55  ;;  %v8921_v55 = vld [vmem:[#allocation2 + $0x320] sm:$0xff] }
 0x995   :  { %v8955_v46 = vpack.c.bf16 %v8921_v55, %v8920_v53  ;;  %v10004_v53 = vld [vmem:[#allocation2 + $0x1fa] sm:$0xff]  ;;  %v10005_v55 = vld [vmem:[#allocation2 + $0x202] sm:$0xff] }
 0x996   :  { %v10051_v29 = vpack.c.bf16 %v10005_v55, %v10004_v53 }
 0x99b   :  { %14025 = vmatmul.mubr.msk.bf16.gmra.mrb[36].mxu1 %vm230_vm0, %v8945_v50  ;;  %v9985_v50 = vld [vmem:[#allocation2 + $0xe2] sm:$0xff] }
 0x99c   :  { %14028 = vmatprep.mubr.msk.bf16.mxu1 %vm230_vm0, %v8946_v54  ;;  %v9986_v54 = vld [vmem:[#allocation2 + $0xf2] sm:$0xff] }
 0x99d   :  { %v10042_v20 = vpack.c.bf16 %v9987_v7, %v9986_v54  ;;  %v10032_v7 = vld [vmem:[#allocation2 + $0x34a] sm:$0xff] }
 0x9a3   :  { %14029 = vmatmul.mubr.msk.bf16.gmra.mrb[40].mxu1 %vm230_vm0, %v8947_v19  ;;  %v9989_v19 = vld [vmem:[#allocation2 + $0x112] sm:$0xff] }
 0x9a4   :  { %14032 = vmatprep.mubr.msk.bf16.mxu1 %vm230_vm0, %v8948_v13  ;;  %v9990_v13 = vld [vmem:[#allocation2 + $0x122] sm:$0xff]  ;;  %v10043_v18 = vpack.c.bf16 %v9989_v19, %v9988_v10 }
 0x9a5   :  { %v10044_v9 = vpack.c.bf16 %v9991_v3, %v9990_v13 }
 0x9ab   :  { %14033 = vmatmul.mubr.msk.bf16.gmra.mrb[44].mxu1 %vm230_vm0, %v8949_v14  ;;  %v9993_v14 = vld [vmem:[#allocation2 + $0x142] sm:$0xff] }
 0x9ac   :  { %14036 = vmatprep.mubr.msk.bf16.mxu1 %vm230_vm0, %v8950_v35  ;;  %v9994_v35 = vld [vmem:[#allocation2 + $0x152] sm:$0xff]  ;;  %v10045_v31 = vpack.c.bf16 %v9993_v14, %v9992_v36 }
 0x9ad   :  { %v10046_v33 = vpack.c.bf16 %v9995_v63, %v9994_v35 }
 0x9b3   :  { %14037 = vmatmul.mubr.msk.bf16.gmra.mrb[48].mxu1 %vm230_vm0, %v8951_v47  ;;  %v9997_v47 = vld [vmem:[#allocation2 + $0x172] sm:$0xff] }
 0x9b4   :  { %14040 = vmatprep.mubr.msk.bf16.mxu1 %vm230_vm0, %v8952_v6  ;;  %v10047_v6 = vpack.c.bf16 %v9997_v47, %v9996_v28 }
 0x9bb   :  { %14041 = vmatmul.mubr.msk.bf16.gmra.mrb[52].mxu1 %vm230_vm0, %v8953_v45  ;;  %v10003_v45 = vld [vmem:[#allocation2 + $0x1ea] sm:$0xff] }
 0x9bc   :  { %14044 = vmatprep.mubr.msk.bf16.mxu1 %vm230_vm0, %v8954_v58  ;;  %v10050_v58 = vpack.c.bf16 %v10003_v45, %v10002_v5 }
 0x9c3   :  { %14045 = vmatmul.mubr.msk.bf16.gmra.mrb[56].mxu1 %vm230_vm0, %v8955_v46  ;;  %v10006_v46 = vld [vmem:[#allocation2 + $0x212] sm:$0xff] }
 0x9c4   :  { %14048 = vmatprep.mubr.msk.bf16.mxu1 %vm230_vm0, %v19171_v11  ;;  %v9446_v11 = vld [vmem:[#allocation2 + $0x199] sm:$0xff] }
 0x9cb   :  { %14049 = vmatmul.mubr.msk.bf16.gmra.mrb[60].mxu1 %vm230_vm0, %v8957_v24  ;;  %v10052_v24 = vpack.c.bf16 %v10007_v62, %v10006_v46 }
 0x9cc   :  { %14054 = vmatprep.mubr.msk.bf16.mxu1 %vm230_vm0, %v19176_v34  ;;  %v9447_v34 = vld [vmem:[#allocation2 + $0x1a1] sm:$0xff] }
 0x9d3   :  { %14055 = vmatmul.mubr.msk.bf16.vlgmr.msra.gmra.mrb[0].mxu1 %vm230_vm0, %v19178_v17  ;;  %v9495_v17 = vpack.c.bf16 %v9447_v34, %v9446_v11  ;;  %v10009_v11 = vld [vmem:[#allocation2 + $0x232] sm:$0xff]  ;;  %v10010_v34 = vld [vmem:[#allocation2 + $0x242] sm:$0xff] }
 0x9d4   :  { %14058 = vmatprep.mubr.msk.bf16.mxu1 %vm230_vm0, %v19190_v61  ;;  %14119 = vmatpush3.bf16.msra.mxu1 %v19380_v25  ;;  %v21739_v61 = vld [vmem:[#allocation13_spill] sm:$0xff]  ;;  %v9984_v25 = vld [vmem:[#allocation2 + $0xda] sm:$0xff] }
 0x9d5   :  { %v10041_v0 = vpack.c.bf16 %v9985_v50, %v9984_v25  ;;  %v10028_v25 = vld [vmem:[#allocation2 + $0x31a] sm:$0xff]  ;;  %v10029_v50 = vld [vmem:[#allocation2 + $0x322] sm:$0xff] }
 0x9d6   :  { %v10063_v54 = vpack.c.bf16 %v10029_v50, %v10028_v25 }
 0x9db   :  { %14059 = vmatmul.mubr.msk.bf16.gmra.mrb[4].mxu1 %vm230_vm0, %v19192_v41  ;;  %v21740_v41 = vld [vmem:[#allocation15_spill] sm:$0xff] }
 0x9dc   :  { %14062 = vmatprep.mubr.msk.bf16.mxu1 %vm230_vm0, %v19198_v44  ;;  %v9478_v44 = vld [vmem:[#allocation2 + $0x349] sm:$0xff] }
 0x9e3   :  { %14063 = vmatmul.mubr.msk.bf16.gmra.mrb[8].mxu1 %vm230_vm0, %v19200_v52  ;;  %v9479_v52 = vld [vmem:[#allocation2 + $0x351] sm:$0xff] }
 0x9e4   :  { %14066 = vmatprep.mubr.msk.bf16.mxu1 %vm230_vm0, %v19206_v60  ;;  %v9511_v60 = vpack.c.bf16 %v9479_v52, %v9478_v44  ;;  %v10012_v44 = vld [vmem:[#allocation2 + $0x25a] sm:$0xff]  ;;  %v10013_v52 = vld [vmem:[#allocation2 + $0x262] sm:$0xff] }
 0x9eb   :  { %14067 = vmatmul.mubr.msk.bf16.gmra.mrb[12].mxu1 %vm230_vm0, %v19208_v15  ;;  %v9970_v15 = vld [vmem:[#allocation2 + $0x32] sm:$0xff] }
 0x9ec   :  { %14070 = vmatprep.mubr.msk.bf16.mxu1 %vm230_vm0, %v19214_v39  ;;  %v9971_v39 = vld [vmem:[#allocation2 + $0x3a] sm:$0xff] }
 0x9f3   :  { %14071 = vmatmul.mubr.msk.bf16.gmra.mrb[16].mxu1 %vm230_vm0, %v19216_v1  ;;  %v10034_v1 = vpack.c.bf16 %v9971_v39, %v9970_v15  ;;  %v10015_v15 = vld [vmem:[#allocation2 + $0x27a] sm:$0xff]  ;;  %v10055_v39 = vpack.c.bf16 %v10013_v52, %v10012_v44 }
 0x9f4   :  { %14074 = vmatprep.mubr.msk.bf16.mxu1 %vm230_vm0, %v19222_v59  ;;  %v9972_v59 = vld [vmem:[#allocation2 + $0x4a] sm:$0xff] }
 0x9fb   :  { %14075 = vmatmul.mubr.msk.bf16.gmra.mrb[20].mxu1 %vm230_vm0, %v19224_v4  ;;  %v9973_v4 = vld [vmem:[#allocation2 + $0x52] sm:$0xff] }
 0x9fc   :  { %14078 = vmatprep.mubr.msk.bf16.mxu1 %vm230_vm0, %v19230_v57  ;;  %v9974_v57 = vld [vmem:[#allocation2 + $0x62] sm:$0xff] }
 0xa03   :  { %14079 = vmatmul.mubr.msk.bf16.gmra.mrb[24].mxu1 %vm230_vm0, %v19232_v43  ;;  %v9975_v43 = vld [vmem:[#allocation2 + $0x6a] sm:$0xff] }
 0xa04   :  { %14082 = vmatprep.mubr.msk.bf16.mxu1 %vm230_vm0, %v19238_v27  ;;  %v10035_v27 = vpack.c.bf16 %v9973_v4, %v9972_v59  ;;  %v10016_v59 = vld [vmem:[#allocation2 + $0x28a] sm:$0xff]  ;;  %v10017_v4 = vld [vmem:[#allocation2 + $0x292] sm:$0xff] }
 0xa0b   :  { %14083 = vmatmul.mubr.msk.bf16.gmra.mrb[28].mxu1 %vm230_vm0, %v9495_v17  ;;  %v10011_v17 = vld [vmem:[#allocation2 + $0x24a] sm:$0xff] }
 0xa0c   :  { %14086 = vmatprep.mubr.msk.bf16.mxu1 %vm230_vm0, %v19243_v40  ;;  %v10036_v40 = vpack.c.bf16 %v9975_v43, %v9974_v57  ;;  %v10018_v57 = vld [vmem:[#allocation2 + $0x2a2] sm:$0xff]  ;;  %v10019_v43 = vld [vmem:[#allocation2 + $0x2aa] sm:$0xff] }
 0xa13   :  { %14087 = vmatmul.mubr.msk.bf16.gmra.mrb[32].mxu1 %vm230_vm0, %v19245_v16  ;;  %v9976_v16 = vld [vmem:[#allocation2 + $0x7a] sm:$0xff] }
 0xa14   :  { %14090 = vmatprep.mubr.msk.bf16.mxu1 %vm230_vm0, %v19251_v56  ;;  %v9977_v56 = vld [vmem:[#allocation2 + $0x82] sm:$0xff] }
 0xa1b   :  { %14091 = vmatmul.mubr.msk.bf16.gmra.mrb[36].mxu1 %vm230_vm0, %v19253_v32  ;;  %v9978_v32 = vld [vmem:[#allocation2 + $0x92] sm:$0xff] }
 0xa1c   :  { %14094 = vmatprep.mubr.msk.bf16.mxu1 %vm230_vm0, %v19259_v12  ;;  %v9979_v12 = vld [vmem:[#allocation2 + $0x9a] sm:$0xff] }
 0xa23   :  { %14095 = vmatmul.mubr.msk.bf16.gmra.mrb[40].mxu1 %vm230_vm0, %v19261_v37  ;;  %v10037_v37 = vpack.c.bf16 %v9977_v56, %v9976_v16  ;;  %v10020_v16 = vld [vmem:[#allocation2 + $0x2ba] sm:$0xff]  ;;  %v10021_v56 = vld [vmem:[#allocation2 + $0x2c2] sm:$0xff] }
 0xa24   :  { %14098 = vmatprep.mubr.msk.bf16.mxu1 %vm230_vm0, %v19267_v38  ;;  %v10038_v38 = vpack.c.bf16 %v9979_v12, %v9978_v32  ;;  %v10022_v32 = vld [vmem:[#allocation2 + $0x2d2] sm:$0xff]  ;;  %v10023_v12 = vld [vmem:[#allocation2 + $0x2da] sm:$0xff] }
 0xa2b   :  { %14099 = vmatmul.mubr.msk.bf16.gmra.mrb[44].mxu1 %vm230_vm0, %v19269_v22  ;;  %v9980_v22 = vld [vmem:[#allocation2 + $0xaa] sm:$0xff] }
 0xa2c   :  { %14102 = vmatprep.mubr.msk.bf16.mxu1 %vm230_vm0, %v21739_v61 }
 0xa33   :  { %14103 = vmatmul.mubr.msk.bf16.gmra.mrb[48].mxu1 %vm230_vm0, %v21740_v41  ;;  %v10054_v41 = vpack.c.bf16 %v10011_v17, %v10010_v34 }
 0xa34   :  { %14106 = vmatprep.mubr.msk.bf16.mxu1 %vm230_vm0, %v19283_v42  ;;  %v9983_v42 = vld [vmem:[#allocation2 + $0xca] sm:$0xff] }
 0xa3b   :  { %14107 = vmatmul.mubr.msk.bf16.gmra.mrb[52].mxu1 %vm230_vm0, %v19285_v30 }
 0xa3c   :  { %14110 = vmatprep.mubr.msk.bf16.mxu1 %vm230_vm0, %v19291_v21  ;;  %v9981_v21 = vld [vmem:[#allocation2 + $0xb2] sm:$0xff] }
 0xa3d   :  { %v10039_v30 = vpack.c.bf16 %v9981_v21, %v9980_v22  ;;  %v10024_v22 = vld [vmem:[#allocation2 + $0x2ea] sm:$0xff]  ;;  %v10025_v21 = vld [vmem:[#allocation2 + $0x2f2] sm:$0xff] }
 0xa43   :  { %14111 = vmatmul.mubr.msk.bf16.gmra.mrb[56].mxu1 %vm230_vm0, %v19293_v51  ;;  %v9982_v51 = vld [vmem:[#allocation2 + $0xc2] sm:$0xff] }
 0xa44   :  { %14114 = vmatprep.mubr.msk.bf16.mxu1 %vm230_vm0, %v19299_v49  ;;  %v10040_v49 = vpack.c.bf16 %v9983_v42, %v9982_v51  ;;  %v10026_v51 = vld [vmem:[#allocation2 + $0x302] sm:$0xff]  ;;  %v10027_v42 = vld [vmem:[#allocation2 + $0x30a] sm:$0xff] }
 0xa4b   :  { %14115 = vmatmul.mubr.msk.bf16.gmra.mrb[60].mxu1 %vm230_vm0, %v9511_v60  ;;  %v10014_v60 = vld [vmem:[#allocation2 + $0x272] sm:$0xff] }
 0xa4c   :  { %14120 = vmatprep.mubr.msk.bf16.mxu1 %vm230_vm0, %v10034_v1  ;;  %v10056_v1 = vpack.c.bf16 %v10015_v15, %v10014_v60 }
 0xa53   :  { %14121 = vmatmul.mubr.msk.bf16.vlgmr.msra.gmra.mrb[0].mxu1 %vm230_vm0, %v10035_v27  ;;  %v10057_v27 = vpack.c.bf16 %v10017_v4, %v10016_v59 }
 0xa54   :  { %14124 = vmatprep.mubr.msk.bf16.mxu1 %vm230_vm0, %v10036_v40  ;;  %v10058_v40 = vpack.c.bf16 %v10019_v43, %v10018_v57 }
 0xa5b   :  { %14125 = vmatmul.mubr.msk.bf16.gmra.mrb[4].mxu1 %vm230_vm0, %v10037_v37  ;;  %v10059_v37 = vpack.c.bf16 %v10021_v56, %v10020_v16 }
 0xa5c   :  { %14128 = vmatprep.mubr.msk.bf16.mxu1 %vm230_vm0, %v10038_v38  ;;  %v10060_v38 = vpack.c.bf16 %v10023_v12, %v10022_v32 }
 0xa63   :  { %14129 = vmatmul.mubr.msk.bf16.gmra.mrb[8].mxu1 %vm230_vm0, %v10039_v30  ;;  %v10061_v30 = vpack.c.bf16 %v10025_v21, %v10024_v22 }
 0xa64   :  { %14132 = vmatprep.mubr.msk.bf16.mxu1 %vm230_vm0, %v10040_v49  ;;  %v10062_v49 = vpack.c.bf16 %v10027_v42, %v10026_v51 }
 0xa6b   :  { %14133 = vmatmul.mubr.msk.bf16.gmra.mrb[12].mxu1 %vm230_vm0, %v10041_v0  ;;  %v10033_v0 = vld [vmem:[#allocation2 + $0x352] sm:$0xff] }
 0xa6c   :  { %14136 = vmatprep.mubr.msk.bf16.mxu1 %vm230_vm0, %v10042_v20  ;;  %v10065_v20 = vpack.c.bf16 %v10033_v0, %v10032_v7 }
 0xa73   :  { %14137 = vmatmul.mubr.msk.bf16.gmra.mrb[16].mxu1 %vm230_vm0, %v10043_v18 }
 0xa74   :  { %14140 = vmatprep.mubr.msk.bf16.mxu1 %vm230_vm0, %v10044_v9 }
 0xa7b   :  { %14141 = vmatmul.mubr.msk.bf16.gmra.mrb[20].mxu1 %vm230_vm0, %v10045_v31 }
 0xa7c   :  { %14144 = vmatprep.mubr.msk.bf16.mxu1 %vm230_vm0, %v10046_v33 }
 0xa83   :  { %14145 = vmatmul.mubr.msk.bf16.gmra.mrb[24].mxu1 %vm230_vm0, %v10047_v6 }
 0xa84   :  { %14148 = vmatprep.mubr.msk.bf16.mxu1 %vm230_vm0, %v19337_v23  ;;  %v10008_v23 = vld [vmem:[#allocation2 + $0x22a] sm:$0xff] }
 0xa85   :  { %v10053_v61 = vpack.c.bf16 %v10009_v11, %v10008_v23 }
 0xa8b   :  { %14149 = vmatmul.mubr.msk.bf16.gmra.mrb[28].mxu1 %vm230_vm0, %v10049_v26 }
 0xa8c   :  { %14152 = vmatprep.mubr.msk.bf16.mxu1 %vm230_vm0, %v10050_v58 }
 0xa93   :  { %14153 = vmatmul.mubr.msk.bf16.gmra.mrb[32].mxu1 %vm230_vm0, %v10051_v29 }
 0xa94   :  { %14156 = vmatprep.mubr.msk.bf16.mxu1 %vm230_vm0, %v10052_v24 }
 0xa9b   :  { %14157 = vmatmul.mubr.msk.bf16.gmra.mrb[36].mxu1 %vm230_vm0, %v10053_v61 }
 0xa9c   :  { %14160 = vmatprep.mubr.msk.bf16.mxu1 %vm230_vm0, %v10054_v41 }
 0xaa3   :  { %14161 = vmatmul.mubr.msk.bf16.gmra.mrb[40].mxu1 %vm230_vm0, %v10055_v39 }
 0xaa4   :  { %14164 = vmatprep.mubr.msk.bf16.mxu1 %vm230_vm0, %v10056_v1 }
 0xaab   :  { %14165 = vmatmul.mubr.msk.bf16.gmra.mrb[44].mxu1 %vm230_vm0, %v10057_v27 }
 0xaac   :  { %14168 = vmatprep.mubr.msk.bf16.mxu1 %vm230_vm0, %v10058_v40 }
 0xab3   :  { %14169 = vmatmul.mubr.msk.bf16.gmra.mrb[48].mxu1 %vm230_vm0, %v10059_v37 }
 0xab4   :  { %14172 = vmatprep.mubr.msk.bf16.mxu1 %vm230_vm0, %v10060_v38 }
 0xabb   :  { %14173 = vmatmul.mubr.msk.bf16.gmra.mrb[52].mxu1 %vm230_vm0, %v10061_v30 }
 0xabc   :  { %14176 = vmatprep.mubr.msk.bf16.mxu1 %vm230_vm0, %v10062_v49 }
 0xac3   :  { %14177 = vmatmul.mubr.msk.bf16.gmra.mrb[56].mxu1 %vm230_vm0, %v10063_v54 }
 0xac4   :  { %14180 = vmatprep.mubr.msk.bf16.mxu1 %vm230_vm0, %v19371_v8 }
 0xacb   :  { %14181 = vmatmul.mubr.msk.bf16.gmra.mrb[60].mxu1 %vm230_vm0, %v10065_v20 }
 0xb26   :  { %v19512_v10 = vpop.f32.mrb[0].mxu1 }
 0xb27   :  { %v19514_v19 = vpop.f32.mrb[1].mxu1  ;;  %v10527_v36 = vsel %vm230_vm0, %v19512_v10, 0.0 }
 0xb28   :  { %v19516_v13 = vpop.f32.mrb[2].mxu1  ;;  %v10524_v18 = vsel %vm230_vm0, %v19514_v19, 0.0 }
 0xb29   :  { %v19518_v3 = vpop.f32.mrb[3].mxu1  ;;  %v10529_v35 = vsel %vm230_vm0, %v19516_v13, 0.0 }
 0xb2a   :  { %v10525_v9 = vsel %vm230_vm0, %v19518_v3, 0.0 }
 0xb2b   :  { %v10526_v8 = vadd.f32 %v10525_v9, %v10524_v18 }
 0xb2d   :  { %v10528_v14 = vadd.f32 %v10527_v36, %v10526_v8 }
 0xb2e   :  { %v19528_v63 = vpop.f32.mrb[4].mxu1 }
 0xb2f   :  { %v19530_v31 = vpop.f32.mrb[5].mxu1  ;;  %v10530_v33 = vadd.f32 %v10529_v35, %v10528_v14  ;;  %v10535_v5 = vsel %vm230_vm0, %v19528_v63, 0.0 }
 0xb30   :  { %v10531_v28 = vsel %vm230_vm0, %v19530_v31, 0.0  ;;  %v19534_v47 = vpop.f32.mrb[6].mxu1 }
 0xb31   :  { %v10532_v6 = vadd.f32 %v10531_v28, %v10530_v33  ;;  %v19536_v48 = vpop.f32.mrb[7].mxu1  ;;  %v10537_v58 = vsel %vm230_vm0, %v19534_v47, 0.0 }
 0xb32   :  { %v10533_v2 = vsel %vm230_vm0, %v19536_v48, 0.0 }
 0xb33   :  { %v10534_v26 = vadd.f32 %v10533_v2, %v10532_v6 }
 0xb35   :  { %v10536_v45 = vadd.f32 %v10535_v5, %v10534_v26 }
 0xb36   :  { %v19544_v53 = vpop.f32.mrb[8].mxu1 }
 0xb37   :  { %v19546_v55 = vpop.f32.mrb[9].mxu1  ;;  %v10538_v46 = vadd.f32 %v10537_v58, %v10536_v45  ;;  %v10543_v17 = vsel %vm230_vm0, %v19544_v53, 0.0 }
 0xb38   :  { %v10539_v62 = vsel %vm230_vm0, %v19546_v55, 0.0  ;;  %v19550_v29 = vpop.f32.mrb[10].mxu1 }
 0xb39   :  { %v10540_v24 = vadd.f32 %v10539_v62, %v10538_v46  ;;  %v19552_v23 = vpop.f32.mrb[11].mxu1  ;;  %v10545_v41 = vsel %vm230_vm0, %v19550_v29, 0.0 }
 0xb3a   :  { %v10541_v11 = vsel %vm230_vm0, %v19552_v23, 0.0 }
 0xb3b   :  { %v10542_v34 = vadd.f32 %v10541_v11, %v10540_v24 }
 0xb3d   :  { %v10544_v61 = vadd.f32 %v10543_v17, %v10542_v34 }
 0xb3e   :  { %v19560_v44 = vpop.f32.mrb[12].mxu1 }
 0xb3f   :  { %v19562_v52 = vpop.f32.mrb[13].mxu1  ;;  %v10546_v60 = vadd.f32 %v10545_v41, %v10544_v61  ;;  %v10551_v43 = vsel %vm230_vm0, %v19560_v44, 0.0 }
 0xb40   :  { %v10547_v15 = vsel %vm230_vm0, %v19562_v52, 0.0  ;;  %v19566_v39 = vpop.f32.mrb[14].mxu1 }
 0xb41   :  { %v10548_v1 = vadd.f32 %v10547_v15, %v10546_v60  ;;  %v19568_v59 = vpop.f32.mrb[15].mxu1  ;;  %v10553_v40 = vsel %vm230_vm0, %v19566_v39, 0.0 }
 0xb42   :  { %v10549_v4 = vsel %vm230_vm0, %v19568_v59, 0.0 }
 0xb43   :  { %v10550_v57 = vadd.f32 %v10549_v4, %v10548_v1 }
 0xb45   :  { %v10552_v27 = vadd.f32 %v10551_v43, %v10550_v57 }
 0xb46   :  { %v19576_v16 = vpop.f32.mrb[16].mxu1 }
 0xb47   :  { %v19578_v56 = vpop.f32.mrb[17].mxu1  ;;  %v10554_v32 = vadd.f32 %v10553_v40, %v10552_v27  ;;  %v10559_v42 = vsel %vm230_vm0, %v19576_v16, 0.0 }
 0xb48   :  { %v10555_v12 = vsel %vm230_vm0, %v19578_v56, 0.0  ;;  %v19582_v37 = vpop.f32.mrb[18].mxu1 }
 0xb49   :  { %v10556_v38 = vadd.f32 %v10555_v12, %v10554_v32  ;;  %v19584_v22 = vpop.f32.mrb[19].mxu1  ;;  %v10561_v49 = vsel %vm230_vm0, %v19582_v37, 0.0 }
 0xb4a   :  { %v10557_v21 = vsel %vm230_vm0, %v19584_v22, 0.0 }
 0xb4b   :  { %v10558_v51 = vadd.f32 %v10557_v21, %v10556_v38 }
 0xb4d   :  { %v10560_v30 = vadd.f32 %v10559_v42, %v10558_v51 }
 0xb4e   :  { %v19592_v25 = vpop.f32.mrb[20].mxu1 }
 0xb4f   :  { %v19594_v50 = vpop.f32.mrb[21].mxu1  ;;  %v10562_v54 = vadd.f32 %v10561_v49, %v10560_v30  ;;  %v10567_v36 = vsel %vm230_vm0, %v19592_v25, 0.0 }
 0xb50   :  { %v10563_v7 = vsel %vm230_vm0, %v19594_v50, 0.0  ;;  %v19598_v0 = vpop.f32.mrb[22].mxu1 }
 0xb51   :  { %v10564_v20 = vadd.f32 %v10563_v7, %v10562_v54  ;;  %v19600_v18 = vpop.f32.mrb[23].mxu1  ;;  %v10569_v35 = vsel %vm230_vm0, %v19598_v0, 0.0 }
 0xb52   :  { %v10565_v9 = vsel %vm230_vm0, %v19600_v18, 0.0 }
 0xb53   :  { %v10566_v8 = vadd.f32 %v10565_v9, %v10564_v20 }
 0xb55   :  { %v10568_v14 = vadd.f32 %v10567_v36, %v10566_v8 }
 0xb56   :  { %v19608_v33 = vpop.f32.mrb[24].mxu1 }
 0xb57   :  { %v19610_v28 = vpop.f32.mrb[25].mxu1  ;;  %v10570_v6 = vadd.f32 %v10569_v35, %v10568_v14  ;;  %v10575_v62 = vsel %vm230_vm0, %v19608_v33, 0.0 }
 0xb58   :  { %v10571_v2 = vsel %vm230_vm0, %v19610_v28, 0.0  ;;  %v19614_v26 = vpop.f32.mrb[26].mxu1 }
 0xb59   :  { %v10572_v5 = vadd.f32 %v10571_v2, %v10570_v6  ;;  %v19616_v45 = vpop.f32.mrb[27].mxu1  ;;  %v10577_v11 = vsel %vm230_vm0, %v19614_v26, 0.0 }
 0xb5a   :  { %v10573_v58 = vsel %vm230_vm0, %v19616_v45, 0.0 }
 0xb5b   :  { %v10574_v46 = vadd.f32 %v10573_v58, %v10572_v5 }
 0xb5d   :  { %v10576_v24 = vadd.f32 %v10575_v62, %v10574_v46 }
 0xb5e   :  { %v19624_v34 = vpop.f32.mrb[28].mxu1 }
 0xb5f   :  { %v19626_v17 = vpop.f32.mrb[29].mxu1  ;;  %v10578_v61 = vadd.f32 %v10577_v11, %v10576_v24  ;;  %v10583_v43 = vsel %vm230_vm0, %v19624_v34, 0.0 }
 0xb60   :  { %v10579_v41 = vsel %vm230_vm0, %v19626_v17, 0.0  ;;  %v19630_v60 = vpop.f32.mrb[30].mxu1 }
 0xb61   :  { %v10580_v15 = vadd.f32 %v10579_v41, %v10578_v61  ;;  %v19632_v1 = vpop.f32.mrb[31].mxu1  ;;  %v10585_v40 = vsel %vm230_vm0, %v19630_v60, 0.0 }
 0xb62   :  { %v10581_v4 = vsel %vm230_vm0, %v19632_v1, 0.0 }
 0xb63   :  { %v10582_v57 = vadd.f32 %v10581_v4, %v10580_v15 }
 0xb65   :  { %v10584_v27 = vadd.f32 %v10583_v43, %v10582_v57 }
 0xb66   :  { %v19640_v32 = vpop.f32.mrb[32].mxu1 }
 0xb67   :  { %v19642_v12 = vpop.f32.mrb[33].mxu1  ;;  %v10586_v38 = vadd.f32 %v10585_v40, %v10584_v27  ;;  %v10591_v7 = vsel %vm230_vm0, %v19640_v32, 0.0 }
 0xb68   :  { %v10587_v21 = vsel %vm230_vm0, %v19642_v12, 0.0  ;;  %v19646_v51 = vpop.f32.mrb[34].mxu1 }
 0xb69   :  { %v10588_v42 = vadd.f32 %v10587_v21, %v10586_v38  ;;  %v19648_v30 = vpop.f32.mrb[35].mxu1  ;;  %v10593_v9 = vsel %vm230_vm0, %v19646_v51, 0.0 }
 0xb6a   :  { %v10589_v49 = vsel %vm230_vm0, %v19648_v30, 0.0 }
 0xb6b   :  { %v10590_v54 = vadd.f32 %v10589_v49, %v10588_v42 }
 0xb6d   :  { %v10592_v20 = vadd.f32 %v10591_v7, %v10590_v54 }
 0xb6e   :  { %v19656_v8 = vpop.f32.mrb[36].mxu1 }
 0xb6f   :  { %v19658_v36 = vpop.f32.mrb[37].mxu1  ;;  %v10594_v14 = vadd.f32 %v10593_v9, %v10592_v20  ;;  %v10599_v62 = vsel %vm230_vm0, %v19656_v8, 0.0 }
 0xb70   :  { %v10595_v35 = vsel %vm230_vm0, %v19658_v36, 0.0  ;;  %v19662_v6 = vpop.f32.mrb[38].mxu1 }
 0xb71   :  { %v10596_v2 = vadd.f32 %v10595_v35, %v10594_v14  ;;  %v19664_v5 = vpop.f32.mrb[39].mxu1  ;;  %v10601_v11 = vsel %vm230_vm0, %v19662_v6, 0.0 }
 0xb72   :  { %v10597_v58 = vsel %vm230_vm0, %v19664_v5, 0.0 }
 0xb73   :  { %v10598_v46 = vadd.f32 %v10597_v58, %v10596_v2 }
 0xb75   :  { %v10600_v24 = vadd.f32 %v10599_v62, %v10598_v46 }
 0xb76   :  { %v19672_v61 = vpop.f32.mrb[40].mxu1 }
 0xb77   :  { %v19674_v41 = vpop.f32.mrb[41].mxu1  ;;  %v10602_v15 = vadd.f32 %v10601_v11, %v10600_v24  ;;  %v10607_v21 = vsel %vm230_vm0, %v19672_v61, 0.0 }
 0xb78   :  { %v10603_v4 = vsel %vm230_vm0, %v19674_v41, 0.0  ;;  %v19678_v57 = vpop.f32.mrb[42].mxu1 }
 0xb79   :  { %v10604_v43 = vadd.f32 %v10603_v4, %v10602_v15  ;;  %v19680_v27 = vpop.f32.mrb[43].mxu1  ;;  %v10609_v49 = vsel %vm230_vm0, %v19678_v57, 0.0 }
 0xb7a   :  { %v10605_v40 = vsel %vm230_vm0, %v19680_v27, 0.0 }
 0xb7b   :  { %v10606_v38 = vadd.f32 %v10605_v40, %v10604_v43 }
 0xb7d   :  { %v10608_v42 = vadd.f32 %v10607_v21, %v10606_v38 }
 0xb7e   :  { %v19688_v54 = vpop.f32.mrb[44].mxu1 }
 0xb7f   :  { %v19690_v7 = vpop.f32.mrb[45].mxu1  ;;  %v10610_v20 = vadd.f32 %v10609_v49, %v10608_v42  ;;  %v10615_v62 = vsel %vm230_vm0, %v19688_v54, 0.0 }
 0xb80   :  { %v10611_v9 = vsel %vm230_vm0, %v19690_v7, 0.0  ;;  %v19694_v14 = vpop.f32.mrb[46].mxu1 }
 0xb81   :  { %21741 = vst [vmem:[#allocation14_spill] sm:$0xff] %v19694_v14  ;;  %v10612_v35 = vadd.f32 %v10611_v9, %v10610_v20  ;;  %v19696_v2 = vpop.f32.mrb[47].mxu1  ;;  %v10617_v11 = vsel %vm230_vm0, %v19694_v14, 0.0 }
 0xb82   :  { %v10613_v58 = vsel %vm230_vm0, %v19696_v2, 0.0 }
 0xb83   :  { %v10614_v46 = vadd.f32 %v10613_v58, %v10612_v35 }
 0xb85   :  { %v10616_v24 = vadd.f32 %v10615_v62, %v10614_v46 }
 0xb86   :  { %v19704_v15 = vpop.f32.mrb[48].mxu1 }
 0xb87   :  { %21742 = vst [vmem:[#allocation12_spill] sm:$0xff] %v19704_v15  ;;  %v19706_v4 = vpop.f32.mrb[49].mxu1  ;;  %v10618_v43 = vadd.f32 %v10617_v11, %v10616_v24  ;;  %v10623_v9 = vsel %vm230_vm0, %v19704_v15, 0.0 }
 0xb88   :  { %21743 = vst [vmem:[#allocation16_spill] sm:$0xff] %v19706_v4  ;;  %v10619_v40 = vsel %vm230_vm0, %v19706_v4, 0.0  ;;  %v19710_v38 = vpop.f32.mrb[50].mxu1 }
 0xb89   :  { %21744 = vst [vmem:[#allocation18_spill] sm:$0xff] %v19710_v38  ;;  %v10620_v21 = vadd.f32 %v10619_v40, %v10618_v43  ;;  %v19712_v42 = vpop.f32.mrb[51].mxu1  ;;  %v10625_v58 = vsel %vm230_vm0, %v19710_v38, 0.0 }
 0xb8a   :  { %21745 = vst [vmem:[#allocation19_spill] sm:$0xff] %v19712_v42  ;;  %v10621_v49 = vsel %vm230_vm0, %v19712_v42, 0.0 }
 0xb8b   :  { %v10622_v20 = vadd.f32 %v10621_v49, %v10620_v21 }
 0xb8d   :  { %v10624_v35 = vadd.f32 %v10623_v9, %v10622_v20 }
 0xb8e   :  { %v19720_v46 = vpop.f32.mrb[52].mxu1 }
 0xb8f   :  { %21746 = vst [vmem:[#allocation20_spill] sm:$0xff] %v19720_v46  ;;  %v19722_v62 = vpop.f32.mrb[53].mxu1  ;;  %v10626_v24 = vadd.f32 %v10625_v58, %v10624_v35  ;;  %v10631_v20 = vsel %vm230_vm0, %v19720_v46, 0.0 }
 0xb90   :  { %21747 = vst [vmem:[#allocation21_spill] sm:$0xff] %v19722_v62  ;;  %v10627_v11 = vsel %vm230_vm0, %v19722_v62, 0.0  ;;  %v19726_v43 = vpop.f32.mrb[54].mxu1 }
 0xb91   :  { %21748 = vst [vmem:[#allocation3_spill] sm:$0xff] %v19726_v43  ;;  %v10628_v40 = vadd.f32 %v10627_v11, %v10626_v24  ;;  %v19728_v42 = vpop.f32.mrb[55].mxu1  ;;  %v10633_v38 = vsel %vm230_vm0, %v19726_v43, 0.0 }
 0xb92   :  { %21749 = vst [vmem:[#allocation22_spill] sm:$0xff] %v19728_v42  ;;  %v10629_v21 = vsel %vm230_vm0, %v19728_v42, 0.0 }
 0xb93   :  { %v10630_v49 = vadd.f32 %v10629_v21, %v10628_v40 }
 0xb95   :  { %v10632_v9 = vadd.f32 %v10631_v20, %v10630_v49 }
 0xb96   :  { %v19736_v35 = vpop.f32.mrb[56].mxu1 }
 0xb97   :  { %21750 = vst [vmem:[#allocation23_spill] sm:$0xff] %v19736_v35  ;;  %v19738_v58 = vpop.f32.mrb[57].mxu1  ;;  %v10634_v62 = vadd.f32 %v10633_v38, %v10632_v9  ;;  %v10639_v49 = vsel %vm230_vm0, %v19736_v35, 0.0 }
 0xb98   :  { %21751 = vst [vmem:[#allocation24_spill] sm:$0xff] %v19738_v58  ;;  %v10635_v24 = vsel %vm230_vm0, %v19738_v58, 0.0  ;;  %v19742_v11 = vpop.f32.mrb[58].mxu1 }
 0xb99   :  { %21752 = vst [vmem:[#allocation25_spill] sm:$0xff] %v19742_v11  ;;  %v10636_v15 = vadd.f32 %v10635_v24, %v10634_v62  ;;  %v19744_v42 = vpop.f32.mrb[59].mxu1  ;;  %v10641_v43 = vsel %vm230_vm0, %v19742_v11, 0.0 }
 0xb9a   :  { %21753 = vst [vmem:[#allocation5_spill] sm:$0xff] %v19744_v42  ;;  %v10637_v40 = vsel %vm230_vm0, %v19744_v42, 0.0 }
 0xb9b   :  { %v10638_v21 = vadd.f32 %v10637_v40, %v10636_v15 }
 0xb9d   :  { %v10640_v20 = vadd.f32 %v10639_v49, %v10638_v21 }
 0xb9e   :  { %v19752_v38 = vpop.f32.mrb[60].mxu1 }
 0xb9f   :  { %v19754_v9 = vpop.f32.mrb[61].mxu1  ;;  %v10642_v58 = vadd.f32 %v10641_v43, %v10640_v20  ;;  %v10647_v21 = vsel %vm230_vm0, %v19752_v38, 0.0 }
 0xba0   :  { %21754 = vst [vmem:[#allocation7_spill] sm:$0xff] %v19754_v9  ;;  %v10643_v62 = vsel %vm230_vm0, %v19754_v9, 0.0  ;;  %v19758_v24 = vpop.f32.mrb[62].mxu1 }
 0xba1   :  { %v10644_v46 = vadd.f32 %v10643_v62, %v10642_v58  ;;  %v19760_v42 = vpop.f32.mrb[63].mxu1  ;;  %v10649_v11 = vsel %vm230_vm0, %v19758_v24, 0.0 }
 0xba2   :  { %21755 = vst [vmem:[#allocation4_spill] sm:$0xff] %v19760_v42  ;;  %v10645_v15 = vsel %vm230_vm0, %v19760_v42, 0.0 }
 0xba3   :  { %v10646_v40 = vadd.f32 %v10645_v15, %v10644_v46 }
 0xba5   :  { %v10648_v49 = vadd.f32 %v10647_v21, %v10646_v40  ;;  %v21766_v40 = vld [vmem:[#allocation12_spill] sm:$0xff]  ;;  %v21768_v21 = vld [vmem:[#allocation18_spill] sm:$0xff] }
 0xba7   :  { %v10650_v43 = vadd.f32 %v10649_v11, %v10648_v49  ;;  %v21770_v49 = vld [vmem:[#allocation21_spill] sm:$0xff] }
 0xba9   :  { %v10651_v20 = vrot.slane %v10650_v43, 4 }
 0xbab   :  { %v10652_v35 = vadd.f32 %v10651_v20, %v10650_v43  ;;  %v21772_v20 = vld [vmem:[#allocation22_spill] sm:$0xff] }
 0xbad   :  { %v10653_v9 = vrot.slane %v10652_v35, 2 }
 0xbaf   :  { %v10654_v4 = vadd.f32 %v10653_v9, %v10652_v35  ;;  %v21762_v35 = vld [vmem:[#allocation16_spill] sm:$0xff]  ;;  %v21764_v9 = vld [vmem:[#allocation19_spill] sm:$0xff] }
 0xbb1   :  { %v10655_v14 = vrot.slane %v10654_v4, 1 }
 0xbb3   :  { %v10656_v58 = vadd.f32 %v10655_v14, %v10654_v4  ;;  %v21760_v4 = vld [vmem:[#allocation14_spill] sm:$0xff] }
 0xbb5   :  { %v19768_v62 = vmul.f32 0.001953125, %v10656_v58 }
 0xbb7   :  { %v19772_v42 = vsub.f32 %v19514_v19, %v19768_v62  ;;  %v19776_v46 = vsub.f32 %v19518_v3, %v19768_v62  ;;  %v19780_v15 = vsub.f32 %v19512_v10, %v19768_v62  ;;  %v19784_v11 = vsub.f32 %v19516_v13, %v19768_v62 }
 0xbb8   :  { %v19788_v14 = vsub.f32 %v19530_v31, %v19768_v62  ;;  %v19792_v19 = vsub.f32 %v19536_v48, %v19768_v62  ;;  %v19796_v3 = vsub.f32 %v19528_v63, %v19768_v62  ;;  %v19800_v10 = vsub.f32 %v19534_v47, %v19768_v62 }
 0xbb9   :  { %21756 = vst [vmem:[#allocation6_spill] sm:$0xff] %v19772_v42  ;;  %21757 = vst [vmem:[#allocation17_spill] sm:$0xff] %v19776_v46  ;;  %v19804_v13 = vsub.f32 %v19546_v55, %v19768_v62  ;;  %v19808_v31 = vsub.f32 %v19552_v23, %v19768_v62  ;;  %v19812_v48 = vsub.f32 %v19544_v53, %v19768_v62 }
 0xbba   :  { %21758 = vst [vmem:[#allocation9_spill] sm:$0xff] %v19780_v15  ;;  %21759 = vst [vmem:[#allocation11_spill] sm:$0xff] %v19784_v11  ;;  %v19816_v63 = vsub.f32 %v19550_v29, %v19768_v62  ;;  %v19820_v47 = vsub.f32 %v19562_v52, %v19768_v62  ;;  %v19824_v55 = vsub.f32 %v19568_v59, %v19768_v62 }
 0xbbb   :  { %v19828_v23 = vsub.f32 %v19560_v44, %v19768_v62  ;;  %v19832_v53 = vsub.f32 %v19566_v39, %v19768_v62  ;;  %v19836_v29 = vsub.f32 %v19578_v56, %v19768_v62  ;;  %v19840_v52 = vsub.f32 %v19584_v22, %v19768_v62 }
 0xbbc   :  { %v19844_v59 = vsub.f32 %v19576_v16, %v19768_v62  ;;  %v19848_v44 = vsub.f32 %v19582_v37, %v19768_v62  ;;  %v19852_v39 = vsub.f32 %v19594_v50, %v19768_v62  ;;  %v19856_v56 = vsub.f32 %v19600_v18, %v19768_v62 }
 0xbbd   :  { %v19860_v22 = vsub.f32 %v19592_v25, %v19768_v62  ;;  %v19864_v16 = vsub.f32 %v19598_v0, %v19768_v62  ;;  %v19868_v37 = vsub.f32 %v19610_v28, %v19768_v62  ;;  %v19872_v50 = vsub.f32 %v19616_v45, %v19768_v62 }
 0xbbe   :  { %v19876_v18 = vsub.f32 %v19608_v33, %v19768_v62  ;;  %v19880_v25 = vsub.f32 %v19614_v26, %v19768_v62  ;;  %v19884_v0 = vsub.f32 %v19626_v17, %v19768_v62  ;;  %v19888_v28 = vsub.f32 %v19632_v1, %v19768_v62 }
 0xbbf   :  { %v19892_v45 = vsub.f32 %v19624_v34, %v19768_v62  ;;  %v19896_v33 = vsub.f32 %v19630_v60, %v19768_v62  ;;  %v19900_v26 = vsub.f32 %v19642_v12, %v19768_v62  ;;  %v19904_v17 = vsub.f32 %v19648_v30, %v19768_v62 }
 0xbc0   :  { %v19908_v1 = vsub.f32 %v19640_v32, %v19768_v62  ;;  %v19912_v34 = vsub.f32 %v19646_v51, %v19768_v62  ;;  %v19916_v60 = vsub.f32 %v19658_v36, %v19768_v62  ;;  %v19920_v12 = vsub.f32 %v19664_v5, %v19768_v62 }
 0xbc1   :  { %v19924_v30 = vsub.f32 %v19656_v8, %v19768_v62  ;;  %v19928_v32 = vsub.f32 %v19662_v6, %v19768_v62  ;;  %v19932_v51 = vsub.f32 %v19674_v41, %v19768_v62  ;;  %v19936_v36 = vsub.f32 %v19680_v27, %v19768_v62 }
 0xbc2   :  { %v19940_v5 = vsub.f32 %v19672_v61, %v19768_v62  ;;  %v19944_v8 = vsub.f32 %v19678_v57, %v19768_v62  ;;  %v19948_v6 = vsub.f32 %v19690_v7, %v19768_v62  ;;  %v19952_v41 = vsub.f32 %v19696_v2, %v19768_v62 }
 0xbc3   :  { %v19956_v27 = vsub.f32 %v19688_v54, %v19768_v62  ;;  %v19960_v61 = vsub.f32 %v21760_v4, %v19768_v62  ;;  %v19964_v57 = vsub.f32 %v21762_v35, %v19768_v62  ;;  %v19968_v7 = vsub.f32 %v21764_v9, %v19768_v62  ;;  %v21774_v4 = vld [vmem:[#allocation20_spill] sm:$0xff]  ;;  %v21776_v9 = vld [vmem:[#allocation3_spill] sm:$0xff] }
 0xbc4   :  { %v19972_v2 = vsub.f32 %v21766_v40, %v19768_v62  ;;  %v19976_v54 = vsub.f32 %v21768_v21, %v19768_v62  ;;  %v19980_v43 = vsub.f32 %v21770_v49, %v19768_v62  ;;  %v19984_v58 = vsub.f32 %v21772_v20, %v19768_v62 }
 0xbc5   :  { %21761 = vst [vmem:[#allocation8_spill] sm:$0xff] %v19960_v61  ;;  %21763 = vst [vmem:[#allocation10_spill] sm:$0xff] %v19964_v57  ;;  %v19988_v35 = vsub.f32 %v21774_v4, %v19768_v62  ;;  %v19992_v40 = vsub.f32 %v21776_v9, %v19768_v62 }
 0xbc6   :  { %21765 = vst [vmem:[#allocation13_spill] sm:$0xff] %v19968_v7  ;;  %21767 = vst [vmem:[#allocation15_spill] sm:$0xff] %v19972_v2  ;;  %v21778_v2 = vld [vmem:[#allocation24_spill] sm:$0xff] }
 0xbc7   :  { %21769 = vst [vmem:[#allocation14_spill] sm:$0xff] %v19976_v54  ;;  %21771 = vst [vmem:[#allocation16_spill] sm:$0xff] %v19980_v43  ;;  %v19996_v21 = vsub.f32 %v21778_v2, %v19768_v62  ;;  %v21780_v54 = vld [vmem:[#allocation5_spill] sm:$0xff]  ;;  %v21782_v43 = vld [vmem:[#allocation23_spill] sm:$0xff] }
 0xbc8   :  { %21773 = vst [vmem:[#allocation19_spill] sm:$0xff] %v19984_v58  ;;  %21775 = vst [vmem:[#allocation12_spill] sm:$0xff] %v19988_v35  ;;  %v20000_v49 = vsub.f32 %v21780_v54, %v19768_v62  ;;  %v20004_v20 = vsub.f32 %v21782_v43, %v19768_v62  ;;  %v21784_v58 = vld [vmem:[#allocation25_spill] sm:$0xff]  ;;  %v21786_v35 = vld [vmem:[#allocation7_spill] sm:$0xff]  ;;  %v20020_v54 = vsub.f32 %v19752_v38, %v19768_v62 }
 0xbc9   :  { %21777 = vst [vmem:[#allocation18_spill] sm:$0xff] %v19992_v40  ;;  %21779 = vst [vmem:[#allocation21_spill] sm:$0xff] %v19996_v21  ;;  %v20008_v4 = vsub.f32 %v21784_v58, %v19768_v62  ;;  %v20012_v9 = vsub.f32 %v21786_v35, %v19768_v62  ;;  %v21788_v40 = vld [vmem:[#allocation4_spill] sm:$0xff]  ;;  %v20024_v43 = vsub.f32 %v19758_v24, %v19768_v62 }
 0xbca   :  { %21781 = vst [vmem:[#allocation22_spill] sm:$0xff] %v20000_v49  ;;  %21783 = vst [vmem:[#allocation20_spill] sm:$0xff] %v20004_v20  ;;  %v20016_v2 = vsub.f32 %v21788_v40, %v19768_v62  ;;  %v10722_v58 = vmul.f32 %v19772_v42, %v19772_v42  ;;  %v10724_v35 = vmul.f32 %v19780_v15, %v19780_v15 }
 0xbcb   :  { %21785 = vst [vmem:[#allocation3_spill] sm:$0xff] %v20008_v4  ;;  %21787 = vst [vmem:[#allocation24_spill] sm:$0xff] %v20012_v9  ;;  %v10723_v4 = vmul.f32 %v19776_v46, %v19776_v46  ;;  %v10725_v40 = vmul.f32 %v19784_v11, %v19784_v11  ;;  %v10726_v24 = vmul.f32 %v19788_v14, %v19788_v14 }
 0xbcc   :  { %21789 = vst [vmem:[#allocation5_spill] sm:$0xff] %v20016_v2  ;;  %21790 = vst [vmem:[#allocation23_spill] sm:$0xff] %v20020_v54  ;;  %v10786_v2 = vsel %vm230_vm0, %v10722_v58, 0.0  ;;  %v10789_v62 = vsel %vm230_vm0, %v10724_v35, 0.0  ;;  %v10727_v46 = vmul.f32 %v19792_v19, %v19792_v19  ;;  %v10728_v11 = vmul.f32 %v19796_v3, %v19796_v3 }
 0xbcd   :  { %21791 = vst [vmem:[#allocation25_spill] sm:$0xff] %v20024_v43  ;;  %v10787_v38 = vsel %vm230_vm0, %v10723_v4, 0.0  ;;  %v10791_v43 = vsel %vm230_vm0, %v10725_v40, 0.0  ;;  %v10793_v58 = vsel %vm230_vm0, %v10726_v24, 0.0  ;;  %v10729_v4 = vmul.f32 %v19800_v10, %v19800_v10 }
 0xbce   :  { %v10788_v54 = vadd.f32 %v10787_v38, %v10786_v2  ;;  %v10795_v2 = vsel %vm230_vm0, %v10727_v46, 0.0  ;;  %v10797_v35 = vsel %vm230_vm0, %v10728_v11, 0.0  ;;  %v10733_v46 = vmul.f32 %v19816_v63, %v19816_v63 }
 0xbcf   :  { %v10734_v11 = vmul.f32 %v19820_v47, %v19820_v47 }
 0xbd0   :  { %v10790_v42 = vadd.f32 %v10789_v62, %v10788_v54  ;;  %v10730_v54 = vmul.f32 %v19804_v13, %v19804_v13 }
 0xbd2   :  { %v10792_v15 = vadd.f32 %v10791_v43, %v10790_v42  ;;  %v10731_v42 = vmul.f32 %v19808_v31, %v19808_v31  ;;  %v10799_v43 = vsel %vm230_vm0, %v10729_v4, 0.0  ;;  %v10801_v24 = vsel %vm230_vm0, %v10730_v54, 0.0 }
 0xbd3   :  { %v10735_v4 = vmul.f32 %v19824_v55, %v19824_v55  ;;  %v10736_v54 = vmul.f32 %v19828_v23, %v19828_v23 }
 0xbd4   :  { %v10794_v9 = vadd.f32 %v10793_v58, %v10792_v15  ;;  %v10732_v15 = vmul.f32 %v19812_v48, %v19812_v48 }
 0xbd6   :  { %v10796_v38 = vadd.f32 %v10795_v2, %v10794_v9  ;;  %v10803_v9 = vsel %vm230_vm0, %v10731_v42, 0.0  ;;  %v10737_v42 = vmul.f32 %v19832_v53, %v19832_v53 }
 0xbd8   :  { %v10798_v62 = vadd.f32 %v10797_v35, %v10796_v38  ;;  %v10805_v38 = vsel %vm230_vm0, %v10732_v15, 0.0  ;;  %v10738_v15 = vmul.f32 %v19836_v29, %v19836_v29 }
 0xbda   :  { %v10800_v40 = vadd.f32 %v10799_v43, %v10798_v62  ;;  %v10807_v62 = vsel %vm230_vm0, %v10733_v46, 0.0  ;;  %v10739_v46 = vmul.f32 %v19840_v52, %v19840_v52 }
 0xbdc   :  { %v10802_v58 = vadd.f32 %v10801_v24, %v10800_v40  ;;  %v10809_v40 = vsel %vm230_vm0, %v10734_v11, 0.0  ;;  %v10740_v11 = vmul.f32 %v19844_v59, %v19844_v59 }
 0xbde   :  { %v10804_v2 = vadd.f32 %v10803_v9, %v10802_v58  ;;  %v10811_v58 = vsel %vm230_vm0, %v10735_v4, 0.0  ;;  %v10741_v4 = vmul.f32 %v19848_v44, %v19848_v44 }
 0xbe0   :  { %v10806_v35 = vadd.f32 %v10805_v38, %v10804_v2  ;;  %v10813_v2 = vsel %vm230_vm0, %v10736_v54, 0.0  ;;  %v10742_v54 = vmul.f32 %v19852_v39, %v19852_v39 }
 0xbe2   :  { %v10808_v43 = vadd.f32 %v10807_v62, %v10806_v35  ;;  %v10815_v35 = vsel %vm230_vm0, %v10737_v42, 0.0  ;;  %v10743_v42 = vmul.f32 %v19856_v56, %v19856_v56 }
 0xbe4   :  { %v10810_v24 = vadd.f32 %v10809_v40, %v10808_v43  ;;  %v10817_v43 = vsel %vm230_vm0, %v10738_v15, 0.0  ;;  %v10744_v15 = vmul.f32 %v19860_v22, %v19860_v22 }
 0xbe6   :  { %v10812_v9 = vadd.f32 %v10811_v58, %v10810_v24  ;;  %v10819_v24 = vsel %vm230_vm0, %v10739_v46, 0.0  ;;  %v10745_v46 = vmul.f32 %v19864_v16, %v19864_v16 }
 0xbe8   :  { %v10814_v38 = vadd.f32 %v10813_v2, %v10812_v9  ;;  %v10821_v9 = vsel %vm230_vm0, %v10740_v11, 0.0  ;;  %v10746_v11 = vmul.f32 %v19868_v37, %v19868_v37 }
 0xbea   :  { %v10816_v62 = vadd.f32 %v10815_v35, %v10814_v38  ;;  %v10823_v38 = vsel %vm230_vm0, %v10741_v4, 0.0  ;;  %v10747_v4 = vmul.f32 %v19872_v50, %v19872_v50 }
 0xbec   :  { %v10818_v40 = vadd.f32 %v10817_v43, %v10816_v62  ;;  %v10825_v62 = vsel %vm230_vm0, %v10742_v54, 0.0  ;;  %v10748_v54 = vmul.f32 %v19876_v18, %v19876_v18 }
 0xbee   :  { %v10820_v58 = vadd.f32 %v10819_v24, %v10818_v40  ;;  %v10827_v40 = vsel %vm230_vm0, %v10743_v42, 0.0  ;;  %v10749_v42 = vmul.f32 %v19880_v25, %v19880_v25 }
 0xbf0   :  { %v10822_v2 = vadd.f32 %v10821_v9, %v10820_v58  ;;  %v10829_v58 = vsel %vm230_vm0, %v10744_v15, 0.0  ;;  %v10750_v15 = vmul.f32 %v19884_v0, %v19884_v0 }
 0xbf2   :  { %v10824_v35 = vadd.f32 %v10823_v38, %v10822_v2  ;;  %v10831_v2 = vsel %vm230_vm0, %v10745_v46, 0.0  ;;  %v10751_v46 = vmul.f32 %v19888_v28, %v19888_v28 }
 0xbf4   :  { %v10826_v43 = vadd.f32 %v10825_v62, %v10824_v35  ;;  %v10833_v35 = vsel %vm230_vm0, %v10746_v11, 0.0  ;;  %v10752_v11 = vmul.f32 %v19892_v45, %v19892_v45 }
 0xbf6   :  { %v10828_v24 = vadd.f32 %v10827_v40, %v10826_v43  ;;  %v10835_v43 = vsel %vm230_vm0, %v10747_v4, 0.0  ;;  %v10753_v4 = vmul.f32 %v19896_v33, %v19896_v33 }
 0xbf8   :  { %v10830_v9 = vadd.f32 %v10829_v58, %v10828_v24  ;;  %v10837_v24 = vsel %vm230_vm0, %v10748_v54, 0.0  ;;  %v10754_v54 = vmul.f32 %v19900_v26, %v19900_v26 }
 0xbfa   :  { %v10832_v38 = vadd.f32 %v10831_v2, %v10830_v9  ;;  %v10839_v9 = vsel %vm230_vm0, %v10749_v42, 0.0  ;;  %v10755_v42 = vmul.f32 %v19904_v17, %v19904_v17 }
 0xbfc   :  { %v10834_v62 = vadd.f32 %v10833_v35, %v10832_v38  ;;  %v10841_v38 = vsel %vm230_vm0, %v10750_v15, 0.0  ;;  %v10756_v15 = vmul.f32 %v19908_v1, %v19908_v1 }
 0xbfe   :  { %v10836_v40 = vadd.f32 %v10835_v43, %v10834_v62  ;;  %v10843_v62 = vsel %vm230_vm0, %v10751_v46, 0.0  ;;  %v10757_v46 = vmul.f32 %v19912_v34, %v19912_v34 }
 0xc00   :  { %v10838_v58 = vadd.f32 %v10837_v24, %v10836_v40  ;;  %v10845_v40 = vsel %vm230_vm0, %v10752_v11, 0.0  ;;  %v10758_v11 = vmul.f32 %v19916_v60, %v19916_v60 }
 0xc02   :  { %v10840_v2 = vadd.f32 %v10839_v9, %v10838_v58  ;;  %v10847_v58 = vsel %vm230_vm0, %v10753_v4, 0.0  ;;  %v10759_v4 = vmul.f32 %v19920_v12, %v19920_v12 }
 0xc04   :  { %v10842_v35 = vadd.f32 %v10841_v38, %v10840_v2  ;;  %v10849_v2 = vsel %vm230_vm0, %v10754_v54, 0.0  ;;  %v10760_v54 = vmul.f32 %v19924_v30, %v19924_v30 }
 0xc06   :  { %v10844_v43 = vadd.f32 %v10843_v62, %v10842_v35  ;;  %v10851_v35 = vsel %vm230_vm0, %v10755_v42, 0.0  ;;  %v10761_v42 = vmul.f32 %v19928_v32, %v19928_v32 }
 0xc08   :  { %v10846_v24 = vadd.f32 %v10845_v40, %v10844_v43  ;;  %v10853_v43 = vsel %vm230_vm0, %v10756_v15, 0.0  ;;  %v10762_v15 = vmul.f32 %v19932_v51, %v19932_v51 }
 0xc0a   :  { %v10848_v9 = vadd.f32 %v10847_v58, %v10846_v24  ;;  %v10855_v24 = vsel %vm230_vm0, %v10757_v46, 0.0  ;;  %v10763_v46 = vmul.f32 %v19936_v36, %v19936_v36 }
 0xc0c   :  { %v10850_v38 = vadd.f32 %v10849_v2, %v10848_v9  ;;  %v10857_v9 = vsel %vm230_vm0, %v10758_v11, 0.0  ;;  %v10764_v11 = vmul.f32 %v19940_v5, %v19940_v5 }
 0xc0e   :  { %v10852_v62 = vadd.f32 %v10851_v35, %v10850_v38  ;;  %v10859_v38 = vsel %vm230_vm0, %v10759_v4, 0.0  ;;  %v10765_v4 = vmul.f32 %v19944_v8, %v19944_v8 }
 0xc10   :  { %v10854_v40 = vadd.f32 %v10853_v43, %v10852_v62  ;;  %v10861_v62 = vsel %vm230_vm0, %v10760_v54, 0.0  ;;  %v10766_v54 = vmul.f32 %v19948_v6, %v19948_v6 }
 0xc12   :  { %v10856_v58 = vadd.f32 %v10855_v24, %v10854_v40  ;;  %v10863_v40 = vsel %vm230_vm0, %v10761_v42, 0.0  ;;  %v10767_v42 = vmul.f32 %v19952_v41, %v19952_v41 }
 0xc14   :  { %v10858_v2 = vadd.f32 %v10857_v9, %v10856_v58  ;;  %v10865_v58 = vsel %vm230_vm0, %v10762_v15, 0.0  ;;  %v10768_v15 = vmul.f32 %v19956_v27, %v19956_v27 }
 0xc16   :  { %v10860_v35 = vadd.f32 %v10859_v38, %v10858_v2  ;;  %v10867_v2 = vsel %vm230_vm0, %v10763_v46, 0.0  ;;  %v10769_v46 = vmul.f32 %v19960_v61, %v19960_v61 }
 0xc18   :  { %v10862_v43 = vadd.f32 %v10861_v62, %v10860_v35  ;;  %v10869_v35 = vsel %vm230_vm0, %v10764_v11, 0.0  ;;  %v10770_v11 = vmul.f32 %v19964_v57, %v19964_v57 }
 0xc1a   :  { %v10864_v24 = vadd.f32 %v10863_v40, %v10862_v43  ;;  %v10871_v43 = vsel %vm230_vm0, %v10765_v4, 0.0  ;;  %v10771_v4 = vmul.f32 %v19968_v7, %v19968_v7 }
 0xc1c   :  { %v10866_v9 = vadd.f32 %v10865_v58, %v10864_v24  ;;  %v10873_v24 = vsel %vm230_vm0, %v10766_v54, 0.0  ;;  %v21792_v54 = vld [vmem:[#allocation15_spill] sm:$0xff] }
 0xc1e   :  { %v10868_v38 = vadd.f32 %v10867_v2, %v10866_v9  ;;  %v10875_v9 = vsel %vm230_vm0, %v10767_v42, 0.0  ;;  %v21793_v42 = vld [vmem:[#allocation14_spill] sm:$0xff] }
 0xc20   :  { %v10870_v62 = vadd.f32 %v10869_v35, %v10868_v38  ;;  %v10877_v38 = vsel %vm230_vm0, %v10768_v15, 0.0  ;;  %v21794_v15 = vld [vmem:[#allocation16_spill] sm:$0xff] }
 0xc22   :  { %v10872_v40 = vadd.f32 %v10871_v43, %v10870_v62  ;;  %v10879_v62 = vsel %vm230_vm0, %v10769_v46, 0.0  ;;  %v21795_v46 = vld [vmem:[#allocation19_spill] sm:$0xff] }
 0xc24   :  { %v10874_v58 = vadd.f32 %v10873_v24, %v10872_v40  ;;  %v10772_v40 = vmul.f32 %v21792_v54, %v21792_v54  ;;  %v10881_v24 = vsel %vm230_vm0, %v10770_v11, 0.0  ;;  %v21796_v11 = vld [vmem:[#allocation12_spill] sm:$0xff] }
 0xc26   :  { %v10876_v2 = vadd.f32 %v10875_v9, %v10874_v58  ;;  %v10773_v58 = vmul.f32 %v21793_v42, %v21793_v42  ;;  %v10883_v9 = vsel %vm230_vm0, %v10771_v4, 0.0  ;;  %v21797_v4 = vld [vmem:[#allocation18_spill] sm:$0xff] }
 0xc28   :  { %v10878_v35 = vadd.f32 %v10877_v38, %v10876_v2  ;;  %v10774_v2 = vmul.f32 %v21794_v15, %v21794_v15  ;;  %v10885_v38 = vsel %vm230_vm0, %v10772_v40, 0.0 }
 0xc2a   :  { %v10880_v43 = vadd.f32 %v10879_v62, %v10878_v35  ;;  %v10775_v35 = vmul.f32 %v21795_v46, %v21795_v46  ;;  %v10887_v62 = vsel %vm230_vm0, %v10773_v58, 0.0 }
 0xc2c   :  { %v10882_v61 = vadd.f32 %v10881_v24, %v10880_v43  ;;  %v10776_v43 = vmul.f32 %v21796_v11, %v21796_v11  ;;  %v10889_v24 = vsel %vm230_vm0, %v10774_v2, 0.0 }
 0xc2e   :  { %v10884_v57 = vadd.f32 %v10883_v9, %v10882_v61  ;;  %v10777_v61 = vmul.f32 %v21797_v4, %v21797_v4  ;;  %v10891_v9 = vsel %vm230_vm0, %v10775_v35, 0.0  ;;  %v10893_v40 = vsel %vm230_vm0, %v10776_v43, 0.0  ;;  %v21798_v35 = vld [vmem:[#allocation3_spill] sm:$0xff]  ;;  %v21799_v43 = vld [vmem:[#allocation24_spill] sm:$0xff] }
 0xc30   :  { %v10886_v7 = vadd.f32 %v10885_v38, %v10884_v57  ;;  %v10778_v57 = vmul.f32 %v19996_v21, %v19996_v21  ;;  %v10895_v58 = vsel %vm230_vm0, %v10777_v61, 0.0  ;;  %v21800_v61 = vld [vmem:[#allocation5_spill] sm:$0xff] }
 0xc32   :  { %v10888_v54 = vadd.f32 %v10887_v62, %v10886_v7  ;;  %v10779_v7 = vmul.f32 %v20000_v49, %v20000_v49  ;;  %v10897_v2 = vsel %vm230_vm0, %v10778_v57, 0.0  ;;  %v21801_v57 = vld [vmem:[#allocation23_spill] sm:$0xff] }
 0xc34   :  { %v10890_v42 = vadd.f32 %v10889_v24, %v10888_v54  ;;  %v10780_v54 = vmul.f32 %v20004_v20, %v20004_v20 }
 0xc36   :  { %v10892_v15 = vadd.f32 %v10891_v9, %v10890_v42  ;;  %v10781_v42 = vmul.f32 %v21798_v35, %v21798_v35  ;;  %v10899_v9 = vsel %vm230_vm0, %v10779_v7, 0.0  ;;  %v21802_v7 = vld [vmem:[#allocation25_spill] sm:$0xff] }
 0xc38   :  { %v10894_v38 = vadd.f32 %v10893_v40, %v10892_v15  ;;  %v10782_v15 = vmul.f32 %v21799_v43, %v21799_v43  ;;  %v10901_v40 = vsel %vm230_vm0, %v10780_v54, 0.0 }
 0xc3a   :  { %v10896_v62 = vadd.f32 %v10895_v58, %v10894_v38  ;;  %v10783_v38 = vmul.f32 %v21800_v61, %v21800_v61  ;;  %v10903_v58 = vsel %vm230_vm0, %v10781_v42, 0.0 }
 0xc3c   :  { %v10898_v24 = vadd.f32 %v10897_v2, %v10896_v62  ;;  %v10784_v62 = vmul.f32 %v21801_v57, %v21801_v57  ;;  %v10905_v2 = vsel %vm230_vm0, %v10782_v15, 0.0 }
 0xc3e   :  { %v10900_v21 = vadd.f32 %v10899_v9, %v10898_v24  ;;  %v10785_v24 = vmul.f32 %v21802_v7, %v21802_v7  ;;  %v10907_v9 = vsel %vm230_vm0, %v10783_v38, 0.0  ;;  %v21803_v7 = vld [vmem:[#allocation6_spill] sm:$0xff]  ;;  %v21804_v38 = vld [vmem:[#allocation17_spill] sm:$0xff] }
 0xc40   :  { %v10902_v49 = vadd.f32 %v10901_v40, %v10900_v21  ;;  %v10909_v21 = vsel %vm230_vm0, %v10784_v62, 0.0  ;;  %v10911_v40 = vsel %vm230_vm0, %v10785_v24, 0.0  ;;  %v21805_v62 = vld [vmem:[#allocation9_spill] sm:$0xff]  ;;  %v21806_v24 = vld [vmem:[#allocation11_spill] sm:$0xff] }
 0xc42   :  { %v10904_v20 = vadd.f32 %v10903_v58, %v10902_v49 }
 0xc44   :  { %v10906_v35 = vadd.f32 %v10905_v2, %v10904_v20 }
 0xc46   :  { %v10908_v43 = vadd.f32 %v10907_v9, %v10906_v35 }
 0xc48   :  { %v10910_v54 = vadd.f32 %v10909_v21, %v10908_v43 }
 0xc4a   :  { %v10912_v61 = vadd.f32 %v10911_v40, %v10910_v54  ;;  %v21807_v54 = vld [vmem:[#allocation8_spill] sm:$0xff]  ;;  %v21808_v40 = vld [vmem:[#allocation10_spill] sm:$0xff] }
 0xc4c   :  { %v10913_v42 = vrot.slane %v10912_v61, 4 }
 0xc4e   :  { %v10914_v49 = vadd.f32 %v10913_v42, %v10912_v61  ;;  %v21809_v42 = vld [vmem:[#allocation13_spill] sm:$0xff] }
 0xc50   :  { %v10915_v58 = vrot.slane %v10914_v49, 2 }
 0xc52   :  { %v10916_v4 = vadd.f32 %v10915_v58, %v10914_v49  ;;  %v21810_v49 = vld [vmem:[#allocation15_spill] sm:$0xff]  ;;  %v21811_v58 = vld [vmem:[#allocation14_spill] sm:$0xff] }
 0xc54   :  { %v10917_v57 = vrot.slane %v10916_v4, 1 }
 0xc56   :  { %v10918_v11 = vadd.f32 %v10917_v57, %v10916_v4 }
 0xc58   :  { %v10919_v15 = vmul.f32 0.001953125, %v10918_v11 }
 0xc5a   :  { %v10920_v20 = vadd.f32 1e-05, %v10919_v15  ;;  %v21813_v15 = vld [vmem:[#allocation16_spill] sm:$0xff] }
 0xc5c   :  { %15229 = vrsqrt.f32 %v10920_v20 }
 0xc66   :  { %v20218_v2 = vpop.eup %15229 }
 0xc67   :  { %v20222_v35 = vmul.f32 %v20218_v2, %v21803_v7  ;;  %v20226_v43 = vmul.f32 %v20218_v2, %v21804_v38  ;;  %v20230_v61 = vmul.f32 %v20218_v2, %v21805_v62  ;;  %v20234_v4 = vmul.f32 %v20218_v2, %v21806_v24  ;;  %v21816_v62 = vld [vmem:[#allocation12_spill] sm:$0xff] }
 0xc68   :  { %v20238_v11 = vmul.f32 %v20218_v2, %v19788_v14  ;;  %v20242_v57 = vmul.f32 %v20218_v2, %v19792_v19  ;;  %v20246_v7 = vmul.f32 %v20218_v2, %v19796_v3  ;;  %v20250_v9 = vmul.f32 %v20218_v2, %v19800_v10 }
 0xc69   :  { %v20254_v21 = vmul.f32 %v20218_v2, %v19804_v13  ;;  %v20258_v14 = vmul.f32 %v20218_v2, %v19808_v31  ;;  %v20262_v19 = vmul.f32 %v20218_v2, %v19812_v48  ;;  %v20266_v3 = vmul.f32 %v20218_v2, %v19816_v63 }
 0xc6a   :  { %v20270_v10 = vmul.f32 %v20218_v2, %v19820_v47  ;;  %v20274_v13 = vmul.f32 %v20218_v2, %v19824_v55  ;;  %v20278_v31 = vmul.f32 %v20218_v2, %v19828_v23  ;;  %v20282_v48 = vmul.f32 %v20218_v2, %v19832_v53 }
 0xc6b   :  { %v20286_v63 = vmul.f32 %v20218_v2, %v19836_v29  ;;  %v20290_v47 = vmul.f32 %v20218_v2, %v19840_v52  ;;  %v20294_v55 = vmul.f32 %v20218_v2, %v19844_v59  ;;  %v20298_v23 = vmul.f32 %v20218_v2, %v19848_v44 }
 0xc6c   :  { %v20302_v53 = vmul.f32 %v20218_v2, %v19852_v39  ;;  %v20306_v29 = vmul.f32 %v20218_v2, %v19856_v56  ;;  %v20310_v52 = vmul.f32 %v20218_v2, %v19860_v22  ;;  %v20314_v59 = vmul.f32 %v20218_v2, %v19864_v16 }
 0xc6d   :  { %v20318_v44 = vmul.f32 %v20218_v2, %v19868_v37  ;;  %v20322_v39 = vmul.f32 %v20218_v2, %v19872_v50  ;;  %v20326_v56 = vmul.f32 %v20218_v2, %v19876_v18  ;;  %v20330_v22 = vmul.f32 %v20218_v2, %v19880_v25 }
 0xc6e   :  { %v20334_v16 = vmul.f32 %v20218_v2, %v19884_v0  ;;  %v20338_v37 = vmul.f32 %v20218_v2, %v19888_v28  ;;  %v20342_v50 = vmul.f32 %v20218_v2, %v19892_v45  ;;  %v20346_v18 = vmul.f32 %v20218_v2, %v19896_v33 }
 0xc6f   :  { %v20350_v25 = vmul.f32 %v20218_v2, %v19900_v26  ;;  %v20354_v0 = vmul.f32 %v20218_v2, %v19904_v17  ;;  %v20358_v28 = vmul.f32 %v20218_v2, %v19908_v1  ;;  %v20362_v45 = vmul.f32 %v20218_v2, %v19912_v34 }
 0xc70   :  { %v20366_v33 = vmul.f32 %v20218_v2, %v19916_v60  ;;  %v20370_v26 = vmul.f32 %v20218_v2, %v19920_v12  ;;  %v20374_v17 = vmul.f32 %v20218_v2, %v19924_v30  ;;  %v20378_v1 = vmul.f32 %v20218_v2, %v19928_v32 }
 0xc71   :  { %v20382_v34 = vmul.f32 %v20218_v2, %v19932_v51  ;;  %v20386_v60 = vmul.f32 %v20218_v2, %v19936_v36  ;;  %v20390_v12 = vmul.f32 %v20218_v2, %v19940_v5  ;;  %v20394_v30 = vmul.f32 %v20218_v2, %v19944_v8 }
 0xc72   :  { %v20398_v32 = vmul.f32 %v20218_v2, %v19948_v6  ;;  %v20402_v51 = vmul.f32 %v20218_v2, %v19952_v41  ;;  %v20406_v36 = vmul.f32 %v20218_v2, %v19956_v27  ;;  %v20410_v5 = vmul.f32 %v20218_v2, %v21807_v54  ;;  %v21818_v54 = vld [vmem:[#allocation18_spill] sm:$0xff] }
 0xc73   :  { %v20414_v8 = vmul.f32 %v20218_v2, %v21808_v40  ;;  %v20418_v6 = vmul.f32 %v20218_v2, %v21809_v42  ;;  %v20422_v41 = vmul.f32 %v20218_v2, %v21810_v49  ;;  %v20426_v27 = vmul.f32 %v20218_v2, %v21811_v58  ;;  %v20447_v42 = vld [vmem:[%s21515_s5] ss:$0 sm:$0xff]  ;;  %v21820_v49 = vld [vmem:[#allocation21_spill] sm:$0xff] }
 0xc74   :  { %v20430_v20 = vmul.f32 %v20218_v2, %v21813_v15  ;;  %v20434_v38 = vmul.f32 %v20218_v2, %v21795_v46  ;;  %v20438_v24 = vmul.f32 %v20218_v2, %v21816_v62  ;;  %v20442_v40 = vmul.f32 %v20218_v2, %v21818_v54  ;;  %v21822_v15 = vld [vmem:[#allocation22_spill] sm:$0xff] }
 0xc75   :  { %21812 = vst [vmem:[#allocation7_spill] sm:$0xff] %v20426_v27  ;;  %v20451_v58 = vmul.f32 %v20218_v2, %v21820_v49  ;;  %v20455_v46 = vmul.f32 %v20218_v2, %v21822_v15  ;;  %v21827_v27 = vld [vmem:[#allocation5_spill] sm:$0xff] }
 0xc76   :  { %21814 = vst [vmem:[#allocation4_spill] sm:$0xff] %v20430_v20  ;;  %21815 = vst [vmem:[#allocation19_spill] sm:$0xff] %v20434_v38  ;;  %v21824_v38 = vld [vmem:[#allocation20_spill] sm:$0xff]  ;;  %v20471_v49 = vmul.f32 %v20218_v2, %v21827_v27  ;;  %v20491_v27 = vmul.f32 %v20447_v42, %v20230_v61  ;;  %v20511_v61 = vmul.f32 %v20447_v42, %v20250_v9 }
 0xc77   :  { %21817 = vst [vmem:[#allocation6_spill] sm:$0xff] %v20438_v24  ;;  %21819 = vst [vmem:[#allocation17_spill] sm:$0xff] %v20442_v40  ;;  %v20459_v62 = vmul.f32 %v20218_v2, %v21824_v38  ;;  %v21825_v24 = vld [vmem:[#allocation3_spill] sm:$0xff]  ;;  %v21826_v40 = vld [vmem:[#allocation24_spill] sm:$0xff]  ;;  %v20531_v9 = vmul.f32 %v20447_v42, %v20270_v10  ;;  %v20551_v10 = vmul.f32 %v20447_v42, %v20290_v47 }
 0xc78   :  { %21821 = vst [vmem:[#allocation9_spill] sm:$0xff] %v20451_v58  ;;  %21823 = vst [vmem:[#allocation11_spill] sm:$0xff] %v20455_v46  ;;  %v20463_v54 = vmul.f32 %v20218_v2, %v21825_v24  ;;  %v20467_v20 = vmul.f32 %v20218_v2, %v21826_v40  ;;  %v21828_v58 = vld [vmem:[#allocation23_spill] sm:$0xff]  ;;  %v21829_v46 = vld [vmem:[#allocation25_spill] sm:$0xff]  ;;  %v20483_v24 = vmul.f32 %v20447_v42, %v20222_v35 }
 0xc79   :  { %v20475_v15 = vmul.f32 %v20218_v2, %v21828_v58  ;;  %v20479_v38 = vmul.f32 %v20218_v2, %v21829_v46  ;;  %v20487_v40 = vmul.f32 %v20447_v42, %v20226_v43  ;;  %v20495_v58 = vmul.f32 %v20447_v42, %v20234_v4 }
 0xc7a   :  { %v20499_v2 = vmul.f32 %v20447_v42, %v20238_v11  ;;  %v20503_v35 = vmul.f32 %v20447_v42, %v20242_v57  ;;  %v20507_v43 = vmul.f32 %v20447_v42, %v20246_v7  ;;  %v20515_v4 = vmul.f32 %v20447_v42, %v20254_v21 }
 0xc7b   :  { %v20519_v11 = vmul.f32 %v20447_v42, %v20258_v14  ;;  %v20523_v57 = vmul.f32 %v20447_v42, %v20262_v19  ;;  %v20527_v7 = vmul.f32 %v20447_v42, %v20266_v3  ;;  %v20535_v21 = vmul.f32 %v20447_v42, %v20274_v13 }
 0xc7c   :  { %v20539_v14 = vmul.f32 %v20447_v42, %v20278_v31  ;;  %v20543_v19 = vmul.f32 %v20447_v42, %v20282_v48  ;;  %v20547_v3 = vmul.f32 %v20447_v42, %v20286_v63  ;;  %v20555_v13 = vmul.f32 %v20447_v42, %v20294_v55  ;;  %v21834_v46 = vld [vmem:[#allocation7_spill] sm:$0xff] }
 0xc7d   :  { %v20559_v31 = vmul.f32 %v20447_v42, %v20298_v23  ;;  %v20563_v48 = vmul.f32 %v20447_v42, %v20302_v53  ;;  %v20567_v63 = vmul.f32 %v20447_v42, %v20306_v29  ;;  %v20571_v47 = vmul.f32 %v20447_v42, %v20310_v52 }
 0xc7e   :  { %v20575_v55 = vmul.f32 %v20447_v42, %v20314_v59  ;;  %v20579_v23 = vmul.f32 %v20447_v42, %v20318_v44  ;;  %v20583_v53 = vmul.f32 %v20447_v42, %v20322_v39  ;;  %v20587_v29 = vmul.f32 %v20447_v42, %v20326_v56 }
 0xc7f   :  { %v20591_v52 = vmul.f32 %v20447_v42, %v20330_v22  ;;  %v20595_v59 = vmul.f32 %v20447_v42, %v20334_v16  ;;  %v20599_v44 = vmul.f32 %v20447_v42, %v20338_v37  ;;  %v20603_v39 = vmul.f32 %v20447_v42, %v20342_v50 }
 0xc80   :  { %v20607_v56 = vmul.f32 %v20447_v42, %v20346_v18  ;;  %v20611_v22 = vmul.f32 %v20447_v42, %v20350_v25  ;;  %v20615_v16 = vmul.f32 %v20447_v42, %v20354_v0  ;;  %v20619_v37 = vmul.f32 %v20447_v42, %v20358_v28 }
 0xc81   :  { %v20623_v50 = vmul.f32 %v20447_v42, %v20362_v45  ;;  %v20627_v18 = vmul.f32 %v20447_v42, %v20366_v33  ;;  %v20631_v25 = vmul.f32 %v20447_v42, %v20370_v26  ;;  %v20635_v0 = vmul.f32 %v20447_v42, %v20374_v17 }
 0xc82   :  { %v20639_v28 = vmul.f32 %v20447_v42, %v20378_v1  ;;  %v20643_v45 = vmul.f32 %v20447_v42, %v20382_v34  ;;  %v20647_v33 = vmul.f32 %v20447_v42, %v20386_v60  ;;  %v20651_v26 = vmul.f32 %v20447_v42, %v20390_v12 }
 0xc83   :  { %v20655_v17 = vmul.f32 %v20447_v42, %v20394_v30  ;;  %v20659_v1 = vmul.f32 %v20447_v42, %v20398_v32  ;;  %v20663_v34 = vmul.f32 %v20447_v42, %v20402_v51  ;;  %v20667_v60 = vmul.f32 %v20447_v42, %v20406_v36 }
 0xc84   :  { %v20671_v12 = vmul.f32 %v20447_v42, %v20410_v5  ;;  %v20675_v30 = vmul.f32 %v20447_v42, %v20414_v8  ;;  %v20679_v32 = vmul.f32 %v20447_v42, %v20418_v6  ;;  %v20683_v51 = vmul.f32 %v20447_v42, %v20422_v41 }
 0xc85   :  { %21830 = vst [vmem:[#allocation8_spill] sm:$0xff] %v20667_v60  ;;  %v20687_v36 = vmul.f32 %v20447_v42, %v21834_v46  ;;  %v21836_v60 = vld [vmem:[#allocation4_spill] sm:$0xff]  ;;  %v20708_v46 = vld [vmem:[%s21516_s6] ss:$0 sm:$0xff] }
 0xc86   :  { %21831 = vst [vmem:[#allocation10_spill] sm:$0xff] %v20671_v12  ;;  %21832 = vst [vmem:[#allocation13_spill] sm:$0xff] %v20675_v30  ;;  %v20691_v5 = vmul.f32 %v20447_v42, %v21836_v60  ;;  %v21838_v12 = vld [vmem:[#allocation19_spill] sm:$0xff]  ;;  %v21839_v30 = vld [vmem:[#allocation6_spill] sm:$0xff] }
 0xc87   :  { %21833 = vst [vmem:[#allocation15_spill] sm:$0xff] %v20679_v32  ;;  %21835 = vst [vmem:[#allocation14_spill] sm:$0xff] %v20687_v36  ;;  %v20695_v8 = vmul.f32 %v20447_v42, %v21838_v12  ;;  %v20699_v6 = vmul.f32 %v20447_v42, %v21839_v30  ;;  %v21840_v32 = vld [vmem:[#allocation17_spill] sm:$0xff]  ;;  %v20720_v30 = vmul.f32 %v20447_v42, %v20459_v62 }
 0xc88   :  { %21837 = vst [vmem:[#allocation16_spill] sm:$0xff] %v20691_v5  ;;  %v20703_v41 = vmul.f32 %v20447_v42, %v21840_v32  ;;  %v21842_v36 = vld [vmem:[#allocation9_spill] sm:$0xff]  ;;  %v21843_v5 = vld [vmem:[#allocation11_spill] sm:$0xff]  ;;  %v20724_v32 = vmul.f32 %v20447_v42, %v20463_v54  ;;  %v20740_v62 = vmul.f32 %v20447_v42, %v20479_v38  ;;  %v20744_v54 = vadd.f32 %v20708_v46, %v20483_v24 }
 0xc89   :  { %v20712_v60 = vmul.f32 %v20447_v42, %v21842_v36  ;;  %v20716_v12 = vmul.f32 %v20447_v42, %v21843_v5  ;;  %v20732_v36 = vmul.f32 %v20447_v42, %v20471_v49  ;;  %v20736_v5 = vmul.f32 %v20447_v42, %v20475_v15 }
 0xc8a   :  { %21841 = vst [vmem:[#allocation12_spill] sm:$0xff] %v20703_v41  ;;  %v20728_v41 = vmul.f32 %v20447_v42, %v20467_v20  ;;  %v20748_v20 = vadd.f32 %v20708_v46, %v20487_v40  ;;  %v20752_v49 = vadd.f32 %v20708_v46, %v20491_v27  ;;  %v20756_v15 = vadd.f32 %v20708_v46, %v20495_v58 }
 0xc8b   :  { %v20760_v42 = vadd.f32 %v20708_v46, %v20499_v2  ;;  %v20764_v38 = vadd.f32 %v20708_v46, %v20503_v35  ;;  %v20768_v24 = vadd.f32 %v20708_v46, %v20507_v43  ;;  %v20772_v40 = vadd.f32 %v20708_v46, %v20511_v61 }
 0xc8c   :  { %v20776_v27 = vadd.f32 %v20708_v46, %v20515_v4  ;;  %v20780_v58 = vadd.f32 %v20708_v46, %v20519_v11  ;;  %v20784_v2 = vadd.f32 %v20708_v46, %v20523_v57  ;;  %v20788_v35 = vadd.f32 %v20708_v46, %v20527_v7 }
 0xc8d   :  { %v20792_v43 = vadd.f32 %v20708_v46, %v20531_v9  ;;  %v20796_v61 = vadd.f32 %v20708_v46, %v20535_v21  ;;  %v20800_v4 = vadd.f32 %v20708_v46, %v20539_v14  ;;  %v20804_v11 = vadd.f32 %v20708_v46, %v20543_v19 }
 0xc8e   :  { %v20808_v57 = vadd.f32 %v20708_v46, %v20547_v3  ;;  %v20812_v7 = vadd.f32 %v20708_v46, %v20551_v10  ;;  %v20816_v9 = vadd.f32 %v20708_v46, %v20555_v13  ;;  %v20820_v21 = vadd.f32 %v20708_v46, %v20559_v31 }
 0xc8f   :  { %v20824_v14 = vadd.f32 %v20708_v46, %v20563_v48  ;;  %v20828_v19 = vadd.f32 %v20708_v46, %v20567_v63  ;;  %v20832_v3 = vadd.f32 %v20708_v46, %v20571_v47  ;;  %v20836_v10 = vadd.f32 %v20708_v46, %v20575_v55 }
 0xc90   :  { %v20840_v13 = vadd.f32 %v20708_v46, %v20579_v23  ;;  %v20844_v31 = vadd.f32 %v20708_v46, %v20583_v53  ;;  %v20848_v48 = vadd.f32 %v20708_v46, %v20587_v29  ;;  %v20852_v63 = vadd.f32 %v20708_v46, %v20591_v52 }
 0xc91   :  { %v20856_v47 = vadd.f32 %v20708_v46, %v20595_v59  ;;  %v20860_v55 = vadd.f32 %v20708_v46, %v20599_v44  ;;  %v20864_v23 = vadd.f32 %v20708_v46, %v20603_v39  ;;  %v20868_v53 = vadd.f32 %v20708_v46, %v20607_v56 }
 0xc92   :  { %v20872_v29 = vadd.f32 %v20708_v46, %v20611_v22  ;;  %v20876_v52 = vadd.f32 %v20708_v46, %v20615_v16  ;;  %v20880_v59 = vadd.f32 %v20708_v46, %v20619_v37  ;;  %v20884_v44 = vadd.f32 %v20708_v46, %v20623_v50 }
 0xc93   :  { %v20888_v39 = vadd.f32 %v20708_v46, %v20627_v18  ;;  %v20892_v56 = vadd.f32 %v20708_v46, %v20631_v25  ;;  %v20896_v22 = vadd.f32 %v20708_v46, %v20635_v0  ;;  %v20900_v16 = vadd.f32 %v20708_v46, %v20639_v28 }
 0xc94   :  { %21844 = vst [vmem:[#allocation18_spill] sm:$0xff] %v20876_v52  ;;  %21845 = vst [vmem:[#allocation21_spill] sm:$0xff] %v20880_v59  ;;  %v20904_v37 = vadd.f32 %v20708_v46, %v20643_v45  ;;  %v20908_v50 = vadd.f32 %v20708_v46, %v20647_v33  ;;  %v20912_v18 = vadd.f32 %v20708_v46, %v20651_v26  ;;  %v21857_v45 = vld [vmem:[#allocation8_spill] sm:$0xff]  ;;  %v12364_v52 = vld [vmem:[%s21511_s0 + $0x151] sm:$0xff] }
 0xc95   :  { %21846 = vst [vmem:[#allocation22_spill] sm:$0xff] %v20884_v44  ;;  %21847 = vst [vmem:[#allocation20_spill] sm:$0xff] %v20888_v39  ;;  %v20916_v25 = vadd.f32 %v20708_v46, %v20655_v17  ;;  %v20920_v0 = vadd.f32 %v20708_v46, %v20659_v1  ;;  %v20924_v28 = vadd.f32 %v20708_v46, %v20663_v34  ;;  %v12338_v17 = vld [vmem:[%s21511_s0 + $0x19] sm:$0xff]  ;;  %v12339_v1 = vld [vmem:[%s21511_s0 + $0x21] sm:$0xff] }
 0xc96   :  { %21848 = vst [vmem:[#allocation3_spill] sm:$0xff] %v20892_v56  ;;  %21849 = vst [vmem:[#allocation24_spill] sm:$0xff] %v20896_v22  ;;  %v20928_v33 = vadd.f32 %v20708_v46, %v21857_v45  ;;  %v12340_v34 = vld [vmem:[%s21511_s0 + $0x31] sm:$0xff]  ;;  %v12341_v45 = vld [vmem:[%s21511_s0 + $0x39] sm:$0xff] }
 0xc97   :  { %21850 = vst [vmem:[#allocation5_spill] sm:$0xff] %v20900_v16  ;;  %21851 = vst [vmem:[#allocation23_spill] sm:$0xff] %v20904_v37  ;;  %v12342_v37 = vld [vmem:[%s21511_s0 + $0x49] sm:$0xff]  ;;  %v12346_v22 = vld [vmem:[%s21511_s0 + $0x79] sm:$0xff]  ;;  %v11194_v56 = vadd.f32 %v12340_v34, %v20752_v49  ;;  %v11195_v39 = vadd.f32 %v12341_v45, %v20756_v15 }
 0xc98   :  { %21852 = vst [vmem:[#allocation25_spill] sm:$0xff] %v20908_v50  ;;  %21853 = vst [vmem:[#allocation7_spill] sm:$0xff] %v20912_v18  ;;  %v21859_v50 = vld [vmem:[#allocation10_spill] sm:$0xff]  ;;  %v12363_v59 = vld [vmem:[%s21511_s0 + $0x141] sm:$0xff] }
 0xc99   :  { %21854 = vst [vmem:[#allocation4_spill] sm:$0xff] %v20916_v25  ;;  %21855 = vst [vmem:[#allocation19_spill] sm:$0xff] %v20920_v0  ;;  %v20932_v26 = vadd.f32 %v20708_v46, %v21859_v50  ;;  %v20956_v0 = vadd.f32 %v20708_v46, %v20683_v51  ;;  %v21866_v25 = vld [vmem:[#allocation14_spill] sm:$0xff]  ;;  %v12345_v51 = vld [vmem:[%s21511_s0 + $0x69] sm:$0xff] }
 0xc9a   :  { %21856 = vst [vmem:[#allocation6_spill] sm:$0xff] %v20924_v28  ;;  %21858 = vst [vmem:[#allocation17_spill] sm:$0xff] %v20928_v33  ;;  %v21861_v33 = vld [vmem:[#allocation13_spill] sm:$0xff]  ;;  %v20960_v18 = vadd.f32 %v20708_v46, %v21866_v25  ;;  %v12362_v44 = vld [vmem:[%s21511_s0 + $0x139] sm:$0xff] }
 0xc9b   :  { %21860 = vst [vmem:[#allocation9_spill] sm:$0xff] %v20932_v26  ;;  %v20948_v50 = vadd.f32 %v20708_v46, %v21861_v33  ;;  %v21863_v26 = vld [vmem:[#allocation15_spill] sm:$0xff]  ;;  %21865 = vst [vmem:[#allocation10_spill] sm:$0xff] %v20956_v0  ;;  %v12343_v33 = vld [vmem:[%s21511_s0 + $0x51] sm:$0xff] }
 0xc9c   :  { %v20952_v28 = vadd.f32 %v20708_v46, %v21863_v26  ;;  %21867 = vst [vmem:[#allocation13_spill] sm:$0xff] %v20960_v18  ;;  %v12344_v26 = vld [vmem:[%s21511_s0 + $0x61] sm:$0xff]  ;;  %v20980_v18 = vadd.f32 %v20708_v46, %v20695_v8  ;;  %v12348_v8 = vld [vmem:[%s21511_s0 + $0x91] sm:$0xff]  ;;  %v11197_v49 = vadd.f32 %v12343_v33, %v20764_v38  ;;  %v11200_v38 = vadd.f32 %v12346_v22, %v20776_v27  ;;  %v12370_v27 = vld [vmem:[%s21511_s0 + $0x1c9] sm:$0xff] }
 0xc9d   :  { %21862 = vst [vmem:[#allocation11_spill] sm:$0xff] %v20948_v50  ;;  %v21868_v0 = vld [vmem:[#allocation16_spill] sm:$0xff]  ;;  %v11198_v15 = vadd.f32 %v12344_v26, %v20768_v24  ;;  %v12367_v34 = vld [vmem:[%s21511_s0 + $0x171] sm:$0xff]  ;;  %11258 = vst.msk [vmem:[%s21517_s7 + $0x10] sm:$0xff] %vm230_vm0, %v11194_v56 }
 0xc9e   :  { %21864 = vst [vmem:[#allocation8_spill] sm:$0xff] %v20952_v28  ;;  %v20976_v25 = vadd.f32 %v20708_v46, %v21868_v0  ;;  %21870 = vst [vmem:[#allocation14_spill] sm:$0xff] %v20980_v18  ;;  %v20984_v28 = vadd.f32 %v20708_v46, %v20699_v6  ;;  %v21872_v50 = vld [vmem:[#allocation12_spill] sm:$0xff]  ;;  %v12349_v6 = vld [vmem:[%s21511_s0 + $0x99] sm:$0xff]  ;;  %v21016_v18 = vadd.f32 %v20708_v46, %v20724_v32 }
 0xc9f   :  { %v20988_v16 = vadd.f32 %v20708_v46, %v21872_v50  ;;  %v12347_v0 = vld [vmem:[%s21511_s0 + $0x81] sm:$0xff]  ;;  %v21004_v50 = vadd.f32 %v20708_v46, %v20712_v60  ;;  %v12351_v60 = vld [vmem:[%s21511_s0 + $0xb1] sm:$0xff]  ;;  %v21032_v32 = vadd.f32 %v20708_v46, %v20728_v41  ;;  %11259 = vst.msk [vmem:[%s21517_s7 + $0x18] sm:$0xff] %vm230_vm0, %v11195_v39  ;;  %11261 = vst.msk [vmem:[%s21517_s7 + $0x28] sm:$0xff] %vm230_vm0, %v11197_v49 }
 0xca0   :  { %21869 = vst [vmem:[#allocation15_spill] sm:$0xff] %v20976_v25  ;;  %21871 = vst [vmem:[#allocation16_spill] sm:$0xff] %v20984_v28  ;;  %v21012_v28 = vadd.f32 %v20708_v46, %v20720_v30  ;;  %v12350_v25 = vld [vmem:[%s21511_s0 + $0xa9] sm:$0xff]  ;;  %v12355_v41 = vld [vmem:[%s21511_s0 + $0xe1] sm:$0xff]  ;;  %v11201_v24 = vadd.f32 %v12347_v0, %v20780_v58  ;;  %v11205_v39 = vadd.f32 %v12351_v60, %v20796_v61 }
 0xca1   :  { %21873 = vst [vmem:[#allocation12_spill] sm:$0xff] %v20988_v16  ;;  %21874 = vst [vmem:[#allocation26_spill] sm:$0xff] %v21004_v50  ;;  %v21008_v16 = vadd.f32 %v20708_v46, %v20716_v12  ;;  %v12352_v12 = vld [vmem:[%s21511_s0 + $0xc1] sm:$0xff]  ;;  %v12353_v30 = vld [vmem:[%s21511_s0 + $0xc9] sm:$0xff]  ;;  %v11204_v56 = vadd.f32 %v12350_v25, %v20792_v43  ;;  %v11209_v26 = vadd.f32 %v12355_v41, %v20812_v7 }
 0xca2   :  { %21876 = vst [vmem:[#allocation28_spill] sm:$0xff] %v21012_v28  ;;  %21877 = vst [vmem:[#allocation29_spill] sm:$0xff] %v21016_v18  ;;  %v21036_v18 = vadd.f32 %v20708_v46, %v20732_v36  ;;  %v21040_v28 = vadd.f32 %v20708_v46, %v20736_v5  ;;  %v12354_v50 = vld [vmem:[%s21511_s0 + $0xd9] sm:$0xff]  ;;  %v12356_v36 = vld [vmem:[%s21511_s0 + $0xf1] sm:$0xff]  ;;  %v11206_v22 = vadd.f32 %v12352_v12, %v20800_v4 }
 0xca3   :  { %21875 = vst [vmem:[#allocation27_spill] sm:$0xff] %v21008_v16  ;;  %21878 = vst [vmem:[#allocation30_spill] sm:$0xff] %v21032_v32  ;;  %v21044_v16 = vadd.f32 %v20708_v46, %v20740_v62  ;;  %v12357_v5 = vld [vmem:[%s21511_s0 + $0xf9] sm:$0xff]  ;;  %v12358_v46 = vld [vmem:[%s21511_s0 + $0x109] sm:$0xff]  ;;  %v11193_v32 = vadd.f32 %v12339_v1, %v20748_v20  ;;  %v11196_v20 = vadd.f32 %v12342_v37, %v20760_v42 }
 0xca4   :  { %21879 = vst [vmem:[#allocation31_spill] sm:$0xff] %v21036_v18  ;;  %21880 = vst [vmem:[#allocation32_spill] sm:$0xff] %v21040_v28  ;;  %v12359_v62 = vld [vmem:[%s21511_s0 + $0x111] sm:$0xff]  ;;  %v12361_v28 = vld [vmem:[%s21511_s0 + $0x129] sm:$0xff]  ;;  %v11192_v18 = vadd.f32 %v12338_v17, %v20744_v54  ;;  %v11199_v17 = vadd.f32 %v12345_v51, %v20772_v40  ;;  %v11202_v40 = vadd.f32 %v12348_v8, %v20784_v2 }
 0xca5   :  { %21881 = vst [vmem:[#allocation33_spill] sm:$0xff] %v21044_v16  ;;  %v12360_v16 = vld [vmem:[%s21511_s0 + $0x121] sm:$0xff]  ;;  %v12365_v54 = vld [vmem:[%s21511_s0 + $0x159] sm:$0xff]  ;;  %v12366_v1 = vld [vmem:[%s21511_s0 + $0x169] sm:$0xff]  ;;  %v11203_v37 = vadd.f32 %v12349_v6, %v20788_v35  ;;  %v11208_v33 = vadd.f32 %v12354_v50, %v20808_v57  ;;  %v11210_v51 = vadd.f32 %v12356_v36, %v20816_v9  ;;  %v11211_v25 = vadd.f32 %v12357_v5, %v20820_v21 }
 0xca6   :  { %v12368_v45 = vld [vmem:[%s21511_s0 + $0x181] sm:$0xff]  ;;  %v12369_v42 = vld [vmem:[%s21511_s0 + $0x189] sm:$0xff]  ;;  %11256 = vst.msk [vmem:[%s21517_s7] sm:$0xff] %vm230_vm0, %v11192_v18  ;;  %11257 = vst.msk [vmem:[%s21517_s7 + $0x8] sm:$0xff] %vm230_vm0, %v11193_v32  ;;  %v11207_v18 = vadd.f32 %v12353_v30, %v20804_v11  ;;  %v11212_v21 = vadd.f32 %v12358_v46, %v20824_v14  ;;  %v11213_v0 = vadd.f32 %v12359_v62, %v20828_v19 }
 0xca7   :  { %v12371_v58 = vld [vmem:[%s21511_s0 + $0x1d1] sm:$0xff]  ;;  %v12372_v2 = vld [vmem:[%s21511_s0 + $0x1e1] sm:$0xff]  ;;  %v12373_v35 = vld [vmem:[%s21511_s0 + $0x1e9] sm:$0xff]  ;;  %11260 = vst.msk [vmem:[%s21517_s7 + $0x20] sm:$0xff] %vm230_vm0, %v11196_v20  ;;  %v11214_v8 = vadd.f32 %v12360_v16, %v20832_v3  ;;  %v11215_v6 = vadd.f32 %v12361_v28, %v20836_v10  ;;  %v11216_v10 = vadd.f32 %v12362_v44, %v20840_v13  ;;  %v11217_v16 = vadd.f32 %v12363_v59, %v20844_v31 }
 0xca8   :  { %11262 = vst.msk [vmem:[%s21517_s7 + $0x30] sm:$0xff] %vm230_vm0, %v11198_v15  ;;  %11263 = vst.msk [vmem:[%s21517_s7 + $0x38] sm:$0xff] %vm230_vm0, %v11199_v17  ;;  %v12374_v43 = vld [vmem:[%s21511_s0 + $0x1f9] sm:$0xff]  ;;  %v12375_v61 = vld [vmem:[%s21511_s0 + $0x201] sm:$0xff]  ;;  %v11218_v28 = vadd.f32 %v12364_v52, %v20848_v48  ;;  %v11219_v50 = vadd.f32 %v12365_v54, %v20852_v63  ;;  %v11220_v63 = vadd.f32 %v12366_v1, %v20856_v47 }
 0xca9   :  { %v12376_v4 = vld [vmem:[%s21511_s0 + $0x211] sm:$0xff]  ;;  %v12377_v11 = vld [vmem:[%s21511_s0 + $0x219] sm:$0xff]  ;;  %11264 = vst.msk [vmem:[%s21517_s7 + $0x40] sm:$0xff] %vm230_vm0, %v11200_v38  ;;  %11265 = vst.msk [vmem:[%s21517_s7 + $0x48] sm:$0xff] %vm230_vm0, %v11201_v24  ;;  %v11221_v52 = vadd.f32 %v12367_v34, %v20860_v55  ;;  %v11222_v59 = vadd.f32 %v12368_v45, %v20864_v23  ;;  %v11223_v44 = vadd.f32 %v12369_v42, %v20868_v53 }
 0xcaa   :  { %11266 = vst.msk [vmem:[%s21517_s7 + $0x50] sm:$0xff] %vm230_vm0, %v11202_v40  ;;  %11267 = vst.msk [vmem:[%s21517_s7 + $0x58] sm:$0xff] %vm230_vm0, %v11203_v37  ;;  %v12378_v57 = vld [vmem:[%s21511_s0 + $0x229] sm:$0xff]  ;;  %v12379_v7 = vld [vmem:[%s21511_s0 + $0x231] sm:$0xff]  ;;  %v11224_v53 = vadd.f32 %v12370_v27, %v20872_v29 }
 0xcab   :  { %v12380_v9 = vld [vmem:[%s21511_s0 + $0x241] sm:$0xff]  ;;  %11268 = vst.msk [vmem:[%s21517_s7 + $0x60] sm:$0xff] %vm230_vm0, %v11204_v56  ;;  %11269 = vst.msk [vmem:[%s21517_s7 + $0x68] sm:$0xff] %vm230_vm0, %v11205_v39  ;;  %v12381_v14 = vld [vmem:[%s21511_s0 + $0x249] sm:$0xff] }
 0xcac   :  { %11270 = vst.msk [vmem:[%s21517_s7 + $0x70] sm:$0xff] %vm230_vm0, %v11206_v22  ;;  %11271 = vst.msk [vmem:[%s21517_s7 + $0x78] sm:$0xff] %vm230_vm0, %v11207_v18  ;;  %v12382_v19 = vld [vmem:[%s21511_s0 + $0x259] sm:$0xff]  ;;  %v12383_v3 = vld [vmem:[%s21511_s0 + $0x261] sm:$0xff] }
 0xcad   :  { %11272 = vst.msk [vmem:[%s21517_s7 + $0x80] sm:$0xff] %vm230_vm0, %v11208_v33  ;;  %11273 = vst.msk [vmem:[%s21517_s7 + $0x88] sm:$0xff] %vm230_vm0, %v11209_v26  ;;  %v12384_v13 = vld [vmem:[%s21511_s0 + $0x271] sm:$0xff]  ;;  %v12385_v31 = vld [vmem:[%s21511_s0 + $0x279] sm:$0xff] }
 0xcae   :  { %11274 = vst.msk [vmem:[%s21517_s7 + $0x90] sm:$0xff] %vm230_vm0, %v11210_v51  ;;  %11275 = vst.msk [vmem:[%s21517_s7 + $0x98] sm:$0xff] %vm230_vm0, %v11211_v25  ;;  %v12386_v48 = vld [vmem:[%s21511_s0 + $0x289] sm:$0xff]  ;;  %v12387_v47 = vld [vmem:[%s21511_s0 + $0x291] sm:$0xff] }
 0xcaf   :  { %11276 = vst.msk [vmem:[%s21517_s7 + $0xa0] sm:$0xff] %vm230_vm0, %v11212_v21  ;;  %11277 = vst.msk [vmem:[%s21517_s7 + $0xa8] sm:$0xff] %vm230_vm0, %v11213_v0  ;;  %v12388_v55 = vld [vmem:[%s21511_s0 + $0x2a1] sm:$0xff]  ;;  %v12389_v23 = vld [vmem:[%s21511_s0 + $0x2a9] sm:$0xff] }
 0xcb0   :  { %11278 = vst.msk [vmem:[%s21517_s7 + $0xb0] sm:$0xff] %vm230_vm0, %v11214_v8  ;;  %11279 = vst.msk [vmem:[%s21517_s7 + $0xb8] sm:$0xff] %vm230_vm0, %v11215_v6  ;;  %v21882_v60 = vld [vmem:[#allocation18_spill] sm:$0xff]  ;;  %v21883_v30 = vld [vmem:[#allocation21_spill] sm:$0xff] }
 0xcb1   :  { %v11225_v12 = vadd.f32 %v12371_v58, %v21882_v60  ;;  %v11226_v32 = vadd.f32 %v12372_v2, %v21883_v30  ;;  %v21884_v41 = vld [vmem:[#allocation22_spill] sm:$0xff]  ;;  %11280 = vst.msk [vmem:[%s21517_s7 + $0xc0] sm:$0xff] %vm230_vm0, %v11216_v10  ;;  %11281 = vst.msk [vmem:[%s21517_s7 + $0xc8] sm:$0xff] %vm230_vm0, %v11217_v16  ;;  %v12391_v5 = vld [vmem:[%s21511_s0 + $0x2c1] sm:$0xff] }
 0xcb2   :  { %v11227_v36 = vadd.f32 %v12373_v35, %v21884_v41  ;;  %11282 = vst.msk [vmem:[%s21517_s7 + $0xd0] sm:$0xff] %vm230_vm0, %v11218_v28  ;;  %11283 = vst.msk [vmem:[%s21517_s7 + $0xd8] sm:$0xff] %vm230_vm0, %v11219_v50  ;;  %v12390_v29 = vld [vmem:[%s21511_s0 + $0x2b9] sm:$0xff]  ;;  %v12392_v46 = vld [vmem:[%s21511_s0 + $0x2d1] sm:$0xff] }
 0xcb3   :  { %v21885_v62 = vld [vmem:[#allocation20_spill] sm:$0xff]  ;;  %v21886_v20 = vld [vmem:[#allocation3_spill] sm:$0xff]  ;;  %v21888_v1 = vld [vmem:[#allocation5_spill] sm:$0xff]  ;;  %11284 = vst.msk [vmem:[%s21517_s7 + $0xe0] sm:$0xff] %vm230_vm0, %v11220_v63 }
 0xcb4   :  { %v11228_v54 = vadd.f32 %v12374_v43, %v21885_v62  ;;  %v11229_v49 = vadd.f32 %v12375_v61, %v21886_v20  ;;  %v21887_v15 = vld [vmem:[#allocation24_spill] sm:$0xff]  ;;  %v11231_v34 = vadd.f32 %v12377_v11, %v21888_v1  ;;  %11285 = vst.msk [vmem:[%s21517_s7 + $0xe8] sm:$0xff] %vm230_vm0, %v11221_v52  ;;  %11286 = vst.msk [vmem:[%s21517_s7 + $0xf0] sm:$0xff] %vm230_vm0, %v11222_v59  ;;  %v12393_v45 = vld [vmem:[%s21511_s0 + $0x2d9] sm:$0xff] }
 0xcb5   :  { %v11230_v17 = vadd.f32 %v12376_v4, %v21887_v15  ;;  %11287 = vst.msk [vmem:[%s21517_s7 + $0xf8] sm:$0xff] %vm230_vm0, %v11223_v44  ;;  %v12394_v42 = vld [vmem:[%s21511_s0 + $0x2e9] sm:$0xff]  ;;  %v12395_v38 = vld [vmem:[%s21511_s0 + $0x2f1] sm:$0xff]  ;;  %v21889_v24 = vld [vmem:[#allocation23_spill] sm:$0xff] }
 0xcb6   :  { %v11232_v40 = vadd.f32 %v12378_v57, %v21889_v24  ;;  %v21890_v37 = vld [vmem:[#allocation25_spill] sm:$0xff]  ;;  %v21891_v58 = vld [vmem:[#allocation7_spill] sm:$0xff]  ;;  %v21892_v35 = vld [vmem:[#allocation4_spill] sm:$0xff]  ;;  %11288 = vst.msk [vmem:[%s21517_s7 + $0x100] sm:$0xff] %vm230_vm0, %v11224_v53 }
 0xcb7   :  { %v11233_v27 = vadd.f32 %v12379_v7, %v21890_v37  ;;  %v11234_v2 = vadd.f32 %v12380_v9, %v21891_v58  ;;  %v11235_v56 = vadd.f32 %v12381_v14, %v21892_v35  ;;  %11289 = vst.msk [vmem:[%s21517_s7 + $0x108] sm:$0xff] %vm230_vm0, %v11225_v12  ;;  %11290 = vst.msk [vmem:[%s21517_s7 + $0x110] sm:$0xff] %vm230_vm0, %v11226_v32  ;;  %v12396_v39 = vld [vmem:[%s21511_s0 + $0x301] sm:$0xff]  ;;  %v12397_v22 = vld [vmem:[%s21511_s0 + $0x309] sm:$0xff] }
 0xcb8   :  { %11291 = vst.msk [vmem:[%s21517_s7 + $0x118] sm:$0xff] %vm230_vm0, %v11227_v36  ;;  %v12398_v18 = vld [vmem:[%s21511_s0 + $0x319] sm:$0xff]  ;;  %v21895_v33 = vld [vmem:[#allocation17_spill] sm:$0xff]  ;;  %11292 = vst.msk [vmem:[%s21517_s7 + $0x120] sm:$0xff] %vm230_vm0, %v11228_v54 }
 0xcb9   :  { %v21893_v43 = vld [vmem:[#allocation19_spill] sm:$0xff]  ;;  %v21894_v4 = vld [vmem:[#allocation6_spill] sm:$0xff]  ;;  %v11238_v26 = vadd.f32 %v12384_v13, %v21895_v33  ;;  %v21896_v51 = vld [vmem:[#allocation9_spill] sm:$0xff]  ;;  %11293 = vst.msk [vmem:[%s21517_s7 + $0x128] sm:$0xff] %vm230_vm0, %v11229_v49 }
 0xcba   :  { %v11236_v61 = vadd.f32 %v12382_v19, %v21893_v43  ;;  %v11237_v11 = vadd.f32 %v12383_v3, %v21894_v4  ;;  %v11239_v25 = vadd.f32 %v12385_v31, %v21896_v51  ;;  %11294 = vst.msk [vmem:[%s21517_s7 + $0x130] sm:$0xff] %vm230_vm0, %v11230_v17  ;;  %11295 = vst.msk [vmem:[%s21517_s7 + $0x138] sm:$0xff] %vm230_vm0, %v11231_v34  ;;  %v12399_v57 = vld [vmem:[%s21511_s0 + $0x321] sm:$0xff]  ;;  %v12400_v7 = vld [vmem:[%s21511_s0 + $0x331] sm:$0xff] }
 0xcbb   :  { %v12401_v9 = vld [vmem:[%s21511_s0 + $0x339] sm:$0xff]  ;;  %v21898_v8 = vld [vmem:[#allocation8_spill] sm:$0xff]  ;;  %v21900_v3 = vld [vmem:[#allocation13_spill] sm:$0xff]  ;;  %11296 = vst.msk [vmem:[%s21517_s7 + $0x140] sm:$0xff] %vm230_vm0, %v11232_v40 }
 0xcbc   :  { %v21897_v21 = vld [vmem:[#allocation11_spill] sm:$0xff]  ;;  %v11241_v6 = vadd.f32 %v12387_v47, %v21898_v8  ;;  %v21899_v14 = vld [vmem:[#allocation10_spill] sm:$0xff]  ;;  %v11243_v10 = vadd.f32 %v12389_v23, %v21900_v3  ;;  %11297 = vst.msk [vmem:[%s21517_s7 + $0x148] sm:$0xff] %vm230_vm0, %v11233_v27  ;;  %11298 = vst.msk [vmem:[%s21517_s7 + $0x150] sm:$0xff] %vm230_vm0, %v11234_v2 }
 0xcbd   :  { %v11240_v0 = vadd.f32 %v12386_v48, %v21897_v21  ;;  %v11242_v19 = vadd.f32 %v12388_v55, %v21899_v14  ;;  %11299 = vst.msk [vmem:[%s21517_s7 + $0x158] sm:$0xff] %vm230_vm0, %v11235_v56  ;;  %v21901_v16 = vld [vmem:[#allocation15_spill] sm:$0xff]  ;;  %v21902_v50 = vld [vmem:[#allocation14_spill] sm:$0xff]  ;;  %v21903_v31 = vld [vmem:[#allocation16_spill] sm:$0xff] }
 0xcbe   :  { %v11244_v28 = vadd.f32 %v12390_v29, %v21901_v16  ;;  %v11245_v13 = vadd.f32 %v12391_v5, %v21902_v50  ;;  %v11246_v48 = vadd.f32 %v12392_v46, %v21903_v31  ;;  %v21904_v63 = vld [vmem:[#allocation12_spill] sm:$0xff]  ;;  %11300 = vst.msk [vmem:[%s21517_s7 + $0x160] sm:$0xff] %vm230_vm0, %v11236_v61  ;;  %11301 = vst.msk [vmem:[%s21517_s7 + $0x168] sm:$0xff] %vm230_vm0, %v11237_v11  ;;  %v21905_v59 = vld [vmem:[#allocation26_spill] sm:$0xff] }
 0xcbf   :  { %v11247_v52 = vadd.f32 %v12393_v45, %v21904_v63  ;;  %11302 = vst.msk [vmem:[%s21517_s7 + $0x170] sm:$0xff] %vm230_vm0, %v11238_v26  ;;  %11303 = vst.msk [vmem:[%s21517_s7 + $0x178] sm:$0xff] %vm230_vm0, %v11239_v25  ;;  %v11248_v44 = vadd.f32 %v12394_v42, %v21905_v59  ;;  %v21906_v47 = vld [vmem:[#allocation27_spill] sm:$0xff]  ;;  %v21907_v23 = vld [vmem:[#allocation28_spill] sm:$0xff] }
 0xcc0   :  { %v11249_v55 = vadd.f32 %v12395_v38, %v21906_v47  ;;  %v11250_v53 = vadd.f32 %v12396_v39, %v21907_v23  ;;  %v21908_v60 = vld [vmem:[#allocation29_spill] sm:$0xff]  ;;  %11304 = vst.msk [vmem:[%s21517_s7 + $0x180] sm:$0xff] %vm230_vm0, %v11240_v0  ;;  %11305 = vst.msk [vmem:[%s21517_s7 + $0x188] sm:$0xff] %vm230_vm0, %v11241_v6  ;;  %v21909_v30 = vld [vmem:[#allocation30_spill] sm:$0xff] }
 0xcc1   :  { %v11251_v12 = vadd.f32 %v12397_v22, %v21908_v60  ;;  %11306 = vst.msk [vmem:[%s21517_s7 + $0x190] sm:$0xff] %vm230_vm0, %v11242_v19  ;;  %11307 = vst.msk [vmem:[%s21517_s7 + $0x198] sm:$0xff] %vm230_vm0, %v11243_v10  ;;  %v11252_v32 = vadd.f32 %v12398_v18, %v21909_v30  ;;  %v21910_v41 = vld [vmem:[#allocation31_spill] sm:$0xff]  ;;  %v21911_v29 = vld [vmem:[#allocation32_spill] sm:$0xff] }
 0xcc2   :  { %v11253_v36 = vadd.f32 %v12399_v57, %v21910_v41  ;;  %v11254_v5 = vadd.f32 %v12400_v7, %v21911_v29  ;;  %v21912_v46 = vld [vmem:[#allocation33_spill] sm:$0xff]  ;;  %11308 = vst.msk [vmem:[%s21517_s7 + $0x1a0] sm:$0xff] %vm230_vm0, %v11244_v28  ;;  %11309 = vst.msk [vmem:[%s21517_s7 + $0x1a8] sm:$0xff] %vm230_vm0, %v11245_v13 }
 0xcc3   :  { %v11255_v62 = vadd.f32 %v12401_v9, %v21912_v46  ;;  %11310 = vst.msk [vmem:[%s21517_s7 + $0x1b0] sm:$0xff] %vm230_vm0, %v11246_v48  ;;  %11311 = vst.msk [vmem:[%s21517_s7 + $0x1b8] sm:$0xff] %vm230_vm0, %v11247_v52 }
 0xcc4   :  { %11312 = vst.msk [vmem:[%s21517_s7 + $0x1c0] sm:$0xff] %vm230_vm0, %v11248_v44  ;;  %11313 = vst.msk [vmem:[%s21517_s7 + $0x1c8] sm:$0xff] %vm230_vm0, %v11249_v55 }
 0xcc5   :  { %11314 = vst.msk [vmem:[%s21517_s7 + $0x1d0] sm:$0xff] %vm230_vm0, %v11250_v53  ;;  %11315 = vst.msk [vmem:[%s21517_s7 + $0x1d8] sm:$0xff] %vm230_vm0, %v11251_v12 }
 0xcc6   :  { %11316 = vst.msk [vmem:[%s21517_s7 + $0x1e0] sm:$0xff] %vm230_vm0, %v11252_v32  ;;  %11317 = vst.msk [vmem:[%s21517_s7 + $0x1e8] sm:$0xff] %vm230_vm0, %v11253_v36 }
 0xcc7   :  { %11318 = vst.msk [vmem:[%s21517_s7 + $0x1f0] sm:$0xff] %vm230_vm0, %v11254_v5  ;;  %11319 = vst.msk [vmem:[%s21517_s7 + $0x1f8] sm:$0xff] %vm230_vm0, %v11255_v62 }

</bundles_post_ra>
